<compile_context>
chip_gen: v6e
topology: v6e:2x2x1
jax: 0.10.0
libtpu: 0.0.40
codegen_flags: <defaults>
</compile_context>

<pallas_src>
import functools

import jax
import jax.numpy as jnp
from jax.experimental import pallas as pl
from jax.experimental.pallas import tpu as pltpu


def _round_up(v, m):
    return ((v + m - 1) // m) * m


def _coupling_block_kernel(x_ref, mask_ref,
                           pre_w_ref, pre_b_ref,
                           w_in_ref, b_in_ref,
                           rs_w_ref, rs_b_ref,
                           skl_w_ref, skl_b_ref,
                           post_w_ref, post_b_ref,
                           out_ref,
                           h_pad_ref,
                           *, hidden, kernel_size, dilation_rate,
                           n_layers, n_flows, pad):
    """Fused ResidualCouplingBlock forward (all flows; Flip absorbed into weights).

    Block shapes (per grid step b over batch):
      x        : (1, T, C)              mask    : (1, T, 1)
      pre_w    : (F, C/2, H)            pre_b   : (F, 1, H)
      w_in     : (F, L, K*H, 2H)        b_in    : (F, L, 1, 2H)   [tanh | sigmoid]
      rs_w     : (F, max(L-1,1), H, 2H) rs_b    : same leading    [res | skip]
      skl_w    : (F, H, H)              skl_b   : (F, 1, H)       last-layer skip
      post_w   : (F, H, C/2)            post_b  : (F, 1, C/2)
      out      : (1, T, C)
      h_pad    : VMEM scratch (T + 2*pad, H), matmul operand dtype (bf16)
    """
    T = x_ref.shape[1]
    C = x_ref.shape[2]
    Cq = C // 2
    H = hidden
    K = kernel_size
    cdt = h_pad_ref.dtype                     # matmul operand dtype (bf16)

    xf = x_ref[...].reshape(T, C).astype(jnp.float32)
    u = xf[:, :Cq]                            # first half
    v = xf[:, Cq:]                            # second half
    m1 = mask_ref[...].reshape(T, 1).astype(jnp.float32)
    # hoist mask broadcasts out of the flow/layer loops
    mH = jnp.broadcast_to(m1, (T, H))
    mC = jnp.broadcast_to(m1, (T, Cq))

    # Zero the halo rows: exact zero-padded 'same'-conv semantics; taps are then
    # plain static shifted slices of the scratch.  Unconditional (cheap) because
    # with a core-split "parallel" batch axis each core owns a private scratch.
    if pad > 0:
        h_pad_ref[:pad, :] = jnp.zeros((pad, H), cdt)
        h_pad_ref[pad + T:, :] = jnp.zeros((pad, H), cdt)

    for f in range(n_flows):
        src = u if f % 2 == 0 else v          # half that drives the WN this flow

        # pre: 1x1 conv + mask   (h = pre(x0) * x_mask)
        h = (jnp.dot(src.astype(cdt), pre_w_ref[f],
                     preferred_element_type=jnp.float32)
             + pre_b_ref[f]) * mH             # (T, H) f32

        skip = jnp.zeros((T, H), jnp.float32)
        for i in range(n_layers):
            dil = dilation_rate ** i
            # stage current hidden state into the zero-padded scratch
            h_pad_ref[pad:pad + T, :] = h.astype(cdt)
            taps = []
            for j in range(K):
                off = (j - K // 2) * dil
                taps.append(h_pad_ref[pad + off:pad + off + T, :])
            hstack = taps[0] if K == 1 else jnp.concatenate(taps, axis=-1)  # (T, K*H)

            # dilated conv: ONE fused MXU matmul (contraction K*H, output [tanh|sig])
            gates = (jnp.dot(hstack, w_in_ref[f, i],
                             preferred_element_type=jnp.float32)
                     + b_in_ref[f, i])                          # (T, 2H) f32
            # fused_add_tanh_sigmoid_multiply (g == 0 since gin_channels == 0)
            acts = jnp.tanh(gates[:, :H]) * jax.nn.sigmoid(gates[:, H:])
            acts_c = acts.astype(cdt)

            if i < n_layers - 1:
                # fused res/skip 1x1: one (T,H)@(H,2H) matmul, split into halves
                rs = (jnp.dot(acts_c, rs_w_ref[f, i],
                              preferred_element_type=jnp.float32)
                      + rs_b_ref[f, i])                         # (T, 2H)
                h = (h + rs[:, :H]) * mH
                skip = skip + rs[:, H:]
            else:
                # last layer: skip-only (H, H) matrix (no dead res columns)
                skip = skip + (jnp.dot(acts_c, skl_w_ref[f],
                                       preferred_element_type=jnp.float32)
                               + skl_b_ref[f])

        wn_out = skip * mH                    # WN returns output * x_mask

        # post: 1x1 conv + mask; mean_only=True -> stats == m, logs == 0
        stats = (jnp.dot(wn_out.astype(cdt), post_w_ref[f],
                         preferred_element_type=jnp.float32)
                 + post_b_ref[f]) * mC        # (T, Cq)

        # x1 = m + x1 * exp(logs) * x_mask  (logs == 0); role alternates per flow
        # because the inter-flow Flip was absorbed into the weights.
        if f % 2 == 0:
            v = stats + v * mC
        else:
            u = stats + u * mC

    out = jnp.concatenate([u, v], axis=-1)    # (T, C), single lane-dense store
    out_ref[...] = out.reshape(1, T, C).astype(out_ref.dtype)


def _weight_spec(a, single_buffer):
    """Full-array spec with a constant index map (weights stay VMEM-resident)."""
    nd = a.ndim
    idx = lambda b, _nd=nd: (0,) * _nd
    if single_buffer:
        # Constant index map -> second pipeline buffer is pure waste; single-buffer.
        return pl.BlockSpec(a.shape, idx, pipeline_mode=pl.Buffered(1))
    return pl.BlockSpec(a.shape, idx)


def residual_coupling_block(x, x_mask, params, *, hidden, kernel_size,
                            dilation_rate, n_layers, n_flows,
                            single_buffer_weights=True):
    """Forward pass (reverse=False, g=None). x: (B, T, C); x_mask: (B, T, 1)."""
    B, T, C = x.shape
    assert C % 2 == 0
    Cq = C // 2

    pad = (kernel_size // 2) * (dilation_rate ** (n_layers - 1))
    pad = _round_up(pad, 8) if pad > 0 else 0     # 8-sublane-align the staging store
    cdt = params["w_in"].dtype

    kernel = functools.partial(
        _coupling_block_kernel, hidden=hidden, kernel_size=kernel_size,
        dilation_rate=dilation_rate, n_layers=n_layers, n_flows=n_flows, pad=pad)

    weight_names = ("pre_w", "pre_b", "w_in", "b_in", "rs_w", "rs_b",
                    "skl_w", "skl_b", "post_w", "post_b")
    weights = [params[k] for k in weight_names]

    in_specs = ([pl.BlockSpec((1, T, C), lambda b: (b, 0, 0)),
                 pl.BlockSpec((1, T, 1), lambda b: (b, 0, 0))]
                + [_weight_spec(w, single_buffer_weights) for w in weights])

    # Explicit scoped-VMEM budget: single/double-buffered weights + activation
    # blocks + halo scratch + generous f32 temporaries + headroom, capped at the
    # 64 MiB v7x physical limit (defaults: 16 MiB v5e / 32 MiB v6e-v7x scoped).
    weight_bytes = sum(int(w.size) * w.dtype.itemsize for w in weights)
    act_bytes = 2 * (T * C + T) * x.dtype.itemsize          # x + mask (2 buffers)
    out_bytes = 2 * T * C * x.dtype.itemsize
    scratch_bytes = (T + 2 * pad) * hidden * jnp.dtype(cdt).itemsize
    tmp_bytes = 16 * T * max(kernel_size * hidden, 2 * hidden) * 4
    vmem_limit = (2 * weight_bytes + act_bytes + out_bytes + scratch_bytes
                  + tmp_bytes + (4 << 20))
    vmem_limit = int(min(max(vmem_limit, 32 << 20), 64 << 20))

    out = pl.pallas_call(
        kernel,
        out_shape=jax.ShapeDtypeStruct((B, T, C), x.dtype),
        grid=(B,),
        in_specs=in_specs,
        out_specs=pl.BlockSpec((1, T, C), lambda b: (b, 0, 0)),
        scratch_shapes=[pltpu.VMEM((T + 2 * pad, hidden), cdt)],
        compiler_params=pltpu.CompilerParams(
            dimension_semantics=("parallel",),
            vmem_limit_bytes=vmem_limit),
    )(x, x_mask, *weights)

    if n_flows % 2 == 0:
        return out
    # Odd n_flows: the trailing Flip is not absorbed into any following flow;
    # it is exactly a full-channel reversal of the kernel output.
    # TODO(synk): fold this reversal into the kernel store if lax.rev lowering is
    #             available, to avoid the extra host-side pass (rare in practice).
    return out[:, :, ::-1]


def init_raw_params(key, channels, hidden, kernel_size, dilation_rate,
                    n_layers, n_flows):
    """Per-flow parameters in plain math layout (conv weights as (in, out))."""
    half = channels // 2
    flows = []
    for _ in range(n_flows):
        key, *ks = jax.random.split(key, 9)
        p = {}
        p["pre_w"] = 0.1 * jax.random.normal(ks[0], (half, hidden), jnp.float32)
        p["pre_b"] = 0.1 * jax.random.normal(ks[1], (hidden,), jnp.float32)
        p["in_w"] = 0.1 * jax.random.normal(
            ks[2], (n_layers, kernel_size, hidden, 2 * hidden), jnp.float32)
        p["in_b"] = 0.1 * jax.random.normal(
            ks[3], (n_layers, 1, 2 * hidden), jnp.float32)
        rs_w = 0.1 * jax.random.normal(
            ks[4], (n_layers, hidden, 2 * hidden), jnp.float32)
        rs_b = 0.1 * jax.random.normal(
            ks[5], (n_layers, 1, 2 * hidden), jnp.float32)
        # last res_skip conv only has `hidden` output channels (skip only):
        # keep its valid weights in the first H columns, zero the rest.
        rs_w = rs_w.at[n_layers - 1, :, hidden:].set(0.0)
        rs_b = rs_b.at[n_layers - 1, :, hidden:].set(0.0)
        p["rs_w"], p["rs_b"] = rs_w, rs_b
        # NOTE: the real module zero-inits `post`; small random values keep the
        # kernel output non-trivial for testing.
        p["post_w"] = 0.01 * jax.random.normal(ks[6], (hidden, half), jnp.float32)
        p["post_b"] = 0.01 * jax.random.normal(ks[7], (half,), jnp.float32)
        flows.append(p)
    return flows


def prepare_block_params(raw_flows, *, hidden, kernel_size, n_layers,
                         weight_dtype=jnp.bfloat16):
    """Convert per-flow raw params into the fused-kernel layout.

    - Absorbs the inter-flow Flip (channel reversal) into odd flows' 1x1 convs.
    - Keeps the dilated conv weight fused as (K*H, 2H): columns [tanh | sigmoid].
    - Keeps res/skip fused as (H, 2H) for layers 0..L-2: columns [res | skip];
      the last layer gets a dedicated (H, H) skip-only matrix.
    - Stacks everything on a leading flow axis; matmul weights cast to bf16,
      biases kept f32.
    """
    H, K, L = hidden, kernel_size, n_layers
    acc = {k: [] for k in ("pre_w", "pre_b", "w_in", "b_in", "rs_w", "rs_b",
                           "skl_w", "skl_b", "post_w", "post_b")}
    for f, p in enumerate(raw_flows):
        pre_w, post_w, post_b = p["pre_w"], p["post_w"], p["post_b"]
        if f % 2 == 1:
            # Flip() before this flow == reverse all channels; with the x0/x1 role
            # swap this reduces to reversing pre input rows and post output cols
            # (the time mask is channel-invariant).
            pre_w = pre_w[::-1, :]
            post_w = post_w[:, ::-1]
            post_b = post_b[::-1]
        acc["pre_w"].append(pre_w)
        acc["pre_b"].append(p["pre_b"].reshape(1, H))
        acc["w_in"].append(p["in_w"].reshape(L, K * H, 2 * H))   # [tanh | sigmoid]
        acc["b_in"].append(p["in_b"].reshape(L, 1, 2 * H))
        rsw, rsb = p["rs_w"], p["rs_b"]          # (L, H, 2H), (L, 1, 2H)
        if L > 1:
            acc["rs_w"].append(rsw[:L - 1])      # [res | skip] per non-final layer
            acc["rs_b"].append(rsb[:L - 1])
        else:                                    # dummy (never read when L == 1)
            acc["rs_w"].append(jnp.zeros((1, H, 2 * H), rsw.dtype))
            acc["rs_b"].append(jnp.zeros((1, 1, 2 * H), rsb.dtype))
        acc["skl_w"].append(rsw[L - 1, :, :H])   # last layer: skip only
        acc["skl_b"].append(rsb[L - 1, :, :H])
        acc["post_w"].append(post_w)
        acc["post_b"].append(post_b.reshape(1, -1))
    matmul_keys = ("pre_w", "w_in", "rs_w", "skl_w", "post_w")
    out = {}
    for k, vals in acc.items():
        stacked = jnp.stack(vals)
        out[k] = stacked.astype(weight_dtype if k in matmul_keys else jnp.float32)
    return out


def _reference_forward(x, x_mask, raw_flows, *, hidden, kernel_size,
                       dilation_rate, n_layers):
    """Pure-JAX f32 reference mirroring the PyTorch module literally
    (per-flow coupling layer followed by an explicit channel Flip)."""
    H, K = hidden, kernel_size
    B, T, C = x.shape
    Cq = C // 2
    m = x_mask
    for p in raw_flows:
        x0, x1 = x[..., :Cq], x[..., Cq:]
        h = (jnp.einsum("btc,ch->bth", x0, p["pre_w"]) + p["pre_b"]) * m
        output = jnp.zeros((B, T, H), jnp.float32)
        for i in range(n_layers):
            dil = dilation_rate ** i
            pad = (K // 2) * dil
            hp = jnp.pad(h, ((0, 0), (pad, pad), (0, 0)))
            x_in = jnp.zeros((B, T, 2 * H), jnp.float32)
            for j in range(K):
                x_in = x_in + jnp.einsum(
                    "bth,ho->bto", hp[:, j * dil:j * dil + T, :], p["in_w"][i, j])
            x_in = x_in + p["in_b"][i]
            acts = jnp.tanh(x_in[..., :H]) * jax.nn.sigmoid(x_in[..., H:])
            rs = jnp.einsum("bth,ho->bto", acts, p["rs_w"][i]) + p["rs_b"][i]
            if i < n_layers - 1:
                h = (h + rs[..., :H]) * m
                output = output + rs[..., H:]
            else:
                output = output + rs[..., :H]
        output = output * m
        stats = (jnp.einsum("bth,hc->btc", output, p["post_w"]) + p["post_b"]) * m
        x1 = stats + x1 * m
        x = jnp.concatenate([x0, x1], axis=-1)
        x = x[:, :, ::-1]                        # Flip
    return x


if __name__ == "__main__":
    B, T = 2, 16
    channels, hidden = 8, 32
    kernel_size, dilation_rate, n_layers = 3, 2, 3

    key = jax.random.PRNGKey(0)
    kx, kp = jax.random.split(key)

    x = jax.random.normal(kx, (B, T, channels), jnp.float32)          # (B, T, C)
    lengths = jnp.array([T, T - 4])
    t = jnp.arange(T)[None, :, None]
    x_mask = (t < lengths[:, None, None]).astype(jnp.float32)          # (B, T, 1)

    raw = init_raw_params(kp, channels, hidden, kernel_size,
                          dilation_rate, n_layers, n_flows=4)

    def run(n_flows, single_buffer):
        params = prepare_block_params(raw[:n_flows], hidden=hidden,
                                      kernel_size=kernel_size, n_layers=n_layers)
        fwd = jax.jit(functools.partial(
            residual_coupling_block, hidden=hidden, kernel_size=kernel_size,
            dilation_rate=dilation_rate, n_layers=n_layers, n_flows=n_flows,
            single_buffer_weights=single_buffer))
        return jax.block_until_ready(fwd(x, x_mask, params))

    # Prefer single-buffered weight specs (pl.Buffered(1)); fall back gracefully
    # if this JAX build does not support pipeline_mode on pallas_call BlockSpecs.
    single_buffer = True
    try:
        y4 = run(4, True)
    except Exception:
        single_buffer = False
        y4 = run(4, False)

    # Also exercise the odd-n_flows trailing-Flip path (review correctness concern).
    y3 = run(3, single_buffer)

    for n_flows, y in ((4, y4), (3, y3)):
        assert y.shape == x.shape
        assert bool(jnp.all(jnp.isfinite(y)))
        y_ref = _reference_forward(x, x_mask, raw[:n_flows], hidden=hidden,
                                   kernel_size=kernel_size,
                                   dilation_rate=dilation_rate, n_layers=n_layers)
        err = float(jnp.max(jnp.abs(y - y_ref)))
        assert err < 5e-2, f"n_flows={n_flows}: max abs error vs reference: {err}"

    print("KERNEL_OK")
</pallas_src>

<mosaic_0001>
module attributes {stable_mosaic.version = 11 : i64} {
  func.func @_coupling_block_kernel(%arg0: i32, %arg1: memref<1x16x8xf32, #tpu.memory_space<vmem>>, %arg2: memref<1x16x1xf32, #tpu.memory_space<vmem>>, %arg3: memref<4x4x32xbf16, #tpu.memory_space<vmem>>, %arg4: memref<4x1x32xf32, #tpu.memory_space<vmem>>, %arg5: memref<4x3x96x64xbf16, #tpu.memory_space<vmem>>, %arg6: memref<4x3x1x64xf32, #tpu.memory_space<vmem>>, %arg7: memref<4x2x32x64xbf16, #tpu.memory_space<vmem>>, %arg8: memref<4x2x1x64xf32, #tpu.memory_space<vmem>>, %arg9: memref<4x32x32xbf16, #tpu.memory_space<vmem>>, %arg10: memref<4x1x32xf32, #tpu.memory_space<vmem>>, %arg11: memref<4x32x4xbf16, #tpu.memory_space<vmem>>, %arg12: memref<4x1x4xf32, #tpu.memory_space<vmem>>, %arg13: memref<1x16x8xf32, #tpu.memory_space<vmem>>, %arg14: memref<32x32xbf16, #tpu.memory_space<vmem>>) attributes {dimension_semantics = [#tpu.dimension_semantics<parallel>], iteration_bounds = array<i64: 2>, scalar_prefetch = 0 : i64, scratch_operands = 1 : i64, tpu.core_type = #tpu.core_type<tc>, window_params = [{transform_indices = @transform_0, window_bounds = array<i64: 1, 16, 8>}, {transform_indices = @transform_1, window_bounds = array<i64: 1, 16, 1>}, {pipeline_mode = #tpu.pipeline_mode<synchronous>, transform_indices = @transform_2, window_bounds = array<i64: 4, 4, 32>}, {pipeline_mode = #tpu.pipeline_mode<synchronous>, transform_indices = @transform_3, window_bounds = array<i64: 4, 1, 32>}, {pipeline_mode = #tpu.pipeline_mode<synchronous>, transform_indices = @transform_4, window_bounds = array<i64: 4, 3, 96, 64>}, {pipeline_mode = #tpu.pipeline_mode<synchronous>, transform_indices = @transform_5, window_bounds = array<i64: 4, 3, 1, 64>}, {pipeline_mode = #tpu.pipeline_mode<synchronous>, transform_indices = @transform_6, window_bounds = array<i64: 4, 2, 32, 64>}, {pipeline_mode = #tpu.pipeline_mode<synchronous>, transform_indices = @transform_7, window_bounds = array<i64: 4, 2, 1, 64>}, {pipeline_mode = #tpu.pipeline_mode<synchronous>, transform_indices = @transform_8, window_bounds = array<i64: 4, 32, 32>}, {pipeline_mode = #tpu.pipeline_mode<synchronous>, transform_indices = @transform_9, window_bounds = array<i64: 4, 1, 32>}, {pipeline_mode = #tpu.pipeline_mode<synchronous>, transform_indices = @transform_10, window_bounds = array<i64: 4, 32, 4>}, {pipeline_mode = #tpu.pipeline_mode<synchronous>, transform_indices = @transform_11, window_bounds = array<i64: 4, 1, 4>}, {transform_indices = @transform_12, window_bounds = array<i64: 1, 16, 8>}]} {
    %c0 = arith.constant 0 : index
    %c0_0 = arith.constant 0 : index
    %c0_1 = arith.constant 0 : index
    %0 = vector.load %arg1[%c0, %c0_0, %c0_1] : memref<1x16x8xf32, #tpu.memory_space<vmem>>, vector<1x16x8xf32>
    %1 = vector.shape_cast %0 : vector<1x16x8xf32> to vector<16x8xf32>
    %2 = vector.extract_strided_slice %1 {offsets = [0, 0], sizes = [16, 4], strides = [1, 1]} : vector<16x8xf32> to vector<16x4xf32>
    %3 = vector.extract_strided_slice %1 {offsets = [0, 4], sizes = [16, 4], strides = [1, 1]} : vector<16x8xf32> to vector<16x4xf32>
    %c0_2 = arith.constant 0 : index
    %c0_3 = arith.constant 0 : index
    %c0_4 = arith.constant 0 : index
    %4 = vector.load %arg2[%c0_2, %c0_3, %c0_4] : memref<1x16x1xf32, #tpu.memory_space<vmem>>, vector<1x16x1xf32>
    %5 = vector.shape_cast %4 : vector<1x16x1xf32> to vector<16x1xf32>
    %6 = vector.shape_cast %5 : vector<16x1xf32> to vector<16x1xf32>
    %7 = vector.broadcast %6 : vector<16x1xf32> to vector<16x32xf32>
    %8 = vector.shape_cast %5 : vector<16x1xf32> to vector<16x1xf32>
    %9 = vector.broadcast %8 : vector<16x1xf32> to vector<16x4xf32>
    %cst = arith.constant 0.000000e+00 : bf16
    %10 = vector.broadcast %cst : bf16 to vector<8x32xbf16>
    %c0_5 = arith.constant 0 : index
    %c0_6 = arith.constant 0 : index
    %11 = vector.load %arg14[%c0_5, %c0_6] : memref<32x32xbf16, #tpu.memory_space<vmem>>, vector<8x32xbf16>
    tpu.vector_store %arg14[%c0_5, %c0_6], %10 {strides = array<i32>} : memref<32x32xbf16, #tpu.memory_space<vmem>>, vector<8x32xbf16>,
    %cst_7 = arith.constant 0.000000e+00 : bf16
    %12 = vector.broadcast %cst_7 : bf16 to vector<8x32xbf16>
    %c24 = arith.constant 24 : index
    %c0_8 = arith.constant 0 : index
    %13 = vector.load %arg14[%c24, %c0_8] : memref<32x32xbf16, #tpu.memory_space<vmem>>, vector<8x32xbf16>
    tpu.vector_store %arg14[%c24, %c0_8], %12 {strides = array<i32>} : memref<32x32xbf16, #tpu.memory_space<vmem>>, vector<8x32xbf16>,
    %14 = arith.truncf %2 : vector<16x4xf32> to vector<16x4xbf16>
    %c0_9 = arith.constant 0 : index
    %c0_10 = arith.constant 0 : index
    %c0_11 = arith.constant 0 : index
    %15 = vector.load %arg3[%c0_9, %c0_10, %c0_11] : memref<4x4x32xbf16, #tpu.memory_space<vmem>>, vector<1x4x32xbf16>
    %16 = vector.shape_cast %15 : vector<1x4x32xbf16> to vector<4x32xbf16>
    %cst_12 = arith.constant dense<0.000000e+00> : vector<16x32xf32>
    %17 = tpu.matmul %14, %16, %cst_12 {dimension_numbers = #tpu.dot_dimension_numbers<[1], [0], [0], [1], [0, 0, 1, 1], [], []>} : vector<16x4xbf16>, vector<4x32xbf16>, vector<16x32xf32> -> vector<16x32xf32>
    %c0_13 = arith.constant 0 : index
    %c0_14 = arith.constant 0 : index
    %c0_15 = arith.constant 0 : index
    %18 = vector.load %arg4[%c0_13, %c0_14, %c0_15] : memref<4x1x32xf32, #tpu.memory_space<vmem>>, vector<1x1x32xf32>
    %19 = vector.shape_cast %18 : vector<1x1x32xf32> to vector<1x32xf32>
    %20 = vector.broadcast %19 : vector<1x32xf32> to vector<16x32xf32>
    %21 = arith.addf %17, %20 : vector<16x32xf32>
    %22 = arith.mulf %21, %7 : vector<16x32xf32>
    %cst_16 = arith.constant 0.000000e+00 : f32
    %23 = vector.broadcast %cst_16 : f32 to vector<16x32xf32>
    %24 = arith.truncf %22 : vector<16x32xf32> to vector<16x32xbf16>
    %c8 = arith.constant 8 : index
    %c0_17 = arith.constant 0 : index
    %25 = vector.load %arg14[%c8, %c0_17] : memref<32x32xbf16, #tpu.memory_space<vmem>>, vector<16x32xbf16>
    tpu.vector_store %arg14[%c8, %c0_17], %24 {strides = array<i32>} : memref<32x32xbf16, #tpu.memory_space<vmem>>, vector<16x32xbf16>,
    %c7 = arith.constant 7 : index
    %c0_18 = arith.constant 0 : index
    %26 = vector.load %arg14[%c7, %c0_18] : memref<32x32xbf16, #tpu.memory_space<vmem>>, vector<16x32xbf16>
    %c8_19 = arith.constant 8 : index
    %c0_20 = arith.constant 0 : index
    %27 = vector.load %arg14[%c8_19, %c0_20] : memref<32x32xbf16, #tpu.memory_space<vmem>>, vector<16x32xbf16>
    %c9 = arith.constant 9 : index
    %c0_21 = arith.constant 0 : index
    %28 = vector.load %arg14[%c9, %c0_21] : memref<32x32xbf16, #tpu.memory_space<vmem>>, vector<16x32xbf16>
    %29 = tpu.concatenate %26, %27, %28 in 1 : vector<16x32xbf16>, vector<16x32xbf16>, vector<16x32xbf16> -> vector<16x96xbf16>
    %c0_22 = arith.constant 0 : index
    %c0_23 = arith.constant 0 : index
    %c0_24 = arith.constant 0 : index
    %c0_25 = arith.constant 0 : index
    %30 = vector.load %arg5[%c0_22, %c0_23, %c0_24, %c0_25] : memref<4x3x96x64xbf16, #tpu.memory_space<vmem>>, vector<1x1x96x64xbf16>
    %31 = vector.shape_cast %30 : vector<1x1x96x64xbf16> to vector<96x64xbf16>
    %cst_26 = arith.constant dense<0.000000e+00> : vector<16x64xf32>
    %32 = tpu.matmul %29, %31, %cst_26 {dimension_numbers = #tpu.dot_dimension_numbers<[1], [0], [0], [1], [0, 0, 1, 1], [], []>} : vector<16x96xbf16>, vector<96x64xbf16>, vector<16x64xf32> -> vector<16x64xf32>
    %c0_27 = arith.constant 0 : index
    %c0_28 = arith.constant 0 : index
    %c0_29 = arith.constant 0 : index
    %c0_30 = arith.constant 0 : index
    %33 = vector.load %arg6[%c0_27, %c0_28, %c0_29, %c0_30] : memref<4x3x1x64xf32, #tpu.memory_space<vmem>>, vector<1x1x1x64xf32>
    %34 = vector.shape_cast %33 : vector<1x1x1x64xf32> to vector<1x64xf32>
    %35 = vector.broadcast %34 : vector<1x64xf32> to vector<16x64xf32>
    %36 = arith.addf %32, %35 : vector<16x64xf32>
    %37 = vector.extract_strided_slice %36 {offsets = [0, 0], sizes = [16, 32], strides = [1, 1]} : vector<16x64xf32> to vector<16x32xf32>
    %38 = math.tanh %37 : vector<16x32xf32>
    %39 = vector.extract_strided_slice %36 {offsets = [0, 32], sizes = [16, 32], strides = [1, 1]} : vector<16x64xf32> to vector<16x32xf32>
    %40 = arith.negf %39 : vector<16x32xf32>
    %41 = math.exp %40 : vector<16x32xf32>
    %cst_31 = arith.constant 1.000000e+00 : f32
    %42 = vector.broadcast %cst_31 : f32 to vector<16x32xf32>
    %43 = arith.addf %42, %41 : vector<16x32xf32>
    %44 = arith.divf %42, %43 : vector<16x32xf32>
    %45 = arith.mulf %38, %44 : vector<16x32xf32>
    %46 = arith.truncf %45 : vector<16x32xf32> to vector<16x32xbf16>
    %c0_32 = arith.constant 0 : index
    %c0_33 = arith.constant 0 : index
    %c0_34 = arith.constant 0 : index
    %c0_35 = arith.constant 0 : index
    %47 = vector.load %arg7[%c0_32, %c0_33, %c0_34, %c0_35] : memref<4x2x32x64xbf16, #tpu.memory_space<vmem>>, vector<1x1x32x64xbf16>
    %48 = vector.shape_cast %47 : vector<1x1x32x64xbf16> to vector<32x64xbf16>
    %cst_36 = arith.constant dense<0.000000e+00> : vector<16x64xf32>
    %49 = tpu.matmul %46, %48, %cst_36 {dimension_numbers = #tpu.dot_dimension_numbers<[1], [0], [0], [1], [0, 0, 1, 1], [], []>} : vector<16x32xbf16>, vector<32x64xbf16>, vector<16x64xf32> -> vector<16x64xf32>
    %c0_37 = arith.constant 0 : index
    %c0_38 = arith.constant 0 : index
    %c0_39 = arith.constant 0 : index
    %c0_40 = arith.constant 0 : index
    %50 = vector.load %arg8[%c0_37, %c0_38, %c0_39, %c0_40] : memref<4x2x1x64xf32, #tpu.memory_space<vmem>>, vector<1x1x1x64xf32>
    %51 = vector.shape_cast %50 : vector<1x1x1x64xf32> to vector<1x64xf32>
    %52 = vector.broadcast %51 : vector<1x64xf32> to vector<16x64xf32>
    %53 = arith.addf %49, %52 : vector<16x64xf32>
    %54 = vector.extract_strided_slice %53 {offsets = [0, 0], sizes = [16, 32], strides = [1, 1]} : vector<16x64xf32> to vector<16x32xf32>
    %55 = arith.addf %22, %54 : vector<16x32xf32>
    %56 = arith.mulf %55, %7 : vector<16x32xf32>
    %57 = vector.extract_strided_slice %53 {offsets = [0, 32], sizes = [16, 32], strides = [1, 1]} : vector<16x64xf32> to vector<16x32xf32>
    %58 = arith.addf %23, %57 : vector<16x32xf32>
    %59 = arith.truncf %56 : vector<16x32xf32> to vector<16x32xbf16>
    %c8_41 = arith.constant 8 : index
    %c0_42 = arith.constant 0 : index
    %60 = vector.load %arg14[%c8_41, %c0_42] : memref<32x32xbf16, #tpu.memory_space<vmem>>, vector<16x32xbf16>
    tpu.vector_store %arg14[%c8_41, %c0_42], %59 {strides = array<i32>} : memref<32x32xbf16, #tpu.memory_space<vmem>>, vector<16x32xbf16>,
    %c6 = arith.constant 6 : index
    %c0_43 = arith.constant 0 : index
    %61 = vector.load %arg14[%c6, %c0_43] : memref<32x32xbf16, #tpu.memory_space<vmem>>, vector<16x32xbf16>
    %c8_44 = arith.constant 8 : index
    %c0_45 = arith.constant 0 : index
    %62 = vector.load %arg14[%c8_44, %c0_45] : memref<32x32xbf16, #tpu.memory_space<vmem>>, vector<16x32xbf16>
    %c10 = arith.constant 10 : index
    %c0_46 = arith.constant 0 : index
    %63 = vector.load %arg14[%c10, %c0_46] : memref<32x32xbf16, #tpu.memory_space<vmem>>, vector<16x32xbf16>
    %64 = tpu.concatenate %61, %62, %63 in 1 : vector<16x32xbf16>, vector<16x32xbf16>, vector<16x32xbf16> -> vector<16x96xbf16>
    %c0_47 = arith.constant 0 : index
    %c1 = arith.constant 1 : index
    %c0_48 = arith.constant 0 : index
    %c0_49 = arith.constant 0 : index
    %65 = vector.load %arg5[%c0_47, %c1, %c0_48, %c0_49] : memref<4x3x96x64xbf16, #tpu.memory_space<vmem>>, vector<1x1x96x64xbf16>
    %66 = vector.shape_cast %65 : vector<1x1x96x64xbf16> to vector<96x64xbf16>
    %cst_50 = arith.constant dense<0.000000e+00> : vector<16x64xf32>
    %67 = tpu.matmul %64, %66, %cst_50 {dimension_numbers = #tpu.dot_dimension_numbers<[1], [0], [0], [1], [0, 0, 1, 1], [], []>} : vector<16x96xbf16>, vector<96x64xbf16>, vector<16x64xf32> -> vector<16x64xf32>
    %c0_51 = arith.constant 0 : index
    %c1_52 = arith.constant 1 : index
    %c0_53 = arith.constant 0 : index
    %c0_54 = arith.constant 0 : index
    %68 = vector.load %arg6[%c0_51, %c1_52, %c0_53, %c0_54] : memref<4x3x1x64xf32, #tpu.memory_space<vmem>>, vector<1x1x1x64xf32>
    %69 = vector.shape_cast %68 : vector<1x1x1x64xf32> to vector<1x64xf32>
    %70 = vector.broadcast %69 : vector<1x64xf32> to vector<16x64xf32>
    %71 = arith.addf %67, %70 : vector<16x64xf32>
    %72 = vector.extract_strided_slice %71 {offsets = [0, 0], sizes = [16, 32], strides = [1, 1]} : vector<16x64xf32> to vector<16x32xf32>
    %73 = math.tanh %72 : vector<16x32xf32>
    %74 = vector.extract_strided_slice %71 {offsets = [0, 32], sizes = [16, 32], strides = [1, 1]} : vector<16x64xf32> to vector<16x32xf32>
    %75 = arith.negf %74 : vector<16x32xf32>
    %76 = math.exp %75 : vector<16x32xf32>
    %cst_55 = arith.constant 1.000000e+00 : f32
    %77 = vector.broadcast %cst_55 : f32 to vector<16x32xf32>
    %78 = arith.addf %77, %76 : vector<16x32xf32>
    %79 = arith.divf %77, %78 : vector<16x32xf32>
    %80 = arith.mulf %73, %79 : vector<16x32xf32>
    %81 = arith.truncf %80 : vector<16x32xf32> to vector<16x32xbf16>
    %c0_56 = arith.constant 0 : index
    %c1_57 = arith.constant 1 : index
    %c0_58 = arith.constant 0 : index
    %c0_59 = arith.constant 0 : index
    %82 = vector.load %arg7[%c0_56, %c1_57, %c0_58, %c0_59] : memref<4x2x32x64xbf16, #tpu.memory_space<vmem>>, vector<1x1x32x64xbf16>
    %83 = vector.shape_cast %82 : vector<1x1x32x64xbf16> to vector<32x64xbf16>
    %cst_60 = arith.constant dense<0.000000e+00> : vector<16x64xf32>
    %84 = tpu.matmul %81, %83, %cst_60 {dimension_numbers = #tpu.dot_dimension_numbers<[1], [0], [0], [1], [0, 0, 1, 1], [], []>} : vector<16x32xbf16>, vector<32x64xbf16>, vector<16x64xf32> -> vector<16x64xf32>
    %c0_61 = arith.constant 0 : index
    %c1_62 = arith.constant 1 : index
    %c0_63 = arith.constant 0 : index
    %c0_64 = arith.constant 0 : index
    %85 = vector.load %arg8[%c0_61, %c1_62, %c0_63, %c0_64] : memref<4x2x1x64xf32, #tpu.memory_space<vmem>>, vector<1x1x1x64xf32>
    %86 = vector.shape_cast %85 : vector<1x1x1x64xf32> to vector<1x64xf32>
    %87 = vector.broadcast %86 : vector<1x64xf32> to vector<16x64xf32>
    %88 = arith.addf %84, %87 : vector<16x64xf32>
    %89 = vector.extract_strided_slice %88 {offsets = [0, 0], sizes = [16, 32], strides = [1, 1]} : vector<16x64xf32> to vector<16x32xf32>
    %90 = arith.addf %56, %89 : vector<16x32xf32>
    %91 = arith.mulf %90, %7 : vector<16x32xf32>
    %92 = vector.extract_strided_slice %88 {offsets = [0, 32], sizes = [16, 32], strides = [1, 1]} : vector<16x64xf32> to vector<16x32xf32>
    %93 = arith.addf %58, %92 : vector<16x32xf32>
    %94 = arith.truncf %91 : vector<16x32xf32> to vector<16x32xbf16>
    %c8_65 = arith.constant 8 : index
    %c0_66 = arith.constant 0 : index
    %95 = vector.load %arg14[%c8_65, %c0_66] : memref<32x32xbf16, #tpu.memory_space<vmem>>, vector<16x32xbf16>
    tpu.vector_store %arg14[%c8_65, %c0_66], %94 {strides = array<i32>} : memref<32x32xbf16, #tpu.memory_space<vmem>>, vector<16x32xbf16>,
    %c4 = arith.constant 4 : index
    %c0_67 = arith.constant 0 : index
    %96 = vector.load %arg14[%c4, %c0_67] : memref<32x32xbf16, #tpu.memory_space<vmem>>, vector<16x32xbf16>
    %c8_68 = arith.constant 8 : index
    %c0_69 = arith.constant 0 : index
    %97 = vector.load %arg14[%c8_68, %c0_69] : memref<32x32xbf16, #tpu.memory_space<vmem>>, vector<16x32xbf16>
    %c12 = arith.constant 12 : index
    %c0_70 = arith.constant 0 : index
    %98 = vector.load %arg14[%c12, %c0_70] : memref<32x32xbf16, #tpu.memory_space<vmem>>, vector<16x32xbf16>
    %99 = tpu.concatenate %96, %97, %98 in 1 : vector<16x32xbf16>, vector<16x32xbf16>, vector<16x32xbf16> -> vector<16x96xbf16>
    %c0_71 = arith.constant 0 : index
    %c2 = arith.constant 2 : index
    %c0_72 = arith.constant 0 : index
    %c0_73 = arith.constant 0 : index
    %100 = vector.load %arg5[%c0_71, %c2, %c0_72, %c0_73] : memref<4x3x96x64xbf16, #tpu.memory_space<vmem>>, vector<1x1x96x64xbf16>
    %101 = vector.shape_cast %100 : vector<1x1x96x64xbf16> to vector<96x64xbf16>
    %cst_74 = arith.constant dense<0.000000e+00> : vector<16x64xf32>
    %102 = tpu.matmul %99, %101, %cst_74 {dimension_numbers = #tpu.dot_dimension_numbers<[1], [0], [0], [1], [0, 0, 1, 1], [], []>} : vector<16x96xbf16>, vector<96x64xbf16>, vector<16x64xf32> -> vector<16x64xf32>
    %c0_75 = arith.constant 0 : index
    %c2_76 = arith.constant 2 : index
    %c0_77 = arith.constant 0 : index
    %c0_78 = arith.constant 0 : index
    %103 = vector.load %arg6[%c0_75, %c2_76, %c0_77, %c0_78] : memref<4x3x1x64xf32, #tpu.memory_space<vmem>>, vector<1x1x1x64xf32>
    %104 = vector.shape_cast %103 : vector<1x1x1x64xf32> to vector<1x64xf32>
    %105 = vector.broadcast %104 : vector<1x64xf32> to vector<16x64xf32>
    %106 = arith.addf %102, %105 : vector<16x64xf32>
    %107 = vector.extract_strided_slice %106 {offsets = [0, 0], sizes = [16, 32], strides = [1, 1]} : vector<16x64xf32> to vector<16x32xf32>
    %108 = math.tanh %107 : vector<16x32xf32>
    %109 = vector.extract_strided_slice %106 {offsets = [0, 32], sizes = [16, 32], strides = [1, 1]} : vector<16x64xf32> to vector<16x32xf32>
    %110 = arith.negf %109 : vector<16x32xf32>
    %111 = math.exp %110 : vector<16x32xf32>
    %cst_79 = arith.constant 1.000000e+00 : f32
    %112 = vector.broadcast %cst_79 : f32 to vector<16x32xf32>
    %113 = arith.addf %112, %111 : vector<16x32xf32>
    %114 = arith.divf %112, %113 : vector<16x32xf32>
    %115 = arith.mulf %108, %114 : vector<16x32xf32>
    %116 = arith.truncf %115 : vector<16x32xf32> to vector<16x32xbf16>
    %c0_80 = arith.constant 0 : index
    %c0_81 = arith.constant 0 : index
    %c0_82 = arith.constant 0 : index
    %117 = vector.load %arg9[%c0_80, %c0_81, %c0_82] : memref<4x32x32xbf16, #tpu.memory_space<vmem>>, vector<1x32x32xbf16>
    %118 = vector.shape_cast %117 : vector<1x32x32xbf16> to vector<32x32xbf16>
    %cst_83 = arith.constant dense<0.000000e+00> : vector<16x32xf32>
    %119 = tpu.matmul %116, %118, %cst_83 {dimension_numbers = #tpu.dot_dimension_numbers<[1], [0], [0], [1], [0, 0, 1, 1], [], []>} : vector<16x32xbf16>, vector<32x32xbf16>, vector<16x32xf32> -> vector<16x32xf32>
    %c0_84 = arith.constant 0 : index
    %c0_85 = arith.constant 0 : index
    %c0_86 = arith.constant 0 : index
    %120 = vector.load %arg10[%c0_84, %c0_85, %c0_86] : memref<4x1x32xf32, #tpu.memory_space<vmem>>, vector<1x1x32xf32>
    %121 = vector.shape_cast %120 : vector<1x1x32xf32> to vector<1x32xf32>
    %122 = vector.broadcast %121 : vector<1x32xf32> to vector<16x32xf32>
    %123 = arith.addf %119, %122 : vector<16x32xf32>
    %124 = arith.addf %93, %123 : vector<16x32xf32>
    %125 = arith.mulf %124, %7 : vector<16x32xf32>
    %126 = arith.truncf %125 : vector<16x32xf32> to vector<16x32xbf16>
    %c0_87 = arith.constant 0 : index
    %c0_88 = arith.constant 0 : index
    %c0_89 = arith.constant 0 : index
    %127 = vector.load %arg11[%c0_87, %c0_88, %c0_89] : memref<4x32x4xbf16, #tpu.memory_space<vmem>>, vector<1x32x4xbf16>
    %128 = vector.shape_cast %127 : vector<1x32x4xbf16> to vector<32x4xbf16>
    %cst_90 = arith.constant dense<0.000000e+00> : vector<16x4xf32>
    %129 = tpu.matmul %126, %128, %cst_90 {dimension_numbers = #tpu.dot_dimension_numbers<[1], [0], [0], [1], [0, 0, 1, 1], [], []>} : vector<16x32xbf16>, vector<32x4xbf16>, vector<16x4xf32> -> vector<16x4xf32>
    %c0_91 = arith.constant 0 : index
    %c0_92 = arith.constant 0 : index
    %c0_93 = arith.constant 0 : index
    %130 = vector.load %arg12[%c0_91, %c0_92, %c0_93] : memref<4x1x4xf32, #tpu.memory_space<vmem>>, vector<1x1x4xf32>
    %131 = vector.shape_cast %130 : vector<1x1x4xf32> to vector<1x4xf32>
    %132 = vector.broadcast %131 : vector<1x4xf32> to vector<16x4xf32>
    %133 = arith.addf %129, %132 : vector<16x4xf32>
    %134 = arith.mulf %133, %9 : vector<16x4xf32>
    %135 = arith.mulf %3, %9 : vector<16x4xf32>
    %136 = arith.addf %134, %135 : vector<16x4xf32>
    %137 = arith.truncf %136 : vector<16x4xf32> to vector<16x4xbf16>
    %c1_94 = arith.constant 1 : index
    %c0_95 = arith.constant 0 : index
    %c0_96 = arith.constant 0 : index
    %138 = vector.load %arg3[%c1_94, %c0_95, %c0_96] : memref<4x4x32xbf16, #tpu.memory_space<vmem>>, vector<1x4x32xbf16>
    %139 = vector.shape_cast %138 : vector<1x4x32xbf16> to vector<4x32xbf16>
    %cst_97 = arith.constant dense<0.000000e+00> : vector<16x32xf32>
    %140 = tpu.matmul %137, %139, %cst_97 {dimension_numbers = #tpu.dot_dimension_numbers<[1], [0], [0], [1], [0, 0, 1, 1], [], []>} : vector<16x4xbf16>, vector<4x32xbf16>, vector<16x32xf32> -> vector<16x32xf32>
    %c1_98 = arith.constant 1 : index
    %c0_99 = arith.constant 0 : index
    %c0_100 = arith.constant 0 : index
    %141 = vector.load %arg4[%c1_98, %c0_99, %c0_100] : memref<4x1x32xf32, #tpu.memory_space<vmem>>, vector<1x1x32xf32>
    %142 = vector.shape_cast %141 : vector<1x1x32xf32> to vector<1x32xf32>
    %143 = vector.broadcast %142 : vector<1x32xf32> to vector<16x32xf32>
    %144 = arith.addf %140, %143 : vector<16x32xf32>
    %145 = arith.mulf %144, %7 : vector<16x32xf32>
    %cst_101 = arith.constant 0.000000e+00 : f32
    %146 = vector.broadcast %cst_101 : f32 to vector<16x32xf32>
    %147 = arith.truncf %145 : vector<16x32xf32> to vector<16x32xbf16>
    %c8_102 = arith.constant 8 : index
    %c0_103 = arith.constant 0 : index
    %148 = vector.load %arg14[%c8_102, %c0_103] : memref<32x32xbf16, #tpu.memory_space<vmem>>, vector<16x32xbf16>
    tpu.vector_store %arg14[%c8_102, %c0_103], %147 {strides = array<i32>} : memref<32x32xbf16, #tpu.memory_space<vmem>>, vector<16x32xbf16>,
    %c7_104 = arith.constant 7 : index
    %c0_105 = arith.constant 0 : index
    %149 = vector.load %arg14[%c7_104, %c0_105] : memref<32x32xbf16, #tpu.memory_space<vmem>>, vector<16x32xbf16>
    %c8_106 = arith.constant 8 : index
    %c0_107 = arith.constant 0 : index
    %150 = vector.load %arg14[%c8_106, %c0_107] : memref<32x32xbf16, #tpu.memory_space<vmem>>, vector<16x32xbf16>
    %c9_108 = arith.constant 9 : index
    %c0_109 = arith.constant 0 : index
    %151 = vector.load %arg14[%c9_108, %c0_109] : memref<32x32xbf16, #tpu.memory_space<vmem>>, vector<16x32xbf16>
    %152 = tpu.concatenate %149, %150, %151 in 1 : vector<16x32xbf16>, vector<16x32xbf16>, vector<16x32xbf16> -> vector<16x96xbf16>
    %c1_110 = arith.constant 1 : index
    %c0_111 = arith.constant 0 : index
    %c0_112 = arith.constant 0 : index
    %c0_113 = arith.constant 0 : index
    %153 = vector.load %arg5[%c1_110, %c0_111, %c0_112, %c0_113] : memref<4x3x96x64xbf16, #tpu.memory_space<vmem>>, vector<1x1x96x64xbf16>
    %154 = vector.shape_cast %153 : vector<1x1x96x64xbf16> to vector<96x64xbf16>
    %cst_114 = arith.constant dense<0.000000e+00> : vector<16x64xf32>
    %155 = tpu.matmul %152, %154, %cst_114 {dimension_numbers = #tpu.dot_dimension_numbers<[1], [0], [0], [1], [0, 0, 1, 1], [], []>} : vector<16x96xbf16>, vector<96x64xbf16>, vector<16x64xf32> -> vector<16x64xf32>
    %c1_115 = arith.constant 1 : index
    %c0_116 = arith.constant 0 : index
    %c0_117 = arith.constant 0 : index
    %c0_118 = arith.constant 0 : index
    %156 = vector.load %arg6[%c1_115, %c0_116, %c0_117, %c0_118] : memref<4x3x1x64xf32, #tpu.memory_space<vmem>>, vector<1x1x1x64xf32>
    %157 = vector.shape_cast %156 : vector<1x1x1x64xf32> to vector<1x64xf32>
    %158 = vector.broadcast %157 : vector<1x64xf32> to vector<16x64xf32>
    %159 = arith.addf %155, %158 : vector<16x64xf32>
    %160 = vector.extract_strided_slice %159 {offsets = [0, 0], sizes = [16, 32], strides = [1, 1]} : vector<16x64xf32> to vector<16x32xf32>
    %161 = math.tanh %160 : vector<16x32xf32>
    %162 = vector.extract_strided_slice %159 {offsets = [0, 32], sizes = [16, 32], strides = [1, 1]} : vector<16x64xf32> to vector<16x32xf32>
    %163 = arith.negf %162 : vector<16x32xf32>
    %164 = math.exp %163 : vector<16x32xf32>
    %cst_119 = arith.constant 1.000000e+00 : f32
    %165 = vector.broadcast %cst_119 : f32 to vector<16x32xf32>
    %166 = arith.addf %165, %164 : vector<16x32xf32>
    %167 = arith.divf %165, %166 : vector<16x32xf32>
    %168 = arith.mulf %161, %167 : vector<16x32xf32>
    %169 = arith.truncf %168 : vector<16x32xf32> to vector<16x32xbf16>
    %c1_120 = arith.constant 1 : index
    %c0_121 = arith.constant 0 : index
    %c0_122 = arith.constant 0 : index
    %c0_123 = arith.constant 0 : index
    %170 = vector.load %arg7[%c1_120, %c0_121, %c0_122, %c0_123] : memref<4x2x32x64xbf16, #tpu.memory_space<vmem>>, vector<1x1x32x64xbf16>
    %171 = vector.shape_cast %170 : vector<1x1x32x64xbf16> to vector<32x64xbf16>
    %cst_124 = arith.constant dense<0.000000e+00> : vector<16x64xf32>
    %172 = tpu.matmul %169, %171, %cst_124 {dimension_numbers = #tpu.dot_dimension_numbers<[1], [0], [0], [1], [0, 0, 1, 1], [], []>} : vector<16x32xbf16>, vector<32x64xbf16>, vector<16x64xf32> -> vector<16x64xf32>
    %c1_125 = arith.constant 1 : index
    %c0_126 = arith.constant 0 : index
    %c0_127 = arith.constant 0 : index
    %c0_128 = arith.constant 0 : index
    %173 = vector.load %arg8[%c1_125, %c0_126, %c0_127, %c0_128] : memref<4x2x1x64xf32, #tpu.memory_space<vmem>>, vector<1x1x1x64xf32>
    %174 = vector.shape_cast %173 : vector<1x1x1x64xf32> to vector<1x64xf32>
    %175 = vector.broadcast %174 : vector<1x64xf32> to vector<16x64xf32>
    %176 = arith.addf %172, %175 : vector<16x64xf32>
    %177 = vector.extract_strided_slice %176 {offsets = [0, 0], sizes = [16, 32], strides = [1, 1]} : vector<16x64xf32> to vector<16x32xf32>
    %178 = arith.addf %145, %177 : vector<16x32xf32>
    %179 = arith.mulf %178, %7 : vector<16x32xf32>
    %180 = vector.extract_strided_slice %176 {offsets = [0, 32], sizes = [16, 32], strides = [1, 1]} : vector<16x64xf32> to vector<16x32xf32>
    %181 = arith.addf %146, %180 : vector<16x32xf32>
    %182 = arith.truncf %179 : vector<16x32xf32> to vector<16x32xbf16>
    %c8_129 = arith.constant 8 : index
    %c0_130 = arith.constant 0 : index
    %183 = vector.load %arg14[%c8_129, %c0_130] : memref<32x32xbf16, #tpu.memory_space<vmem>>, vector<16x32xbf16>
    tpu.vector_store %arg14[%c8_129, %c0_130], %182 {strides = array<i32>} : memref<32x32xbf16, #tpu.memory_space<vmem>>, vector<16x32xbf16>,
    %c6_131 = arith.constant 6 : index
    %c0_132 = arith.constant 0 : index
    %184 = vector.load %arg14[%c6_131, %c0_132] : memref<32x32xbf16, #tpu.memory_space<vmem>>, vector<16x32xbf16>
    %c8_133 = arith.constant 8 : index
    %c0_134 = arith.constant 0 : index
    %185 = vector.load %arg14[%c8_133, %c0_134] : memref<32x32xbf16, #tpu.memory_space<vmem>>, vector<16x32xbf16>
    %c10_135 = arith.constant 10 : index
    %c0_136 = arith.constant 0 : index
    %186 = vector.load %arg14[%c10_135, %c0_136] : memref<32x32xbf16, #tpu.memory_space<vmem>>, vector<16x32xbf16>
    %187 = tpu.concatenate %184, %185, %186 in 1 : vector<16x32xbf16>, vector<16x32xbf16>, vector<16x32xbf16> -> vector<16x96xbf16>
    %c1_137 = arith.constant 1 : index
    %c1_138 = arith.constant 1 : index
    %c0_139 = arith.constant 0 : index
    %c0_140 = arith.constant 0 : index
    %188 = vector.load %arg5[%c1_137, %c1_138, %c0_139, %c0_140] : memref<4x3x96x64xbf16, #tpu.memory_space<vmem>>, vector<1x1x96x64xbf16>
    %189 = vector.shape_cast %188 : vector<1x1x96x64xbf16> to vector<96x64xbf16>
    %cst_141 = arith.constant dense<0.000000e+00> : vector<16x64xf32>
    %190 = tpu.matmul %187, %189, %cst_141 {dimension_numbers = #tpu.dot_dimension_numbers<[1], [0], [0], [1], [0, 0, 1, 1], [], []>} : vector<16x96xbf16>, vector<96x64xbf16>, vector<16x64xf32> -> vector<16x64xf32>
    %c1_142 = arith.constant 1 : index
    %c1_143 = arith.constant 1 : index
    %c0_144 = arith.constant 0 : index
    %c0_145 = arith.constant 0 : index
    %191 = vector.load %arg6[%c1_142, %c1_143, %c0_144, %c0_145] : memref<4x3x1x64xf32, #tpu.memory_space<vmem>>, vector<1x1x1x64xf32>
    %192 = vector.shape_cast %191 : vector<1x1x1x64xf32> to vector<1x64xf32>
    %193 = vector.broadcast %192 : vector<1x64xf32> to vector<16x64xf32>
    %194 = arith.addf %190, %193 : vector<16x64xf32>
    %195 = vector.extract_strided_slice %194 {offsets = [0, 0], sizes = [16, 32], strides = [1, 1]} : vector<16x64xf32> to vector<16x32xf32>
    %196 = math.tanh %195 : vector<16x32xf32>
    %197 = vector.extract_strided_slice %194 {offsets = [0, 32], sizes = [16, 32], strides = [1, 1]} : vector<16x64xf32> to vector<16x32xf32>
    %198 = arith.negf %197 : vector<16x32xf32>
    %199 = math.exp %198 : vector<16x32xf32>
    %cst_146 = arith.constant 1.000000e+00 : f32
    %200 = vector.broadcast %cst_146 : f32 to vector<16x32xf32>
    %201 = arith.addf %200, %199 : vector<16x32xf32>
    %202 = arith.divf %200, %201 : vector<16x32xf32>
    %203 = arith.mulf %196, %202 : vector<16x32xf32>
    %204 = arith.truncf %203 : vector<16x32xf32> to vector<16x32xbf16>
    %c1_147 = arith.constant 1 : index
    %c1_148 = arith.constant 1 : index
    %c0_149 = arith.constant 0 : index
    %c0_150 = arith.constant 0 : index
    %205 = vector.load %arg7[%c1_147, %c1_148, %c0_149, %c0_150] : memref<4x2x32x64xbf16, #tpu.memory_space<vmem>>, vector<1x1x32x64xbf16>
    %206 = vector.shape_cast %205 : vector<1x1x32x64xbf16> to vector<32x64xbf16>
    %cst_151 = arith.constant dense<0.000000e+00> : vector<16x64xf32>
    %207 = tpu.matmul %204, %206, %cst_151 {dimension_numbers = #tpu.dot_dimension_numbers<[1], [0], [0], [1], [0, 0, 1, 1], [], []>} : vector<16x32xbf16>, vector<32x64xbf16>, vector<16x64xf32> -> vector<16x64xf32>
    %c1_152 = arith.constant 1 : index
    %c1_153 = arith.constant 1 : index
    %c0_154 = arith.constant 0 : index
    %c0_155 = arith.constant 0 : index
    %208 = vector.load %arg8[%c1_152, %c1_153, %c0_154, %c0_155] : memref<4x2x1x64xf32, #tpu.memory_space<vmem>>, vector<1x1x1x64xf32>
    %209 = vector.shape_cast %208 : vector<1x1x1x64xf32> to vector<1x64xf32>
    %210 = vector.broadcast %209 : vector<1x64xf32> to vector<16x64xf32>
    %211 = arith.addf %207, %210 : vector<16x64xf32>
    %212 = vector.extract_strided_slice %211 {offsets = [0, 0], sizes = [16, 32], strides = [1, 1]} : vector<16x64xf32> to vector<16x32xf32>
    %213 = arith.addf %179, %212 : vector<16x32xf32>
    %214 = arith.mulf %213, %7 : vector<16x32xf32>
    %215 = vector.extract_strided_slice %211 {offsets = [0, 32], sizes = [16, 32], strides = [1, 1]} : vector<16x64xf32> to vector<16x32xf32>
    %216 = arith.addf %181, %215 : vector<16x32xf32>
    %217 = arith.truncf %214 : vector<16x32xf32> to vector<16x32xbf16>
    %c8_156 = arith.constant 8 : index
    %c0_157 = arith.constant 0 : index
    %218 = vector.load %arg14[%c8_156, %c0_157] : memref<32x32xbf16, #tpu.memory_space<vmem>>, vector<16x32xbf16>
    tpu.vector_store %arg14[%c8_156, %c0_157], %217 {strides = array<i32>} : memref<32x32xbf16, #tpu.memory_space<vmem>>, vector<16x32xbf16>,
    %c4_158 = arith.constant 4 : index
    %c0_159 = arith.constant 0 : index
    %219 = vector.load %arg14[%c4_158, %c0_159] : memref<32x32xbf16, #tpu.memory_space<vmem>>, vector<16x32xbf16>
    %c8_160 = arith.constant 8 : index
    %c0_161 = arith.constant 0 : index
    %220 = vector.load %arg14[%c8_160, %c0_161] : memref<32x32xbf16, #tpu.memory_space<vmem>>, vector<16x32xbf16>
    %c12_162 = arith.constant 12 : index
    %c0_163 = arith.constant 0 : index
    %221 = vector.load %arg14[%c12_162, %c0_163] : memref<32x32xbf16, #tpu.memory_space<vmem>>, vector<16x32xbf16>
    %222 = tpu.concatenate %219, %220, %221 in 1 : vector<16x32xbf16>, vector<16x32xbf16>, vector<16x32xbf16> -> vector<16x96xbf16>
    %c1_164 = arith.constant 1 : index
    %c2_165 = arith.constant 2 : index
    %c0_166 = arith.constant 0 : index
    %c0_167 = arith.constant 0 : index
    %223 = vector.load %arg5[%c1_164, %c2_165, %c0_166, %c0_167] : memref<4x3x96x64xbf16, #tpu.memory_space<vmem>>, vector<1x1x96x64xbf16>
    %224 = vector.shape_cast %223 : vector<1x1x96x64xbf16> to vector<96x64xbf16>
    %cst_168 = arith.constant dense<0.000000e+00> : vector<16x64xf32>
    %225 = tpu.matmul %222, %224, %cst_168 {dimension_numbers = #tpu.dot_dimension_numbers<[1], [0], [0], [1], [0, 0, 1, 1], [], []>} : vector<16x96xbf16>, vector<96x64xbf16>, vector<16x64xf32> -> vector<16x64xf32>
    %c1_169 = arith.constant 1 : index
    %c2_170 = arith.constant 2 : index
    %c0_171 = arith.constant 0 : index
    %c0_172 = arith.constant 0 : index
    %226 = vector.load %arg6[%c1_169, %c2_170, %c0_171, %c0_172] : memref<4x3x1x64xf32, #tpu.memory_space<vmem>>, vector<1x1x1x64xf32>
    %227 = vector.shape_cast %226 : vector<1x1x1x64xf32> to vector<1x64xf32>
    %228 = vector.broadcast %227 : vector<1x64xf32> to vector<16x64xf32>
    %229 = arith.addf %225, %228 : vector<16x64xf32>
    %230 = vector.extract_strided_slice %229 {offsets = [0, 0], sizes = [16, 32], strides = [1, 1]} : vector<16x64xf32> to vector<16x32xf32>
    %231 = math.tanh %230 : vector<16x32xf32>
    %232 = vector.extract_strided_slice %229 {offsets = [0, 32], sizes = [16, 32], strides = [1, 1]} : vector<16x64xf32> to vector<16x32xf32>
    %233 = arith.negf %232 : vector<16x32xf32>
    %234 = math.exp %233 : vector<16x32xf32>
    %cst_173 = arith.constant 1.000000e+00 : f32
    %235 = vector.broadcast %cst_173 : f32 to vector<16x32xf32>
    %236 = arith.addf %235, %234 : vector<16x32xf32>
    %237 = arith.divf %235, %236 : vector<16x32xf32>
    %238 = arith.mulf %231, %237 : vector<16x32xf32>
    %239 = arith.truncf %238 : vector<16x32xf32> to vector<16x32xbf16>
    %c1_174 = arith.constant 1 : index
    %c0_175 = arith.constant 0 : index
    %c0_176 = arith.constant 0 : index
    %240 = vector.load %arg9[%c1_174, %c0_175, %c0_176] : memref<4x32x32xbf16, #tpu.memory_space<vmem>>, vector<1x32x32xbf16>
    %241 = vector.shape_cast %240 : vector<1x32x32xbf16> to vector<32x32xbf16>
    %cst_177 = arith.constant dense<0.000000e+00> : vector<16x32xf32>
    %242 = tpu.matmul %239, %241, %cst_177 {dimension_numbers = #tpu.dot_dimension_numbers<[1], [0], [0], [1], [0, 0, 1, 1], [], []>} : vector<16x32xbf16>, vector<32x32xbf16>, vector<16x32xf32> -> vector<16x32xf32>
    %c1_178 = arith.constant 1 : index
    %c0_179 = arith.constant 0 : index
    %c0_180 = arith.constant 0 : index
    %243 = vector.load %arg10[%c1_178, %c0_179, %c0_180] : memref<4x1x32xf32, #tpu.memory_space<vmem>>, vector<1x1x32xf32>
    %244 = vector.shape_cast %243 : vector<1x1x32xf32> to vector<1x32xf32>
    %245 = vector.broadcast %244 : vector<1x32xf32> to vector<16x32xf32>
    %246 = arith.addf %242, %245 : vector<16x32xf32>
    %247 = arith.addf %216, %246 : vector<16x32xf32>
    %248 = arith.mulf %247, %7 : vector<16x32xf32>
    %249 = arith.truncf %248 : vector<16x32xf32> to vector<16x32xbf16>
    %c1_181 = arith.constant 1 : index
    %c0_182 = arith.constant 0 : index
    %c0_183 = arith.constant 0 : index
    %250 = vector.load %arg11[%c1_181, %c0_182, %c0_183] : memref<4x32x4xbf16, #tpu.memory_space<vmem>>, vector<1x32x4xbf16>
    %251 = vector.shape_cast %250 : vector<1x32x4xbf16> to vector<32x4xbf16>
    %cst_184 = arith.constant dense<0.000000e+00> : vector<16x4xf32>
    %252 = tpu.matmul %249, %251, %cst_184 {dimension_numbers = #tpu.dot_dimension_numbers<[1], [0], [0], [1], [0, 0, 1, 1], [], []>} : vector<16x32xbf16>, vector<32x4xbf16>, vector<16x4xf32> -> vector<16x4xf32>
    %c1_185 = arith.constant 1 : index
    %c0_186 = arith.constant 0 : index
    %c0_187 = arith.constant 0 : index
    %253 = vector.load %arg12[%c1_185, %c0_186, %c0_187] : memref<4x1x4xf32, #tpu.memory_space<vmem>>, vector<1x1x4xf32>
    %254 = vector.shape_cast %253 : vector<1x1x4xf32> to vector<1x4xf32>
    %255 = vector.broadcast %254 : vector<1x4xf32> to vector<16x4xf32>
    %256 = arith.addf %252, %255 : vector<16x4xf32>
    %257 = arith.mulf %256, %9 : vector<16x4xf32>
    %258 = arith.mulf %2, %9 : vector<16x4xf32>
    %259 = arith.addf %257, %258 : vector<16x4xf32>
    %260 = arith.truncf %259 : vector<16x4xf32> to vector<16x4xbf16>
    %c2_188 = arith.constant 2 : index
    %c0_189 = arith.constant 0 : index
    %c0_190 = arith.constant 0 : index
    %261 = vector.load %arg3[%c2_188, %c0_189, %c0_190] : memref<4x4x32xbf16, #tpu.memory_space<vmem>>, vector<1x4x32xbf16>
    %262 = vector.shape_cast %261 : vector<1x4x32xbf16> to vector<4x32xbf16>
    %cst_191 = arith.constant dense<0.000000e+00> : vector<16x32xf32>
    %263 = tpu.matmul %260, %262, %cst_191 {dimension_numbers = #tpu.dot_dimension_numbers<[1], [0], [0], [1], [0, 0, 1, 1], [], []>} : vector<16x4xbf16>, vector<4x32xbf16>, vector<16x32xf32> -> vector<16x32xf32>
    %c2_192 = arith.constant 2 : index
    %c0_193 = arith.constant 0 : index
    %c0_194 = arith.constant 0 : index
    %264 = vector.load %arg4[%c2_192, %c0_193, %c0_194] : memref<4x1x32xf32, #tpu.memory_space<vmem>>, vector<1x1x32xf32>
    %265 = vector.shape_cast %264 : vector<1x1x32xf32> to vector<1x32xf32>
    %266 = vector.broadcast %265 : vector<1x32xf32> to vector<16x32xf32>
    %267 = arith.addf %263, %266 : vector<16x32xf32>
    %268 = arith.mulf %267, %7 : vector<16x32xf32>
    %cst_195 = arith.constant 0.000000e+00 : f32
    %269 = vector.broadcast %cst_195 : f32 to vector<16x32xf32>
    %270 = arith.truncf %268 : vector<16x32xf32> to vector<16x32xbf16>
    %c8_196 = arith.constant 8 : index
    %c0_197 = arith.constant 0 : index
    %271 = vector.load %arg14[%c8_196, %c0_197] : memref<32x32xbf16, #tpu.memory_space<vmem>>, vector<16x32xbf16>
    tpu.vector_store %arg14[%c8_196, %c0_197], %270 {strides = array<i32>} : memref<32x32xbf16, #tpu.memory_space<vmem>>, vector<16x32xbf16>,
    %c7_198 = arith.constant 7 : index
    %c0_199 = arith.constant 0 : index
    %272 = vector.load %arg14[%c7_198, %c0_199] : memref<32x32xbf16, #tpu.memory_space<vmem>>, vector<16x32xbf16>
    %c8_200 = arith.constant 8 : index
    %c0_201 = arith.constant 0 : index
    %273 = vector.load %arg14[%c8_200, %c0_201] : memref<32x32xbf16, #tpu.memory_space<vmem>>, vector<16x32xbf16>
    %c9_202 = arith.constant 9 : index
    %c0_203 = arith.constant 0 : index
    %274 = vector.load %arg14[%c9_202, %c0_203] : memref<32x32xbf16, #tpu.memory_space<vmem>>, vector<16x32xbf16>
    %275 = tpu.concatenate %272, %273, %274 in 1 : vector<16x32xbf16>, vector<16x32xbf16>, vector<16x32xbf16> -> vector<16x96xbf16>
    %c2_204 = arith.constant 2 : index
    %c0_205 = arith.constant 0 : index
    %c0_206 = arith.constant 0 : index
    %c0_207 = arith.constant 0 : index
    %276 = vector.load %arg5[%c2_204, %c0_205, %c0_206, %c0_207] : memref<4x3x96x64xbf16, #tpu.memory_space<vmem>>, vector<1x1x96x64xbf16>
    %277 = vector.shape_cast %276 : vector<1x1x96x64xbf16> to vector<96x64xbf16>
    %cst_208 = arith.constant dense<0.000000e+00> : vector<16x64xf32>
    %278 = tpu.matmul %275, %277, %cst_208 {dimension_numbers = #tpu.dot_dimension_numbers<[1], [0], [0], [1], [0, 0, 1, 1], [], []>} : vector<16x96xbf16>, vector<96x64xbf16>, vector<16x64xf32> -> vector<16x64xf32>
    %c2_209 = arith.constant 2 : index
    %c0_210 = arith.constant 0 : index
    %c0_211 = arith.constant 0 : index
    %c0_212 = arith.constant 0 : index
    %279 = vector.load %arg6[%c2_209, %c0_210, %c0_211, %c0_212] : memref<4x3x1x64xf32, #tpu.memory_space<vmem>>, vector<1x1x1x64xf32>
    %280 = vector.shape_cast %279 : vector<1x1x1x64xf32> to vector<1x64xf32>
    %281 = vector.broadcast %280 : vector<1x64xf32> to vector<16x64xf32>
    %282 = arith.addf %278, %281 : vector<16x64xf32>
    %283 = vector.extract_strided_slice %282 {offsets = [0, 0], sizes = [16, 32], strides = [1, 1]} : vector<16x64xf32> to vector<16x32xf32>
    %284 = math.tanh %283 : vector<16x32xf32>
    %285 = vector.extract_strided_slice %282 {offsets = [0, 32], sizes = [16, 32], strides = [1, 1]} : vector<16x64xf32> to vector<16x32xf32>
    %286 = arith.negf %285 : vector<16x32xf32>
    %287 = math.exp %286 : vector<16x32xf32>
    %cst_213 = arith.constant 1.000000e+00 : f32
    %288 = vector.broadcast %cst_213 : f32 to vector<16x32xf32>
    %289 = arith.addf %288, %287 : vector<16x32xf32>
    %290 = arith.divf %288, %289 : vector<16x32xf32>
    %291 = arith.mulf %284, %290 : vector<16x32xf32>
    %292 = arith.truncf %291 : vector<16x32xf32> to vector<16x32xbf16>
    %c2_214 = arith.constant 2 : index
    %c0_215 = arith.constant 0 : index
    %c0_216 = arith.constant 0 : index
    %c0_217 = arith.constant 0 : index
    %293 = vector.load %arg7[%c2_214, %c0_215, %c0_216, %c0_217] : memref<4x2x32x64xbf16, #tpu.memory_space<vmem>>, vector<1x1x32x64xbf16>
    %294 = vector.shape_cast %293 : vector<1x1x32x64xbf16> to vector<32x64xbf16>
    %cst_218 = arith.constant dense<0.000000e+00> : vector<16x64xf32>
    %295 = tpu.matmul %292, %294, %cst_218 {dimension_numbers = #tpu.dot_dimension_numbers<[1], [0], [0], [1], [0, 0, 1, 1], [], []>} : vector<16x32xbf16>, vector<32x64xbf16>, vector<16x64xf32> -> vector<16x64xf32>
    %c2_219 = arith.constant 2 : index
    %c0_220 = arith.constant 0 : index
    %c0_221 = arith.constant 0 : index
    %c0_222 = arith.constant 0 : index
    %296 = vector.load %arg8[%c2_219, %c0_220, %c0_221, %c0_222] : memref<4x2x1x64xf32, #tpu.memory_space<vmem>>, vector<1x1x1x64xf32>
    %297 = vector.shape_cast %296 : vector<1x1x1x64xf32> to vector<1x64xf32>
    %298 = vector.broadcast %297 : vector<1x64xf32> to vector<16x64xf32>
    %299 = arith.addf %295, %298 : vector<16x64xf32>
    %300 = vector.extract_strided_slice %299 {offsets = [0, 0], sizes = [16, 32], strides = [1, 1]} : vector<16x64xf32> to vector<16x32xf32>
    %301 = arith.addf %268, %300 : vector<16x32xf32>
    %302 = arith.mulf %301, %7 : vector<16x32xf32>
    %303 = vector.extract_strided_slice %299 {offsets = [0, 32], sizes = [16, 32], strides = [1, 1]} : vector<16x64xf32> to vector<16x32xf32>
    %304 = arith.addf %269, %303 : vector<16x32xf32>
    %305 = arith.truncf %302 : vector<16x32xf32> to vector<16x32xbf16>
    %c8_223 = arith.constant 8 : index
    %c0_224 = arith.constant 0 : index
    %306 = vector.load %arg14[%c8_223, %c0_224] : memref<32x32xbf16, #tpu.memory_space<vmem>>, vector<16x32xbf16>
    tpu.vector_store %arg14[%c8_223, %c0_224], %305 {strides = array<i32>} : memref<32x32xbf16, #tpu.memory_space<vmem>>, vector<16x32xbf16>,
    %c6_225 = arith.constant 6 : index
    %c0_226 = arith.constant 0 : index
    %307 = vector.load %arg14[%c6_225, %c0_226] : memref<32x32xbf16, #tpu.memory_space<vmem>>, vector<16x32xbf16>
    %c8_227 = arith.constant 8 : index
    %c0_228 = arith.constant 0 : index
    %308 = vector.load %arg14[%c8_227, %c0_228] : memref<32x32xbf16, #tpu.memory_space<vmem>>, vector<16x32xbf16>
    %c10_229 = arith.constant 10 : index
    %c0_230 = arith.constant 0 : index
    %309 = vector.load %arg14[%c10_229, %c0_230] : memref<32x32xbf16, #tpu.memory_space<vmem>>, vector<16x32xbf16>
    %310 = tpu.concatenate %307, %308, %309 in 1 : vector<16x32xbf16>, vector<16x32xbf16>, vector<16x32xbf16> -> vector<16x96xbf16>
    %c2_231 = arith.constant 2 : index
    %c1_232 = arith.constant 1 : index
    %c0_233 = arith.constant 0 : index
    %c0_234 = arith.constant 0 : index
    %311 = vector.load %arg5[%c2_231, %c1_232, %c0_233, %c0_234] : memref<4x3x96x64xbf16, #tpu.memory_space<vmem>>, vector<1x1x96x64xbf16>
    %312 = vector.shape_cast %311 : vector<1x1x96x64xbf16> to vector<96x64xbf16>
    %cst_235 = arith.constant dense<0.000000e+00> : vector<16x64xf32>
    %313 = tpu.matmul %310, %312, %cst_235 {dimension_numbers = #tpu.dot_dimension_numbers<[1], [0], [0], [1], [0, 0, 1, 1], [], []>} : vector<16x96xbf16>, vector<96x64xbf16>, vector<16x64xf32> -> vector<16x64xf32>
    %c2_236 = arith.constant 2 : index
    %c1_237 = arith.constant 1 : index
    %c0_238 = arith.constant 0 : index
    %c0_239 = arith.constant 0 : index
    %314 = vector.load %arg6[%c2_236, %c1_237, %c0_238, %c0_239] : memref<4x3x1x64xf32, #tpu.memory_space<vmem>>, vector<1x1x1x64xf32>
    %315 = vector.shape_cast %314 : vector<1x1x1x64xf32> to vector<1x64xf32>
    %316 = vector.broadcast %315 : vector<1x64xf32> to vector<16x64xf32>
    %317 = arith.addf %313, %316 : vector<16x64xf32>
    %318 = vector.extract_strided_slice %317 {offsets = [0, 0], sizes = [16, 32], strides = [1, 1]} : vector<16x64xf32> to vector<16x32xf32>
    %319 = math.tanh %318 : vector<16x32xf32>
    %320 = vector.extract_strided_slice %317 {offsets = [0, 32], sizes = [16, 32], strides = [1, 1]} : vector<16x64xf32> to vector<16x32xf32>
    %321 = arith.negf %320 : vector<16x32xf32>
    %322 = math.exp %321 : vector<16x32xf32>
    %cst_240 = arith.constant 1.000000e+00 : f32
    %323 = vector.broadcast %cst_240 : f32 to vector<16x32xf32>
    %324 = arith.addf %323, %322 : vector<16x32xf32>
    %325 = arith.divf %323, %324 : vector<16x32xf32>
    %326 = arith.mulf %319, %325 : vector<16x32xf32>
    %327 = arith.truncf %326 : vector<16x32xf32> to vector<16x32xbf16>
    %c2_241 = arith.constant 2 : index
    %c1_242 = arith.constant 1 : index
    %c0_243 = arith.constant 0 : index
    %c0_244 = arith.constant 0 : index
    %328 = vector.load %arg7[%c2_241, %c1_242, %c0_243, %c0_244] : memref<4x2x32x64xbf16, #tpu.memory_space<vmem>>, vector<1x1x32x64xbf16>
    %329 = vector.shape_cast %328 : vector<1x1x32x64xbf16> to vector<32x64xbf16>
    %cst_245 = arith.constant dense<0.000000e+00> : vector<16x64xf32>
    %330 = tpu.matmul %327, %329, %cst_245 {dimension_numbers = #tpu.dot_dimension_numbers<[1], [0], [0], [1], [0, 0, 1, 1], [], []>} : vector<16x32xbf16>, vector<32x64xbf16>, vector<16x64xf32> -> vector<16x64xf32>
    %c2_246 = arith.constant 2 : index
    %c1_247 = arith.constant 1 : index
    %c0_248 = arith.constant 0 : index
    %c0_249 = arith.constant 0 : index
    %331 = vector.load %arg8[%c2_246, %c1_247, %c0_248, %c0_249] : memref<4x2x1x64xf32, #tpu.memory_space<vmem>>, vector<1x1x1x64xf32>
    %332 = vector.shape_cast %331 : vector<1x1x1x64xf32> to vector<1x64xf32>
    %333 = vector.broadcast %332 : vector<1x64xf32> to vector<16x64xf32>
    %334 = arith.addf %330, %333 : vector<16x64xf32>
    %335 = vector.extract_strided_slice %334 {offsets = [0, 0], sizes = [16, 32], strides = [1, 1]} : vector<16x64xf32> to vector<16x32xf32>
    %336 = arith.addf %302, %335 : vector<16x32xf32>
    %337 = arith.mulf %336, %7 : vector<16x32xf32>
    %338 = vector.extract_strided_slice %334 {offsets = [0, 32], sizes = [16, 32], strides = [1, 1]} : vector<16x64xf32> to vector<16x32xf32>
    %339 = arith.addf %304, %338 : vector<16x32xf32>
    %340 = arith.truncf %337 : vector<16x32xf32> to vector<16x32xbf16>
    %c8_250 = arith.constant 8 : index
    %c0_251 = arith.constant 0 : index
    %341 = vector.load %arg14[%c8_250, %c0_251] : memref<32x32xbf16, #tpu.memory_space<vmem>>, vector<16x32xbf16>
    tpu.vector_store %arg14[%c8_250, %c0_251], %340 {strides = array<i32>} : memref<32x32xbf16, #tpu.memory_space<vmem>>, vector<16x32xbf16>,
    %c4_252 = arith.constant 4 : index
    %c0_253 = arith.constant 0 : index
    %342 = vector.load %arg14[%c4_252, %c0_253] : memref<32x32xbf16, #tpu.memory_space<vmem>>, vector<16x32xbf16>
    %c8_254 = arith.constant 8 : index
    %c0_255 = arith.constant 0 : index
    %343 = vector.load %arg14[%c8_254, %c0_255] : memref<32x32xbf16, #tpu.memory_space<vmem>>, vector<16x32xbf16>
    %c12_256 = arith.constant 12 : index
    %c0_257 = arith.constant 0 : index
    %344 = vector.load %arg14[%c12_256, %c0_257] : memref<32x32xbf16, #tpu.memory_space<vmem>>, vector<16x32xbf16>
    %345 = tpu.concatenate %342, %343, %344 in 1 : vector<16x32xbf16>, vector<16x32xbf16>, vector<16x32xbf16> -> vector<16x96xbf16>
    %c2_258 = arith.constant 2 : index
    %c2_259 = arith.constant 2 : index
    %c0_260 = arith.constant 0 : index
    %c0_261 = arith.constant 0 : index
    %346 = vector.load %arg5[%c2_258, %c2_259, %c0_260, %c0_261] : memref<4x3x96x64xbf16, #tpu.memory_space<vmem>>, vector<1x1x96x64xbf16>
    %347 = vector.shape_cast %346 : vector<1x1x96x64xbf16> to vector<96x64xbf16>
    %cst_262 = arith.constant dense<0.000000e+00> : vector<16x64xf32>
    %348 = tpu.matmul %345, %347, %cst_262 {dimension_numbers = #tpu.dot_dimension_numbers<[1], [0], [0], [1], [0, 0, 1, 1], [], []>} : vector<16x96xbf16>, vector<96x64xbf16>, vector<16x64xf32> -> vector<16x64xf32>
    %c2_263 = arith.constant 2 : index
    %c2_264 = arith.constant 2 : index
    %c0_265 = arith.constant 0 : index
    %c0_266 = arith.constant 0 : index
    %349 = vector.load %arg6[%c2_263, %c2_264, %c0_265, %c0_266] : memref<4x3x1x64xf32, #tpu.memory_space<vmem>>, vector<1x1x1x64xf32>
    %350 = vector.shape_cast %349 : vector<1x1x1x64xf32> to vector<1x64xf32>
    %351 = vector.broadcast %350 : vector<1x64xf32> to vector<16x64xf32>
    %352 = arith.addf %348, %351 : vector<16x64xf32>
    %353 = vector.extract_strided_slice %352 {offsets = [0, 0], sizes = [16, 32], strides = [1, 1]} : vector<16x64xf32> to vector<16x32xf32>
    %354 = math.tanh %353 : vector<16x32xf32>
    %355 = vector.extract_strided_slice %352 {offsets = [0, 32], sizes = [16, 32], strides = [1, 1]} : vector<16x64xf32> to vector<16x32xf32>
    %356 = arith.negf %355 : vector<16x32xf32>
    %357 = math.exp %356 : vector<16x32xf32>
    %cst_267 = arith.constant 1.000000e+00 : f32
    %358 = vector.broadcast %cst_267 : f32 to vector<16x32xf32>
    %359 = arith.addf %358, %357 : vector<16x32xf32>
    %360 = arith.divf %358, %359 : vector<16x32xf32>
    %361 = arith.mulf %354, %360 : vector<16x32xf32>
    %362 = arith.truncf %361 : vector<16x32xf32> to vector<16x32xbf16>
    %c2_268 = arith.constant 2 : index
    %c0_269 = arith.constant 0 : index
    %c0_270 = arith.constant 0 : index
    %363 = vector.load %arg9[%c2_268, %c0_269, %c0_270] : memref<4x32x32xbf16, #tpu.memory_space<vmem>>, vector<1x32x32xbf16>
    %364 = vector.shape_cast %363 : vector<1x32x32xbf16> to vector<32x32xbf16>
    %cst_271 = arith.constant dense<0.000000e+00> : vector<16x32xf32>
    %365 = tpu.matmul %362, %364, %cst_271 {dimension_numbers = #tpu.dot_dimension_numbers<[1], [0], [0], [1], [0, 0, 1, 1], [], []>} : vector<16x32xbf16>, vector<32x32xbf16>, vector<16x32xf32> -> vector<16x32xf32>
    %c2_272 = arith.constant 2 : index
    %c0_273 = arith.constant 0 : index
    %c0_274 = arith.constant 0 : index
    %366 = vector.load %arg10[%c2_272, %c0_273, %c0_274] : memref<4x1x32xf32, #tpu.memory_space<vmem>>, vector<1x1x32xf32>
    %367 = vector.shape_cast %366 : vector<1x1x32xf32> to vector<1x32xf32>
    %368 = vector.broadcast %367 : vector<1x32xf32> to vector<16x32xf32>
    %369 = arith.addf %365, %368 : vector<16x32xf32>
    %370 = arith.addf %339, %369 : vector<16x32xf32>
    %371 = arith.mulf %370, %7 : vector<16x32xf32>
    %372 = arith.truncf %371 : vector<16x32xf32> to vector<16x32xbf16>
    %c2_275 = arith.constant 2 : index
    %c0_276 = arith.constant 0 : index
    %c0_277 = arith.constant 0 : index
    %373 = vector.load %arg11[%c2_275, %c0_276, %c0_277] : memref<4x32x4xbf16, #tpu.memory_space<vmem>>, vector<1x32x4xbf16>
    %374 = vector.shape_cast %373 : vector<1x32x4xbf16> to vector<32x4xbf16>
    %cst_278 = arith.constant dense<0.000000e+00> : vector<16x4xf32>
    %375 = tpu.matmul %372, %374, %cst_278 {dimension_numbers = #tpu.dot_dimension_numbers<[1], [0], [0], [1], [0, 0, 1, 1], [], []>} : vector<16x32xbf16>, vector<32x4xbf16>, vector<16x4xf32> -> vector<16x4xf32>
    %c2_279 = arith.constant 2 : index
    %c0_280 = arith.constant 0 : index
    %c0_281 = arith.constant 0 : index
    %376 = vector.load %arg12[%c2_279, %c0_280, %c0_281] : memref<4x1x4xf32, #tpu.memory_space<vmem>>, vector<1x1x4xf32>
    %377 = vector.shape_cast %376 : vector<1x1x4xf32> to vector<1x4xf32>
    %378 = vector.broadcast %377 : vector<1x4xf32> to vector<16x4xf32>
    %379 = arith.addf %375, %378 : vector<16x4xf32>
    %380 = arith.mulf %379, %9 : vector<16x4xf32>
    %381 = arith.mulf %136, %9 : vector<16x4xf32>
    %382 = arith.addf %380, %381 : vector<16x4xf32>
    %383 = arith.truncf %382 : vector<16x4xf32> to vector<16x4xbf16>
    %c3 = arith.constant 3 : index
    %c0_282 = arith.constant 0 : index
    %c0_283 = arith.constant 0 : index
    %384 = vector.load %arg3[%c3, %c0_282, %c0_283] : memref<4x4x32xbf16, #tpu.memory_space<vmem>>, vector<1x4x32xbf16>
    %385 = vector.shape_cast %384 : vector<1x4x32xbf16> to vector<4x32xbf16>
    %cst_284 = arith.constant dense<0.000000e+00> : vector<16x32xf32>
    %386 = tpu.matmul %383, %385, %cst_284 {dimension_numbers = #tpu.dot_dimension_numbers<[1], [0], [0], [1], [0, 0, 1, 1], [], []>} : vector<16x4xbf16>, vector<4x32xbf16>, vector<16x32xf32> -> vector<16x32xf32>
    %c3_285 = arith.constant 3 : index
    %c0_286 = arith.constant 0 : index
    %c0_287 = arith.constant 0 : index
    %387 = vector.load %arg4[%c3_285, %c0_286, %c0_287] : memref<4x1x32xf32, #tpu.memory_space<vmem>>, vector<1x1x32xf32>
    %388 = vector.shape_cast %387 : vector<1x1x32xf32> to vector<1x32xf32>
    %389 = vector.broadcast %388 : vector<1x32xf32> to vector<16x32xf32>
    %390 = arith.addf %386, %389 : vector<16x32xf32>
    %391 = arith.mulf %390, %7 : vector<16x32xf32>
    %cst_288 = arith.constant 0.000000e+00 : f32
    %392 = vector.broadcast %cst_288 : f32 to vector<16x32xf32>
    %393 = arith.truncf %391 : vector<16x32xf32> to vector<16x32xbf16>
    %c8_289 = arith.constant 8 : index
    %c0_290 = arith.constant 0 : index
    %394 = vector.load %arg14[%c8_289, %c0_290] : memref<32x32xbf16, #tpu.memory_space<vmem>>, vector<16x32xbf16>
    tpu.vector_store %arg14[%c8_289, %c0_290], %393 {strides = array<i32>} : memref<32x32xbf16, #tpu.memory_space<vmem>>, vector<16x32xbf16>,
    %c7_291 = arith.constant 7 : index
    %c0_292 = arith.constant 0 : index
    %395 = vector.load %arg14[%c7_291, %c0_292] : memref<32x32xbf16, #tpu.memory_space<vmem>>, vector<16x32xbf16>
    %c8_293 = arith.constant 8 : index
    %c0_294 = arith.constant 0 : index
    %396 = vector.load %arg14[%c8_293, %c0_294] : memref<32x32xbf16, #tpu.memory_space<vmem>>, vector<16x32xbf16>
    %c9_295 = arith.constant 9 : index
    %c0_296 = arith.constant 0 : index
    %397 = vector.load %arg14[%c9_295, %c0_296] : memref<32x32xbf16, #tpu.memory_space<vmem>>, vector<16x32xbf16>
    %398 = tpu.concatenate %395, %396, %397 in 1 : vector<16x32xbf16>, vector<16x32xbf16>, vector<16x32xbf16> -> vector<16x96xbf16>
    %c3_297 = arith.constant 3 : index
    %c0_298 = arith.constant 0 : index
    %c0_299 = arith.constant 0 : index
    %c0_300 = arith.constant 0 : index
    %399 = vector.load %arg5[%c3_297, %c0_298, %c0_299, %c0_300] : memref<4x3x96x64xbf16, #tpu.memory_space<vmem>>, vector<1x1x96x64xbf16>
    %400 = vector.shape_cast %399 : vector<1x1x96x64xbf16> to vector<96x64xbf16>
    %cst_301 = arith.constant dense<0.000000e+00> : vector<16x64xf32>
    %401 = tpu.matmul %398, %400, %cst_301 {dimension_numbers = #tpu.dot_dimension_numbers<[1], [0], [0], [1], [0, 0, 1, 1], [], []>} : vector<16x96xbf16>, vector<96x64xbf16>, vector<16x64xf32> -> vector<16x64xf32>
    %c3_302 = arith.constant 3 : index
    %c0_303 = arith.constant 0 : index
    %c0_304 = arith.constant 0 : index
    %c0_305 = arith.constant 0 : index
    %402 = vector.load %arg6[%c3_302, %c0_303, %c0_304, %c0_305] : memref<4x3x1x64xf32, #tpu.memory_space<vmem>>, vector<1x1x1x64xf32>
    %403 = vector.shape_cast %402 : vector<1x1x1x64xf32> to vector<1x64xf32>
    %404 = vector.broadcast %403 : vector<1x64xf32> to vector<16x64xf32>
    %405 = arith.addf %401, %404 : vector<16x64xf32>
    %406 = vector.extract_strided_slice %405 {offsets = [0, 0], sizes = [16, 32], strides = [1, 1]} : vector<16x64xf32> to vector<16x32xf32>
    %407 = math.tanh %406 : vector<16x32xf32>
    %408 = vector.extract_strided_slice %405 {offsets = [0, 32], sizes = [16, 32], strides = [1, 1]} : vector<16x64xf32> to vector<16x32xf32>
    %409 = arith.negf %408 : vector<16x32xf32>
    %410 = math.exp %409 : vector<16x32xf32>
    %cst_306 = arith.constant 1.000000e+00 : f32
    %411 = vector.broadcast %cst_306 : f32 to vector<16x32xf32>
    %412 = arith.addf %411, %410 : vector<16x32xf32>
    %413 = arith.divf %411, %412 : vector<16x32xf32>
    %414 = arith.mulf %407, %413 : vector<16x32xf32>
    %415 = arith.truncf %414 : vector<16x32xf32> to vector<16x32xbf16>
    %c3_307 = arith.constant 3 : index
    %c0_308 = arith.constant 0 : index
    %c0_309 = arith.constant 0 : index
    %c0_310 = arith.constant 0 : index
    %416 = vector.load %arg7[%c3_307, %c0_308, %c0_309, %c0_310] : memref<4x2x32x64xbf16, #tpu.memory_space<vmem>>, vector<1x1x32x64xbf16>
    %417 = vector.shape_cast %416 : vector<1x1x32x64xbf16> to vector<32x64xbf16>
    %cst_311 = arith.constant dense<0.000000e+00> : vector<16x64xf32>
    %418 = tpu.matmul %415, %417, %cst_311 {dimension_numbers = #tpu.dot_dimension_numbers<[1], [0], [0], [1], [0, 0, 1, 1], [], []>} : vector<16x32xbf16>, vector<32x64xbf16>, vector<16x64xf32> -> vector<16x64xf32>
    %c3_312 = arith.constant 3 : index
    %c0_313 = arith.constant 0 : index
    %c0_314 = arith.constant 0 : index
    %c0_315 = arith.constant 0 : index
    %419 = vector.load %arg8[%c3_312, %c0_313, %c0_314, %c0_315] : memref<4x2x1x64xf32, #tpu.memory_space<vmem>>, vector<1x1x1x64xf32>
    %420 = vector.shape_cast %419 : vector<1x1x1x64xf32> to vector<1x64xf32>
    %421 = vector.broadcast %420 : vector<1x64xf32> to vector<16x64xf32>
    %422 = arith.addf %418, %421 : vector<16x64xf32>
    %423 = vector.extract_strided_slice %422 {offsets = [0, 0], sizes = [16, 32], strides = [1, 1]} : vector<16x64xf32> to vector<16x32xf32>
    %424 = arith.addf %391, %423 : vector<16x32xf32>
    %425 = arith.mulf %424, %7 : vector<16x32xf32>
    %426 = vector.extract_strided_slice %422 {offsets = [0, 32], sizes = [16, 32], strides = [1, 1]} : vector<16x64xf32> to vector<16x32xf32>
    %427 = arith.addf %392, %426 : vector<16x32xf32>
    %428 = arith.truncf %425 : vector<16x32xf32> to vector<16x32xbf16>
    %c8_316 = arith.constant 8 : index
    %c0_317 = arith.constant 0 : index
    %429 = vector.load %arg14[%c8_316, %c0_317] : memref<32x32xbf16, #tpu.memory_space<vmem>>, vector<16x32xbf16>
    tpu.vector_store %arg14[%c8_316, %c0_317], %428 {strides = array<i32>} : memref<32x32xbf16, #tpu.memory_space<vmem>>, vector<16x32xbf16>,
    %c6_318 = arith.constant 6 : index
    %c0_319 = arith.constant 0 : index
    %430 = vector.load %arg14[%c6_318, %c0_319] : memref<32x32xbf16, #tpu.memory_space<vmem>>, vector<16x32xbf16>
    %c8_320 = arith.constant 8 : index
    %c0_321 = arith.constant 0 : index
    %431 = vector.load %arg14[%c8_320, %c0_321] : memref<32x32xbf16, #tpu.memory_space<vmem>>, vector<16x32xbf16>
    %c10_322 = arith.constant 10 : index
    %c0_323 = arith.constant 0 : index
    %432 = vector.load %arg14[%c10_322, %c0_323] : memref<32x32xbf16, #tpu.memory_space<vmem>>, vector<16x32xbf16>
    %433 = tpu.concatenate %430, %431, %432 in 1 : vector<16x32xbf16>, vector<16x32xbf16>, vector<16x32xbf16> -> vector<16x96xbf16>
    %c3_324 = arith.constant 3 : index
    %c1_325 = arith.constant 1 : index
    %c0_326 = arith.constant 0 : index
    %c0_327 = arith.constant 0 : index
    %434 = vector.load %arg5[%c3_324, %c1_325, %c0_326, %c0_327] : memref<4x3x96x64xbf16, #tpu.memory_space<vmem>>, vector<1x1x96x64xbf16>
    %435 = vector.shape_cast %434 : vector<1x1x96x64xbf16> to vector<96x64xbf16>
    %cst_328 = arith.constant dense<0.000000e+00> : vector<16x64xf32>
    %436 = tpu.matmul %433, %435, %cst_328 {dimension_numbers = #tpu.dot_dimension_numbers<[1], [0], [0], [1], [0, 0, 1, 1], [], []>} : vector<16x96xbf16>, vector<96x64xbf16>, vector<16x64xf32> -> vector<16x64xf32>
    %c3_329 = arith.constant 3 : index
    %c1_330 = arith.constant 1 : index
    %c0_331 = arith.constant 0 : index
    %c0_332 = arith.constant 0 : index
    %437 = vector.load %arg6[%c3_329, %c1_330, %c0_331, %c0_332] : memref<4x3x1x64xf32, #tpu.memory_space<vmem>>, vector<1x1x1x64xf32>
    %438 = vector.shape_cast %437 : vector<1x1x1x64xf32> to vector<1x64xf32>
    %439 = vector.broadcast %438 : vector<1x64xf32> to vector<16x64xf32>
    %440 = arith.addf %436, %439 : vector<16x64xf32>
    %441 = vector.extract_strided_slice %440 {offsets = [0, 0], sizes = [16, 32], strides = [1, 1]} : vector<16x64xf32> to vector<16x32xf32>
    %442 = math.tanh %441 : vector<16x32xf32>
    %443 = vector.extract_strided_slice %440 {offsets = [0, 32], sizes = [16, 32], strides = [1, 1]} : vector<16x64xf32> to vector<16x32xf32>
    %444 = arith.negf %443 : vector<16x32xf32>
    %445 = math.exp %444 : vector<16x32xf32>
    %cst_333 = arith.constant 1.000000e+00 : f32
    %446 = vector.broadcast %cst_333 : f32 to vector<16x32xf32>
    %447 = arith.addf %446, %445 : vector<16x32xf32>
    %448 = arith.divf %446, %447 : vector<16x32xf32>
    %449 = arith.mulf %442, %448 : vector<16x32xf32>
    %450 = arith.truncf %449 : vector<16x32xf32> to vector<16x32xbf16>
    %c3_334 = arith.constant 3 : index
    %c1_335 = arith.constant 1 : index
    %c0_336 = arith.constant 0 : index
    %c0_337 = arith.constant 0 : index
    %451 = vector.load %arg7[%c3_334, %c1_335, %c0_336, %c0_337] : memref<4x2x32x64xbf16, #tpu.memory_space<vmem>>, vector<1x1x32x64xbf16>
    %452 = vector.shape_cast %451 : vector<1x1x32x64xbf16> to vector<32x64xbf16>
    %cst_338 = arith.constant dense<0.000000e+00> : vector<16x64xf32>
    %453 = tpu.matmul %450, %452, %cst_338 {dimension_numbers = #tpu.dot_dimension_numbers<[1], [0], [0], [1], [0, 0, 1, 1], [], []>} : vector<16x32xbf16>, vector<32x64xbf16>, vector<16x64xf32> -> vector<16x64xf32>
    %c3_339 = arith.constant 3 : index
    %c1_340 = arith.constant 1 : index
    %c0_341 = arith.constant 0 : index
    %c0_342 = arith.constant 0 : index
    %454 = vector.load %arg8[%c3_339, %c1_340, %c0_341, %c0_342] : memref<4x2x1x64xf32, #tpu.memory_space<vmem>>, vector<1x1x1x64xf32>
    %455 = vector.shape_cast %454 : vector<1x1x1x64xf32> to vector<1x64xf32>
    %456 = vector.broadcast %455 : vector<1x64xf32> to vector<16x64xf32>
    %457 = arith.addf %453, %456 : vector<16x64xf32>
    %458 = vector.extract_strided_slice %457 {offsets = [0, 0], sizes = [16, 32], strides = [1, 1]} : vector<16x64xf32> to vector<16x32xf32>
    %459 = arith.addf %425, %458 : vector<16x32xf32>
    %460 = arith.mulf %459, %7 : vector<16x32xf32>
    %461 = vector.extract_strided_slice %457 {offsets = [0, 32], sizes = [16, 32], strides = [1, 1]} : vector<16x64xf32> to vector<16x32xf32>
    %462 = arith.addf %427, %461 : vector<16x32xf32>
    %463 = arith.truncf %460 : vector<16x32xf32> to vector<16x32xbf16>
    %c8_343 = arith.constant 8 : index
    %c0_344 = arith.constant 0 : index
    %464 = vector.load %arg14[%c8_343, %c0_344] : memref<32x32xbf16, #tpu.memory_space<vmem>>, vector<16x32xbf16>
    tpu.vector_store %arg14[%c8_343, %c0_344], %463 {strides = array<i32>} : memref<32x32xbf16, #tpu.memory_space<vmem>>, vector<16x32xbf16>,
    %c4_345 = arith.constant 4 : index
    %c0_346 = arith.constant 0 : index
    %465 = vector.load %arg14[%c4_345, %c0_346] : memref<32x32xbf16, #tpu.memory_space<vmem>>, vector<16x32xbf16>
    %c8_347 = arith.constant 8 : index
    %c0_348 = arith.constant 0 : index
    %466 = vector.load %arg14[%c8_347, %c0_348] : memref<32x32xbf16, #tpu.memory_space<vmem>>, vector<16x32xbf16>
    %c12_349 = arith.constant 12 : index
    %c0_350 = arith.constant 0 : index
    %467 = vector.load %arg14[%c12_349, %c0_350] : memref<32x32xbf16, #tpu.memory_space<vmem>>, vector<16x32xbf16>
    %468 = tpu.concatenate %465, %466, %467 in 1 : vector<16x32xbf16>, vector<16x32xbf16>, vector<16x32xbf16> -> vector<16x96xbf16>
    %c3_351 = arith.constant 3 : index
    %c2_352 = arith.constant 2 : index
    %c0_353 = arith.constant 0 : index
    %c0_354 = arith.constant 0 : index
    %469 = vector.load %arg5[%c3_351, %c2_352, %c0_353, %c0_354] : memref<4x3x96x64xbf16, #tpu.memory_space<vmem>>, vector<1x1x96x64xbf16>
    %470 = vector.shape_cast %469 : vector<1x1x96x64xbf16> to vector<96x64xbf16>
    %cst_355 = arith.constant dense<0.000000e+00> : vector<16x64xf32>
    %471 = tpu.matmul %468, %470, %cst_355 {dimension_numbers = #tpu.dot_dimension_numbers<[1], [0], [0], [1], [0, 0, 1, 1], [], []>} : vector<16x96xbf16>, vector<96x64xbf16>, vector<16x64xf32> -> vector<16x64xf32>
    %c3_356 = arith.constant 3 : index
    %c2_357 = arith.constant 2 : index
    %c0_358 = arith.constant 0 : index
    %c0_359 = arith.constant 0 : index
    %472 = vector.load %arg6[%c3_356, %c2_357, %c0_358, %c0_359] : memref<4x3x1x64xf32, #tpu.memory_space<vmem>>, vector<1x1x1x64xf32>
    %473 = vector.shape_cast %472 : vector<1x1x1x64xf32> to vector<1x64xf32>
    %474 = vector.broadcast %473 : vector<1x64xf32> to vector<16x64xf32>
    %475 = arith.addf %471, %474 : vector<16x64xf32>
    %476 = vector.extract_strided_slice %475 {offsets = [0, 0], sizes = [16, 32], strides = [1, 1]} : vector<16x64xf32> to vector<16x32xf32>
    %477 = math.tanh %476 : vector<16x32xf32>
    %478 = vector.extract_strided_slice %475 {offsets = [0, 32], sizes = [16, 32], strides = [1, 1]} : vector<16x64xf32> to vector<16x32xf32>
    %479 = arith.negf %478 : vector<16x32xf32>
    %480 = math.exp %479 : vector<16x32xf32>
    %cst_360 = arith.constant 1.000000e+00 : f32
    %481 = vector.broadcast %cst_360 : f32 to vector<16x32xf32>
    %482 = arith.addf %481, %480 : vector<16x32xf32>
    %483 = arith.divf %481, %482 : vector<16x32xf32>
    %484 = arith.mulf %477, %483 : vector<16x32xf32>
    %485 = arith.truncf %484 : vector<16x32xf32> to vector<16x32xbf16>
    %c3_361 = arith.constant 3 : index
    %c0_362 = arith.constant 0 : index
    %c0_363 = arith.constant 0 : index
    %486 = vector.load %arg9[%c3_361, %c0_362, %c0_363] : memref<4x32x32xbf16, #tpu.memory_space<vmem>>, vector<1x32x32xbf16>
    %487 = vector.shape_cast %486 : vector<1x32x32xbf16> to vector<32x32xbf16>
    %cst_364 = arith.constant dense<0.000000e+00> : vector<16x32xf32>
    %488 = tpu.matmul %485, %487, %cst_364 {dimension_numbers = #tpu.dot_dimension_numbers<[1], [0], [0], [1], [0, 0, 1, 1], [], []>} : vector<16x32xbf16>, vector<32x32xbf16>, vector<16x32xf32> -> vector<16x32xf32>
    %c3_365 = arith.constant 3 : index
    %c0_366 = arith.constant 0 : index
    %c0_367 = arith.constant 0 : index
    %489 = vector.load %arg10[%c3_365, %c0_366, %c0_367] : memref<4x1x32xf32, #tpu.memory_space<vmem>>, vector<1x1x32xf32>
    %490 = vector.shape_cast %489 : vector<1x1x32xf32> to vector<1x32xf32>
    %491 = vector.broadcast %490 : vector<1x32xf32> to vector<16x32xf32>
    %492 = arith.addf %488, %491 : vector<16x32xf32>
    %493 = arith.addf %462, %492 : vector<16x32xf32>
    %494 = arith.mulf %493, %7 : vector<16x32xf32>
    %495 = arith.truncf %494 : vector<16x32xf32> to vector<16x32xbf16>
    %c3_368 = arith.constant 3 : index
    %c0_369 = arith.constant 0 : index
    %c0_370 = arith.constant 0 : index
    %496 = vector.load %arg11[%c3_368, %c0_369, %c0_370] : memref<4x32x4xbf16, #tpu.memory_space<vmem>>, vector<1x32x4xbf16>
    %497 = vector.shape_cast %496 : vector<1x32x4xbf16> to vector<32x4xbf16>
    %cst_371 = arith.constant dense<0.000000e+00> : vector<16x4xf32>
    %498 = tpu.matmul %495, %497, %cst_371 {dimension_numbers = #tpu.dot_dimension_numbers<[1], [0], [0], [1], [0, 0, 1, 1], [], []>} : vector<16x32xbf16>, vector<32x4xbf16>, vector<16x4xf32> -> vector<16x4xf32>
    %c3_372 = arith.constant 3 : index
    %c0_373 = arith.constant 0 : index
    %c0_374 = arith.constant 0 : index
    %499 = vector.load %arg12[%c3_372, %c0_373, %c0_374] : memref<4x1x4xf32, #tpu.memory_space<vmem>>, vector<1x1x4xf32>
    %500 = vector.shape_cast %499 : vector<1x1x4xf32> to vector<1x4xf32>
    %501 = vector.broadcast %500 : vector<1x4xf32> to vector<16x4xf32>
    %502 = arith.addf %498, %501 : vector<16x4xf32>
    %503 = arith.mulf %502, %9 : vector<16x4xf32>
    %504 = arith.mulf %259, %9 : vector<16x4xf32>
    %505 = arith.addf %503, %504 : vector<16x4xf32>
    %506 = tpu.concatenate %505, %382 in 1 : vector<16x4xf32>, vector<16x4xf32> -> vector<16x8xf32>
    %507 = vector.shape_cast %506 : vector<16x8xf32> to vector<1x16x8xf32>
    %c0_375 = arith.constant 0 : index
    %c0_376 = arith.constant 0 : index
    %c0_377 = arith.constant 0 : index
    %508 = vector.load %arg13[%c0_375, %c0_376, %c0_377] : memref<1x16x8xf32, #tpu.memory_space<vmem>>, vector<1x16x8xf32>
    tpu.vector_store %arg13[%c0_375, %c0_376, %c0_377], %507 {strides = array<i32>} : memref<1x16x8xf32, #tpu.memory_space<vmem>>, vector<1x16x8xf32>,
    return
  }
  func.func @transform_0(%arg0: i32) -> (i32, i32, i32) {
    %c0_i32 = arith.constant 0 : i32
    %c0_i32_0 = arith.constant 0 : i32
    %c0_i32_1 = arith.constant 0 : i32
    return %arg0, %c0_i32, %c0_i32_0 : i32, i32, i32
  }
  func.func @transform_1(%arg0: i32) -> (i32, i32, i32) {
    %c0_i32 = arith.constant 0 : i32
    %c0_i32_0 = arith.constant 0 : i32
    %c0_i32_1 = arith.constant 0 : i32
    return %arg0, %c0_i32, %c0_i32_0 : i32, i32, i32
  }
  func.func @transform_2(%arg0: i32) -> (i32, i32, i32) {
    %c0_i32 = arith.constant 0 : i32
    %c0_i32_0 = arith.constant 0 : i32
    %c0_i32_1 = arith.constant 0 : i32
    %c0_i32_2 = arith.constant 0 : i32
    return %c0_i32, %c0_i32_0, %c0_i32_1 : i32, i32, i32
  }
  func.func @transform_3(%arg0: i32) -> (i32, i32, i32) {
    %c0_i32 = arith.constant 0 : i32
    %c0_i32_0 = arith.constant 0 : i32
    %c0_i32_1 = arith.constant 0 : i32
    %c0_i32_2 = arith.constant 0 : i32
    return %c0_i32, %c0_i32_0, %c0_i32_1 : i32, i32, i32
  }
  func.func @transform_4(%arg0: i32) -> (i32, i32, i32, i32) {
    %c0_i32 = arith.constant 0 : i32
    %c0_i32_0 = arith.constant 0 : i32
    %c0_i32_1 = arith.constant 0 : i32
    %c0_i32_2 = arith.constant 0 : i32
    %c0_i32_3 = arith.constant 0 : i32
    return %c0_i32, %c0_i32_0, %c0_i32_1, %c0_i32_2 : i32, i32, i32, i32
  }
  func.func @transform_5(%arg0: i32) -> (i32, i32, i32, i32) {
    %c0_i32 = arith.constant 0 : i32
    %c0_i32_0 = arith.constant 0 : i32
    %c0_i32_1 = arith.constant 0 : i32
    %c0_i32_2 = arith.constant 0 : i32
    %c0_i32_3 = arith.constant 0 : i32
    return %c0_i32, %c0_i32_0, %c0_i32_1, %c0_i32_2 : i32, i32, i32, i32
  }
  func.func @transform_6(%arg0: i32) -> (i32, i32, i32, i32) {
    %c0_i32 = arith.constant 0 : i32
    %c0_i32_0 = arith.constant 0 : i32
    %c0_i32_1 = arith.constant 0 : i32
    %c0_i32_2 = arith.constant 0 : i32
    %c0_i32_3 = arith.constant 0 : i32
    return %c0_i32, %c0_i32_0, %c0_i32_1, %c0_i32_2 : i32, i32, i32, i32
  }
  func.func @transform_7(%arg0: i32) -> (i32, i32, i32, i32) {
    %c0_i32 = arith.constant 0 : i32
    %c0_i32_0 = arith.constant 0 : i32
    %c0_i32_1 = arith.constant 0 : i32
    %c0_i32_2 = arith.constant 0 : i32
    %c0_i32_3 = arith.constant 0 : i32
    return %c0_i32, %c0_i32_0, %c0_i32_1, %c0_i32_2 : i32, i32, i32, i32
  }
  func.func @transform_8(%arg0: i32) -> (i32, i32, i32) {
    %c0_i32 = arith.constant 0 : i32
    %c0_i32_0 = arith.constant 0 : i32
    %c0_i32_1 = arith.constant 0 : i32
    %c0_i32_2 = arith.constant 0 : i32
    return %c0_i32, %c0_i32_0, %c0_i32_1 : i32, i32, i32
  }
  func.func @transform_9(%arg0: i32) -> (i32, i32, i32) {
    %c0_i32 = arith.constant 0 : i32
    %c0_i32_0 = arith.constant 0 : i32
    %c0_i32_1 = arith.constant 0 : i32
    %c0_i32_2 = arith.constant 0 : i32
    return %c0_i32, %c0_i32_0, %c0_i32_1 : i32, i32, i32
  }
  func.func @transform_10(%arg0: i32) -> (i32, i32, i32) {
    %c0_i32 = arith.constant 0 : i32
    %c0_i32_0 = arith.constant 0 : i32
    %c0_i32_1 = arith.constant 0 : i32
    %c0_i32_2 = arith.constant 0 : i32
    return %c0_i32, %c0_i32_0, %c0_i32_1 : i32, i32, i32
  }
  func.func @transform_11(%arg0: i32) -> (i32, i32, i32) {
    %c0_i32 = arith.constant 0 : i32
    %c0_i32_0 = arith.constant 0 : i32
    %c0_i32_1 = arith.constant 0 : i32
    %c0_i32_2 = arith.constant 0 : i32
    return %c0_i32, %c0_i32_0, %c0_i32_1 : i32, i32, i32
  }
  func.func @transform_12(%arg0: i32) -> (i32, i32, i32) {
    %c0_i32 = arith.constant 0 : i32
    %c0_i32_0 = arith.constant 0 : i32
    %c0_i32_1 = arith.constant 0 : i32
    return %arg0, %c0_i32, %c0_i32_0 : i32, i32, i32
  }
}

module attributes {stable_mosaic.version = 11 : i64} {
  func.func @_coupling_block_kernel(%arg0: i32, %arg1: memref<1x16x8xf32, #tpu.memory_space<vmem>>, %arg2: memref<1x16x1xf32, #tpu.memory_space<vmem>>, %arg3: memref<4x4x32xbf16, #tpu.memory_space<vmem>>, %arg4: memref<4x1x32xf32, #tpu.memory_space<vmem>>, %arg5: memref<4x3x96x64xbf16, #tpu.memory_space<vmem>>, %arg6: memref<4x3x1x64xf32, #tpu.memory_space<vmem>>, %arg7: memref<4x2x32x64xbf16, #tpu.memory_space<vmem>>, %arg8: memref<4x2x1x64xf32, #tpu.memory_space<vmem>>, %arg9: memref<4x32x32xbf16, #tpu.memory_space<vmem>>, %arg10: memref<4x1x32xf32, #tpu.memory_space<vmem>>, %arg11: memref<4x32x4xbf16, #tpu.memory_space<vmem>>, %arg12: memref<4x1x4xf32, #tpu.memory_space<vmem>>, %arg13: memref<1x16x8xf32, #tpu.memory_space<vmem>>, %arg14: memref<32x32xbf16, #tpu.memory_space<vmem>>) attributes {dimension_semantics = [#tpu.dimension_semantics<parallel>], iteration_bounds = array<i64: 2>, scalar_prefetch = 0 : i64, scratch_operands = 1 : i64, tpu.core_type = #tpu.core_type<tc>, window_params = [{transform_indices = @transform_0, window_bounds = array<i64: 1, 16, 8>}, {transform_indices = @transform_1, window_bounds = array<i64: 1, 16, 1>}, {pipeline_mode = #tpu.pipeline_mode<synchronous>, transform_indices = @transform_2, window_bounds = array<i64: 4, 4, 32>}, {pipeline_mode = #tpu.pipeline_mode<synchronous>, transform_indices = @transform_3, window_bounds = array<i64: 4, 1, 32>}, {pipeline_mode = #tpu.pipeline_mode<synchronous>, transform_indices = @transform_4, window_bounds = array<i64: 4, 3, 96, 64>}, {pipeline_mode = #tpu.pipeline_mode<synchronous>, transform_indices = @transform_5, window_bounds = array<i64: 4, 3, 1, 64>}, {pipeline_mode = #tpu.pipeline_mode<synchronous>, transform_indices = @transform_6, window_bounds = array<i64: 4, 2, 32, 64>}, {pipeline_mode = #tpu.pipeline_mode<synchronous>, transform_indices = @transform_7, window_bounds = array<i64: 4, 2, 1, 64>}, {pipeline_mode = #tpu.pipeline_mode<synchronous>, transform_indices = @transform_8, window_bounds = array<i64: 4, 32, 32>}, {pipeline_mode = #tpu.pipeline_mode<synchronous>, transform_indices = @transform_9, window_bounds = array<i64: 4, 1, 32>}, {pipeline_mode = #tpu.pipeline_mode<synchronous>, transform_indices = @transform_10, window_bounds = array<i64: 4, 32, 4>}, {pipeline_mode = #tpu.pipeline_mode<synchronous>, transform_indices = @transform_11, window_bounds = array<i64: 4, 1, 4>}, {transform_indices = @transform_12, window_bounds = array<i64: 1, 16, 8>}]} {
    %c0 = arith.constant 0 : index
    %c0_0 = arith.constant 0 : index
    %c0_1 = arith.constant 0 : index
    %0 = vector.load %arg1[%c0, %c0_0, %c0_1] : memref<1x16x8xf32, #tpu.memory_space<vmem>>, vector<1x16x8xf32>
    %1 = vector.shape_cast %0 : vector<1x16x8xf32> to vector<16x8xf32>
    %2 = vector.extract_strided_slice %1 {offsets = [0, 0], sizes = [16, 4], strides = [1, 1]} : vector<16x8xf32> to vector<16x4xf32>
    %3 = vector.extract_strided_slice %1 {offsets = [0, 4], sizes = [16, 4], strides = [1, 1]} : vector<16x8xf32> to vector<16x4xf32>
    %c0_2 = arith.constant 0 : index
    %c0_3 = arith.constant 0 : index
    %c0_4 = arith.constant 0 : index
    %4 = vector.load %arg2[%c0_2, %c0_3, %c0_4] : memref<1x16x1xf32, #tpu.memory_space<vmem>>, vector<1x16x1xf32>
    %5 = vector.shape_cast %4 : vector<1x16x1xf32> to vector<16x1xf32>
    %6 = vector.shape_cast %5 : vector<16x1xf32> to vector<16x1xf32>
    %7 = vector.broadcast %6 : vector<16x1xf32> to vector<16x32xf32>
    %8 = vector.shape_cast %5 : vector<16x1xf32> to vector<16x1xf32>
    %9 = vector.broadcast %8 : vector<16x1xf32> to vector<16x4xf32>
    %cst = arith.constant 0.000000e+00 : bf16
    %10 = vector.broadcast %cst : bf16 to vector<8x32xbf16>
    %c0_5 = arith.constant 0 : index
    %c0_6 = arith.constant 0 : index
    %11 = vector.load %arg14[%c0_5, %c0_6] : memref<32x32xbf16, #tpu.memory_space<vmem>>, vector<8x32xbf16>
    tpu.vector_store %arg14[%c0_5, %c0_6], %10 {strides = array<i32>} : memref<32x32xbf16, #tpu.memory_space<vmem>>, vector<8x32xbf16>,
    %cst_7 = arith.constant 0.000000e+00 : bf16
    %12 = vector.broadcast %cst_7 : bf16 to vector<8x32xbf16>
    %c24 = arith.constant 24 : index
    %c0_8 = arith.constant 0 : index
    %13 = vector.load %arg14[%c24, %c0_8] : memref<32x32xbf16, #tpu.memory_space<vmem>>, vector<8x32xbf16>
    tpu.vector_store %arg14[%c24, %c0_8], %12 {strides = array<i32>} : memref<32x32xbf16, #tpu.memory_space<vmem>>, vector<8x32xbf16>,
    %14 = arith.truncf %2 : vector<16x4xf32> to vector<16x4xbf16>
    %c0_9 = arith.constant 0 : index
    %c0_10 = arith.constant 0 : index
    %c0_11 = arith.constant 0 : index
    %15 = vector.load %arg3[%c0_9, %c0_10, %c0_11] : memref<4x4x32xbf16, #tpu.memory_space<vmem>>, vector<1x4x32xbf16>
    %16 = vector.shape_cast %15 : vector<1x4x32xbf16> to vector<4x32xbf16>
    %cst_12 = arith.constant dense<0.000000e+00> : vector<16x32xf32>
    %17 = tpu.matmul %14, %16, %cst_12 {dimension_numbers = #tpu.dot_dimension_numbers<[1], [0], [0], [1], [0, 0, 1, 1], [], []>} : vector<16x4xbf16>, vector<4x32xbf16>, vector<16x32xf32> -> vector<16x32xf32>
    %c0_13 = arith.constant 0 : index
    %c0_14 = arith.constant 0 : index
    %c0_15 = arith.constant 0 : index
    %18 = vector.load %arg4[%c0_13, %c0_14, %c0_15] : memref<4x1x32xf32, #tpu.memory_space<vmem>>, vector<1x1x32xf32>
    %19 = vector.shape_cast %18 : vector<1x1x32xf32> to vector<1x32xf32>
    %20 = vector.broadcast %19 : vector<1x32xf32> to vector<16x32xf32>
    %21 = arith.addf %17, %20 : vector<16x32xf32>
    %22 = arith.mulf %21, %7 : vector<16x32xf32>
    %cst_16 = arith.constant 0.000000e+00 : f32
    %23 = vector.broadcast %cst_16 : f32 to vector<16x32xf32>
    %24 = arith.truncf %22 : vector<16x32xf32> to vector<16x32xbf16>
    %c8 = arith.constant 8 : index
    %c0_17 = arith.constant 0 : index
    %25 = vector.load %arg14[%c8, %c0_17] : memref<32x32xbf16, #tpu.memory_space<vmem>>, vector<16x32xbf16>
    tpu.vector_store %arg14[%c8, %c0_17], %24 {strides = array<i32>} : memref<32x32xbf16, #tpu.memory_space<vmem>>, vector<16x32xbf16>,
    %c7 = arith.constant 7 : index
    %c0_18 = arith.constant 0 : index
    %26 = vector.load %arg14[%c7, %c0_18] : memref<32x32xbf16, #tpu.memory_space<vmem>>, vector<16x32xbf16>
    %c8_19 = arith.constant 8 : index
    %c0_20 = arith.constant 0 : index
    %27 = vector.load %arg14[%c8_19, %c0_20] : memref<32x32xbf16, #tpu.memory_space<vmem>>, vector<16x32xbf16>
    %c9 = arith.constant 9 : index
    %c0_21 = arith.constant 0 : index
    %28 = vector.load %arg14[%c9, %c0_21] : memref<32x32xbf16, #tpu.memory_space<vmem>>, vector<16x32xbf16>
    %29 = tpu.concatenate %26, %27, %28 in 1 : vector<16x32xbf16>, vector<16x32xbf16>, vector<16x32xbf16> -> vector<16x96xbf16>
    %c0_22 = arith.constant 0 : index
    %c0_23 = arith.constant 0 : index
    %c0_24 = arith.constant 0 : index
    %c0_25 = arith.constant 0 : index
    %30 = vector.load %arg5[%c0_22, %c0_23, %c0_24, %c0_25] : memref<4x3x96x64xbf16, #tpu.memory_space<vmem>>, vector<1x1x96x64xbf16>
    %31 = vector.shape_cast %30 : vector<1x1x96x64xbf16> to vector<96x64xbf16>
    %cst_26 = arith.constant dense<0.000000e+00> : vector<16x64xf32>
    %32 = tpu.matmul %29, %31, %cst_26 {dimension_numbers = #tpu.dot_dimension_numbers<[1], [0], [0], [1], [0, 0, 1, 1], [], []>} : vector<16x96xbf16>, vector<96x64xbf16>, vector<16x64xf32> -> vector<16x64xf32>
    %c0_27 = arith.constant 0 : index
    %c0_28 = arith.constant 0 : index
    %c0_29 = arith.constant 0 : index
    %c0_30 = arith.constant 0 : index
    %33 = vector.load %arg6[%c0_27, %c0_28, %c0_29, %c0_30] : memref<4x3x1x64xf32, #tpu.memory_space<vmem>>, vector<1x1x1x64xf32>
    %34 = vector.shape_cast %33 : vector<1x1x1x64xf32> to vector<1x64xf32>
    %35 = vector.broadcast %34 : vector<1x64xf32> to vector<16x64xf32>
    %36 = arith.addf %32, %35 : vector<16x64xf32>
    %37 = vector.extract_strided_slice %36 {offsets = [0, 0], sizes = [16, 32], strides = [1, 1]} : vector<16x64xf32> to vector<16x32xf32>
    %38 = math.tanh %37 : vector<16x32xf32>
    %39 = vector.extract_strided_slice %36 {offsets = [0, 32], sizes = [16, 32], strides = [1, 1]} : vector<16x64xf32> to vector<16x32xf32>
    %40 = arith.negf %39 : vector<16x32xf32>
    %41 = math.exp %40 : vector<16x32xf32>
    %cst_31 = arith.constant 1.000000e+00 : f32
    %42 = vector.broadcast %cst_31 : f32 to vector<16x32xf32>
    %43 = arith.addf %42, %41 : vector<16x32xf32>
    %44 = arith.divf %42, %43 : vector<16x32xf32>
    %45 = arith.mulf %38, %44 : vector<16x32xf32>
    %46 = arith.truncf %45 : vector<16x32xf32> to vector<16x32xbf16>
    %c0_32 = arith.constant 0 : index
    %c0_33 = arith.constant 0 : index
    %c0_34 = arith.constant 0 : index
    %c0_35 = arith.constant 0 : index
    %47 = vector.load %arg7[%c0_32, %c0_33, %c0_34, %c0_35] : memref<4x2x32x64xbf16, #tpu.memory_space<vmem>>, vector<1x1x32x64xbf16>
    %48 = vector.shape_cast %47 : vector<1x1x32x64xbf16> to vector<32x64xbf16>
    %cst_36 = arith.constant dense<0.000000e+00> : vector<16x64xf32>
    %49 = tpu.matmul %46, %48, %cst_36 {dimension_numbers = #tpu.dot_dimension_numbers<[1], [0], [0], [1], [0, 0, 1, 1], [], []>} : vector<16x32xbf16>, vector<32x64xbf16>, vector<16x64xf32> -> vector<16x64xf32>
    %c0_37 = arith.constant 0 : index
    %c0_38 = arith.constant 0 : index
    %c0_39 = arith.constant 0 : index
    %c0_40 = arith.constant 0 : index
    %50 = vector.load %arg8[%c0_37, %c0_38, %c0_39, %c0_40] : memref<4x2x1x64xf32, #tpu.memory_space<vmem>>, vector<1x1x1x64xf32>
    %51 = vector.shape_cast %50 : vector<1x1x1x64xf32> to vector<1x64xf32>
    %52 = vector.broadcast %51 : vector<1x64xf32> to vector<16x64xf32>
    %53 = arith.addf %49, %52 : vector<16x64xf32>
    %54 = vector.extract_strided_slice %53 {offsets = [0, 0], sizes = [16, 32], strides = [1, 1]} : vector<16x64xf32> to vector<16x32xf32>
    %55 = arith.addf %22, %54 : vector<16x32xf32>
    %56 = arith.mulf %55, %7 : vector<16x32xf32>
    %57 = vector.extract_strided_slice %53 {offsets = [0, 32], sizes = [16, 32], strides = [1, 1]} : vector<16x64xf32> to vector<16x32xf32>
    %58 = arith.addf %23, %57 : vector<16x32xf32>
    %59 = arith.truncf %56 : vector<16x32xf32> to vector<16x32xbf16>
    %c8_41 = arith.constant 8 : index
    %c0_42 = arith.constant 0 : index
    %60 = vector.load %arg14[%c8_41, %c0_42] : memref<32x32xbf16, #tpu.memory_space<vmem>>, vector<16x32xbf16>
    tpu.vector_store %arg14[%c8_41, %c0_42], %59 {strides = array<i32>} : memref<32x32xbf16, #tpu.memory_space<vmem>>, vector<16x32xbf16>,
    %c6 = arith.constant 6 : index
    %c0_43 = arith.constant 0 : index
    %61 = vector.load %arg14[%c6, %c0_43] : memref<32x32xbf16, #tpu.memory_space<vmem>>, vector<16x32xbf16>
    %c8_44 = arith.constant 8 : index
    %c0_45 = arith.constant 0 : index
    %62 = vector.load %arg14[%c8_44, %c0_45] : memref<32x32xbf16, #tpu.memory_space<vmem>>, vector<16x32xbf16>
    %c10 = arith.constant 10 : index
    %c0_46 = arith.constant 0 : index
    %63 = vector.load %arg14[%c10, %c0_46] : memref<32x32xbf16, #tpu.memory_space<vmem>>, vector<16x32xbf16>
    %64 = tpu.concatenate %61, %62, %63 in 1 : vector<16x32xbf16>, vector<16x32xbf16>, vector<16x32xbf16> -> vector<16x96xbf16>
    %c0_47 = arith.constant 0 : index
    %c1 = arith.constant 1 : index
    %c0_48 = arith.constant 0 : index
    %c0_49 = arith.constant 0 : index
    %65 = vector.load %arg5[%c0_47, %c1, %c0_48, %c0_49] : memref<4x3x96x64xbf16, #tpu.memory_space<vmem>>, vector<1x1x96x64xbf16>
    %66 = vector.shape_cast %65 : vector<1x1x96x64xbf16> to vector<96x64xbf16>
    %cst_50 = arith.constant dense<0.000000e+00> : vector<16x64xf32>
    %67 = tpu.matmul %64, %66, %cst_50 {dimension_numbers = #tpu.dot_dimension_numbers<[1], [0], [0], [1], [0, 0, 1, 1], [], []>} : vector<16x96xbf16>, vector<96x64xbf16>, vector<16x64xf32> -> vector<16x64xf32>
    %c0_51 = arith.constant 0 : index
    %c1_52 = arith.constant 1 : index
    %c0_53 = arith.constant 0 : index
    %c0_54 = arith.constant 0 : index
    %68 = vector.load %arg6[%c0_51, %c1_52, %c0_53, %c0_54] : memref<4x3x1x64xf32, #tpu.memory_space<vmem>>, vector<1x1x1x64xf32>
    %69 = vector.shape_cast %68 : vector<1x1x1x64xf32> to vector<1x64xf32>
    %70 = vector.broadcast %69 : vector<1x64xf32> to vector<16x64xf32>
    %71 = arith.addf %67, %70 : vector<16x64xf32>
    %72 = vector.extract_strided_slice %71 {offsets = [0, 0], sizes = [16, 32], strides = [1, 1]} : vector<16x64xf32> to vector<16x32xf32>
    %73 = math.tanh %72 : vector<16x32xf32>
    %74 = vector.extract_strided_slice %71 {offsets = [0, 32], sizes = [16, 32], strides = [1, 1]} : vector<16x64xf32> to vector<16x32xf32>
    %75 = arith.negf %74 : vector<16x32xf32>
    %76 = math.exp %75 : vector<16x32xf32>
    %cst_55 = arith.constant 1.000000e+00 : f32
    %77 = vector.broadcast %cst_55 : f32 to vector<16x32xf32>
    %78 = arith.addf %77, %76 : vector<16x32xf32>
    %79 = arith.divf %77, %78 : vector<16x32xf32>
    %80 = arith.mulf %73, %79 : vector<16x32xf32>
    %81 = arith.truncf %80 : vector<16x32xf32> to vector<16x32xbf16>
    %c0_56 = arith.constant 0 : index
    %c1_57 = arith.constant 1 : index
    %c0_58 = arith.constant 0 : index
    %c0_59 = arith.constant 0 : index
    %82 = vector.load %arg7[%c0_56, %c1_57, %c0_58, %c0_59] : memref<4x2x32x64xbf16, #tpu.memory_space<vmem>>, vector<1x1x32x64xbf16>
    %83 = vector.shape_cast %82 : vector<1x1x32x64xbf16> to vector<32x64xbf16>
    %cst_60 = arith.constant dense<0.000000e+00> : vector<16x64xf32>
    %84 = tpu.matmul %81, %83, %cst_60 {dimension_numbers = #tpu.dot_dimension_numbers<[1], [0], [0], [1], [0, 0, 1, 1], [], []>} : vector<16x32xbf16>, vector<32x64xbf16>, vector<16x64xf32> -> vector<16x64xf32>
    %c0_61 = arith.constant 0 : index
    %c1_62 = arith.constant 1 : index
    %c0_63 = arith.constant 0 : index
    %c0_64 = arith.constant 0 : index
    %85 = vector.load %arg8[%c0_61, %c1_62, %c0_63, %c0_64] : memref<4x2x1x64xf32, #tpu.memory_space<vmem>>, vector<1x1x1x64xf32>
    %86 = vector.shape_cast %85 : vector<1x1x1x64xf32> to vector<1x64xf32>
    %87 = vector.broadcast %86 : vector<1x64xf32> to vector<16x64xf32>
    %88 = arith.addf %84, %87 : vector<16x64xf32>
    %89 = vector.extract_strided_slice %88 {offsets = [0, 0], sizes = [16, 32], strides = [1, 1]} : vector<16x64xf32> to vector<16x32xf32>
    %90 = arith.addf %56, %89 : vector<16x32xf32>
    %91 = arith.mulf %90, %7 : vector<16x32xf32>
    %92 = vector.extract_strided_slice %88 {offsets = [0, 32], sizes = [16, 32], strides = [1, 1]} : vector<16x64xf32> to vector<16x32xf32>
    %93 = arith.addf %58, %92 : vector<16x32xf32>
    %94 = arith.truncf %91 : vector<16x32xf32> to vector<16x32xbf16>
    %c8_65 = arith.constant 8 : index
    %c0_66 = arith.constant 0 : index
    %95 = vector.load %arg14[%c8_65, %c0_66] : memref<32x32xbf16, #tpu.memory_space<vmem>>, vector<16x32xbf16>
    tpu.vector_store %arg14[%c8_65, %c0_66], %94 {strides = array<i32>} : memref<32x32xbf16, #tpu.memory_space<vmem>>, vector<16x32xbf16>,
    %c4 = arith.constant 4 : index
    %c0_67 = arith.constant 0 : index
    %96 = vector.load %arg14[%c4, %c0_67] : memref<32x32xbf16, #tpu.memory_space<vmem>>, vector<16x32xbf16>
    %c8_68 = arith.constant 8 : index
    %c0_69 = arith.constant 0 : index
    %97 = vector.load %arg14[%c8_68, %c0_69] : memref<32x32xbf16, #tpu.memory_space<vmem>>, vector<16x32xbf16>
    %c12 = arith.constant 12 : index
    %c0_70 = arith.constant 0 : index
    %98 = vector.load %arg14[%c12, %c0_70] : memref<32x32xbf16, #tpu.memory_space<vmem>>, vector<16x32xbf16>
    %99 = tpu.concatenate %96, %97, %98 in 1 : vector<16x32xbf16>, vector<16x32xbf16>, vector<16x32xbf16> -> vector<16x96xbf16>
    %c0_71 = arith.constant 0 : index
    %c2 = arith.constant 2 : index
    %c0_72 = arith.constant 0 : index
    %c0_73 = arith.constant 0 : index
    %100 = vector.load %arg5[%c0_71, %c2, %c0_72, %c0_73] : memref<4x3x96x64xbf16, #tpu.memory_space<vmem>>, vector<1x1x96x64xbf16>
    %101 = vector.shape_cast %100 : vector<1x1x96x64xbf16> to vector<96x64xbf16>
    %cst_74 = arith.constant dense<0.000000e+00> : vector<16x64xf32>
    %102 = tpu.matmul %99, %101, %cst_74 {dimension_numbers = #tpu.dot_dimension_numbers<[1], [0], [0], [1], [0, 0, 1, 1], [], []>} : vector<16x96xbf16>, vector<96x64xbf16>, vector<16x64xf32> -> vector<16x64xf32>
    %c0_75 = arith.constant 0 : index
    %c2_76 = arith.constant 2 : index
    %c0_77 = arith.constant 0 : index
    %c0_78 = arith.constant 0 : index
    %103 = vector.load %arg6[%c0_75, %c2_76, %c0_77, %c0_78] : memref<4x3x1x64xf32, #tpu.memory_space<vmem>>, vector<1x1x1x64xf32>
    %104 = vector.shape_cast %103 : vector<1x1x1x64xf32> to vector<1x64xf32>
    %105 = vector.broadcast %104 : vector<1x64xf32> to vector<16x64xf32>
    %106 = arith.addf %102, %105 : vector<16x64xf32>
    %107 = vector.extract_strided_slice %106 {offsets = [0, 0], sizes = [16, 32], strides = [1, 1]} : vector<16x64xf32> to vector<16x32xf32>
    %108 = math.tanh %107 : vector<16x32xf32>
    %109 = vector.extract_strided_slice %106 {offsets = [0, 32], sizes = [16, 32], strides = [1, 1]} : vector<16x64xf32> to vector<16x32xf32>
    %110 = arith.negf %109 : vector<16x32xf32>
    %111 = math.exp %110 : vector<16x32xf32>
    %cst_79 = arith.constant 1.000000e+00 : f32
    %112 = vector.broadcast %cst_79 : f32 to vector<16x32xf32>
    %113 = arith.addf %112, %111 : vector<16x32xf32>
    %114 = arith.divf %112, %113 : vector<16x32xf32>
    %115 = arith.mulf %108, %114 : vector<16x32xf32>
    %116 = arith.truncf %115 : vector<16x32xf32> to vector<16x32xbf16>
    %c0_80 = arith.constant 0 : index
    %c0_81 = arith.constant 0 : index
    %c0_82 = arith.constant 0 : index
    %117 = vector.load %arg9[%c0_80, %c0_81, %c0_82] : memref<4x32x32xbf16, #tpu.memory_space<vmem>>, vector<1x32x32xbf16>
    %118 = vector.shape_cast %117 : vector<1x32x32xbf16> to vector<32x32xbf16>
    %cst_83 = arith.constant dense<0.000000e+00> : vector<16x32xf32>
    %119 = tpu.matmul %116, %118, %cst_83 {dimension_numbers = #tpu.dot_dimension_numbers<[1], [0], [0], [1], [0, 0, 1, 1], [], []>} : vector<16x32xbf16>, vector<32x32xbf16>, vector<16x32xf32> -> vector<16x32xf32>
    %c0_84 = arith.constant 0 : index
    %c0_85 = arith.constant 0 : index
    %c0_86 = arith.constant 0 : index
    %120 = vector.load %arg10[%c0_84, %c0_85, %c0_86] : memref<4x1x32xf32, #tpu.memory_space<vmem>>, vector<1x1x32xf32>
    %121 = vector.shape_cast %120 : vector<1x1x32xf32> to vector<1x32xf32>
    %122 = vector.broadcast %121 : vector<1x32xf32> to vector<16x32xf32>
    %123 = arith.addf %119, %122 : vector<16x32xf32>
    %124 = arith.addf %93, %123 : vector<16x32xf32>
    %125 = arith.mulf %124, %7 : vector<16x32xf32>
    %126 = arith.truncf %125 : vector<16x32xf32> to vector<16x32xbf16>
    %c0_87 = arith.constant 0 : index
    %c0_88 = arith.constant 0 : index
    %c0_89 = arith.constant 0 : index
    %127 = vector.load %arg11[%c0_87, %c0_88, %c0_89] : memref<4x32x4xbf16, #tpu.memory_space<vmem>>, vector<1x32x4xbf16>
    %128 = vector.shape_cast %127 : vector<1x32x4xbf16> to vector<32x4xbf16>
    %cst_90 = arith.constant dense<0.000000e+00> : vector<16x4xf32>
    %129 = tpu.matmul %126, %128, %cst_90 {dimension_numbers = #tpu.dot_dimension_numbers<[1], [0], [0], [1], [0, 0, 1, 1], [], []>} : vector<16x32xbf16>, vector<32x4xbf16>, vector<16x4xf32> -> vector<16x4xf32>
    %c0_91 = arith.constant 0 : index
    %c0_92 = arith.constant 0 : index
    %c0_93 = arith.constant 0 : index
    %130 = vector.load %arg12[%c0_91, %c0_92, %c0_93] : memref<4x1x4xf32, #tpu.memory_space<vmem>>, vector<1x1x4xf32>
    %131 = vector.shape_cast %130 : vector<1x1x4xf32> to vector<1x4xf32>
    %132 = vector.broadcast %131 : vector<1x4xf32> to vector<16x4xf32>
    %133 = arith.addf %129, %132 : vector<16x4xf32>
    %134 = arith.mulf %133, %9 : vector<16x4xf32>
    %135 = arith.mulf %3, %9 : vector<16x4xf32>
    %136 = arith.addf %134, %135 : vector<16x4xf32>
    %137 = arith.truncf %136 : vector<16x4xf32> to vector<16x4xbf16>
    %c1_94 = arith.constant 1 : index
    %c0_95 = arith.constant 0 : index
    %c0_96 = arith.constant 0 : index
    %138 = vector.load %arg3[%c1_94, %c0_95, %c0_96] : memref<4x4x32xbf16, #tpu.memory_space<vmem>>, vector<1x4x32xbf16>
    %139 = vector.shape_cast %138 : vector<1x4x32xbf16> to vector<4x32xbf16>
    %cst_97 = arith.constant dense<0.000000e+00> : vector<16x32xf32>
    %140 = tpu.matmul %137, %139, %cst_97 {dimension_numbers = #tpu.dot_dimension_numbers<[1], [0], [0], [1], [0, 0, 1, 1], [], []>} : vector<16x4xbf16>, vector<4x32xbf16>, vector<16x32xf32> -> vector<16x32xf32>
    %c1_98 = arith.constant 1 : index
    %c0_99 = arith.constant 0 : index
    %c0_100 = arith.constant 0 : index
    %141 = vector.load %arg4[%c1_98, %c0_99, %c0_100] : memref<4x1x32xf32, #tpu.memory_space<vmem>>, vector<1x1x32xf32>
    %142 = vector.shape_cast %141 : vector<1x1x32xf32> to vector<1x32xf32>
    %143 = vector.broadcast %142 : vector<1x32xf32> to vector<16x32xf32>
    %144 = arith.addf %140, %143 : vector<16x32xf32>
    %145 = arith.mulf %144, %7 : vector<16x32xf32>
    %cst_101 = arith.constant 0.000000e+00 : f32
    %146 = vector.broadcast %cst_101 : f32 to vector<16x32xf32>
    %147 = arith.truncf %145 : vector<16x32xf32> to vector<16x32xbf16>
    %c8_102 = arith.constant 8 : index
    %c0_103 = arith.constant 0 : index
    %148 = vector.load %arg14[%c8_102, %c0_103] : memref<32x32xbf16, #tpu.memory_space<vmem>>, vector<16x32xbf16>
    tpu.vector_store %arg14[%c8_102, %c0_103], %147 {strides = array<i32>} : memref<32x32xbf16, #tpu.memory_space<vmem>>, vector<16x32xbf16>,
    %c7_104 = arith.constant 7 : index
    %c0_105 = arith.constant 0 : index
    %149 = vector.load %arg14[%c7_104, %c0_105] : memref<32x32xbf16, #tpu.memory_space<vmem>>, vector<16x32xbf16>
    %c8_106 = arith.constant 8 : index
    %c0_107 = arith.constant 0 : index
    %150 = vector.load %arg14[%c8_106, %c0_107] : memref<32x32xbf16, #tpu.memory_space<vmem>>, vector<16x32xbf16>
    %c9_108 = arith.constant 9 : index
    %c0_109 = arith.constant 0 : index
    %151 = vector.load %arg14[%c9_108, %c0_109] : memref<32x32xbf16, #tpu.memory_space<vmem>>, vector<16x32xbf16>
    %152 = tpu.concatenate %149, %150, %151 in 1 : vector<16x32xbf16>, vector<16x32xbf16>, vector<16x32xbf16> -> vector<16x96xbf16>
    %c1_110 = arith.constant 1 : index
    %c0_111 = arith.constant 0 : index
    %c0_112 = arith.constant 0 : index
    %c0_113 = arith.constant 0 : index
    %153 = vector.load %arg5[%c1_110, %c0_111, %c0_112, %c0_113] : memref<4x3x96x64xbf16, #tpu.memory_space<vmem>>, vector<1x1x96x64xbf16>
    %154 = vector.shape_cast %153 : vector<1x1x96x64xbf16> to vector<96x64xbf16>
    %cst_114 = arith.constant dense<0.000000e+00> : vector<16x64xf32>
    %155 = tpu.matmul %152, %154, %cst_114 {dimension_numbers = #tpu.dot_dimension_numbers<[1], [0], [0], [1], [0, 0, 1, 1], [], []>} : vector<16x96xbf16>, vector<96x64xbf16>, vector<16x64xf32> -> vector<16x64xf32>
    %c1_115 = arith.constant 1 : index
    %c0_116 = arith.constant 0 : index
    %c0_117 = arith.constant 0 : index
    %c0_118 = arith.constant 0 : index
    %156 = vector.load %arg6[%c1_115, %c0_116, %c0_117, %c0_118] : memref<4x3x1x64xf32, #tpu.memory_space<vmem>>, vector<1x1x1x64xf32>
    %157 = vector.shape_cast %156 : vector<1x1x1x64xf32> to vector<1x64xf32>
    %158 = vector.broadcast %157 : vector<1x64xf32> to vector<16x64xf32>
    %159 = arith.addf %155, %158 : vector<16x64xf32>
    %160 = vector.extract_strided_slice %159 {offsets = [0, 0], sizes = [16, 32], strides = [1, 1]} : vector<16x64xf32> to vector<16x32xf32>
    %161 = math.tanh %160 : vector<16x32xf32>
    %162 = vector.extract_strided_slice %159 {offsets = [0, 32], sizes = [16, 32], strides = [1, 1]} : vector<16x64xf32> to vector<16x32xf32>
    %163 = arith.negf %162 : vector<16x32xf32>
    %164 = math.exp %163 : vector<16x32xf32>
    %cst_119 = arith.constant 1.000000e+00 : f32
    %165 = vector.broadcast %cst_119 : f32 to vector<16x32xf32>
    %166 = arith.addf %165, %164 : vector<16x32xf32>
    %167 = arith.divf %165, %166 : vector<16x32xf32>
    %168 = arith.mulf %161, %167 : vector<16x32xf32>
    %169 = arith.truncf %168 : vector<16x32xf32> to vector<16x32xbf16>
    %c1_120 = arith.constant 1 : index
    %c0_121 = arith.constant 0 : index
    %c0_122 = arith.constant 0 : index
    %c0_123 = arith.constant 0 : index
    %170 = vector.load %arg7[%c1_120, %c0_121, %c0_122, %c0_123] : memref<4x2x32x64xbf16, #tpu.memory_space<vmem>>, vector<1x1x32x64xbf16>
    %171 = vector.shape_cast %170 : vector<1x1x32x64xbf16> to vector<32x64xbf16>
    %cst_124 = arith.constant dense<0.000000e+00> : vector<16x64xf32>
    %172 = tpu.matmul %169, %171, %cst_124 {dimension_numbers = #tpu.dot_dimension_numbers<[1], [0], [0], [1], [0, 0, 1, 1], [], []>} : vector<16x32xbf16>, vector<32x64xbf16>, vector<16x64xf32> -> vector<16x64xf32>
    %c1_125 = arith.constant 1 : index
    %c0_126 = arith.constant 0 : index
    %c0_127 = arith.constant 0 : index
    %c0_128 = arith.constant 0 : index
    %173 = vector.load %arg8[%c1_125, %c0_126, %c0_127, %c0_128] : memref<4x2x1x64xf32, #tpu.memory_space<vmem>>, vector<1x1x1x64xf32>
    %174 = vector.shape_cast %173 : vector<1x1x1x64xf32> to vector<1x64xf32>
    %175 = vector.broadcast %174 : vector<1x64xf32> to vector<16x64xf32>
    %176 = arith.addf %172, %175 : vector<16x64xf32>
    %177 = vector.extract_strided_slice %176 {offsets = [0, 0], sizes = [16, 32], strides = [1, 1]} : vector<16x64xf32> to vector<16x32xf32>
    %178 = arith.addf %145, %177 : vector<16x32xf32>
    %179 = arith.mulf %178, %7 : vector<16x32xf32>
    %180 = vector.extract_strided_slice %176 {offsets = [0, 32], sizes = [16, 32], strides = [1, 1]} : vector<16x64xf32> to vector<16x32xf32>
    %181 = arith.addf %146, %180 : vector<16x32xf32>
    %182 = arith.truncf %179 : vector<16x32xf32> to vector<16x32xbf16>
    %c8_129 = arith.constant 8 : index
    %c0_130 = arith.constant 0 : index
    %183 = vector.load %arg14[%c8_129, %c0_130] : memref<32x32xbf16, #tpu.memory_space<vmem>>, vector<16x32xbf16>
    tpu.vector_store %arg14[%c8_129, %c0_130], %182 {strides = array<i32>} : memref<32x32xbf16, #tpu.memory_space<vmem>>, vector<16x32xbf16>,
    %c6_131 = arith.constant 6 : index
    %c0_132 = arith.constant 0 : index
    %184 = vector.load %arg14[%c6_131, %c0_132] : memref<32x32xbf16, #tpu.memory_space<vmem>>, vector<16x32xbf16>
    %c8_133 = arith.constant 8 : index
    %c0_134 = arith.constant 0 : index
    %185 = vector.load %arg14[%c8_133, %c0_134] : memref<32x32xbf16, #tpu.memory_space<vmem>>, vector<16x32xbf16>
    %c10_135 = arith.constant 10 : index
    %c0_136 = arith.constant 0 : index
    %186 = vector.load %arg14[%c10_135, %c0_136] : memref<32x32xbf16, #tpu.memory_space<vmem>>, vector<16x32xbf16>
    %187 = tpu.concatenate %184, %185, %186 in 1 : vector<16x32xbf16>, vector<16x32xbf16>, vector<16x32xbf16> -> vector<16x96xbf16>
    %c1_137 = arith.constant 1 : index
    %c1_138 = arith.constant 1 : index
    %c0_139 = arith.constant 0 : index
    %c0_140 = arith.constant 0 : index
    %188 = vector.load %arg5[%c1_137, %c1_138, %c0_139, %c0_140] : memref<4x3x96x64xbf16, #tpu.memory_space<vmem>>, vector<1x1x96x64xbf16>
    %189 = vector.shape_cast %188 : vector<1x1x96x64xbf16> to vector<96x64xbf16>
    %cst_141 = arith.constant dense<0.000000e+00> : vector<16x64xf32>
    %190 = tpu.matmul %187, %189, %cst_141 {dimension_numbers = #tpu.dot_dimension_numbers<[1], [0], [0], [1], [0, 0, 1, 1], [], []>} : vector<16x96xbf16>, vector<96x64xbf16>, vector<16x64xf32> -> vector<16x64xf32>
    %c1_142 = arith.constant 1 : index
    %c1_143 = arith.constant 1 : index
    %c0_144 = arith.constant 0 : index
    %c0_145 = arith.constant 0 : index
    %191 = vector.load %arg6[%c1_142, %c1_143, %c0_144, %c0_145] : memref<4x3x1x64xf32, #tpu.memory_space<vmem>>, vector<1x1x1x64xf32>
    %192 = vector.shape_cast %191 : vector<1x1x1x64xf32> to vector<1x64xf32>
    %193 = vector.broadcast %192 : vector<1x64xf32> to vector<16x64xf32>
    %194 = arith.addf %190, %193 : vector<16x64xf32>
    %195 = vector.extract_strided_slice %194 {offsets = [0, 0], sizes = [16, 32], strides = [1, 1]} : vector<16x64xf32> to vector<16x32xf32>
    %196 = math.tanh %195 : vector<16x32xf32>
    %197 = vector.extract_strided_slice %194 {offsets = [0, 32], sizes = [16, 32], strides = [1, 1]} : vector<16x64xf32> to vector<16x32xf32>
    %198 = arith.negf %197 : vector<16x32xf32>
    %199 = math.exp %198 : vector<16x32xf32>
    %cst_146 = arith.constant 1.000000e+00 : f32
    %200 = vector.broadcast %cst_146 : f32 to vector<16x32xf32>
    %201 = arith.addf %200, %199 : vector<16x32xf32>
    %202 = arith.divf %200, %201 : vector<16x32xf32>
    %203 = arith.mulf %196, %202 : vector<16x32xf32>
    %204 = arith.truncf %203 : vector<16x32xf32> to vector<16x32xbf16>
    %c1_147 = arith.constant 1 : index
    %c1_148 = arith.constant 1 : index
    %c0_149 = arith.constant 0 : index
    %c0_150 = arith.constant 0 : index
    %205 = vector.load %arg7[%c1_147, %c1_148, %c0_149, %c0_150] : memref<4x2x32x64xbf16, #tpu.memory_space<vmem>>, vector<1x1x32x64xbf16>
    %206 = vector.shape_cast %205 : vector<1x1x32x64xbf16> to vector<32x64xbf16>
    %cst_151 = arith.constant dense<0.000000e+00> : vector<16x64xf32>
    %207 = tpu.matmul %204, %206, %cst_151 {dimension_numbers = #tpu.dot_dimension_numbers<[1], [0], [0], [1], [0, 0, 1, 1], [], []>} : vector<16x32xbf16>, vector<32x64xbf16>, vector<16x64xf32> -> vector<16x64xf32>
    %c1_152 = arith.constant 1 : index
    %c1_153 = arith.constant 1 : index
    %c0_154 = arith.constant 0 : index
    %c0_155 = arith.constant 0 : index
    %208 = vector.load %arg8[%c1_152, %c1_153, %c0_154, %c0_155] : memref<4x2x1x64xf32, #tpu.memory_space<vmem>>, vector<1x1x1x64xf32>
    %209 = vector.shape_cast %208 : vector<1x1x1x64xf32> to vector<1x64xf32>
    %210 = vector.broadcast %209 : vector<1x64xf32> to vector<16x64xf32>
    %211 = arith.addf %207, %210 : vector<16x64xf32>
    %212 = vector.extract_strided_slice %211 {offsets = [0, 0], sizes = [16, 32], strides = [1, 1]} : vector<16x64xf32> to vector<16x32xf32>
    %213 = arith.addf %179, %212 : vector<16x32xf32>
    %214 = arith.mulf %213, %7 : vector<16x32xf32>
    %215 = vector.extract_strided_slice %211 {offsets = [0, 32], sizes = [16, 32], strides = [1, 1]} : vector<16x64xf32> to vector<16x32xf32>
    %216 = arith.addf %181, %215 : vector<16x32xf32>
    %217 = arith.truncf %214 : vector<16x32xf32> to vector<16x32xbf16>
    %c8_156 = arith.constant 8 : index
    %c0_157 = arith.constant 0 : index
    %218 = vector.load %arg14[%c8_156, %c0_157] : memref<32x32xbf16, #tpu.memory_space<vmem>>, vector<16x32xbf16>
    tpu.vector_store %arg14[%c8_156, %c0_157], %217 {strides = array<i32>} : memref<32x32xbf16, #tpu.memory_space<vmem>>, vector<16x32xbf16>,
    %c4_158 = arith.constant 4 : index
    %c0_159 = arith.constant 0 : index
    %219 = vector.load %arg14[%c4_158, %c0_159] : memref<32x32xbf16, #tpu.memory_space<vmem>>, vector<16x32xbf16>
    %c8_160 = arith.constant 8 : index
    %c0_161 = arith.constant 0 : index
    %220 = vector.load %arg14[%c8_160, %c0_161] : memref<32x32xbf16, #tpu.memory_space<vmem>>, vector<16x32xbf16>
    %c12_162 = arith.constant 12 : index
    %c0_163 = arith.constant 0 : index
    %221 = vector.load %arg14[%c12_162, %c0_163] : memref<32x32xbf16, #tpu.memory_space<vmem>>, vector<16x32xbf16>
    %222 = tpu.concatenate %219, %220, %221 in 1 : vector<16x32xbf16>, vector<16x32xbf16>, vector<16x32xbf16> -> vector<16x96xbf16>
    %c1_164 = arith.constant 1 : index
    %c2_165 = arith.constant 2 : index
    %c0_166 = arith.constant 0 : index
    %c0_167 = arith.constant 0 : index
    %223 = vector.load %arg5[%c1_164, %c2_165, %c0_166, %c0_167] : memref<4x3x96x64xbf16, #tpu.memory_space<vmem>>, vector<1x1x96x64xbf16>
    %224 = vector.shape_cast %223 : vector<1x1x96x64xbf16> to vector<96x64xbf16>
    %cst_168 = arith.constant dense<0.000000e+00> : vector<16x64xf32>
    %225 = tpu.matmul %222, %224, %cst_168 {dimension_numbers = #tpu.dot_dimension_numbers<[1], [0], [0], [1], [0, 0, 1, 1], [], []>} : vector<16x96xbf16>, vector<96x64xbf16>, vector<16x64xf32> -> vector<16x64xf32>
    %c1_169 = arith.constant 1 : index
    %c2_170 = arith.constant 2 : index
    %c0_171 = arith.constant 0 : index
    %c0_172 = arith.constant 0 : index
    %226 = vector.load %arg6[%c1_169, %c2_170, %c0_171, %c0_172] : memref<4x3x1x64xf32, #tpu.memory_space<vmem>>, vector<1x1x1x64xf32>
    %227 = vector.shape_cast %226 : vector<1x1x1x64xf32> to vector<1x64xf32>
    %228 = vector.broadcast %227 : vector<1x64xf32> to vector<16x64xf32>
    %229 = arith.addf %225, %228 : vector<16x64xf32>
    %230 = vector.extract_strided_slice %229 {offsets = [0, 0], sizes = [16, 32], strides = [1, 1]} : vector<16x64xf32> to vector<16x32xf32>
    %231 = math.tanh %230 : vector<16x32xf32>
    %232 = vector.extract_strided_slice %229 {offsets = [0, 32], sizes = [16, 32], strides = [1, 1]} : vector<16x64xf32> to vector<16x32xf32>
    %233 = arith.negf %232 : vector<16x32xf32>
    %234 = math.exp %233 : vector<16x32xf32>
    %cst_173 = arith.constant 1.000000e+00 : f32
    %235 = vector.broadcast %cst_173 : f32 to vector<16x32xf32>
    %236 = arith.addf %235, %234 : vector<16x32xf32>
    %237 = arith.divf %235, %236 : vector<16x32xf32>
    %238 = arith.mulf %231, %237 : vector<16x32xf32>
    %239 = arith.truncf %238 : vector<16x32xf32> to vector<16x32xbf16>
    %c1_174 = arith.constant 1 : index
    %c0_175 = arith.constant 0 : index
    %c0_176 = arith.constant 0 : index
    %240 = vector.load %arg9[%c1_174, %c0_175, %c0_176] : memref<4x32x32xbf16, #tpu.memory_space<vmem>>, vector<1x32x32xbf16>
    %241 = vector.shape_cast %240 : vector<1x32x32xbf16> to vector<32x32xbf16>
    %cst_177 = arith.constant dense<0.000000e+00> : vector<16x32xf32>
    %242 = tpu.matmul %239, %241, %cst_177 {dimension_numbers = #tpu.dot_dimension_numbers<[1], [0], [0], [1], [0, 0, 1, 1], [], []>} : vector<16x32xbf16>, vector<32x32xbf16>, vector<16x32xf32> -> vector<16x32xf32>
    %c1_178 = arith.constant 1 : index
    %c0_179 = arith.constant 0 : index
    %c0_180 = arith.constant 0 : index
    %243 = vector.load %arg10[%c1_178, %c0_179, %c0_180] : memref<4x1x32xf32, #tpu.memory_space<vmem>>, vector<1x1x32xf32>
    %244 = vector.shape_cast %243 : vector<1x1x32xf32> to vector<1x32xf32>
    %245 = vector.broadcast %244 : vector<1x32xf32> to vector<16x32xf32>
    %246 = arith.addf %242, %245 : vector<16x32xf32>
    %247 = arith.addf %216, %246 : vector<16x32xf32>
    %248 = arith.mulf %247, %7 : vector<16x32xf32>
    %249 = arith.truncf %248 : vector<16x32xf32> to vector<16x32xbf16>
    %c1_181 = arith.constant 1 : index
    %c0_182 = arith.constant 0 : index
    %c0_183 = arith.constant 0 : index
    %250 = vector.load %arg11[%c1_181, %c0_182, %c0_183] : memref<4x32x4xbf16, #tpu.memory_space<vmem>>, vector<1x32x4xbf16>
    %251 = vector.shape_cast %250 : vector<1x32x4xbf16> to vector<32x4xbf16>
    %cst_184 = arith.constant dense<0.000000e+00> : vector<16x4xf32>
    %252 = tpu.matmul %249, %251, %cst_184 {dimension_numbers = #tpu.dot_dimension_numbers<[1], [0], [0], [1], [0, 0, 1, 1], [], []>} : vector<16x32xbf16>, vector<32x4xbf16>, vector<16x4xf32> -> vector<16x4xf32>
    %c1_185 = arith.constant 1 : index
    %c0_186 = arith.constant 0 : index
    %c0_187 = arith.constant 0 : index
    %253 = vector.load %arg12[%c1_185, %c0_186, %c0_187] : memref<4x1x4xf32, #tpu.memory_space<vmem>>, vector<1x1x4xf32>
    %254 = vector.shape_cast %253 : vector<1x1x4xf32> to vector<1x4xf32>
    %255 = vector.broadcast %254 : vector<1x4xf32> to vector<16x4xf32>
    %256 = arith.addf %252, %255 : vector<16x4xf32>
    %257 = arith.mulf %256, %9 : vector<16x4xf32>
    %258 = arith.mulf %2, %9 : vector<16x4xf32>
    %259 = arith.addf %257, %258 : vector<16x4xf32>
    %260 = arith.truncf %259 : vector<16x4xf32> to vector<16x4xbf16>
    %c2_188 = arith.constant 2 : index
    %c0_189 = arith.constant 0 : index
    %c0_190 = arith.constant 0 : index
    %261 = vector.load %arg3[%c2_188, %c0_189, %c0_190] : memref<4x4x32xbf16, #tpu.memory_space<vmem>>, vector<1x4x32xbf16>
    %262 = vector.shape_cast %261 : vector<1x4x32xbf16> to vector<4x32xbf16>
    %cst_191 = arith.constant dense<0.000000e+00> : vector<16x32xf32>
    %263 = tpu.matmul %260, %262, %cst_191 {dimension_numbers = #tpu.dot_dimension_numbers<[1], [0], [0], [1], [0, 0, 1, 1], [], []>} : vector<16x4xbf16>, vector<4x32xbf16>, vector<16x32xf32> -> vector<16x32xf32>
    %c2_192 = arith.constant 2 : index
    %c0_193 = arith.constant 0 : index
    %c0_194 = arith.constant 0 : index
    %264 = vector.load %arg4[%c2_192, %c0_193, %c0_194] : memref<4x1x32xf32, #tpu.memory_space<vmem>>, vector<1x1x32xf32>
    %265 = vector.shape_cast %264 : vector<1x1x32xf32> to vector<1x32xf32>
    %266 = vector.broadcast %265 : vector<1x32xf32> to vector<16x32xf32>
    %267 = arith.addf %263, %266 : vector<16x32xf32>
    %268 = arith.mulf %267, %7 : vector<16x32xf32>
    %cst_195 = arith.constant 0.000000e+00 : f32
    %269 = vector.broadcast %cst_195 : f32 to vector<16x32xf32>
    %270 = arith.truncf %268 : vector<16x32xf32> to vector<16x32xbf16>
    %c8_196 = arith.constant 8 : index
    %c0_197 = arith.constant 0 : index
    %271 = vector.load %arg14[%c8_196, %c0_197] : memref<32x32xbf16, #tpu.memory_space<vmem>>, vector<16x32xbf16>
    tpu.vector_store %arg14[%c8_196, %c0_197], %270 {strides = array<i32>} : memref<32x32xbf16, #tpu.memory_space<vmem>>, vector<16x32xbf16>,
    %c7_198 = arith.constant 7 : index
    %c0_199 = arith.constant 0 : index
    %272 = vector.load %arg14[%c7_198, %c0_199] : memref<32x32xbf16, #tpu.memory_space<vmem>>, vector<16x32xbf16>
    %c8_200 = arith.constant 8 : index
    %c0_201 = arith.constant 0 : index
    %273 = vector.load %arg14[%c8_200, %c0_201] : memref<32x32xbf16, #tpu.memory_space<vmem>>, vector<16x32xbf16>
    %c9_202 = arith.constant 9 : index
    %c0_203 = arith.constant 0 : index
    %274 = vector.load %arg14[%c9_202, %c0_203] : memref<32x32xbf16, #tpu.memory_space<vmem>>, vector<16x32xbf16>
    %275 = tpu.concatenate %272, %273, %274 in 1 : vector<16x32xbf16>, vector<16x32xbf16>, vector<16x32xbf16> -> vector<16x96xbf16>
    %c2_204 = arith.constant 2 : index
    %c0_205 = arith.constant 0 : index
    %c0_206 = arith.constant 0 : index
    %c0_207 = arith.constant 0 : index
    %276 = vector.load %arg5[%c2_204, %c0_205, %c0_206, %c0_207] : memref<4x3x96x64xbf16, #tpu.memory_space<vmem>>, vector<1x1x96x64xbf16>
    %277 = vector.shape_cast %276 : vector<1x1x96x64xbf16> to vector<96x64xbf16>
    %cst_208 = arith.constant dense<0.000000e+00> : vector<16x64xf32>
    %278 = tpu.matmul %275, %277, %cst_208 {dimension_numbers = #tpu.dot_dimension_numbers<[1], [0], [0], [1], [0, 0, 1, 1], [], []>} : vector<16x96xbf16>, vector<96x64xbf16>, vector<16x64xf32> -> vector<16x64xf32>
    %c2_209 = arith.constant 2 : index
    %c0_210 = arith.constant 0 : index
    %c0_211 = arith.constant 0 : index
    %c0_212 = arith.constant 0 : index
    %279 = vector.load %arg6[%c2_209, %c0_210, %c0_211, %c0_212] : memref<4x3x1x64xf32, #tpu.memory_space<vmem>>, vector<1x1x1x64xf32>
    %280 = vector.shape_cast %279 : vector<1x1x1x64xf32> to vector<1x64xf32>
    %281 = vector.broadcast %280 : vector<1x64xf32> to vector<16x64xf32>
    %282 = arith.addf %278, %281 : vector<16x64xf32>
    %283 = vector.extract_strided_slice %282 {offsets = [0, 0], sizes = [16, 32], strides = [1, 1]} : vector<16x64xf32> to vector<16x32xf32>
    %284 = math.tanh %283 : vector<16x32xf32>
    %285 = vector.extract_strided_slice %282 {offsets = [0, 32], sizes = [16, 32], strides = [1, 1]} : vector<16x64xf32> to vector<16x32xf32>
    %286 = arith.negf %285 : vector<16x32xf32>
    %287 = math.exp %286 : vector<16x32xf32>
    %cst_213 = arith.constant 1.000000e+00 : f32
    %288 = vector.broadcast %cst_213 : f32 to vector<16x32xf32>
    %289 = arith.addf %288, %287 : vector<16x32xf32>
    %290 = arith.divf %288, %289 : vector<16x32xf32>
    %291 = arith.mulf %284, %290 : vector<16x32xf32>
    %292 = arith.truncf %291 : vector<16x32xf32> to vector<16x32xbf16>
    %c2_214 = arith.constant 2 : index
    %c0_215 = arith.constant 0 : index
    %c0_216 = arith.constant 0 : index
    %c0_217 = arith.constant 0 : index
    %293 = vector.load %arg7[%c2_214, %c0_215, %c0_216, %c0_217] : memref<4x2x32x64xbf16, #tpu.memory_space<vmem>>, vector<1x1x32x64xbf16>
    %294 = vector.shape_cast %293 : vector<1x1x32x64xbf16> to vector<32x64xbf16>
    %cst_218 = arith.constant dense<0.000000e+00> : vector<16x64xf32>
    %295 = tpu.matmul %292, %294, %cst_218 {dimension_numbers = #tpu.dot_dimension_numbers<[1], [0], [0], [1], [0, 0, 1, 1], [], []>} : vector<16x32xbf16>, vector<32x64xbf16>, vector<16x64xf32> -> vector<16x64xf32>
    %c2_219 = arith.constant 2 : index
    %c0_220 = arith.constant 0 : index
    %c0_221 = arith.constant 0 : index
    %c0_222 = arith.constant 0 : index
    %296 = vector.load %arg8[%c2_219, %c0_220, %c0_221, %c0_222] : memref<4x2x1x64xf32, #tpu.memory_space<vmem>>, vector<1x1x1x64xf32>
    %297 = vector.shape_cast %296 : vector<1x1x1x64xf32> to vector<1x64xf32>
    %298 = vector.broadcast %297 : vector<1x64xf32> to vector<16x64xf32>
    %299 = arith.addf %295, %298 : vector<16x64xf32>
    %300 = vector.extract_strided_slice %299 {offsets = [0, 0], sizes = [16, 32], strides = [1, 1]} : vector<16x64xf32> to vector<16x32xf32>
    %301 = arith.addf %268, %300 : vector<16x32xf32>
    %302 = arith.mulf %301, %7 : vector<16x32xf32>
    %303 = vector.extract_strided_slice %299 {offsets = [0, 32], sizes = [16, 32], strides = [1, 1]} : vector<16x64xf32> to vector<16x32xf32>
    %304 = arith.addf %269, %303 : vector<16x32xf32>
    %305 = arith.truncf %302 : vector<16x32xf32> to vector<16x32xbf16>
    %c8_223 = arith.constant 8 : index
    %c0_224 = arith.constant 0 : index
    %306 = vector.load %arg14[%c8_223, %c0_224] : memref<32x32xbf16, #tpu.memory_space<vmem>>, vector<16x32xbf16>
    tpu.vector_store %arg14[%c8_223, %c0_224], %305 {strides = array<i32>} : memref<32x32xbf16, #tpu.memory_space<vmem>>, vector<16x32xbf16>,
    %c6_225 = arith.constant 6 : index
    %c0_226 = arith.constant 0 : index
    %307 = vector.load %arg14[%c6_225, %c0_226] : memref<32x32xbf16, #tpu.memory_space<vmem>>, vector<16x32xbf16>
    %c8_227 = arith.constant 8 : index
    %c0_228 = arith.constant 0 : index
    %308 = vector.load %arg14[%c8_227, %c0_228] : memref<32x32xbf16, #tpu.memory_space<vmem>>, vector<16x32xbf16>
    %c10_229 = arith.constant 10 : index
    %c0_230 = arith.constant 0 : index
    %309 = vector.load %arg14[%c10_229, %c0_230] : memref<32x32xbf16, #tpu.memory_space<vmem>>, vector<16x32xbf16>
    %310 = tpu.concatenate %307, %308, %309 in 1 : vector<16x32xbf16>, vector<16x32xbf16>, vector<16x32xbf16> -> vector<16x96xbf16>
    %c2_231 = arith.constant 2 : index
    %c1_232 = arith.constant 1 : index
    %c0_233 = arith.constant 0 : index
    %c0_234 = arith.constant 0 : index
    %311 = vector.load %arg5[%c2_231, %c1_232, %c0_233, %c0_234] : memref<4x3x96x64xbf16, #tpu.memory_space<vmem>>, vector<1x1x96x64xbf16>
    %312 = vector.shape_cast %311 : vector<1x1x96x64xbf16> to vector<96x64xbf16>
    %cst_235 = arith.constant dense<0.000000e+00> : vector<16x64xf32>
    %313 = tpu.matmul %310, %312, %cst_235 {dimension_numbers = #tpu.dot_dimension_numbers<[1], [0], [0], [1], [0, 0, 1, 1], [], []>} : vector<16x96xbf16>, vector<96x64xbf16>, vector<16x64xf32> -> vector<16x64xf32>
    %c2_236 = arith.constant 2 : index
    %c1_237 = arith.constant 1 : index
    %c0_238 = arith.constant 0 : index
    %c0_239 = arith.constant 0 : index
    %314 = vector.load %arg6[%c2_236, %c1_237, %c0_238, %c0_239] : memref<4x3x1x64xf32, #tpu.memory_space<vmem>>, vector<1x1x1x64xf32>
    %315 = vector.shape_cast %314 : vector<1x1x1x64xf32> to vector<1x64xf32>
    %316 = vector.broadcast %315 : vector<1x64xf32> to vector<16x64xf32>
    %317 = arith.addf %313, %316 : vector<16x64xf32>
    %318 = vector.extract_strided_slice %317 {offsets = [0, 0], sizes = [16, 32], strides = [1, 1]} : vector<16x64xf32> to vector<16x32xf32>
    %319 = math.tanh %318 : vector<16x32xf32>
    %320 = vector.extract_strided_slice %317 {offsets = [0, 32], sizes = [16, 32], strides = [1, 1]} : vector<16x64xf32> to vector<16x32xf32>
    %321 = arith.negf %320 : vector<16x32xf32>
    %322 = math.exp %321 : vector<16x32xf32>
    %cst_240 = arith.constant 1.000000e+00 : f32
    %323 = vector.broadcast %cst_240 : f32 to vector<16x32xf32>
    %324 = arith.addf %323, %322 : vector<16x32xf32>
    %325 = arith.divf %323, %324 : vector<16x32xf32>
    %326 = arith.mulf %319, %325 : vector<16x32xf32>
    %327 = arith.truncf %326 : vector<16x32xf32> to vector<16x32xbf16>
    %c2_241 = arith.constant 2 : index
    %c1_242 = arith.constant 1 : index
    %c0_243 = arith.constant 0 : index
    %c0_244 = arith.constant 0 : index
    %328 = vector.load %arg7[%c2_241, %c1_242, %c0_243, %c0_244] : memref<4x2x32x64xbf16, #tpu.memory_space<vmem>>, vector<1x1x32x64xbf16>
    %329 = vector.shape_cast %328 : vector<1x1x32x64xbf16> to vector<32x64xbf16>
    %cst_245 = arith.constant dense<0.000000e+00> : vector<16x64xf32>
    %330 = tpu.matmul %327, %329, %cst_245 {dimension_numbers = #tpu.dot_dimension_numbers<[1], [0], [0], [1], [0, 0, 1, 1], [], []>} : vector<16x32xbf16>, vector<32x64xbf16>, vector<16x64xf32> -> vector<16x64xf32>
    %c2_246 = arith.constant 2 : index
    %c1_247 = arith.constant 1 : index
    %c0_248 = arith.constant 0 : index
    %c0_249 = arith.constant 0 : index
    %331 = vector.load %arg8[%c2_246, %c1_247, %c0_248, %c0_249] : memref<4x2x1x64xf32, #tpu.memory_space<vmem>>, vector<1x1x1x64xf32>
    %332 = vector.shape_cast %331 : vector<1x1x1x64xf32> to vector<1x64xf32>
    %333 = vector.broadcast %332 : vector<1x64xf32> to vector<16x64xf32>
    %334 = arith.addf %330, %333 : vector<16x64xf32>
    %335 = vector.extract_strided_slice %334 {offsets = [0, 0], sizes = [16, 32], strides = [1, 1]} : vector<16x64xf32> to vector<16x32xf32>
    %336 = arith.addf %302, %335 : vector<16x32xf32>
    %337 = arith.mulf %336, %7 : vector<16x32xf32>
    %338 = vector.extract_strided_slice %334 {offsets = [0, 32], sizes = [16, 32], strides = [1, 1]} : vector<16x64xf32> to vector<16x32xf32>
    %339 = arith.addf %304, %338 : vector<16x32xf32>
    %340 = arith.truncf %337 : vector<16x32xf32> to vector<16x32xbf16>
    %c8_250 = arith.constant 8 : index
    %c0_251 = arith.constant 0 : index
    %341 = vector.load %arg14[%c8_250, %c0_251] : memref<32x32xbf16, #tpu.memory_space<vmem>>, vector<16x32xbf16>
    tpu.vector_store %arg14[%c8_250, %c0_251], %340 {strides = array<i32>} : memref<32x32xbf16, #tpu.memory_space<vmem>>, vector<16x32xbf16>,
    %c4_252 = arith.constant 4 : index
    %c0_253 = arith.constant 0 : index
    %342 = vector.load %arg14[%c4_252, %c0_253] : memref<32x32xbf16, #tpu.memory_space<vmem>>, vector<16x32xbf16>
    %c8_254 = arith.constant 8 : index
    %c0_255 = arith.constant 0 : index
    %343 = vector.load %arg14[%c8_254, %c0_255] : memref<32x32xbf16, #tpu.memory_space<vmem>>, vector<16x32xbf16>
    %c12_256 = arith.constant 12 : index
    %c0_257 = arith.constant 0 : index
    %344 = vector.load %arg14[%c12_256, %c0_257] : memref<32x32xbf16, #tpu.memory_space<vmem>>, vector<16x32xbf16>
    %345 = tpu.concatenate %342, %343, %344 in 1 : vector<16x32xbf16>, vector<16x32xbf16>, vector<16x32xbf16> -> vector<16x96xbf16>
    %c2_258 = arith.constant 2 : index
    %c2_259 = arith.constant 2 : index
    %c0_260 = arith.constant 0 : index
    %c0_261 = arith.constant 0 : index
    %346 = vector.load %arg5[%c2_258, %c2_259, %c0_260, %c0_261] : memref<4x3x96x64xbf16, #tpu.memory_space<vmem>>, vector<1x1x96x64xbf16>
    %347 = vector.shape_cast %346 : vector<1x1x96x64xbf16> to vector<96x64xbf16>
    %cst_262 = arith.constant dense<0.000000e+00> : vector<16x64xf32>
    %348 = tpu.matmul %345, %347, %cst_262 {dimension_numbers = #tpu.dot_dimension_numbers<[1], [0], [0], [1], [0, 0, 1, 1], [], []>} : vector<16x96xbf16>, vector<96x64xbf16>, vector<16x64xf32> -> vector<16x64xf32>
    %c2_263 = arith.constant 2 : index
    %c2_264 = arith.constant 2 : index
    %c0_265 = arith.constant 0 : index
    %c0_266 = arith.constant 0 : index
    %349 = vector.load %arg6[%c2_263, %c2_264, %c0_265, %c0_266] : memref<4x3x1x64xf32, #tpu.memory_space<vmem>>, vector<1x1x1x64xf32>
    %350 = vector.shape_cast %349 : vector<1x1x1x64xf32> to vector<1x64xf32>
    %351 = vector.broadcast %350 : vector<1x64xf32> to vector<16x64xf32>
    %352 = arith.addf %348, %351 : vector<16x64xf32>
    %353 = vector.extract_strided_slice %352 {offsets = [0, 0], sizes = [16, 32], strides = [1, 1]} : vector<16x64xf32> to vector<16x32xf32>
    %354 = math.tanh %353 : vector<16x32xf32>
    %355 = vector.extract_strided_slice %352 {offsets = [0, 32], sizes = [16, 32], strides = [1, 1]} : vector<16x64xf32> to vector<16x32xf32>
    %356 = arith.negf %355 : vector<16x32xf32>
    %357 = math.exp %356 : vector<16x32xf32>
    %cst_267 = arith.constant 1.000000e+00 : f32
    %358 = vector.broadcast %cst_267 : f32 to vector<16x32xf32>
    %359 = arith.addf %358, %357 : vector<16x32xf32>
    %360 = arith.divf %358, %359 : vector<16x32xf32>
    %361 = arith.mulf %354, %360 : vector<16x32xf32>
    %362 = arith.truncf %361 : vector<16x32xf32> to vector<16x32xbf16>
    %c2_268 = arith.constant 2 : index
    %c0_269 = arith.constant 0 : index
    %c0_270 = arith.constant 0 : index
    %363 = vector.load %arg9[%c2_268, %c0_269, %c0_270] : memref<4x32x32xbf16, #tpu.memory_space<vmem>>, vector<1x32x32xbf16>
    %364 = vector.shape_cast %363 : vector<1x32x32xbf16> to vector<32x32xbf16>
    %cst_271 = arith.constant dense<0.000000e+00> : vector<16x32xf32>
    %365 = tpu.matmul %362, %364, %cst_271 {dimension_numbers = #tpu.dot_dimension_numbers<[1], [0], [0], [1], [0, 0, 1, 1], [], []>} : vector<16x32xbf16>, vector<32x32xbf16>, vector<16x32xf32> -> vector<16x32xf32>
    %c2_272 = arith.constant 2 : index
    %c0_273 = arith.constant 0 : index
    %c0_274 = arith.constant 0 : index
    %366 = vector.load %arg10[%c2_272, %c0_273, %c0_274] : memref<4x1x32xf32, #tpu.memory_space<vmem>>, vector<1x1x32xf32>
    %367 = vector.shape_cast %366 : vector<1x1x32xf32> to vector<1x32xf32>
    %368 = vector.broadcast %367 : vector<1x32xf32> to vector<16x32xf32>
    %369 = arith.addf %365, %368 : vector<16x32xf32>
    %370 = arith.addf %339, %369 : vector<16x32xf32>
    %371 = arith.mulf %370, %7 : vector<16x32xf32>
    %372 = arith.truncf %371 : vector<16x32xf32> to vector<16x32xbf16>
    %c2_275 = arith.constant 2 : index
    %c0_276 = arith.constant 0 : index
    %c0_277 = arith.constant 0 : index
    %373 = vector.load %arg11[%c2_275, %c0_276, %c0_277] : memref<4x32x4xbf16, #tpu.memory_space<vmem>>, vector<1x32x4xbf16>
    %374 = vector.shape_cast %373 : vector<1x32x4xbf16> to vector<32x4xbf16>
    %cst_278 = arith.constant dense<0.000000e+00> : vector<16x4xf32>
    %375 = tpu.matmul %372, %374, %cst_278 {dimension_numbers = #tpu.dot_dimension_numbers<[1], [0], [0], [1], [0, 0, 1, 1], [], []>} : vector<16x32xbf16>, vector<32x4xbf16>, vector<16x4xf32> -> vector<16x4xf32>
    %c2_279 = arith.constant 2 : index
    %c0_280 = arith.constant 0 : index
    %c0_281 = arith.constant 0 : index
    %376 = vector.load %arg12[%c2_279, %c0_280, %c0_281] : memref<4x1x4xf32, #tpu.memory_space<vmem>>, vector<1x1x4xf32>
    %377 = vector.shape_cast %376 : vector<1x1x4xf32> to vector<1x4xf32>
    %378 = vector.broadcast %377 : vector<1x4xf32> to vector<16x4xf32>
    %379 = arith.addf %375, %378 : vector<16x4xf32>
    %380 = arith.mulf %379, %9 : vector<16x4xf32>
    %381 = arith.mulf %136, %9 : vector<16x4xf32>
    %382 = arith.addf %380, %381 : vector<16x4xf32>
    %383 = arith.truncf %382 : vector<16x4xf32> to vector<16x4xbf16>
    %c3 = arith.constant 3 : index
    %c0_282 = arith.constant 0 : index
    %c0_283 = arith.constant 0 : index
    %384 = vector.load %arg3[%c3, %c0_282, %c0_283] : memref<4x4x32xbf16, #tpu.memory_space<vmem>>, vector<1x4x32xbf16>
    %385 = vector.shape_cast %384 : vector<1x4x32xbf16> to vector<4x32xbf16>
    %cst_284 = arith.constant dense<0.000000e+00> : vector<16x32xf32>
    %386 = tpu.matmul %383, %385, %cst_284 {dimension_numbers = #tpu.dot_dimension_numbers<[1], [0], [0], [1], [0, 0, 1, 1], [], []>} : vector<16x4xbf16>, vector<4x32xbf16>, vector<16x32xf32> -> vector<16x32xf32>
    %c3_285 = arith.constant 3 : index
    %c0_286 = arith.constant 0 : index
    %c0_287 = arith.constant 0 : index
    %387 = vector.load %arg4[%c3_285, %c0_286, %c0_287] : memref<4x1x32xf32, #tpu.memory_space<vmem>>, vector<1x1x32xf32>
    %388 = vector.shape_cast %387 : vector<1x1x32xf32> to vector<1x32xf32>
    %389 = vector.broadcast %388 : vector<1x32xf32> to vector<16x32xf32>
    %390 = arith.addf %386, %389 : vector<16x32xf32>
    %391 = arith.mulf %390, %7 : vector<16x32xf32>
    %cst_288 = arith.constant 0.000000e+00 : f32
    %392 = vector.broadcast %cst_288 : f32 to vector<16x32xf32>
    %393 = arith.truncf %391 : vector<16x32xf32> to vector<16x32xbf16>
    %c8_289 = arith.constant 8 : index
    %c0_290 = arith.constant 0 : index
    %394 = vector.load %arg14[%c8_289, %c0_290] : memref<32x32xbf16, #tpu.memory_space<vmem>>, vector<16x32xbf16>
    tpu.vector_store %arg14[%c8_289, %c0_290], %393 {strides = array<i32>} : memref<32x32xbf16, #tpu.memory_space<vmem>>, vector<16x32xbf16>,
    %c7_291 = arith.constant 7 : index
    %c0_292 = arith.constant 0 : index
    %395 = vector.load %arg14[%c7_291, %c0_292] : memref<32x32xbf16, #tpu.memory_space<vmem>>, vector<16x32xbf16>
    %c8_293 = arith.constant 8 : index
    %c0_294 = arith.constant 0 : index
    %396 = vector.load %arg14[%c8_293, %c0_294] : memref<32x32xbf16, #tpu.memory_space<vmem>>, vector<16x32xbf16>
    %c9_295 = arith.constant 9 : index
    %c0_296 = arith.constant 0 : index
    %397 = vector.load %arg14[%c9_295, %c0_296] : memref<32x32xbf16, #tpu.memory_space<vmem>>, vector<16x32xbf16>
    %398 = tpu.concatenate %395, %396, %397 in 1 : vector<16x32xbf16>, vector<16x32xbf16>, vector<16x32xbf16> -> vector<16x96xbf16>
    %c3_297 = arith.constant 3 : index
    %c0_298 = arith.constant 0 : index
    %c0_299 = arith.constant 0 : index
    %c0_300 = arith.constant 0 : index
    %399 = vector.load %arg5[%c3_297, %c0_298, %c0_299, %c0_300] : memref<4x3x96x64xbf16, #tpu.memory_space<vmem>>, vector<1x1x96x64xbf16>
    %400 = vector.shape_cast %399 : vector<1x1x96x64xbf16> to vector<96x64xbf16>
    %cst_301 = arith.constant dense<0.000000e+00> : vector<16x64xf32>
    %401 = tpu.matmul %398, %400, %cst_301 {dimension_numbers = #tpu.dot_dimension_numbers<[1], [0], [0], [1], [0, 0, 1, 1], [], []>} : vector<16x96xbf16>, vector<96x64xbf16>, vector<16x64xf32> -> vector<16x64xf32>
    %c3_302 = arith.constant 3 : index
    %c0_303 = arith.constant 0 : index
    %c0_304 = arith.constant 0 : index
    %c0_305 = arith.constant 0 : index
    %402 = vector.load %arg6[%c3_302, %c0_303, %c0_304, %c0_305] : memref<4x3x1x64xf32, #tpu.memory_space<vmem>>, vector<1x1x1x64xf32>
    %403 = vector.shape_cast %402 : vector<1x1x1x64xf32> to vector<1x64xf32>
    %404 = vector.broadcast %403 : vector<1x64xf32> to vector<16x64xf32>
    %405 = arith.addf %401, %404 : vector<16x64xf32>
    %406 = vector.extract_strided_slice %405 {offsets = [0, 0], sizes = [16, 32], strides = [1, 1]} : vector<16x64xf32> to vector<16x32xf32>
    %407 = math.tanh %406 : vector<16x32xf32>
    %408 = vector.extract_strided_slice %405 {offsets = [0, 32], sizes = [16, 32], strides = [1, 1]} : vector<16x64xf32> to vector<16x32xf32>
    %409 = arith.negf %408 : vector<16x32xf32>
    %410 = math.exp %409 : vector<16x32xf32>
    %cst_306 = arith.constant 1.000000e+00 : f32
    %411 = vector.broadcast %cst_306 : f32 to vector<16x32xf32>
    %412 = arith.addf %411, %410 : vector<16x32xf32>
    %413 = arith.divf %411, %412 : vector<16x32xf32>
    %414 = arith.mulf %407, %413 : vector<16x32xf32>
    %415 = arith.truncf %414 : vector<16x32xf32> to vector<16x32xbf16>
    %c3_307 = arith.constant 3 : index
    %c0_308 = arith.constant 0 : index
    %c0_309 = arith.constant 0 : index
    %c0_310 = arith.constant 0 : index
    %416 = vector.load %arg7[%c3_307, %c0_308, %c0_309, %c0_310] : memref<4x2x32x64xbf16, #tpu.memory_space<vmem>>, vector<1x1x32x64xbf16>
    %417 = vector.shape_cast %416 : vector<1x1x32x64xbf16> to vector<32x64xbf16>
    %cst_311 = arith.constant dense<0.000000e+00> : vector<16x64xf32>
    %418 = tpu.matmul %415, %417, %cst_311 {dimension_numbers = #tpu.dot_dimension_numbers<[1], [0], [0], [1], [0, 0, 1, 1], [], []>} : vector<16x32xbf16>, vector<32x64xbf16>, vector<16x64xf32> -> vector<16x64xf32>
    %c3_312 = arith.constant 3 : index
    %c0_313 = arith.constant 0 : index
    %c0_314 = arith.constant 0 : index
    %c0_315 = arith.constant 0 : index
    %419 = vector.load %arg8[%c3_312, %c0_313, %c0_314, %c0_315] : memref<4x2x1x64xf32, #tpu.memory_space<vmem>>, vector<1x1x1x64xf32>
    %420 = vector.shape_cast %419 : vector<1x1x1x64xf32> to vector<1x64xf32>
    %421 = vector.broadcast %420 : vector<1x64xf32> to vector<16x64xf32>
    %422 = arith.addf %418, %421 : vector<16x64xf32>
    %423 = vector.extract_strided_slice %422 {offsets = [0, 0], sizes = [16, 32], strides = [1, 1]} : vector<16x64xf32> to vector<16x32xf32>
    %424 = arith.addf %391, %423 : vector<16x32xf32>
    %425 = arith.mulf %424, %7 : vector<16x32xf32>
    %426 = vector.extract_strided_slice %422 {offsets = [0, 32], sizes = [16, 32], strides = [1, 1]} : vector<16x64xf32> to vector<16x32xf32>
    %427 = arith.addf %392, %426 : vector<16x32xf32>
    %428 = arith.truncf %425 : vector<16x32xf32> to vector<16x32xbf16>
    %c8_316 = arith.constant 8 : index
    %c0_317 = arith.constant 0 : index
    %429 = vector.load %arg14[%c8_316, %c0_317] : memref<32x32xbf16, #tpu.memory_space<vmem>>, vector<16x32xbf16>
    tpu.vector_store %arg14[%c8_316, %c0_317], %428 {strides = array<i32>} : memref<32x32xbf16, #tpu.memory_space<vmem>>, vector<16x32xbf16>,
    %c6_318 = arith.constant 6 : index
    %c0_319 = arith.constant 0 : index
    %430 = vector.load %arg14[%c6_318, %c0_319] : memref<32x32xbf16, #tpu.memory_space<vmem>>, vector<16x32xbf16>
    %c8_320 = arith.constant 8 : index
    %c0_321 = arith.constant 0 : index
    %431 = vector.load %arg14[%c8_320, %c0_321] : memref<32x32xbf16, #tpu.memory_space<vmem>>, vector<16x32xbf16>
    %c10_322 = arith.constant 10 : index
    %c0_323 = arith.constant 0 : index
    %432 = vector.load %arg14[%c10_322, %c0_323] : memref<32x32xbf16, #tpu.memory_space<vmem>>, vector<16x32xbf16>
    %433 = tpu.concatenate %430, %431, %432 in 1 : vector<16x32xbf16>, vector<16x32xbf16>, vector<16x32xbf16> -> vector<16x96xbf16>
    %c3_324 = arith.constant 3 : index
    %c1_325 = arith.constant 1 : index
    %c0_326 = arith.constant 0 : index
    %c0_327 = arith.constant 0 : index
    %434 = vector.load %arg5[%c3_324, %c1_325, %c0_326, %c0_327] : memref<4x3x96x64xbf16, #tpu.memory_space<vmem>>, vector<1x1x96x64xbf16>
    %435 = vector.shape_cast %434 : vector<1x1x96x64xbf16> to vector<96x64xbf16>
    %cst_328 = arith.constant dense<0.000000e+00> : vector<16x64xf32>
    %436 = tpu.matmul %433, %435, %cst_328 {dimension_numbers = #tpu.dot_dimension_numbers<[1], [0], [0], [1], [0, 0, 1, 1], [], []>} : vector<16x96xbf16>, vector<96x64xbf16>, vector<16x64xf32> -> vector<16x64xf32>
    %c3_329 = arith.constant 3 : index
    %c1_330 = arith.constant 1 : index
    %c0_331 = arith.constant 0 : index
    %c0_332 = arith.constant 0 : index
    %437 = vector.load %arg6[%c3_329, %c1_330, %c0_331, %c0_332] : memref<4x3x1x64xf32, #tpu.memory_space<vmem>>, vector<1x1x1x64xf32>
    %438 = vector.shape_cast %437 : vector<1x1x1x64xf32> to vector<1x64xf32>
    %439 = vector.broadcast %438 : vector<1x64xf32> to vector<16x64xf32>
    %440 = arith.addf %436, %439 : vector<16x64xf32>
    %441 = vector.extract_strided_slice %440 {offsets = [0, 0], sizes = [16, 32], strides = [1, 1]} : vector<16x64xf32> to vector<16x32xf32>
    %442 = math.tanh %441 : vector<16x32xf32>
    %443 = vector.extract_strided_slice %440 {offsets = [0, 32], sizes = [16, 32], strides = [1, 1]} : vector<16x64xf32> to vector<16x32xf32>
    %444 = arith.negf %443 : vector<16x32xf32>
    %445 = math.exp %444 : vector<16x32xf32>
    %cst_333 = arith.constant 1.000000e+00 : f32
    %446 = vector.broadcast %cst_333 : f32 to vector<16x32xf32>
    %447 = arith.addf %446, %445 : vector<16x32xf32>
    %448 = arith.divf %446, %447 : vector<16x32xf32>
    %449 = arith.mulf %442, %448 : vector<16x32xf32>
    %450 = arith.truncf %449 : vector<16x32xf32> to vector<16x32xbf16>
    %c3_334 = arith.constant 3 : index
    %c1_335 = arith.constant 1 : index
    %c0_336 = arith.constant 0 : index
    %c0_337 = arith.constant 0 : index
    %451 = vector.load %arg7[%c3_334, %c1_335, %c0_336, %c0_337] : memref<4x2x32x64xbf16, #tpu.memory_space<vmem>>, vector<1x1x32x64xbf16>
    %452 = vector.shape_cast %451 : vector<1x1x32x64xbf16> to vector<32x64xbf16>
    %cst_338 = arith.constant dense<0.000000e+00> : vector<16x64xf32>
    %453 = tpu.matmul %450, %452, %cst_338 {dimension_numbers = #tpu.dot_dimension_numbers<[1], [0], [0], [1], [0, 0, 1, 1], [], []>} : vector<16x32xbf16>, vector<32x64xbf16>, vector<16x64xf32> -> vector<16x64xf32>
    %c3_339 = arith.constant 3 : index
    %c1_340 = arith.constant 1 : index
    %c0_341 = arith.constant 0 : index
    %c0_342 = arith.constant 0 : index
    %454 = vector.load %arg8[%c3_339, %c1_340, %c0_341, %c0_342] : memref<4x2x1x64xf32, #tpu.memory_space<vmem>>, vector<1x1x1x64xf32>
    %455 = vector.shape_cast %454 : vector<1x1x1x64xf32> to vector<1x64xf32>
    %456 = vector.broadcast %455 : vector<1x64xf32> to vector<16x64xf32>
    %457 = arith.addf %453, %456 : vector<16x64xf32>
    %458 = vector.extract_strided_slice %457 {offsets = [0, 0], sizes = [16, 32], strides = [1, 1]} : vector<16x64xf32> to vector<16x32xf32>
    %459 = arith.addf %425, %458 : vector<16x32xf32>
    %460 = arith.mulf %459, %7 : vector<16x32xf32>
    %461 = vector.extract_strided_slice %457 {offsets = [0, 32], sizes = [16, 32], strides = [1, 1]} : vector<16x64xf32> to vector<16x32xf32>
    %462 = arith.addf %427, %461 : vector<16x32xf32>
    %463 = arith.truncf %460 : vector<16x32xf32> to vector<16x32xbf16>
    %c8_343 = arith.constant 8 : index
    %c0_344 = arith.constant 0 : index
    %464 = vector.load %arg14[%c8_343, %c0_344] : memref<32x32xbf16, #tpu.memory_space<vmem>>, vector<16x32xbf16>
    tpu.vector_store %arg14[%c8_343, %c0_344], %463 {strides = array<i32>} : memref<32x32xbf16, #tpu.memory_space<vmem>>, vector<16x32xbf16>,
    %c4_345 = arith.constant 4 : index
    %c0_346 = arith.constant 0 : index
    %465 = vector.load %arg14[%c4_345, %c0_346] : memref<32x32xbf16, #tpu.memory_space<vmem>>, vector<16x32xbf16>
    %c8_347 = arith.constant 8 : index
    %c0_348 = arith.constant 0 : index
    %466 = vector.load %arg14[%c8_347, %c0_348] : memref<32x32xbf16, #tpu.memory_space<vmem>>, vector<16x32xbf16>
    %c12_349 = arith.constant 12 : index
    %c0_350 = arith.constant 0 : index
    %467 = vector.load %arg14[%c12_349, %c0_350] : memref<32x32xbf16, #tpu.memory_space<vmem>>, vector<16x32xbf16>
    %468 = tpu.concatenate %465, %466, %467 in 1 : vector<16x32xbf16>, vector<16x32xbf16>, vector<16x32xbf16> -> vector<16x96xbf16>
    %c3_351 = arith.constant 3 : index
    %c2_352 = arith.constant 2 : index
    %c0_353 = arith.constant 0 : index
    %c0_354 = arith.constant 0 : index
    %469 = vector.load %arg5[%c3_351, %c2_352, %c0_353, %c0_354] : memref<4x3x96x64xbf16, #tpu.memory_space<vmem>>, vector<1x1x96x64xbf16>
    %470 = vector.shape_cast %469 : vector<1x1x96x64xbf16> to vector<96x64xbf16>
    %cst_355 = arith.constant dense<0.000000e+00> : vector<16x64xf32>
    %471 = tpu.matmul %468, %470, %cst_355 {dimension_numbers = #tpu.dot_dimension_numbers<[1], [0], [0], [1], [0, 0, 1, 1], [], []>} : vector<16x96xbf16>, vector<96x64xbf16>, vector<16x64xf32> -> vector<16x64xf32>
    %c3_356 = arith.constant 3 : index
    %c2_357 = arith.constant 2 : index
    %c0_358 = arith.constant 0 : index
    %c0_359 = arith.constant 0 : index
    %472 = vector.load %arg6[%c3_356, %c2_357, %c0_358, %c0_359] : memref<4x3x1x64xf32, #tpu.memory_space<vmem>>, vector<1x1x1x64xf32>
    %473 = vector.shape_cast %472 : vector<1x1x1x64xf32> to vector<1x64xf32>
    %474 = vector.broadcast %473 : vector<1x64xf32> to vector<16x64xf32>
    %475 = arith.addf %471, %474 : vector<16x64xf32>
    %476 = vector.extract_strided_slice %475 {offsets = [0, 0], sizes = [16, 32], strides = [1, 1]} : vector<16x64xf32> to vector<16x32xf32>
    %477 = math.tanh %476 : vector<16x32xf32>
    %478 = vector.extract_strided_slice %475 {offsets = [0, 32], sizes = [16, 32], strides = [1, 1]} : vector<16x64xf32> to vector<16x32xf32>
    %479 = arith.negf %478 : vector<16x32xf32>
    %480 = math.exp %479 : vector<16x32xf32>
    %cst_360 = arith.constant 1.000000e+00 : f32
    %481 = vector.broadcast %cst_360 : f32 to vector<16x32xf32>
    %482 = arith.addf %481, %480 : vector<16x32xf32>
    %483 = arith.divf %481, %482 : vector<16x32xf32>
    %484 = arith.mulf %477, %483 : vector<16x32xf32>
    %485 = arith.truncf %484 : vector<16x32xf32> to vector<16x32xbf16>
    %c3_361 = arith.constant 3 : index
    %c0_362 = arith.constant 0 : index
    %c0_363 = arith.constant 0 : index
    %486 = vector.load %arg9[%c3_361, %c0_362, %c0_363] : memref<4x32x32xbf16, #tpu.memory_space<vmem>>, vector<1x32x32xbf16>
    %487 = vector.shape_cast %486 : vector<1x32x32xbf16> to vector<32x32xbf16>
    %cst_364 = arith.constant dense<0.000000e+00> : vector<16x32xf32>
    %488 = tpu.matmul %485, %487, %cst_364 {dimension_numbers = #tpu.dot_dimension_numbers<[1], [0], [0], [1], [0, 0, 1, 1], [], []>} : vector<16x32xbf16>, vector<32x32xbf16>, vector<16x32xf32> -> vector<16x32xf32>
    %c3_365 = arith.constant 3 : index
    %c0_366 = arith.constant 0 : index
    %c0_367 = arith.constant 0 : index
    %489 = vector.load %arg10[%c3_365, %c0_366, %c0_367] : memref<4x1x32xf32, #tpu.memory_space<vmem>>, vector<1x1x32xf32>
    %490 = vector.shape_cast %489 : vector<1x1x32xf32> to vector<1x32xf32>
    %491 = vector.broadcast %490 : vector<1x32xf32> to vector<16x32xf32>
    %492 = arith.addf %488, %491 : vector<16x32xf32>
    %493 = arith.addf %462, %492 : vector<16x32xf32>
    %494 = arith.mulf %493, %7 : vector<16x32xf32>
    %495 = arith.truncf %494 : vector<16x32xf32> to vector<16x32xbf16>
    %c3_368 = arith.constant 3 : index
    %c0_369 = arith.constant 0 : index
    %c0_370 = arith.constant 0 : index
    %496 = vector.load %arg11[%c3_368, %c0_369, %c0_370] : memref<4x32x4xbf16, #tpu.memory_space<vmem>>, vector<1x32x4xbf16>
    %497 = vector.shape_cast %496 : vector<1x32x4xbf16> to vector<32x4xbf16>
    %cst_371 = arith.constant dense<0.000000e+00> : vector<16x4xf32>
    %498 = tpu.matmul %495, %497, %cst_371 {dimension_numbers = #tpu.dot_dimension_numbers<[1], [0], [0], [1], [0, 0, 1, 1], [], []>} : vector<16x32xbf16>, vector<32x4xbf16>, vector<16x4xf32> -> vector<16x4xf32>
    %c3_372 = arith.constant 3 : index
    %c0_373 = arith.constant 0 : index
    %c0_374 = arith.constant 0 : index
    %499 = vector.load %arg12[%c3_372, %c0_373, %c0_374] : memref<4x1x4xf32, #tpu.memory_space<vmem>>, vector<1x1x4xf32>
    %500 = vector.shape_cast %499 : vector<1x1x4xf32> to vector<1x4xf32>
    %501 = vector.broadcast %500 : vector<1x4xf32> to vector<16x4xf32>
    %502 = arith.addf %498, %501 : vector<16x4xf32>
    %503 = arith.mulf %502, %9 : vector<16x4xf32>
    %504 = arith.mulf %259, %9 : vector<16x4xf32>
    %505 = arith.addf %503, %504 : vector<16x4xf32>
    %506 = tpu.concatenate %505, %382 in 1 : vector<16x4xf32>, vector<16x4xf32> -> vector<16x8xf32>
    %507 = vector.shape_cast %506 : vector<16x8xf32> to vector<1x16x8xf32>
    %c0_375 = arith.constant 0 : index
    %c0_376 = arith.constant 0 : index
    %c0_377 = arith.constant 0 : index
    %508 = vector.load %arg13[%c0_375, %c0_376, %c0_377] : memref<1x16x8xf32, #tpu.memory_space<vmem>>, vector<1x16x8xf32>
    tpu.vector_store %arg13[%c0_375, %c0_376, %c0_377], %507 {strides = array<i32>} : memref<1x16x8xf32, #tpu.memory_space<vmem>>, vector<1x16x8xf32>,
    return
  }
  func.func @transform_0(%arg0: i32) -> (i32, i32, i32) {
    %c0_i32 = arith.constant 0 : i32
    %c0_i32_0 = arith.constant 0 : i32
    %c0_i32_1 = arith.constant 0 : i32
    return %arg0, %c0_i32, %c0_i32_0 : i32, i32, i32
  }
  func.func @transform_1(%arg0: i32) -> (i32, i32, i32) {
    %c0_i32 = arith.constant 0 : i32
    %c0_i32_0 = arith.constant 0 : i32
    %c0_i32_1 = arith.constant 0 : i32
    return %arg0, %c0_i32, %c0_i32_0 : i32, i32, i32
  }
  func.func @transform_2(%arg0: i32) -> (i32, i32, i32) {
    %c0_i32 = arith.constant 0 : i32
    %c0_i32_0 = arith.constant 0 : i32
    %c0_i32_1 = arith.constant 0 : i32
    %c0_i32_2 = arith.constant 0 : i32
    return %c0_i32, %c0_i32_0, %c0_i32_1 : i32, i32, i32
  }
  func.func @transform_3(%arg0: i32) -> (i32, i32, i32) {
    %c0_i32 = arith.constant 0 : i32
    %c0_i32_0 = arith.constant 0 : i32
    %c0_i32_1 = arith.constant 0 : i32
    %c0_i32_2 = arith.constant 0 : i32
    return %c0_i32, %c0_i32_0, %c0_i32_1 : i32, i32, i32
  }
  func.func @transform_4(%arg0: i32) -> (i32, i32, i32, i32) {
    %c0_i32 = arith.constant 0 : i32
    %c0_i32_0 = arith.constant 0 : i32
    %c0_i32_1 = arith.constant 0 : i32
    %c0_i32_2 = arith.constant 0 : i32
    %c0_i32_3 = arith.constant 0 : i32
    return %c0_i32, %c0_i32_0, %c0_i32_1, %c0_i32_2 : i32, i32, i32, i32
  }
  func.func @transform_5(%arg0: i32) -> (i32, i32, i32, i32) {
    %c0_i32 = arith.constant 0 : i32
    %c0_i32_0 = arith.constant 0 : i32
    %c0_i32_1 = arith.constant 0 : i32
    %c0_i32_2 = arith.constant 0 : i32
    %c0_i32_3 = arith.constant 0 : i32
    return %c0_i32, %c0_i32_0, %c0_i32_1, %c0_i32_2 : i32, i32, i32, i32
  }
  func.func @transform_6(%arg0: i32) -> (i32, i32, i32, i32) {
    %c0_i32 = arith.constant 0 : i32
    %c0_i32_0 = arith.constant 0 : i32
    %c0_i32_1 = arith.constant 0 : i32
    %c0_i32_2 = arith.constant 0 : i32
    %c0_i32_3 = arith.constant 0 : i32
    return %c0_i32, %c0_i32_0, %c0_i32_1, %c0_i32_2 : i32, i32, i32, i32
  }
  func.func @transform_7(%arg0: i32) -> (i32, i32, i32, i32) {
    %c0_i32 = arith.constant 0 : i32
    %c0_i32_0 = arith.constant 0 : i32
    %c0_i32_1 = arith.constant 0 : i32
    %c0_i32_2 = arith.constant 0 : i32
    %c0_i32_3 = arith.constant 0 : i32
    return %c0_i32, %c0_i32_0, %c0_i32_1, %c0_i32_2 : i32, i32, i32, i32
  }
  func.func @transform_8(%arg0: i32) -> (i32, i32, i32) {
    %c0_i32 = arith.constant 0 : i32
    %c0_i32_0 = arith.constant 0 : i32
    %c0_i32_1 = arith.constant 0 : i32
    %c0_i32_2 = arith.constant 0 : i32
    return %c0_i32, %c0_i32_0, %c0_i32_1 : i32, i32, i32
  }
  func.func @transform_9(%arg0: i32) -> (i32, i32, i32) {
    %c0_i32 = arith.constant 0 : i32
    %c0_i32_0 = arith.constant 0 : i32
    %c0_i32_1 = arith.constant 0 : i32
    %c0_i32_2 = arith.constant 0 : i32
    return %c0_i32, %c0_i32_0, %c0_i32_1 : i32, i32, i32
  }
  func.func @transform_10(%arg0: i32) -> (i32, i32, i32) {
    %c0_i32 = arith.constant 0 : i32
    %c0_i32_0 = arith.constant 0 : i32
    %c0_i32_1 = arith.constant 0 : i32
    %c0_i32_2 = arith.constant 0 : i32
    return %c0_i32, %c0_i32_0, %c0_i32_1 : i32, i32, i32
  }
  func.func @transform_11(%arg0: i32) -> (i32, i32, i32) {
    %c0_i32 = arith.constant 0 : i32
    %c0_i32_0 = arith.constant 0 : i32
    %c0_i32_1 = arith.constant 0 : i32
    %c0_i32_2 = arith.constant 0 : i32
    return %c0_i32, %c0_i32_0, %c0_i32_1 : i32, i32, i32
  }
  func.func @transform_12(%arg0: i32) -> (i32, i32, i32) {
    %c0_i32 = arith.constant 0 : i32
    %c0_i32_0 = arith.constant 0 : i32
    %c0_i32_1 = arith.constant 0 : i32
    return %arg0, %c0_i32, %c0_i32_0 : i32, i32, i32
  }
}

</mosaic_0001>

<bundles_post_ra>
// kernel: residual_coupling_block.1
= control target key start
LH: loop header
LB: loop body
LE: loop exit
PB: predicated region body
PF: predicated region fallthrough
CT: control target
= control target key end

     0   :  { %s5654_s21 = smov 0   ;;  %s6707_s0 = inlined_call_operand.vmem [shape: f32[2,16,8], index: 0, kind: input, shape index: {}]   ;;  %s6708_s1 = inlined_call_operand.vmem [shape: f32[2,16,1], index: 1, kind: input, shape index: {}]   ;;  %s6709_s2 = inlined_call_operand.vmem [shape: bf16[4,4,32], index: 2, kind: input, shape index: {}]   ;;  %s6710_s3 = inlined_call_operand.vmem [shape: f32[4,1,32], index: 3, kind: input, shape index: {}]   ;;  %s6711_s4 = inlined_call_operand.vmem [shape: bf16[4,3,96,64], index: 4, kind: input, shape index: {}]   ;;  %s6712_s5 = inlined_call_operand.vmem [shape: f32[4,3,1,64], index: 5, kind: input, shape index: {}]   ;;  %s6713_s6 = inlined_call_operand.vmem [shape: bf16[4,2,32,64], index: 6, kind: input, shape index: {}]   ;;  %s6714_s7 = inlined_call_operand.vmem [shape: f32[4,2,1,64], index: 7, kind: input, shape index: {}]   ;;  %s6715_s8 = inlined_call_operand.vmem [shape: bf16[4,32,32], index: 8, kind: input, shape index: {}]   ;;  %s6716_s9 = inlined_call_operand.vmem [shape: f32[4,1,32], index: 9, kind: input, shape index: {}]   ;;  %s6717_s10 = inlined_call_operand.vmem [shape: bf16[4,32,4], index: 10, kind: input, shape index: {}]   ;;  %s6718_s11 = inlined_call_operand.vmem [shape: f32[4,1,4], index: 11, kind: input, shape index: {}]   ;;  %s6719_s12 = inlined_call_operand.vmem [shape: f32[2,16,8], index: 12, kind: output, shape index: {}]  }
   0x1 LB: > { %s4242_s22 = sadd.s32 4294967295, %s5579_s21   ;;  %p4246_p0 = scmp.ge.s32.totalorder %s5579_s21, 1  ;;  %s5579_s21 = sphi %s5654_s21, %s22_s21  }
   0x2   : > { %p372_p1 = scmp.lt.s32.totalorder %s5579_s21, 3 }
   0x4   : > { %p373_p2 = pnand %p4246_p0, %p372_p1 }
   0x5   : > { %p419_p3 = scmp.lt.s32.totalorder (!%p373_p2), %s4242_s22, 1  ;;  %s5585_s14 = smov (!%p373_p2), 32  }
   0x6   : > { %376 = sbr.rel (%p373_p2) target bundleno = 10882 (0x2a82), region = 68  ;;  %s5587_s19 = smov (!%p373_p2), 124  }
   0x7   : > { %s5588_s23 = smov (!%p373_p2), 4  }
   0xb   : > { %v453_v0 = vld [vmem:[%s6709_s2] sm:$0x3]  ;;  %vm465_vm0 = vcmask 1041408   ;;  %v5581_v1 = vmov 0.0   ;;  %vm5582_vm1 = vmmov 0   ;;  %vm449_vm2 = vcmask 257024  }
   0xc   : > { %4908 = vmatprep.subr.bf16.mxu0 %v5581_v1  ;;  %v467_v2 = vsel %vm465_vm0, %v453_v0, 0  ;;  %4910 = vmatprep.mubr.msk.bf16.mxu0 %vm5582_vm1, %v5581_v1  ;;  %s6721_s22 = smov (!%p419_p3, %s4242_s22), 1  ;;  %v5583_v3 = vmov 0   ;;  %vm461_vm3 = vcmask 31744   ;;  %v5270_v9 = vld [vmem:[%s6711_s4 + $0x28] sm:$0xff]   ;;  %v5271_v10 = vld [vmem:[%s6711_s4 + $0x20] sm:$0xff]  }
   0xd   : > { %4909 = vmatpush3.bf16.msra.mxu0 %v467_v2  ;;  %5268 = vset.pattern.permute.xlu0 %v5583_v3  ;;  %450 = vst.msk [vmem:[#allocation2] sm:$0xf] %vm449_vm2, %v5583_v3  ;;  %451 = vst.msk [vmem:[#allocation2 + $0xc] sm:$0xf] %vm449_vm2, %v5583_v3  ;;  %s5674_s25 = sshll.u32 %s6721_s22, 4  ;;  %v5272_v24 = vld [vmem:[%s6711_s4 + $0x18] sm:$0xff]  }
   0xe   : > { %4914 = vmatprep.subr.bf16.mxu1 %v5581_v1  ;;  %4926 = vmatprep.mubr.msk.bf16.mxu1 %vm5582_vm1, %v5581_v1  ;;  %s5681_s28 = scalar_lea.vmem %s6707_s0, %s5674_s25  ;;  %s428_s13 = scalar_lea.vmem %s6708_s1, %s5674_s25  ;;  %v4253_v11 = vld [vmem:[%s6710_s3] ss:$0 sm:$0xff]  ;;  %v5274_v25 = vld [vmem:[%s6711_s4 + $0x10] sm:$0xff]   ;;  %v5275_v27 = vld [vmem:[%s6711_s4 + $0x8] sm:$0xff]   ;;  %vm548_vm4 = vcmask 1042432   ;;  %vm556_vm5 = vcmask 261120  }
   0xf   : > { %4930 = vmatprep.subr.bf16.mxu0 %v5581_v1  ;;  %v435_v4 = vld [vmem:[%s5681_s28] sm:$0xff]  ;;  %v436_v5 = vld [vmem:[%s5681_s28 + $0x8] sm:$0xff]  ;;  %4915 = vmatpush3.bf16.msra.mxu1 %v5270_v9  ;;  %vm562_vm6 = vcmask 523264   ;;  %vm586_vm7 = vsmask.f32 4352  ;;  %vm638_vm8 = vcmask 785408   ;;  %s433_s24 = scalar_lea.vmem %s6719_s12, %s5674_s25 }
  0x10   : > { %v437_v6 = vld [vmem:[%s428_s13] sm:$0xff]  ;;  %v452_v7 = vpack.c.bf16 %v436_v5, %v435_v4  ;;  %v438_v8 = vld [vmem:[%s428_s13 + $0x8] sm:$0xff]  ;;  %4916 = vmatprep.subr.bf16.mxu1 %v5581_v1  ;;  %s5584_s13 = smov 64   ;;  %s5586_s22 = smov 96   ;;  %vm857_vm9 = vcmask 1044480   ;;  %vm1113_vm10 = vcmask 1045504  }
  0x11   : > { %441 = vperm.xlu0 %5268, %v437_v6   ;;  %v5276_v35 = vld [vmem:[%s6711_s4] sm:$0xff]   ;;  %v5277_v9 = vld [vmem:[%s6713_s6 + $0x8] sm:$0xff]   ;;  %vm4172_vm11 = vcmask 64512  }
  0x12   : > { %4911 = vmatmul.mubr.msk.bf16.vlgmr.msra.gmra.mxu0 %vm461_vm3, %v452_v7  ;;  %v4261_v61 = vld [vmem:[%s6712_s5] ss:$0 sm:$0xff] }
  0x13   : > { %4934 = vmatprep.mubr.msk.bf16.mxu0 %vm5582_vm1, %v5581_v1  ;;  %4917 = vmatpush3.bf16.msra.mxu1 %v5271_v10 }
  0x14   : > { %4918 = vmatprep.subr.bf16.mxu1 %v5581_v1  ;;  %v5269_v26 = vld [vmem:[#allocation2 + $0xc] ss:$0 sps:$4 sm:$0x11]   ;;  %v522_v40 = vld [vmem:[#allocation2] sm:$0x8]  ;;  %4931 = vmatpush3.bf16.msra.mxu0 %v5277_v9 }
  0x15   : > { %446 = vperm.xlu0 %5268, %v438_v8   ;;  %v550_v31 = vrot.slane %v5269_v26, 5  ;;  %4932 = vmatprep.subr.bf16.mxu0 %v5581_v1  ;;  %v5282_v26 = vld [vmem:[%s6711_s4 + $0x58] sm:$0xff]  }
  0x17   : > { %4919 = vmatpush3.bf16.msra.mxu1 %v5272_v24 }
  0x18   : > { %4920 = vmatprep.subr.bf16.mxu1 %v5581_v1 }
  0x1b   : > { %4921 = vmatpush3.bf16.msra.mxu1 %v5274_v25 }
  0x1c   : > { %4922 = vmatprep.subr.bf16.mxu1 %v5581_v1 }
  0x1f   : > { %4923 = vmatpush3.bf16.msra.mxu1 %v5275_v27  ;;  %v5283_v27 = vld [vmem:[%s6711_s4 + $0x50] sm:$0xff]  }
  0x20   : > { %4924 = vmatprep.subr.bf16.mxu1 %v5581_v1 }
  0x23   : > { %4925 = vmatpush3.bf16.msra.mxu1 %v5276_v35 }
  0x24   : > { %4954 = vmatprep.subr.bf16.mxu1 %v5581_v1 }
  0x8c   : > { %v5703_v12 = vpop.permute.xlu0 %441 }
  0x90   : > { %v5710_v20 = vpop.permute.xlu0 %446 }
  0xd2   : > { %v503_v13 = vpop.f32.mrf.mxu0 }
  0xd3   : > { %v504_v14 = vadd.f32 %v4253_v11, %v503_v13  ;;  %v5278_v13 = vld [vmem:[%s6713_s6] sm:$0xff]  }
  0xd4   : > { %v4912_v15 = vpop.f32.mrf.mxu0  ;;  %4933 = vmatpush3.bf16.msra.mxu0 %v5278_v13 }
  0xd5   : > { %v5706_v16 = vmul.f32 %v504_v14, %v5703_v12  ;;  %4938 = vmatprep.subr.bf16.mxu0 %v5581_v1 }
  0xd6   : > { %v506_v17 = vpop.f32.mrf.mxu0 }
  0xd7   : > { %v4744_v18 = vpack.c.bf16 %v5706_v16, %v5706_v16  ;;  %v507_v19 = vadd.f32 %v4253_v11, %v506_v17 }
  0xd8   : > { %v4913_v21 = vpop.f32.mrf.mxu0 }
  0xd9   : > { %520 = vst.msk [vmem:[#allocation2 + $0x4] sm:$0xf] %vm449_vm2, %v4744_v18  ;;  %v5714_v22 = vmul.f32 %v507_v19, %v5710_v20 }
  0xdb   : > { %v4745_v23 = vpack.c.bf16 %v5714_v22, %v5714_v22 }
  0xdd   : > { %521 = vst.msk [vmem:[#allocation2 + $0x8] sm:$0xf] %vm449_vm2, %v4745_v23 }
  0xe0   : > { %v523_v28 = vld [vmem:[#allocation2 + $0x4] sm:$0xf] }
  0xe1   : > { %v4257_v45 = vcombine.low %v522_v40, %v523_v28 }
  0xe4   : > { %v524_v29 = vld [vmem:[#allocation2 + $0x8] sm:$0xf] }
  0xe5   : > { %v4259_v30 = vcombine.low %v523_v28, %v524_v29  ;;  %v4258_v41 = vcombine.low %v524_v29, %v524_v29  ;;  %v5284_v28 = vld [vmem:[%s6711_s4 + $0x48] sm:$0xff]   ;;  %v5285_v29 = vld [vmem:[%s6711_s4 + $0x40] sm:$0xff]  }
  0xe7   : > { %v549_v32 = vrot.slane %v4259_v30, 5  ;;  %v536_v33 = vshrl.u32 %v4259_v30, 16  ;;  %v539_v34 = vshll.u32 %v4259_v30, 16  ;;  %v4271_v30 = vld [vmem:[%s6714_s7] ss:$0 sm:$0xff] }
  0xe9   : > { %v551_v36 = vsel %vm548_vm4, %v549_v32, %v550_v31  ;;  %v538_v37 = vrot.slane %v536_v33, 4  ;;  %v541_v38 = vrot.slane %v539_v34, 5 }
  0xea   : > { %554 = vrot.lane.b32.xlu0 %v551_v36, %s5584_s13 }
  0xeb   : > { %v542_v39 = vor.u32 %v541_v38, %v538_v37 }
  0xed   : > { %543 = vrot.lane.b32.xlu1 %v542_v39, %s5585_s14 }
  0xf1   : > { %552 = vrot.lane.b32.xlu1 %v549_v32, %s5584_s13 }
 0x15c   : > { %v555_v43 = vpop.permute.xlu0 %554 }
 0x15f   : > { %v544_v42 = vpop.permute.xlu1 %543 }
 0x160   : > { %v561_v44 = vsel %vm556_vm5, %v4258_v41, %v544_v42  ;;  %v559_v49 = vsel %vm556_vm5, %v4257_v45, %v544_v42  ;;  %v5288_v42 = vld [vmem:[%s6711_s4 + $0x38] sm:$0xff]  }
 0x161   : > { %v566_v46 = vsel %vm562_vm6, %v561_v44, %v555_v43  ;;  %v5281_v44 = vld [vmem:[#allocation2 + $0xc] ss:$0 sps:$4 sm:$0x11]  }
 0x162   : > { %v594_v47 = vshrl.u32 %v566_v46, 16  ;;  %v597_v48 = vshll.u32 %v566_v46, 16 }
 0x163   : > { %v553_v50 = vpop.permute.xlu1 %552 }
 0x164   : > { %v564_v51 = vsel %vm562_vm6, %v559_v49, %v553_v50  ;;  %v596_v52 = vrot.slane %v594_v47, 3  ;;  %v599_v53 = vrot.slane %v597_v48, 4 }
 0x165   : > { %v587_v54 = vshrl.u32 %v564_v51, 16  ;;  %v590_v55 = vshll.u32 %v564_v51, 16  ;;  %v819_v51 = vrot.slane %v5281_v44, 6 }
 0x166   : > { %v600_v58 = vor.u32 %v599_v53, %v596_v52  ;;  %v791_v53 = vld [vmem:[#allocation2] sm:$0x8] }
 0x167   : > { %v589_v56 = vrot.slane %v587_v54, 3  ;;  %v592_v57 = vrot.slane %v590_v55, 4 }
 0x169   : > { %v593_v59 = vor.u32 %v592_v57, %v589_v56 }
 0x16b   : > { %v601_v60 = vsel %vm586_vm7, %v593_v59, %v600_v58 }
 0x16c   : > { %4927 = vmatmul.mubr.msk.bf16.vlgmr.msra.gmra.mxu1 %vm638_vm8, %v601_v60 }
 0x16d   : > { %4958 = vmatprep.mubr.msk.bf16.mxu1 %vm5582_vm1, %v5581_v1 }
 0x22c   : > { %v676_v62 = vpop.f32.mrf.mxu1 }
 0x22d   : > { %v677_v63 = vadd.f32 %v4261_v61, %v676_v62 }
 0x22e   : > { %v4928_v0 = vpop.f32.mrf.mxu1 }
 0x22f   : > { %v4269_v2 = vmul.f32 -1.442695, %v677_v63 }
 0x230   : > { %v679_v3 = vpop.f32.mrf.mxu1 }
 0x231   : > { %5427 = vpow2.f32 %v4269_v2  ;;  %v680_v4 = vadd.f32 %v4261_v61, %v679_v3  ;;  %v4295_v3 = vld [vmem:[%s6712_s5 + $0x1] ss:$0 sm:$0xff] }
 0x232   : > { %v4929_v5 = vpop.f32.mrf.mxu1 }
 0x233   : > { %v4270_v6 = vmul.f32 -1.442695, %v680_v4 }
 0x235   : > { %5429 = vpow2.f32 %v4270_v6 }
 0x23e   : > { %v5428_v7 = vpop.eup %5427 }
 0x23f   : > { %v691_v8 = vadd.f32 1.0, %v5428_v7 }
 0x241   : > { %5431 = vrcp.f32 %v691_v8 }
 0x242   : > { %v5430_v10 = vpop.eup %5429 }
 0x243   : > { %v692_v11 = vadd.f32 1.0, %v5430_v10 }
 0x245   : > { %5433 = vrcp.f32 %v692_v11 }
 0x246   : > { %5435 = vtanh.f32 %v677_v63 }
 0x247   : > { %5437 = vtanh.f32 %v680_v4 }
 0x24e   : > { %v5432_v14 = vpop.eup %5431 }
 0x24f   : > { %699 = vrot.lane.b32.xlu1 %v5432_v14, %s5586_s22 }
 0x252   : > { %v5434_v15 = vpop.eup %5433 }
 0x253   : > { %701 = vrot.lane.b32.xlu0 %v5434_v15, %s5586_s22  ;;  %v5436_v18 = vpop.eup %5435 }
 0x254   : > { %v5438_v19 = vpop.eup %5437 }
 0x2c1   : > { %v700_v17 = vpop.permute.xlu1 %699 }
 0x2c2   : > { %v705_v23 = vmul.f32 %v5436_v18, %v700_v17  ;;  %v5290_v17 = vld [vmem:[%s6713_s6 + $0x18] sm:$0xff]  }
 0x2c3   : > { %4955 = vmatpush3.bf16.msra.mxu1 %v5290_v17 }
 0x2c4   : > { %4956 = vmatprep.subr.bf16.mxu1 %v5581_v1 }
 0x2c5   : > { %v702_v21 = vpop.permute.xlu0 %701 }
 0x2c6   : > { %v706_v24 = vmul.f32 %v5438_v19, %v702_v21  ;;  %v5291_v19 = vld [vmem:[%s6713_s6 + $0x10] sm:$0xff]  }
 0x2c7   : > { %4957 = vmatpush3.bf16.msra.mxu1 %v5291_v19 }
 0x2c8   : > { %v707_v25 = vpack.c.bf16 %v706_v24, %v705_v23  ;;  %4962 = vmatprep.subr.bf16.mxu1 %v5581_v1 }
 0x2ca   : > { %4935 = vmatmul.mubr.msk.bf16.vlgmr.msra.gmra.mxu0 %vm556_vm5, %v707_v25 }
 0x2cb   : > { %4950 = vmatprep.mubr.msk.bf16.mxu0 %vm5582_vm1, %v5581_v1  ;;  %4939 = vmatpush3.bf16.msra.mxu0 %v5282_v26 }
 0x2cc   : > { %4940 = vmatprep.subr.bf16.mxu0 %v5581_v1 }
 0x2cf   : > { %4941 = vmatpush3.bf16.msra.mxu0 %v5283_v27 }
 0x2d0   : > { %4942 = vmatprep.subr.bf16.mxu0 %v5581_v1 }
 0x2d3   : > { %4943 = vmatpush3.bf16.msra.mxu0 %v5284_v28 }
 0x2d4   : > { %4944 = vmatprep.subr.bf16.mxu0 %v5581_v1 }
 0x2d7   : > { %4945 = vmatpush3.bf16.msra.mxu0 %v5285_v29 }
 0x2d8   : > { %4946 = vmatprep.subr.bf16.mxu0 %v5581_v1 }
 0x2db   : > { %4947 = vmatpush3.bf16.msra.mxu0 %v5288_v42 }
 0x2dc   : > { %4948 = vmatprep.subr.bf16.mxu0 %v5581_v1 }
 0x38a   : > { %v768_v31 = vpop.f32.mrf.mxu0 }
 0x38b   : > { %v5782_v32 = vadd.f32 %v4271_v30, %v768_v31  ;;  %v5295_v31 = vld [vmem:[%s6711_s4 + $0x88] sm:$0xff]  }
 0x38c   : > { %v4936_v33 = vpop.f32.mrf.mxu0 }
 0x38d   : > { %v775_v34 = vadd.f32 %v5782_v32, %v5706_v16  ;;  %v5296_v33 = vld [vmem:[%s6711_s4 + $0x80] sm:$0xff]  }
 0x38e   : > { %v771_v35 = vpop.f32.mrf.mxu0 }
 0x38f   : > { %v5787_v36 = vmul.f32 %v775_v34, %v5703_v12  ;;  %v5789_v37 = vadd.f32 %v4271_v30, %v771_v35  ;;  %v5297_v34 = vld [vmem:[%s6711_s4 + $0x78] sm:$0xff]   ;;  %v5298_v35 = vld [vmem:[%s6711_s4 + $0x70] sm:$0xff]  }
 0x390   : > { %v4937_v38 = vpop.f32.mrf.mxu0 }
 0x391   : > { %v4746_v39 = vpack.c.bf16 %v5787_v36, %v5787_v36  ;;  %v776_v40 = vadd.f32 %v5789_v37, %v5714_v22  ;;  %v5289_v22 = vld [vmem:[%s6711_s4 + $0x30] sm:$0xff]   ;;  %v4310_v38 = vld [vmem:[%s6714_s7 + $0x1] ss:$0 sm:$0xff] }
 0x392   : > { %4949 = vmatpush3.bf16.msra.mxu0 %v5289_v22 }
 0x393   : > { %789 = vst.msk [vmem:[#allocation2 + $0x4] sm:$0xf] %vm449_vm2, %v4746_v39  ;;  %v5797_v41 = vmul.f32 %v776_v40, %v5710_v20  ;;  %4978 = vmatprep.subr.bf16.mxu0 %v5581_v1 }
 0x395   : > { %v4747_v16 = vpack.c.bf16 %v5797_v41, %v5797_v41 }
 0x397   : > { %790 = vst.msk [vmem:[#allocation2 + $0x8] sm:$0xf] %vm449_vm2, %v4747_v16 }
 0x39a   : > { %v795_v43 = vld [vmem:[#allocation2 + $0x4] sm:$0xe] }
 0x39b   : > { %v792_v46 = vld [vmem:[#allocation2 + $0x4] sm:$0xf] }
 0x39c   : > { %v4277_v54 = vcombine.low %v791_v53, %v792_v46 }
 0x39e   : > { %v794_v45 = vld [vmem:[#allocation2 + $0x8] sm:$0xf] }
 0x39f   : > { %v4280_v47 = vcombine.low %v795_v43, %v794_v45  ;;  %v4279_v48 = vcombine.low %v792_v46, %v794_v45  ;;  %v5287_v58 = vld [vmem:[#allocation2 + $0x8] ss:$0 sps:$4 sm:$0x77]  }
 0x3a1   : > { %v818_v49 = vrot.slane %v4280_v47, 6  ;;  %v808_v50 = vrot.slane %v4279_v48, 5 }
 0x3a3   : > { %821 = vrot.lane.b32.xlu0 %v818_v49, %s5584_s13  ;;  %809 = vrot.lane.b32.xlu1 %v808_v50, %s5585_s14  ;;  %v820_v52 = vsel %vm465_vm0, %v818_v49, %v819_v51  ;;  %v5301_v50 = vld [vmem:[%s6711_s4 + $0x68] sm:$0xff]  }
 0x3a7   : > { %823 = vrot.lane.b32.xlu1 %v820_v52, %s5584_s13 }
 0x415   : > { %v822_v55 = vpop.permute.xlu0 %821  ;;  %v810_v56 = vpop.permute.xlu1 %809 }
 0x416   : > { %v827_v57 = vsel %vm556_vm5, %v4277_v54, %v810_v56  ;;  %v829_v60 = vsel %vm556_vm5, %v5287_v58, %v810_v56  ;;  %v5294_v56 = vld [vmem:[#allocation2 + $0xc] ss:$0 sps:$4 sm:$0x33]  }
 0x417   : > { %v831_v59 = vsel %vm562_vm6, %v827_v57, %v822_v55  ;;  %v1051_v57 = vld [vmem:[#allocation2] sm:$0xc] }
 0x418   : > { %v858_v63 = vrot.slane %v831_v59, 3 }
 0x419   : > { %v824_v61 = vpop.permute.xlu1 %823 }
 0x41a   : > { %v833_v62 = vsel %vm562_vm6, %v829_v60, %v824_v61 }
 0x41b   : > { %v859_v0 = vrot.slane %v833_v62, 3 }
 0x41d   : > { %v860_v2 = vsel %vm857_vm9, %v858_v63, %v859_v0 }
 0x41e   : > { %4951 = vmatmul.mubr.msk.bf16.vlgmr.msra.gmra.mxu0 %vm638_vm8, %v860_v2 }
 0x41f   : > { %4982 = vmatprep.mubr.msk.bf16.mxu0 %vm5582_vm1, %v5581_v1 }
 0x4de   : > { %v934_v4 = vpop.f32.mrf.mxu0 }
 0x4df   : > { %v935_v5 = vadd.f32 %v4295_v3, %v934_v4 }
 0x4e0   : > { %v4952_v6 = vpop.f32.mrf.mxu0 }
 0x4e1   : > { %v4303_v7 = vmul.f32 -1.442695, %v935_v5 }
 0x4e2   : > { %v937_v8 = vpop.f32.mrf.mxu0 }
 0x4e3   : > { %5439 = vpow2.f32 %v4303_v7  ;;  %v938_v9 = vadd.f32 %v4295_v3, %v937_v8  ;;  %v4334_v7 = vld [vmem:[%s6712_s5 + $0x2] ss:$0 sm:$0xff] }
 0x4e4   : > { %v4953_v10 = vpop.f32.mrf.mxu0 }
 0x4e5   : > { %v4304_v11 = vmul.f32 -1.442695, %v938_v9 }
 0x4e7   : > { %5441 = vpow2.f32 %v4304_v11 }
 0x4f0   : > { %v5440_v13 = vpop.eup %5439 }
 0x4f1   : > { %v949_v14 = vadd.f32 1.0, %v5440_v13 }
 0x4f3   : > { %5443 = vrcp.f32 %v949_v14 }
 0x4f4   : > { %v5442_v15 = vpop.eup %5441 }
 0x4f5   : > { %v950_v18 = vadd.f32 1.0, %v5442_v15 }
 0x4f7   : > { %5445 = vrcp.f32 %v950_v18 }
 0x4f8   : > { %5447 = vtanh.f32 %v935_v5 }
 0x4f9   : > { %5449 = vtanh.f32 %v938_v9 }
 0x500   : > { %v5444_v21 = vpop.eup %5443 }
 0x501   : > { %957 = vrot.lane.b32.xlu0 %v5444_v21, %s5586_s22 }
 0x504   : > { %v5446_v23 = vpop.eup %5445 }
 0x505   : > { %959 = vrot.lane.b32.xlu1 %v5446_v23, %s5586_s22  ;;  %v5448_v25 = vpop.eup %5447  ;;  %v5303_v23 = vld [vmem:[%s6715_s8 + $0x8] sm:$0xff]  }
 0x506   : > { %v5450_v26 = vpop.eup %5449  ;;  %4979 = vmatpush3.bf16.msra.mxu0 %v5303_v23 }
 0x507   : > { %4980 = vmatprep.subr.bf16.mxu0 %v5581_v1 }
 0x573   : > { %v958_v24 = vpop.permute.xlu0 %957 }
 0x574   : > { %v963_v28 = vmul.f32 %v5448_v25, %v958_v24  ;;  %v5304_v25 = vld [vmem:[%s6715_s8] sm:$0xff]  }
 0x575   : > { %4981 = vmatpush3.bf16.msra.mxu0 %v5304_v25 }
 0x576   : > { %4986 = vmatprep.subr.bf16.mxu0 %v5581_v1 }
 0x577   : > { %v960_v27 = vpop.permute.xlu1 %959 }
 0x578   : > { %v964_v29 = vmul.f32 %v5450_v26, %v960_v27 }
 0x57a   : > { %v965_v30 = vpack.c.bf16 %v964_v29, %v963_v28 }
 0x57c   : > { %4959 = vmatmul.mubr.msk.bf16.vlgmr.msra.gmra.mxu1 %vm556_vm5, %v965_v30 }
 0x57d   : > { %4974 = vmatprep.mubr.msk.bf16.mxu1 %vm5582_vm1, %v5581_v1  ;;  %4963 = vmatpush3.bf16.msra.mxu1 %v5295_v31 }
 0x57e   : > { %4964 = vmatprep.subr.bf16.mxu1 %v5581_v1 }
 0x581   : > { %4965 = vmatpush3.bf16.msra.mxu1 %v5296_v33 }
 0x582   : > { %4966 = vmatprep.subr.bf16.mxu1 %v5581_v1 }
 0x585   : > { %4967 = vmatpush3.bf16.msra.mxu1 %v5297_v34 }
 0x586   : > { %4968 = vmatprep.subr.bf16.mxu1 %v5581_v1 }
 0x589   : > { %4969 = vmatpush3.bf16.msra.mxu1 %v5298_v35 }
 0x58a   : > { %4970 = vmatprep.subr.bf16.mxu1 %v5581_v1 }
 0x58d   : > { %4971 = vmatpush3.bf16.msra.mxu1 %v5301_v50 }
 0x58e   : > { %4972 = vmatprep.subr.bf16.mxu1 %v5581_v1 }
 0x63c   : > { %v1028_v39 = vpop.f32.mrf.mxu1 }
 0x63d   : > { %v5857_v40 = vadd.f32 %v4310_v38, %v1028_v39 }
 0x63e   : > { %v4960_v16 = vpop.f32.mrf.mxu1 }
 0x63f   : > { %v1035_v42 = vadd.f32 %v5857_v40, %v5787_v36  ;;  %v5302_v36 = vld [vmem:[%s6711_s4 + $0x60] sm:$0xff]  }
 0x640   : > { %v1031_v22 = vpop.f32.mrf.mxu1  ;;  %4973 = vmatpush3.bf16.msra.mxu1 %v5302_v36  ;;  %v1039_v36 = vadd.f32 %v5857_v40, %v5782_v32 }
 0x641   : > { %v1037_v43 = vmul.f32 %v1035_v42, %v5703_v12  ;;  %v5862_v44 = vadd.f32 %v4310_v38, %v1031_v22  ;;  %5000 = vmatprep.subr.bf16.mxu1 %v5581_v1  ;;  %v4344_v38 = vld [vmem:[%s6716_s9] ss:$0 sm:$0xff] }
 0x642   : > { %v4961_v45 = vpop.f32.mrf.mxu1 }
 0x643   : > { %v4748_v46 = vpack.c.bf16 %v1037_v43, %v1037_v43  ;;  %v1036_v47 = vadd.f32 %v5862_v44, %v5797_v41  ;;  %v5305_v43 = vld [vmem:[%s6717_s10 + $0x8] sm:$0xff]  }
 0x645   : > { %1049 = vst.msk [vmem:[#allocation2 + $0x4] sm:$0xf] %vm449_vm2, %v4748_v46  ;;  %v1038_v48 = vmul.f32 %v1036_v47, %v5710_v20  ;;  %v5306_v47 = vld [vmem:[%s6717_s10] sm:$0xff]  }
 0x647   : > { %v4749_v49 = vpack.c.bf16 %v1038_v48, %v1038_v48  ;;  %v5571_v48 = vld [vmem:[%s5681_s28] sm:$0xff] }
 0x649   : > { %1050 = vst.msk [vmem:[#allocation2 + $0x8] sm:$0xf] %vm449_vm2, %v4749_v49  ;;  %v5918_v49 = vmul.f32 %v5571_v48, %v5703_v12 }
 0x64c   : > { %v1055_v41 = vld [vmem:[#allocation2 + $0x4] sm:$0xc] }
 0x64d   : > { %v1052_v52 = vld [vmem:[#allocation2 + $0x4] sm:$0xf] }
 0x64e   : > { %v4316_v58 = vcombine.low %v1051_v57, %v1052_v52  ;;  %v5572_v57 = vld [vmem:[%s5681_s28 + $0x8] sm:$0xff] }
 0x650   : > { %v1054_v51 = vld [vmem:[#allocation2 + $0x8] sm:$0xf] }
 0x651   : > { %v4319_v53 = vcombine.low %v1055_v41, %v1054_v51  ;;  %v4318_v54 = vcombine.low %v1052_v52, %v1054_v51  ;;  %v5300_v62 = vld [vmem:[#allocation2 + $0x8] ss:$0 sps:$4 sm:$0x33]   ;;  %v1040_v51 = vadd.f32 %v5862_v44, %v5789_v37  ;;  %v4352_v37 = vld [vmem:[%s6709_s2 + $0x2] sm:$0x3] }
 0x652   : > { %v1401_v40 = vsel %vm465_vm0, %v4352_v37, 0  ;;  %v4348_v44 = vld [vmem:[%s6718_s11] ss:$0 sm:$0xff] }
 0x653   : > { %1077 = vrot.lane.b32.xlu1 %v4319_v53, %s5584_s13  ;;  %v1068_v55 = vrot.slane %v4318_v54, 6 }
 0x655   : > { %1069 = vrot.lane.b32.xlu0 %v1068_v55, %s5585_s14 }
 0x659   : > { %1079 = vrot.lane.b32.xlu0 %v5294_v56, %s5584_s13 }
 0x6c5   : > { %v1078_v61 = vpop.permute.xlu1 %1077 }
 0x6c7   : > { %v1070_v59 = vpop.permute.xlu0 %1069 }
 0x6c8   : > { %v1083_v60 = vsel %vm556_vm5, %v4316_v58, %v1070_v59  ;;  %v1085_v0 = vsel %vm556_vm5, %v5300_v62, %v1070_v59  ;;  %v5931_v58 = vmul.f32 %v5572_v57, %v5710_v20 }
 0x6c9   : > { %v1087_v63 = vsel %vm562_vm6, %v1083_v60, %v1078_v61 }
 0x6ca   : > { %v1114_v4 = vrot.slane %v1087_v63, 2 }
 0x6cb   : > { %v1080_v2 = vpop.permute.xlu0 %1079 }
 0x6cc   : > { %v1089_v3 = vsel %vm562_vm6, %v1085_v0, %v1080_v2 }
 0x6cd   : > { %v1115_v5 = vrot.slane %v1089_v3, 2 }
 0x6cf   : > { %v1116_v6 = vsel %vm1113_vm10, %v1114_v4, %v1115_v5 }
 0x6d0   : > { %4975 = vmatmul.mubr.msk.bf16.vlgmr.msra.gmra.mxu1 %vm638_vm8, %v1116_v6 }
 0x6d1   : > { %5012 = vmatprep.mubr.msk.bf16.mxu1 %vm5582_vm1, %v5581_v1 }
 0x790   : > { %v1190_v8 = vpop.f32.mrf.mxu1 }
 0x791   : > { %v1191_v9 = vadd.f32 %v4334_v7, %v1190_v8 }
 0x792   : > { %v4976_v10 = vpop.f32.mrf.mxu1 }
 0x793   : > { %v4342_v11 = vmul.f32 -1.442695, %v1191_v9  ;;  %v5310_v10 = vld [vmem:[%s6711_s4 + $0xb0] sm:$0xff]  }
 0x794   : > { %v1193_v13 = vpop.f32.mrf.mxu1 }
 0x795   : > { %5451 = vpow2.f32 %v4342_v11  ;;  %v1194_v14 = vadd.f32 %v4334_v7, %v1193_v13  ;;  %v4354_v11 = vld [vmem:[%s6710_s3 + $0x1] ss:$0 sm:$0xff] }
 0x796   : > { %v4977_v15 = vpop.f32.mrf.mxu1 }
 0x797   : > { %v4343_v17 = vmul.f32 -1.442695, %v1194_v14 }
 0x799   : > { %5453 = vpow2.f32 %v4343_v17 }
 0x7a2   : > { %v5452_v18 = vpop.eup %5451 }
 0x7a3   : > { %v1205_v19 = vadd.f32 1.0, %v5452_v18 }
 0x7a5   : > { %5455 = vrcp.f32 %v1205_v19 }
 0x7a6   : > { %v5454_v21 = vpop.eup %5453 }
 0x7a7   : > { %v1206_v24 = vadd.f32 1.0, %v5454_v21 }
 0x7a9   : > { %5457 = vrcp.f32 %v1206_v24 }
 0x7aa   : > { %5459 = vtanh.f32 %v1191_v9  ;;  %v5309_v9 = vld [vmem:[%s6711_s4 + $0xb8] sm:$0xff]  }
 0x7ab   : > { %5461 = vtanh.f32 %v1194_v14  ;;  %5001 = vmatpush3.bf16.msra.mxu1 %v5309_v9 }
 0x7ac   : > { %5002 = vmatprep.subr.bf16.mxu1 %v5581_v1 }
 0x7af   : > { %5003 = vmatpush3.bf16.msra.mxu1 %v5310_v10 }
 0x7b0   : > { %5004 = vmatprep.subr.bf16.mxu1 %v5581_v1 }
 0x7b2   : > { %v5456_v26 = vpop.eup %5455 }
 0x7b3   : > { %1213 = vrot.lane.b32.xlu1 %v5456_v26, %s5586_s22  ;;  %v5311_v26 = vld [vmem:[%s6711_s4 + $0xa8] sm:$0xff]  }
 0x7b4   : > { %5005 = vmatpush3.bf16.msra.mxu1 %v5311_v26 }
 0x7b5   : > { %5006 = vmatprep.subr.bf16.mxu1 %v5581_v1 }
 0x7b6   : > { %v5458_v27 = vpop.eup %5457 }
 0x7b7   : > { %1215 = vrot.lane.b32.xlu0 %v5458_v27, %s5586_s22  ;;  %v5460_v29 = vpop.eup %5459  ;;  %v5314_v27 = vld [vmem:[%s6711_s4 + $0xa0] sm:$0xff]  }
 0x7b8   : > { %v5462_v30 = vpop.eup %5461  ;;  %5007 = vmatpush3.bf16.msra.mxu1 %v5314_v27 }
 0x7b9   : > { %5008 = vmatprep.subr.bf16.mxu1 %v5581_v1 }
 0x825   : > { %v1214_v28 = vpop.permute.xlu1 %1213 }
 0x826   : > { %v1219_v33 = vmul.f32 %v5460_v29, %v1214_v28 }
 0x829   : > { %v1216_v31 = vpop.permute.xlu0 %1215 }
 0x82a   : > { %v1220_v34 = vmul.f32 %v5462_v30, %v1216_v31  ;;  %v5315_v30 = vld [vmem:[%s6711_s4 + $0x98] sm:$0xff]  }
 0x82b   : > { %5009 = vmatpush3.bf16.msra.mxu1 %v5315_v30 }
 0x82c   : > { %v1221_v35 = vpack.c.bf16 %v1220_v34, %v1219_v33  ;;  %5010 = vmatprep.subr.bf16.mxu1 %v5581_v1 }
 0x82e   : > { %4983 = vmatmul.mubr.msk.bf16.vlgmr.msra.gmra.mxu0 %vm556_vm5, %v1221_v35 }
 0x82f   : > { %4990 = vmatprep.mubr.msk.bf16.mxu0 %vm5582_vm1, %v5581_v1  ;;  %4987 = vmatpush3.bf16.msra.mxu0 %v5305_v43 }
 0x830   : > { %4988 = vmatprep.subr.bf16.mxu0 %v5581_v1 }
 0x833   : > { %4989 = vmatpush3.bf16.msra.mxu0 %v5306_v47 }
 0x834   : > { %4994 = vmatprep.subr.bf16.mxu0 %v5581_v1 }
 0x8ee   : > { %v1282_v39 = vpop.f32.mrf.mxu0 }
 0x8ef   : > { %v1283_v16 = vadd.f32 %v4344_v38, %v1282_v39  ;;  %v5316_v39 = vld [vmem:[%s6711_s4 + $0x90] sm:$0xff]  }
 0x8f0   : > { %v4984_v42 = vpop.f32.mrf.mxu0  ;;  %5011 = vmatpush3.bf16.msra.mxu1 %v5316_v39  ;;  %v4390_v39 = vld [vmem:[%s6714_s7 + $0x2] ss:$0 sm:$0xff] }
 0x8f1   : > { %1291 = vrot.lane.b32.xlu1 %v1283_v16, %s5585_s14  ;;  %5040 = vmatprep.subr.bf16.mxu1 %v5581_v1 }
 0x8f2   : > { %v1285_v22 = vpop.f32.mrf.mxu0 }
 0x8f3   : > { %v1286_v45 = vadd.f32 %v4344_v38, %v1285_v22  ;;  %v5308_v38 = vld [vmem:[#allocation2 + $0xc] ss:$0 sps:$4 sm:$0x11]  }
 0x8f4   : > { %v4985_v46 = vpop.f32.mrf.mxu0  ;;  %v1483_v43 = vrot.slane %v5308_v38, 5  ;;  %v5325_v38 = vld [vmem:[%s6711_s4 + $0xd0] sm:$0xff]  }
 0x8f5   : > { %1293 = vrot.lane.b32.xlu0 %v1286_v45, %s5585_s14  ;;  %v1456_v46 = vld [vmem:[#allocation2] sm:$0x8] }
 0x8f9   : > { %1378 = vrot.lane.b32.xlu0 %v5918_v49, %s5587_s19 }
 0x963   : > { %v1292_v50 = vpop.permute.xlu1 %1291 }
 0x964   : > { %v1297_v41 = vadd.f32 %v1292_v50, %v1039_v36 }
 0x966   : > { %v1299_v54 = vmul.f32 %v1297_v41, %v5703_v12 }
 0x967   : > { %v1294_v52 = vpop.permute.xlu0 %1293 }
 0x968   : > { %v1298_v53 = vadd.f32 %v1294_v52, %v1040_v51 }
 0x96a   : > { %v1300_v55 = vmul.f32 %v1298_v53, %v5710_v20 }
 0x96b   : > { %v1379_v4 = vpop.permute.xlu0 %1378 }
 0x96c   : > { %v1301_v56 = vpack.c.bf16 %v1300_v55, %v1299_v54 }
 0x96e   : > { %1314 = vrot.lane.b32.xlu1 %v1301_v56, %s5586_s22 }
 0x972   : > { %1380 = vrot.lane.b32.xlu1 %v5931_v58, %s5587_s19 }
 0x9e0   : > { %v1315_v32 = vpop.permute.xlu1 %1314 }
 0x9e1   : > { %4991 = vmatmul.mubr.msk.bf16.vlgmr.msra.gmra.mxu0 %vm556_vm5, %v1315_v32 }
 0x9e2   : > { %4996 = vmatprep.mubr.msk.bf16.mxu0 %vm5582_vm1, %v5581_v1  ;;  %4995 = vmatpush3.bf16.msra.mxu0 %v1401_v40 }
 0x9e3   : > { %5016 = vmatprep.subr.bf16.mxu0 %v5581_v1 }
 0x9e4   : > { %v1381_v5 = vpop.permute.xlu1 %1380 }
 0xaa1   : > { %v1365_v59 = vpop.f32.mrf.mxu0 }
 0xaa2   : > { %v1366_v60 = vadd.f32 %v4348_v44, %v1365_v59 }
 0xaa3   : > { %v4992_v61 = vpop.f32.mrf.mxu0 }
 0xaa4   : > { %v1372_v63 = vmul.f32 %v1366_v60, %v5703_v12 }
 0xaa5   : > { %v1368_v62 = vpop.f32.mrf.mxu0 }
 0xaa6   : > { %v1369_v0 = vadd.f32 %v4348_v44, %v1368_v62  ;;  %v5947_v6 = vadd.f32 %v1379_v4, %v1372_v63  ;;  %v4375_v63 = vld [vmem:[%s6712_s5 + $0x3] ss:$0 sm:$0xff] }
 0xaa7   : > { %v4993_v2 = vpop.f32.mrf.mxu0 }
 0xaa8   : > { %v1373_v3 = vmul.f32 %v1369_v0, %v5710_v20 }
 0xaaa   : > { %v5949_v7 = vadd.f32 %v1381_v5, %v1373_v3 }
 0xaac   : > { %v1386_v8 = vpack.c.bf16 %v5949_v7, %v5947_v6 }
 0xaae   : > { %4997 = vmatmul.mubr.msk.bf16.vlgmr.msra.gmra.mxu0 %vm461_vm3, %v1386_v8 }
 0xaaf   : > { %5020 = vmatprep.mubr.msk.bf16.mxu0 %vm5582_vm1, %v5581_v1 }
 0xb6e   : > { %v1437_v13 = vpop.f32.mrf.mxu0 }
 0xb6f   : > { %v1438_v14 = vadd.f32 %v4354_v11, %v1437_v13 }
 0xb70   : > { %v4998_v15 = vpop.f32.mrf.mxu0 }
 0xb71   : > { %v5968_v17 = vmul.f32 %v1438_v14, %v5703_v12  ;;  %v5317_v15 = vld [vmem:[%s6713_s6 + $0x28] sm:$0xff]  }
 0xb72   : > { %v1440_v18 = vpop.f32.mrf.mxu0  ;;  %5017 = vmatpush3.bf16.msra.mxu0 %v5317_v15 }
 0xb73   : > { %v4750_v19 = vpack.c.bf16 %v5968_v17, %v5968_v17  ;;  %v1441_v21 = vadd.f32 %v4354_v11, %v1440_v18  ;;  %5018 = vmatprep.subr.bf16.mxu0 %v5581_v1 }
 0xb74   : > { %v4999_v23 = vpop.f32.mrf.mxu0 }
 0xb75   : > { %1454 = vst.msk [vmem:[#allocation2 + $0x4] sm:$0xf] %vm449_vm2, %v4750_v19  ;;  %v5974_v24 = vmul.f32 %v1441_v21, %v5710_v20  ;;  %v5318_v19 = vld [vmem:[%s6713_s6 + $0x20] sm:$0xff]  }
 0xb76   : > { %5019 = vmatpush3.bf16.msra.mxu0 %v5318_v19 }
 0xb77   : > { %v4751_v25 = vpack.c.bf16 %v5974_v24, %v5974_v24  ;;  %5024 = vmatprep.subr.bf16.mxu0 %v5581_v1 }
 0xb79   : > { %1455 = vst.msk [vmem:[#allocation2 + $0x8] sm:$0xf] %vm449_vm2, %v4751_v25 }
 0xb7c   : > { %v1457_v28 = vld [vmem:[#allocation2 + $0x4] sm:$0xf] }
 0xb7d   : > { %v4358_v47 = vcombine.low %v1456_v46, %v1457_v28 }
 0xb80   : > { %v1458_v29 = vld [vmem:[#allocation2 + $0x8] sm:$0xf] }
 0xb81   : > { %v4360_v31 = vcombine.low %v1457_v28, %v1458_v29  ;;  %v4359_v41 = vcombine.low %v1458_v29, %v1458_v29 }
 0xb83   : > { %v1482_v33 = vrot.slane %v4360_v31, 5  ;;  %v1470_v34 = vshrl.u32 %v4360_v31, 16  ;;  %v1473_v35 = vshll.u32 %v4360_v31, 16 }
 0xb85   : > { %1485 = vrot.lane.b32.xlu1 %v1482_v33, %s5584_s13  ;;  %v1472_v16 = vrot.slane %v1470_v34, 4  ;;  %v1475_v42 = vrot.slane %v1473_v35, 5  ;;  %v1484_v45 = vsel %vm548_vm4, %v1482_v33, %v1483_v43  ;;  %v5322_v33 = vld [vmem:[%s6711_s4 + $0xe8] sm:$0xff]   ;;  %v5323_v34 = vld [vmem:[%s6711_s4 + $0xe0] sm:$0xff]   ;;  %v5324_v35 = vld [vmem:[%s6711_s4 + $0xd8] sm:$0xff]  }
 0xb87   : > { %v1476_v22 = vor.u32 %v1475_v42, %v1472_v16 }
 0xb89   : > { %1477 = vrot.lane.b32.xlu0 %v1476_v22, %s5585_s14 }
 0xb8d   : > { %1487 = vrot.lane.b32.xlu0 %v1484_v45, %s5584_s13 }
 0xbf7   : > { %v1486_v50 = vpop.permute.xlu1 %1485 }
 0xbfb   : > { %v1478_v48 = vpop.permute.xlu0 %1477 }
 0xbfc   : > { %v1491_v36 = vsel %vm556_vm5, %v4358_v47, %v1478_v48  ;;  %v1493_v54 = vsel %vm556_vm5, %v4359_v41, %v1478_v48 }
 0xbfd   : > { %v1495_v51 = vsel %vm562_vm6, %v1491_v36, %v1486_v50 }
 0xbfe   : > { %v1519_v52 = vshrl.u32 %v1495_v51, 16  ;;  %v1522_v53 = vshll.u32 %v1495_v51, 16  ;;  %v5328_v51 = vld [vmem:[%s6711_s4 + $0xc8] sm:$0xff]  }
 0xbff   : > { %v1488_v55 = vpop.permute.xlu0 %1487 }
 0xc00   : > { %v1497_v56 = vsel %vm562_vm6, %v1493_v54, %v1488_v55  ;;  %v1521_v57 = vrot.slane %v1519_v52, 3  ;;  %v1524_v32 = vrot.slane %v1522_v53, 4  ;;  %v5321_v53 = vld [vmem:[#allocation2 + $0xc] ss:$0 sps:$4 sm:$0x11]  }
 0xc01   : > { %v1526_v37 = vshrl.u32 %v1497_v56, 16  ;;  %v1529_v40 = vshll.u32 %v1497_v56, 16 }
 0xc02   : > { %v1525_v60 = vor.u32 %v1524_v32, %v1521_v57 }
 0xc03   : > { %v1528_v44 = vrot.slane %v1526_v37, 3  ;;  %v1531_v59 = vrot.slane %v1529_v40, 4  ;;  %v1751_v40 = vrot.slane %v5321_v53, 6 }
 0xc05   : > { %v1532_v61 = vor.u32 %v1531_v59, %v1528_v44  ;;  %v1724_v59 = vld [vmem:[#allocation2] sm:$0x8] }
 0xc07   : > { %v1533_v62 = vsel %vm586_vm7, %v1525_v60, %v1532_v61 }
 0xc08   : > { %5013 = vmatmul.mubr.msk.bf16.vlgmr.msra.gmra.mxu1 %vm638_vm8, %v1533_v62 }
 0xc09   : > { %5044 = vmatprep.mubr.msk.bf16.mxu1 %vm5582_vm1, %v5581_v1 }
 0xcc8   : > { %v1607_v0 = vpop.f32.mrf.mxu1 }
 0xcc9   : > { %v1608_v2 = vadd.f32 %v4375_v63, %v1607_v0 }
 0xcca   : > { %v5014_v3 = vpop.f32.mrf.mxu1 }
 0xccb   : > { %v4383_v4 = vmul.f32 -1.442695, %v1608_v2 }
 0xccc   : > { %v1610_v5 = vpop.f32.mrf.mxu1 }
 0xccd   : > { %5463 = vpow2.f32 %v4383_v4  ;;  %v1611_v8 = vadd.f32 %v4375_v63, %v1610_v5 }
 0xcce   : > { %v5015_v9 = vpop.f32.mrf.mxu1 }
 0xccf   : > { %v4384_v10 = vmul.f32 -1.442695, %v1611_v8 }
 0xcd1   : > { %5465 = vpow2.f32 %v4384_v10 }
 0xcda   : > { %v5464_v11 = vpop.eup %5463 }
 0xcdb   : > { %v1622_v13 = vadd.f32 1.0, %v5464_v11  ;;  %v4414_v11 = vld [vmem:[%s6712_s5 + $0x4] ss:$0 sm:$0xff] }
 0xcdd   : > { %5467 = vrcp.f32 %v1622_v13 }
 0xcde   : > { %v5466_v14 = vpop.eup %5465 }
 0xcdf   : > { %v1623_v18 = vadd.f32 1.0, %v5466_v14 }
 0xce1   : > { %5469 = vrcp.f32 %v1623_v18 }
 0xce2   : > { %5471 = vtanh.f32 %v1608_v2 }
 0xce3   : > { %5473 = vtanh.f32 %v1611_v8 }
 0xcea   : > { %v5468_v21 = vpop.eup %5467 }
 0xceb   : > { %1630 = vrot.lane.b32.xlu1 %v5468_v21, %s5586_s22 }
 0xcee   : > { %v5470_v23 = vpop.eup %5469 }
 0xcef   : > { %1632 = vrot.lane.b32.xlu0 %v5470_v23, %s5586_s22  ;;  %v5472_v26 = vpop.eup %5471 }
 0xcf0   : > { %v5474_v27 = vpop.eup %5473 }
 0xd5d   : > { %v1631_v25 = vpop.permute.xlu1 %1630 }
 0xd5e   : > { %v1636_v29 = vmul.f32 %v5472_v26, %v1631_v25 }
 0xd61   : > { %v1633_v28 = vpop.permute.xlu0 %1632 }
 0xd62   : > { %v1637_v30 = vmul.f32 %v5474_v27, %v1633_v28 }
 0xd64   : > { %v1638_v31 = vpack.c.bf16 %v1637_v30, %v1636_v29  ;;  %v5330_v29 = vld [vmem:[%s6713_s6 + $0x38] sm:$0xff]  }
 0xd65   : > { %5041 = vmatpush3.bf16.msra.mxu1 %v5330_v29 }
 0xd66   : > { %5021 = vmatmul.mubr.msk.bf16.vlgmr.msra.gmra.mxu0 %vm556_vm5, %v1638_v31  ;;  %5042 = vmatprep.subr.bf16.mxu1 %v5581_v1  ;;  %v5331_v31 = vld [vmem:[%s6713_s6 + $0x30] sm:$0xff]  }
 0xd67   : > { %5036 = vmatprep.mubr.msk.bf16.mxu0 %vm5582_vm1, %v5581_v1  ;;  %5025 = vmatpush3.bf16.msra.mxu0 %v5322_v33 }
 0xd68   : > { %5026 = vmatprep.subr.bf16.mxu0 %v5581_v1 }
 0xd69   : > { %5043 = vmatpush3.bf16.msra.mxu1 %v5331_v31 }
 0xd6a   : > { %5048 = vmatprep.subr.bf16.mxu1 %v5581_v1 }
 0xd6b   : > { %5027 = vmatpush3.bf16.msra.mxu0 %v5323_v34 }
 0xd6c   : > { %5028 = vmatprep.subr.bf16.mxu0 %v5581_v1 }
 0xd6f   : > { %5029 = vmatpush3.bf16.msra.mxu0 %v5324_v35 }
 0xd70   : > { %5030 = vmatprep.subr.bf16.mxu0 %v5581_v1 }
 0xd73   : > { %5031 = vmatpush3.bf16.msra.mxu0 %v5325_v38 }
 0xd74   : > { %5032 = vmatprep.subr.bf16.mxu0 %v5581_v1 }
 0xd77   : > { %5033 = vmatpush3.bf16.msra.mxu0 %v5328_v51  ;;  %v4429_v51 = vld [vmem:[%s6714_s7 + $0x3] ss:$0 sm:$0xff] }
 0xd78   : > { %5034 = vmatprep.subr.bf16.mxu0 %v5581_v1 }
 0xe26   : > { %v1701_v16 = vpop.f32.mrf.mxu0 }
 0xe27   : > { %v6042_v42 = vadd.f32 %v4390_v39, %v1701_v16 }
 0xe28   : > { %v5022_v22 = vpop.f32.mrf.mxu0 }
 0xe29   : > { %v1708_v43 = vadd.f32 %v6042_v42, %v5968_v17 }
 0xe2a   : > { %v1704_v45 = vpop.f32.mrf.mxu0 }
 0xe2b   : > { %v6047_v46 = vmul.f32 %v1708_v43, %v5703_v12  ;;  %v6049_v47 = vadd.f32 %v4390_v39, %v1704_v45 }
 0xe2c   : > { %v5023_v48 = vpop.f32.mrf.mxu0 }
 0xe2d   : > { %v4752_v50 = vpack.c.bf16 %v6047_v46, %v6047_v46  ;;  %v1709_v36 = vadd.f32 %v6049_v47, %v5974_v24  ;;  %v5329_v24 = vld [vmem:[%s6711_s4 + $0xc0] sm:$0xff]   ;;  %v5335_v48 = vld [vmem:[%s6711_s4 + $0x118] sm:$0xff]  }
 0xe2e   : > { %5035 = vmatpush3.bf16.msra.mxu0 %v5329_v24 }
 0xe2f   : > { %1722 = vst.msk [vmem:[#allocation2 + $0x4] sm:$0xf] %vm449_vm2, %v4752_v50  ;;  %v6057_v41 = vmul.f32 %v1709_v36, %v5710_v20  ;;  %5064 = vmatprep.subr.bf16.mxu0 %v5581_v1  ;;  %v5336_v50 = vld [vmem:[%s6711_s4 + $0x110] sm:$0xff]   ;;  %v5337_v36 = vld [vmem:[%s6711_s4 + $0x108] sm:$0xff]  }
 0xe31   : > { %v4753_v17 = vpack.c.bf16 %v6057_v41, %v6057_v41 }
 0xe33   : > { %1723 = vst.msk [vmem:[#allocation2 + $0x8] sm:$0xf] %vm449_vm2, %v4753_v17  ;;  %v5338_v17 = vld [vmem:[%s6711_s4 + $0x100] sm:$0xff]  }
 0xe36   : > { %v1728_v52 = vld [vmem:[#allocation2 + $0x4] sm:$0xe] }
 0xe37   : > { %v1725_v55 = vld [vmem:[#allocation2 + $0x4] sm:$0xf] }
 0xe38   : > { %v4396_v60 = vcombine.low %v1724_v59, %v1725_v55 }
 0xe3a   : > { %v1727_v54 = vld [vmem:[#allocation2 + $0x8] sm:$0xf] }
 0xe3b   : > { %v4399_v56 = vcombine.low %v1728_v52, %v1727_v54  ;;  %v4398_v57 = vcombine.low %v1725_v55, %v1727_v54  ;;  %v5327_v0 = vld [vmem:[#allocation2 + $0x8] ss:$0 sps:$4 sm:$0x77]  }
 0xe3d   : > { %v1750_v32 = vrot.slane %v4399_v56, 6  ;;  %v1741_v37 = vrot.slane %v4398_v57, 5 }
 0xe3f   : > { %1753 = vrot.lane.b32.xlu0 %v1750_v32, %s5584_s13  ;;  %1742 = vrot.lane.b32.xlu1 %v1741_v37, %s5585_s14  ;;  %v1752_v44 = vsel %vm465_vm0, %v1750_v32, %v1751_v40 }
 0xe43   : > { %1755 = vrot.lane.b32.xlu1 %v1752_v44, %s5584_s13 }
 0xeb1   : > { %v1754_v61 = vpop.permute.xlu0 %1753  ;;  %v1743_v62 = vpop.permute.xlu1 %1742 }
 0xeb2   : > { %v1759_v63 = vsel %vm556_vm5, %v4396_v60, %v1743_v62  ;;  %v1761_v3 = vsel %vm556_vm5, %v5327_v0, %v1743_v62  ;;  %v5341_v60 = vld [vmem:[%s6711_s4 + $0xf8] sm:$0xff]  }
 0xeb3   : > { %v1763_v2 = vsel %vm562_vm6, %v1759_v63, %v1754_v61 }
 0xeb4   : > { %v1789_v8 = vrot.slane %v1763_v2, 3 }
 0xeb5   : > { %v1756_v4 = vpop.permute.xlu1 %1755 }
 0xeb6   : > { %v1765_v5 = vsel %vm562_vm6, %v1761_v3, %v1756_v4  ;;  %v5334_v3 = vld [vmem:[#allocation2 + $0xc] ss:$0 sps:$4 sm:$0x33]   ;;  %v1982_v4 = vld [vmem:[#allocation2] sm:$0xc] }
 0xeb7   : > { %v1790_v9 = vrot.slane %v1765_v5, 3 }
 0xeb9   : > { %v1791_v10 = vsel %vm857_vm9, %v1789_v8, %v1790_v9 }
 0xeba   : > { %5037 = vmatmul.mubr.msk.bf16.vlgmr.msra.gmra.mxu0 %vm638_vm8, %v1791_v10 }
 0xebb   : > { %5068 = vmatprep.mubr.msk.bf16.mxu0 %vm5582_vm1, %v5581_v1 }
 0xf7a   : > { %v1865_v13 = vpop.f32.mrf.mxu0 }
 0xf7b   : > { %v1866_v14 = vadd.f32 %v4414_v11, %v1865_v13 }
 0xf7c   : > { %v5038_v15 = vpop.f32.mrf.mxu0 }
 0xf7d   : > { %v4422_v18 = vmul.f32 -1.442695, %v1866_v14 }
 0xf7e   : > { %v1868_v19 = vpop.f32.mrf.mxu0 }
 0xf7f   : > { %5475 = vpow2.f32 %v4422_v18  ;;  %v1869_v21 = vadd.f32 %v4414_v11, %v1868_v19 }
 0xf80   : > { %v5039_v23 = vpop.f32.mrf.mxu0 }
 0xf81   : > { %v4423_v25 = vmul.f32 -1.442695, %v1869_v21 }
 0xf83   : > { %5477 = vpow2.f32 %v4423_v25  ;;  %v4453_v25 = vld [vmem:[%s6712_s5 + $0x5] ss:$0 sm:$0xff] }
 0xf8c   : > { %v5476_v26 = vpop.eup %5475 }
 0xf8d   : > { %v1880_v27 = vadd.f32 1.0, %v5476_v26 }
 0xf8f   : > { %5479 = vrcp.f32 %v1880_v27 }
 0xf90   : > { %v5478_v28 = vpop.eup %5477 }
 0xf91   : > { %v1881_v30 = vadd.f32 1.0, %v5478_v28 }
 0xf93   : > { %5481 = vrcp.f32 %v1881_v30 }
 0xf94   : > { %5483 = vtanh.f32 %v1866_v14 }
 0xf95   : > { %5485 = vtanh.f32 %v1869_v21 }
 0xf9c   : > { %v5480_v33 = vpop.eup %5479 }
 0xf9d   : > { %1888 = vrot.lane.b32.xlu0 %v5480_v33, %s5586_s22 }
 0xfa0   : > { %v5482_v34 = vpop.eup %5481 }
 0xfa1   : > { %1890 = vrot.lane.b32.xlu1 %v5482_v34, %s5586_s22  ;;  %v5484_v38 = vpop.eup %5483 }
 0xfa2   : > { %v5486_v39 = vpop.eup %5485 }
0x100f   : > { %v1889_v35 = vpop.permute.xlu0 %1888 }
0x1010   : > { %v1894_v22 = vmul.f32 %v5484_v38, %v1889_v35 }
0x1013   : > { %v1891_v16 = vpop.permute.xlu1 %1890 }
0x1014   : > { %v1895_v43 = vmul.f32 %v5486_v39, %v1891_v16  ;;  %v5343_v16 = vld [vmem:[%s6715_s8 + $0x18] sm:$0xff]  }
0x1015   : > { %5065 = vmatpush3.bf16.msra.mxu0 %v5343_v16  ;;  %v5354_v16 = vld [vmem:[%s6711_s4 + $0x130] sm:$0xff]  }
0x1016   : > { %v1896_v45 = vpack.c.bf16 %v1895_v43, %v1894_v22  ;;  %5066 = vmatprep.subr.bf16.mxu0 %v5581_v1  ;;  %v5344_v43 = vld [vmem:[%s6715_s8 + $0x10] sm:$0xff]  }
0x1018   : > { %5045 = vmatmul.mubr.msk.bf16.vlgmr.msra.gmra.mxu1 %vm556_vm5, %v1896_v45 }
0x1019   : > { %5060 = vmatprep.mubr.msk.bf16.mxu1 %vm5582_vm1, %v5581_v1  ;;  %5049 = vmatpush3.bf16.msra.mxu1 %v5335_v48 }
0x101a   : > { %5050 = vmatprep.subr.bf16.mxu1 %v5581_v1  ;;  %5067 = vmatpush3.bf16.msra.mxu0 %v5344_v43 }
0x101b   : > { %5072 = vmatprep.subr.bf16.mxu0 %v5581_v1 }
0x101d   : > { %5051 = vmatpush3.bf16.msra.mxu1 %v5336_v50 }
0x101e   : > { %5052 = vmatprep.subr.bf16.mxu1 %v5581_v1 }
0x1021   : > { %5053 = vmatpush3.bf16.msra.mxu1 %v5337_v36 }
0x1022   : > { %5054 = vmatprep.subr.bf16.mxu1 %v5581_v1 }
0x1025   : > { %5055 = vmatpush3.bf16.msra.mxu1 %v5338_v17 }
0x1026   : > { %5056 = vmatprep.subr.bf16.mxu1 %v5581_v1 }
0x1029   : > { %5057 = vmatpush3.bf16.msra.mxu1 %v5341_v60 }
0x102a   : > { %5058 = vmatprep.subr.bf16.mxu1 %v5581_v1 }
0x10d8   : > { %v1959_v24 = vpop.f32.mrf.mxu1 }
0x10d9   : > { %v6117_v52 = vadd.f32 %v4429_v51, %v1959_v24 }
0x10da   : > { %v5046_v53 = vpop.f32.mrf.mxu1 }
0x10db   : > { %v1966_v54 = vadd.f32 %v6117_v52, %v6047_v46  ;;  %v5342_v46 = vld [vmem:[%s6711_s4 + $0xf0] sm:$0xff]  }
0x10dc   : > { %v1962_v55 = vpop.f32.mrf.mxu1  ;;  %5059 = vmatpush3.bf16.msra.mxu1 %v5342_v46 }
0x10dd   : > { %v1968_v56 = vmul.f32 %v1966_v54, %v5703_v12  ;;  %v6122_v57 = vadd.f32 %v4429_v51, %v1962_v55  ;;  %5086 = vmatprep.subr.bf16.mxu1 %v5581_v1  ;;  %v4468_v55 = vld [vmem:[%s6716_s9 + $0x1] ss:$0 sm:$0xff] }
0x10de   : > { %v5047_v32 = vpop.f32.mrf.mxu1 }
0x10df   : > { %v4754_v37 = vpack.c.bf16 %v1968_v56, %v1968_v56  ;;  %v1967_v40 = vadd.f32 %v6122_v57, %v6057_v41  ;;  %v5345_v32 = vld [vmem:[%s6717_s10 + $0x18] sm:$0xff]  }
0x10e1   : > { %1980 = vst.msk [vmem:[#allocation2 + $0x4] sm:$0xf] %vm449_vm2, %v4754_v37  ;;  %v1969_v44 = vmul.f32 %v1967_v40, %v5710_v20 }
0x10e3   : > { %v4755_v59 = vpack.c.bf16 %v1969_v44, %v1969_v44  ;;  %v5346_v44 = vld [vmem:[%s6717_s10 + $0x10] sm:$0xff]  }
0x10e5   : > { %1981 = vst.msk [vmem:[#allocation2 + $0x8] sm:$0xf] %vm449_vm2, %v4755_v59 }
0x10e8   : > { %v1986_v41 = vld [vmem:[#allocation2 + $0x4] sm:$0xc] }
0x10e9   : > { %v1983_v62 = vld [vmem:[#allocation2 + $0x4] sm:$0xf] }
0x10ea   : > { %v4435_v5 = vcombine.low %v1982_v4, %v1983_v62 }
0x10ec   : > { %v1985_v61 = vld [vmem:[#allocation2 + $0x8] sm:$0xf] }
0x10ed   : > { %v4438_v63 = vcombine.low %v1986_v41, %v1985_v61  ;;  %v4437_v0 = vcombine.low %v1983_v62, %v1985_v61  ;;  %v5340_v11 = vld [vmem:[#allocation2 + $0x8] ss:$0 sps:$4 sm:$0x33]   ;;  %v1970_v61 = vadd.f32 %v6117_v52, %v6042_v42  ;;  %v4481_v42 = vld [vmem:[%s6709_s2 + $0x4] sm:$0x3] }
0x10ee   : > { %v4477_v52 = vld [vmem:[%s6718_s11 + $0x1] ss:$0 sm:$0xff] }
0x10ef   : > { %2008 = vrot.lane.b32.xlu1 %v4438_v63, %s5584_s13  ;;  %v1999_v2 = vrot.slane %v4437_v0, 6  ;;  %v1971_v63 = vadd.f32 %v6122_v57, %v6049_v47  ;;  %v2325_v47 = vsel %vm465_vm0, %v4481_v42, 0 }
0x10f1   : > { %2000 = vrot.lane.b32.xlu0 %v1999_v2, %s5585_s14 }
0x10f5   : > { %2010 = vrot.lane.b32.xlu0 %v5334_v3, %s5584_s13 }
0x1161   : > { %v2009_v10 = vpop.permute.xlu1 %2008 }
0x1163   : > { %v2001_v8 = vpop.permute.xlu0 %2000 }
0x1164   : > { %v2014_v9 = vsel %vm556_vm5, %v4435_v5, %v2001_v8  ;;  %v2016_v14 = vsel %vm556_vm5, %v5340_v11, %v2001_v8 }
0x1165   : > { %v2018_v13 = vsel %vm562_vm6, %v2014_v9, %v2009_v10 }
0x1166   : > { %v2044_v19 = vrot.slane %v2018_v13, 2 }
0x1167   : > { %v2011_v15 = vpop.permute.xlu0 %2010 }
0x1168   : > { %v2020_v18 = vsel %vm562_vm6, %v2016_v14, %v2011_v15 }
0x1169   : > { %v2045_v21 = vrot.slane %v2020_v18, 2 }
0x116b   : > { %v2046_v23 = vsel %vm1113_vm10, %v2044_v19, %v2045_v21 }
0x116c   : > { %5061 = vmatmul.mubr.msk.bf16.vlgmr.msra.gmra.mxu1 %vm638_vm8, %v2046_v23 }
0x116d   : > { %5098 = vmatprep.mubr.msk.bf16.mxu1 %vm5582_vm1, %v5581_v1 }
0x122c   : > { %v2120_v26 = vpop.f32.mrf.mxu1 }
0x122d   : > { %v2121_v27 = vadd.f32 %v4453_v25, %v2120_v26 }
0x122e   : > { %v5062_v28 = vpop.f32.mrf.mxu1 }
0x122f   : > { %v4461_v29 = vmul.f32 -1.442695, %v2121_v27 }
0x1230   : > { %v2123_v30 = vpop.f32.mrf.mxu1 }
0x1231   : > { %5487 = vpow2.f32 %v4461_v29  ;;  %v2124_v31 = vadd.f32 %v4453_v25, %v2123_v30  ;;  %v5349_v25 = vld [vmem:[%s6711_s4 + $0x148] sm:$0xff]  }
0x1232   : > { %v5063_v33 = vpop.f32.mrf.mxu1  ;;  %5087 = vmatpush3.bf16.msra.mxu1 %v5349_v25 }
0x1233   : > { %v4462_v34 = vmul.f32 -1.442695, %v2124_v31  ;;  %5088 = vmatprep.subr.bf16.mxu1 %v5581_v1 }
0x1235   : > { %5489 = vpow2.f32 %v4462_v34 }
0x123e   : > { %v5488_v35 = vpop.eup %5487 }
0x123f   : > { %v2135_v38 = vadd.f32 1.0, %v5488_v35 }
0x1241   : > { %5491 = vrcp.f32 %v2135_v38 }
0x1242   : > { %v5490_v39 = vpop.eup %5489 }
0x1243   : > { %v2136_v22 = vadd.f32 1.0, %v5490_v39  ;;  %v5351_v39 = vld [vmem:[%s6711_s4 + $0x138] sm:$0xff]  }
0x1245   : > { %5493 = vrcp.f32 %v2136_v22 }
0x1246   : > { %5495 = vtanh.f32 %v2121_v27 }
0x1247   : > { %5497 = vtanh.f32 %v2124_v31 }
0x124e   : > { %v5492_v45 = vpop.eup %5491 }
0x124f   : > { %2143 = vrot.lane.b32.xlu1 %v5492_v45, %s5586_s22  ;;  %v5355_v45 = vld [vmem:[%s6711_s4 + $0x128] sm:$0xff]  }
0x1252   : > { %v5494_v48 = vpop.eup %5493 }
0x1253   : > { %2145 = vrot.lane.b32.xlu0 %v5494_v48, %s5586_s22  ;;  %v5496_v36 = vpop.eup %5495 }
0x1254   : > { %v5498_v17 = vpop.eup %5497 }
0x12c1   : > { %v2144_v50 = vpop.permute.xlu1 %2143 }
0x12c2   : > { %v2149_v24 = vmul.f32 %v5496_v36, %v2144_v50 }
0x12c5   : > { %v2146_v51 = vpop.permute.xlu0 %2145 }
0x12c6   : > { %v2150_v53 = vmul.f32 %v5498_v17, %v2146_v51  ;;  %v5348_v51 = vld [vmem:[#allocation2 + $0xc] ss:$0 sps:$4 sm:$0x11]  }
0x12c8   : > { %v2151_v54 = vpack.c.bf16 %v2150_v53, %v2149_v24  ;;  %v5356_v24 = vld [vmem:[%s6711_s4 + $0x120] sm:$0xff]  }
0x12ca   : > { %5069 = vmatmul.mubr.msk.bf16.vlgmr.msra.gmra.mxu0 %vm556_vm5, %v2151_v54 }
0x12cb   : > { %5076 = vmatprep.mubr.msk.bf16.mxu0 %vm5582_vm1, %v5581_v1  ;;  %5073 = vmatpush3.bf16.msra.mxu0 %v5345_v32 }
0x12cc   : > { %5074 = vmatprep.subr.bf16.mxu0 %v5581_v1 }
0x12cf   : > { %5075 = vmatpush3.bf16.msra.mxu0 %v5346_v44 }
0x12d0   : > { %5080 = vmatprep.subr.bf16.mxu0 %v5581_v1 }
0x138a   : > { %v2214_v56 = vpop.f32.mrf.mxu0 }
0x138b   : > { %v2215_v37 = vadd.f32 %v4468_v55, %v2214_v56  ;;  %v2407_v56 = vrot.slane %v5348_v51, 5  ;;  %v5365_v51 = vld [vmem:[%s6711_s4 + $0x160] sm:$0xff]  }
0x138c   : > { %v5070_v40 = vpop.f32.mrf.mxu0 }
0x138d   : > { %2223 = vrot.lane.b32.xlu1 %v2215_v37, %s5585_s14  ;;  %v2380_v37 = vld [vmem:[#allocation2] sm:$0x8] }
0x138e   : > { %v2217_v59 = vpop.f32.mrf.mxu0 }
0x138f   : > { %v2218_v60 = vadd.f32 %v4468_v55, %v2217_v59 }
0x1390   : > { %v5071_v46 = vpop.f32.mrf.mxu0 }
0x1391   : > { %2225 = vrot.lane.b32.xlu0 %v2218_v60, %s5585_s14 }
0x13ff   : > { %v2224_v41 = vpop.permute.xlu1 %2223 }
0x1400   : > { %v2229_v62 = vadd.f32 %v2224_v41, %v1970_v61 }
0x1402   : > { %v2231_v3 = vmul.f32 %v2229_v62, %v5703_v12 }
0x1403   : > { %v2226_v0 = vpop.permute.xlu0 %2225 }
0x1404   : > { %v2230_v2 = vadd.f32 %v2226_v0, %v1971_v63 }
0x1406   : > { %v2232_v4 = vmul.f32 %v2230_v2, %v5710_v20 }
0x1408   : > { %v2233_v5 = vpack.c.bf16 %v2232_v4, %v2231_v3 }
0x140a   : > { %2248 = vrot.lane.b32.xlu1 %v2233_v5, %s5586_s22 }
0x147c   : > { %v2249_v8 = vpop.permute.xlu1 %2248 }
0x147d   : > { %5077 = vmatmul.mubr.msk.bf16.vlgmr.msra.gmra.mxu0 %vm556_vm5, %v2249_v8 }
0x147e   : > { %5082 = vmatprep.mubr.msk.bf16.mxu0 %vm5582_vm1, %v5581_v1  ;;  %5081 = vmatpush3.bf16.msra.mxu0 %v2325_v47 }
0x147f   : > { %5102 = vmatprep.subr.bf16.mxu0 %v5581_v1 }
0x153d   : > { %v2299_v57 = vpop.f32.mrf.mxu0 }
0x153e   : > { %v2300_v9 = vadd.f32 %v4477_v52, %v2299_v57 }
0x153f   : > { %v5078_v10 = vpop.f32.mrf.mxu0 }
0x1540   : > { %v2306_v13 = vmul.f32 %v2300_v9, %v5703_v12  ;;  %v4504_v10 = vld [vmem:[%s6712_s5 + $0x6] ss:$0 sm:$0xff] }
0x1541   : > { %v2302_v11 = vpop.f32.mrf.mxu0 }
0x1542   : > { %v2303_v14 = vadd.f32 %v4477_v52, %v2302_v11  ;;  %v6198_v19 = vadd.f32 %v2306_v13, %v5918_v49  ;;  %v5350_v49 = vld [vmem:[%s6711_s4 + $0x140] sm:$0xff]  }
0x1543   : > { %v5079_v15 = vpop.f32.mrf.mxu0  ;;  %5089 = vmatpush3.bf16.msra.mxu1 %v5350_v49 }
0x1544   : > { %v2307_v18 = vmul.f32 %v2303_v14, %v5710_v20  ;;  %5090 = vmatprep.subr.bf16.mxu1 %v5581_v1 }
0x1546   : > { %v6201_v21 = vadd.f32 %v2307_v18, %v5931_v58  ;;  %v4483_v58 = vld [vmem:[%s6710_s3 + $0x2] ss:$0 sm:$0xff] }
0x1547   : > { %5091 = vmatpush3.bf16.msra.mxu1 %v5351_v39 }
0x1548   : > { %v2310_v23 = vpack.c.bf16 %v6201_v21, %v6198_v19  ;;  %5092 = vmatprep.subr.bf16.mxu1 %v5581_v1 }
0x154a   : > { %5083 = vmatmul.mubr.msk.bf16.vlgmr.msra.gmra.mxu0 %vm461_vm3, %v2310_v23 }
0x154b   : > { %5106 = vmatprep.mubr.msk.bf16.mxu0 %vm5582_vm1, %v5581_v1  ;;  %5093 = vmatpush3.bf16.msra.mxu1 %v5354_v16 }
0x154c   : > { %5094 = vmatprep.subr.bf16.mxu1 %v5581_v1 }
0x154f   : > { %5095 = vmatpush3.bf16.msra.mxu1 %v5355_v45 }
0x1550   : > { %5096 = vmatprep.subr.bf16.mxu1 %v5581_v1 }
0x1553   : > { %5097 = vmatpush3.bf16.msra.mxu1 %v5356_v24  ;;  %v4519_v24 = vld [vmem:[%s6714_s7 + $0x4] ss:$0 sm:$0xff] }
0x1554   : > { %5126 = vmatprep.subr.bf16.mxu1 %v5581_v1 }
0x160a   : > { %v2361_v26 = vpop.f32.mrf.mxu0 }
0x160b   : > { %v2362_v27 = vadd.f32 %v4483_v58, %v2361_v26 }
0x160c   : > { %v5084_v28 = vpop.f32.mrf.mxu0 }
0x160d   : > { %v6220_v29 = vmul.f32 %v2362_v27, %v5703_v12  ;;  %v5357_v28 = vld [vmem:[%s6713_s6 + $0x48] sm:$0xff]  }
0x160e   : > { %v2364_v30 = vpop.f32.mrf.mxu0  ;;  %5103 = vmatpush3.bf16.msra.mxu0 %v5357_v28 }
0x160f   : > { %v4756_v31 = vpack.c.bf16 %v6220_v29, %v6220_v29  ;;  %v2365_v33 = vadd.f32 %v4483_v58, %v2364_v30  ;;  %5104 = vmatprep.subr.bf16.mxu0 %v5581_v1 }
0x1610   : > { %v5085_v34 = vpop.f32.mrf.mxu0 }
0x1611   : > { %2378 = vst.msk [vmem:[#allocation2 + $0x4] sm:$0xf] %vm449_vm2, %v4756_v31  ;;  %v6226_v35 = vmul.f32 %v2365_v33, %v5710_v20  ;;  %v5358_v31 = vld [vmem:[%s6713_s6 + $0x40] sm:$0xff]  }
0x1612   : > { %5105 = vmatpush3.bf16.msra.mxu0 %v5358_v31 }
0x1613   : > { %v4757_v38 = vpack.c.bf16 %v6226_v35, %v6226_v35  ;;  %5110 = vmatprep.subr.bf16.mxu0 %v5581_v1 }
0x1615   : > { %2379 = vst.msk [vmem:[#allocation2 + $0x8] sm:$0xf] %vm449_vm2, %v4757_v38 }
0x1618   : > { %v2381_v22 = vld [vmem:[#allocation2 + $0x4] sm:$0xf] }
0x1619   : > { %v4487_v40 = vcombine.low %v2380_v37, %v2381_v22 }
0x161c   : > { %v2382_v43 = vld [vmem:[#allocation2 + $0x8] sm:$0xf] }
0x161d   : > { %v4489_v48 = vcombine.low %v2381_v22, %v2382_v43  ;;  %v4488_v46 = vcombine.low %v2382_v43, %v2382_v43 }
0x161f   : > { %v2406_v50 = vrot.slane %v4489_v48, 5  ;;  %v2394_v36 = vshrl.u32 %v4489_v48, 16  ;;  %v2397_v17 = vshll.u32 %v4489_v48, 16 }
0x1621   : > { %2409 = vrot.lane.b32.xlu1 %v2406_v50, %s5584_s13  ;;  %v2396_v53 = vrot.slane %v2394_v36, 4  ;;  %v2399_v54 = vrot.slane %v2397_v17, 5  ;;  %v2408_v32 = vsel %vm548_vm4, %v2406_v50, %v2407_v56  ;;  %v5362_v50 = vld [vmem:[%s6711_s4 + $0x178] sm:$0xff]   ;;  %v5363_v36 = vld [vmem:[%s6711_s4 + $0x170] sm:$0xff]   ;;  %v5364_v17 = vld [vmem:[%s6711_s4 + $0x168] sm:$0xff]  }
0x1623   : > { %v2400_v55 = vor.u32 %v2399_v54, %v2396_v53 }
0x1625   : > { %2401 = vrot.lane.b32.xlu0 %v2400_v55, %s5585_s14 }
0x1629   : > { %2411 = vrot.lane.b32.xlu0 %v2408_v32, %s5584_s13 }
0x1693   : > { %v2410_v59 = vpop.permute.xlu1 %2409 }
0x1697   : > { %v2402_v44 = vpop.permute.xlu0 %2401 }
0x1698   : > { %v2415_v60 = vsel %vm556_vm5, %v4487_v40, %v2402_v44  ;;  %v2417_v63 = vsel %vm556_vm5, %v4488_v46, %v2402_v44 }
0x1699   : > { %v2419_v41 = vsel %vm562_vm6, %v2415_v60, %v2410_v59 }
0x169a   : > { %v2443_v61 = vshrl.u32 %v2419_v41, 16  ;;  %v2446_v62 = vshll.u32 %v2419_v41, 16  ;;  %v5368_v41 = vld [vmem:[%s6711_s4 + $0x158] sm:$0xff]  }
0x169b   : > { %v2412_v0 = vpop.permute.xlu0 %2411 }
0x169c   : > { %v2421_v2 = vsel %vm562_vm6, %v2417_v63, %v2412_v0  ;;  %v2445_v3 = vrot.slane %v2443_v61, 3  ;;  %v2448_v4 = vrot.slane %v2446_v62, 4  ;;  %v5361_v62 = vld [vmem:[#allocation2 + $0xc] ss:$0 sps:$4 sm:$0x11]  }
0x169d   : > { %v2450_v5 = vshrl.u32 %v2421_v2, 16  ;;  %v2453_v8 = vshll.u32 %v2421_v2, 16 }
0x169e   : > { %v2449_v52 = vor.u32 %v2448_v4, %v2445_v3 }
0x169f   : > { %v2452_v42 = vrot.slane %v2450_v5, 3  ;;  %v2455_v47 = vrot.slane %v2453_v8, 4  ;;  %v2675_v8 = vrot.slane %v5361_v62, 6 }
0x16a1   : > { %v2456_v57 = vor.u32 %v2455_v47, %v2452_v42  ;;  %v2648_v47 = vld [vmem:[#allocation2] sm:$0x8] }
0x16a3   : > { %v2457_v9 = vsel %vm586_vm7, %v2449_v52, %v2456_v57 }
0x16a4   : > { %5099 = vmatmul.mubr.msk.bf16.vlgmr.msra.gmra.mxu1 %vm638_vm8, %v2457_v9 }
0x16a5   : > { %5130 = vmatprep.mubr.msk.bf16.mxu1 %vm5582_vm1, %v5581_v1 }
0x1764   : > { %v2531_v11 = vpop.f32.mrf.mxu1 }
0x1765   : > { %v2532_v13 = vadd.f32 %v4504_v10, %v2531_v11 }
0x1766   : > { %v5100_v14 = vpop.f32.mrf.mxu1 }
0x1767   : > { %v4512_v15 = vmul.f32 -1.442695, %v2532_v13 }
0x1768   : > { %v2534_v18 = vpop.f32.mrf.mxu1 }
0x1769   : > { %5499 = vpow2.f32 %v4512_v15  ;;  %v2535_v23 = vadd.f32 %v4504_v10, %v2534_v18 }
0x176a   : > { %v5101_v25 = vpop.f32.mrf.mxu1 }
0x176b   : > { %v4513_v49 = vmul.f32 -1.442695, %v2535_v23 }
0x176d   : > { %5501 = vpow2.f32 %v4513_v49 }
0x1776   : > { %v5500_v58 = vpop.eup %5499 }
0x1777   : > { %v2546_v26 = vadd.f32 1.0, %v5500_v58  ;;  %v4543_v58 = vld [vmem:[%s6712_s5 + $0x7] ss:$0 sm:$0xff] }
0x1779   : > { %5503 = vrcp.f32 %v2546_v26 }
0x177a   : > { %v5502_v27 = vpop.eup %5501 }
0x177b   : > { %v2547_v30 = vadd.f32 1.0, %v5502_v27 }
0x177d   : > { %5505 = vrcp.f32 %v2547_v30 }
0x177e   : > { %5507 = vtanh.f32 %v2532_v13 }
0x177f   : > { %5509 = vtanh.f32 %v2535_v23 }
0x1786   : > { %v5504_v33 = vpop.eup %5503 }
0x1787   : > { %2554 = vrot.lane.b32.xlu1 %v5504_v33, %s5586_s22 }
0x178a   : > { %v5506_v34 = vpop.eup %5505 }
0x178b   : > { %2556 = vrot.lane.b32.xlu0 %v5506_v34, %s5586_s22  ;;  %v5508_v39 = vpop.eup %5507 }
0x178c   : > { %v5510_v16 = vpop.eup %5509 }
0x17f9   : > { %v2555_v38 = vpop.permute.xlu1 %2554 }
0x17fa   : > { %v2560_v43 = vmul.f32 %v5508_v39, %v2555_v38 }
0x17fd   : > { %v2557_v22 = vpop.permute.xlu0 %2556 }
0x17fe   : > { %v2561_v45 = vmul.f32 %v5510_v16, %v2557_v22 }
0x1800   : > { %v2562_v48 = vpack.c.bf16 %v2561_v45, %v2560_v43  ;;  %v5370_v43 = vld [vmem:[%s6713_s6 + $0x58] sm:$0xff]  }
0x1801   : > { %5127 = vmatpush3.bf16.msra.mxu1 %v5370_v43 }
0x1802   : > { %5107 = vmatmul.mubr.msk.bf16.vlgmr.msra.gmra.mxu0 %vm556_vm5, %v2562_v48  ;;  %5128 = vmatprep.subr.bf16.mxu1 %v5581_v1  ;;  %v5371_v48 = vld [vmem:[%s6713_s6 + $0x50] sm:$0xff]  }
0x1803   : > { %5122 = vmatprep.mubr.msk.bf16.mxu0 %vm5582_vm1, %v5581_v1  ;;  %5111 = vmatpush3.bf16.msra.mxu0 %v5362_v50 }
0x1804   : > { %5112 = vmatprep.subr.bf16.mxu0 %v5581_v1 }
0x1805   : > { %5129 = vmatpush3.bf16.msra.mxu1 %v5371_v48 }
0x1806   : > { %5134 = vmatprep.subr.bf16.mxu1 %v5581_v1 }
0x1807   : > { %5113 = vmatpush3.bf16.msra.mxu0 %v5363_v36 }
0x1808   : > { %5114 = vmatprep.subr.bf16.mxu0 %v5581_v1 }
0x180b   : > { %5115 = vmatpush3.bf16.msra.mxu0 %v5364_v17 }
0x180c   : > { %5116 = vmatprep.subr.bf16.mxu0 %v5581_v1 }
0x180f   : > { %5117 = vmatpush3.bf16.msra.mxu0 %v5365_v51 }
0x1810   : > { %5118 = vmatprep.subr.bf16.mxu0 %v5581_v1 }
0x1813   : > { %5119 = vmatpush3.bf16.msra.mxu0 %v5368_v41  ;;  %v4558_v41 = vld [vmem:[%s6714_s7 + $0x5] ss:$0 sm:$0xff] }
0x1814   : > { %5120 = vmatprep.subr.bf16.mxu0 %v5581_v1 }
0x18c2   : > { %v2625_v53 = vpop.f32.mrf.mxu0 }
0x18c3   : > { %v6294_v54 = vadd.f32 %v4519_v24, %v2625_v53 }
0x18c4   : > { %v5108_v55 = vpop.f32.mrf.mxu0 }
0x18c5   : > { %v2632_v56 = vadd.f32 %v6294_v54, %v6220_v29 }
0x18c6   : > { %v2628_v32 = vpop.f32.mrf.mxu0 }
0x18c7   : > { %v6299_v37 = vmul.f32 %v2632_v56, %v5703_v12  ;;  %v6301_v40 = vadd.f32 %v4519_v24, %v2628_v32 }
0x18c8   : > { %v5109_v44 = vpop.f32.mrf.mxu0 }
0x18c9   : > { %v4758_v59 = vpack.c.bf16 %v6299_v37, %v6299_v37  ;;  %v2633_v60 = vadd.f32 %v6301_v40, %v6226_v35  ;;  %v5369_v35 = vld [vmem:[%s6711_s4 + $0x150] sm:$0xff]   ;;  %v5375_v44 = vld [vmem:[%s6711_s4 + $0x1a8] sm:$0xff]  }
0x18ca   : > { %5121 = vmatpush3.bf16.msra.mxu0 %v5369_v35 }
0x18cb   : > { %2646 = vst.msk [vmem:[#allocation2 + $0x4] sm:$0xf] %vm449_vm2, %v4758_v59  ;;  %v6309_v46 = vmul.f32 %v2633_v60, %v5710_v20  ;;  %5150 = vmatprep.subr.bf16.mxu0 %v5581_v1  ;;  %v5376_v59 = vld [vmem:[%s6711_s4 + $0x1a0] sm:$0xff]   ;;  %v5377_v60 = vld [vmem:[%s6711_s4 + $0x198] sm:$0xff]  }
0x18cd   : > { %v4759_v29 = vpack.c.bf16 %v6309_v46, %v6309_v46 }
0x18cf   : > { %2647 = vst.msk [vmem:[#allocation2 + $0x8] sm:$0xf] %vm449_vm2, %v4759_v29  ;;  %v5378_v29 = vld [vmem:[%s6711_s4 + $0x190] sm:$0xff]  }
0x18d2   : > { %v2652_v61 = vld [vmem:[#allocation2 + $0x4] sm:$0xe] }
0x18d3   : > { %v2649_v0 = vld [vmem:[#allocation2 + $0x4] sm:$0xf] }
0x18d4   : > { %v4525_v52 = vcombine.low %v2648_v47, %v2649_v0 }
0x18d6   : > { %v2651_v63 = vld [vmem:[#allocation2 + $0x8] sm:$0xf] }
0x18d7   : > { %v4528_v2 = vcombine.low %v2652_v61, %v2651_v63  ;;  %v4527_v3 = vcombine.low %v2649_v0, %v2651_v63  ;;  %v5367_v11 = vld [vmem:[#allocation2 + $0x8] ss:$0 sps:$4 sm:$0x77]  }
0x18d9   : > { %v2674_v4 = vrot.slane %v4528_v2, 6  ;;  %v2665_v5 = vrot.slane %v4527_v3, 5 }
0x18db   : > { %2677 = vrot.lane.b32.xlu0 %v2674_v4, %s5584_s13  ;;  %2666 = vrot.lane.b32.xlu1 %v2665_v5, %s5585_s14  ;;  %v2676_v42 = vsel %vm465_vm0, %v2674_v4, %v2675_v8 }
0x18df   : > { %2679 = vrot.lane.b32.xlu1 %v2676_v42, %s5584_s13 }
0x194d   : > { %v2678_v57 = vpop.permute.xlu0 %2677  ;;  %v2667_v9 = vpop.permute.xlu1 %2666 }
0x194e   : > { %v2683_v10 = vsel %vm556_vm5, %v4525_v52, %v2667_v9  ;;  %v2685_v14 = vsel %vm556_vm5, %v5367_v11, %v2667_v9  ;;  %v5381_v52 = vld [vmem:[%s6711_s4 + $0x188] sm:$0xff]  }
0x194f   : > { %v2687_v13 = vsel %vm562_vm6, %v2683_v10, %v2678_v57 }
0x1950   : > { %v2713_v23 = vrot.slane %v2687_v13, 3 }
0x1951   : > { %v2680_v15 = vpop.permute.xlu1 %2679 }
0x1952   : > { %v2689_v18 = vsel %vm562_vm6, %v2685_v14, %v2680_v15  ;;  %v5374_v14 = vld [vmem:[#allocation2 + $0xc] ss:$0 sps:$4 sm:$0x33]   ;;  %v2906_v15 = vld [vmem:[#allocation2] sm:$0xc] }
0x1953   : > { %v2714_v25 = vrot.slane %v2689_v18, 3 }
0x1955   : > { %v2715_v49 = vsel %vm857_vm9, %v2713_v23, %v2714_v25 }
0x1956   : > { %5123 = vmatmul.mubr.msk.bf16.vlgmr.msra.gmra.mxu0 %vm638_vm8, %v2715_v49 }
0x1957   : > { %5154 = vmatprep.mubr.msk.bf16.mxu0 %vm5582_vm1, %v5581_v1 }
0x1a16   : > { %v2789_v26 = vpop.f32.mrf.mxu0 }
0x1a17   : > { %v2790_v27 = vadd.f32 %v4543_v58, %v2789_v26 }
0x1a18   : > { %v5124_v28 = vpop.f32.mrf.mxu0 }
0x1a19   : > { %v4551_v30 = vmul.f32 -1.442695, %v2790_v27 }
0x1a1a   : > { %v2792_v31 = vpop.f32.mrf.mxu0 }
0x1a1b   : > { %5511 = vpow2.f32 %v4551_v30  ;;  %v2793_v33 = vadd.f32 %v4543_v58, %v2792_v31 }
0x1a1c   : > { %v5125_v34 = vpop.f32.mrf.mxu0 }
0x1a1d   : > { %v4552_v38 = vmul.f32 -1.442695, %v2793_v33 }
0x1a1f   : > { %5513 = vpow2.f32 %v4552_v38  ;;  %v4582_v38 = vld [vmem:[%s6712_s5 + $0x8] ss:$0 sm:$0xff] }
0x1a28   : > { %v5512_v39 = vpop.eup %5511 }
0x1a29   : > { %v2804_v16 = vadd.f32 1.0, %v5512_v39 }
0x1a2b   : > { %5515 = vrcp.f32 %v2804_v16 }
0x1a2c   : > { %v5514_v22 = vpop.eup %5513 }
0x1a2d   : > { %v2805_v45 = vadd.f32 1.0, %v5514_v22 }
0x1a2f   : > { %5517 = vrcp.f32 %v2805_v45 }
0x1a30   : > { %5519 = vtanh.f32 %v2790_v27 }
0x1a31   : > { %5521 = vtanh.f32 %v2793_v33 }
0x1a38   : > { %v5516_v50 = vpop.eup %5515 }
0x1a39   : > { %2812 = vrot.lane.b32.xlu0 %v5516_v50, %s5586_s22 }
0x1a3c   : > { %v5518_v36 = vpop.eup %5517 }
0x1a3d   : > { %2814 = vrot.lane.b32.xlu1 %v5518_v36, %s5586_s22  ;;  %v5520_v51 = vpop.eup %5519 }
0x1a3e   : > { %v5522_v24 = vpop.eup %5521 }
0x1aab   : > { %v2813_v17 = vpop.permute.xlu0 %2812 }
0x1aac   : > { %v2818_v55 = vmul.f32 %v5520_v51, %v2813_v17 }
0x1aaf   : > { %v2815_v53 = vpop.permute.xlu1 %2814 }
0x1ab0   : > { %v2819_v56 = vmul.f32 %v5522_v24, %v2815_v53  ;;  %v5383_v53 = vld [vmem:[%s6715_s8 + $0x28] sm:$0xff]  }
0x1ab1   : > { %5151 = vmatpush3.bf16.msra.mxu0 %v5383_v53 }
0x1ab2   : > { %v2820_v32 = vpack.c.bf16 %v2819_v56, %v2818_v55  ;;  %5152 = vmatprep.subr.bf16.mxu0 %v5581_v1  ;;  %v5384_v56 = vld [vmem:[%s6715_s8 + $0x20] sm:$0xff]  }
0x1ab4   : > { %5131 = vmatmul.mubr.msk.bf16.vlgmr.msra.gmra.mxu1 %vm556_vm5, %v2820_v32 }
0x1ab5   : > { %5146 = vmatprep.mubr.msk.bf16.mxu1 %vm5582_vm1, %v5581_v1  ;;  %5135 = vmatpush3.bf16.msra.mxu1 %v5375_v44 }
0x1ab6   : > { %5136 = vmatprep.subr.bf16.mxu1 %v5581_v1  ;;  %5153 = vmatpush3.bf16.msra.mxu0 %v5384_v56  ;;  %v5394_v56 = vld [vmem:[%s6711_s4 + $0x1c0] sm:$0xff]  }
0x1ab7   : > { %5158 = vmatprep.subr.bf16.mxu0 %v5581_v1 }
0x1ab9   : > { %5137 = vmatpush3.bf16.msra.mxu1 %v5376_v59 }
0x1aba   : > { %5138 = vmatprep.subr.bf16.mxu1 %v5581_v1 }
0x1abd   : > { %5139 = vmatpush3.bf16.msra.mxu1 %v5377_v60 }
0x1abe   : > { %5140 = vmatprep.subr.bf16.mxu1 %v5581_v1 }
0x1ac1   : > { %5141 = vmatpush3.bf16.msra.mxu1 %v5378_v29 }
0x1ac2   : > { %5142 = vmatprep.subr.bf16.mxu1 %v5581_v1 }
0x1ac5   : > { %5143 = vmatpush3.bf16.msra.mxu1 %v5381_v52 }
0x1ac6   : > { %5144 = vmatprep.subr.bf16.mxu1 %v5581_v1 }
0x1b74   : > { %v2883_v35 = vpop.f32.mrf.mxu1 }
0x1b75   : > { %v6369_v61 = vadd.f32 %v4558_v41, %v2883_v35 }
0x1b76   : > { %v5132_v62 = vpop.f32.mrf.mxu1 }
0x1b77   : > { %v2890_v63 = vadd.f32 %v6369_v61, %v6299_v37  ;;  %v5382_v37 = vld [vmem:[%s6711_s4 + $0x180] sm:$0xff]  }
0x1b78   : > { %v2886_v0 = vpop.f32.mrf.mxu1  ;;  %5145 = vmatpush3.bf16.msra.mxu1 %v5382_v37 }
0x1b79   : > { %v2892_v2 = vmul.f32 %v2890_v63, %v5703_v12  ;;  %v6374_v3 = vadd.f32 %v4558_v41, %v2886_v0  ;;  %5172 = vmatprep.subr.bf16.mxu1 %v5581_v1  ;;  %v4597_v0 = vld [vmem:[%s6716_s9 + $0x2] ss:$0 sm:$0xff] }
0x1b7a   : > { %v5133_v4 = vpop.f32.mrf.mxu1 }
0x1b7b   : > { %v4760_v5 = vpack.c.bf16 %v2892_v2, %v2892_v2  ;;  %v2891_v8 = vadd.f32 %v6374_v3, %v6309_v46  ;;  %v5385_v4 = vld [vmem:[%s6717_s10 + $0x28] sm:$0xff]  }
0x1b7d   : > { %2904 = vst.msk [vmem:[#allocation2 + $0x4] sm:$0xf] %vm449_vm2, %v4760_v5  ;;  %v2893_v42 = vmul.f32 %v2891_v8, %v5710_v20 }
0x1b7f   : > { %v4761_v47 = vpack.c.bf16 %v2893_v42, %v2893_v42  ;;  %v5386_v42 = vld [vmem:[%s6717_s10 + $0x20] sm:$0xff]  }
0x1b81   : > { %2905 = vst.msk [vmem:[#allocation2 + $0x8] sm:$0xf] %vm449_vm2, %v4761_v47 }
0x1b84   : > { %v2910_v46 = vld [vmem:[#allocation2 + $0x4] sm:$0xc] }
0x1b85   : > { %v2907_v9 = vld [vmem:[#allocation2 + $0x4] sm:$0xf] }
0x1b86   : > { %v4564_v18 = vcombine.low %v2906_v15, %v2907_v9 }
0x1b88   : > { %v2909_v57 = vld [vmem:[#allocation2 + $0x8] sm:$0xf] }
0x1b89   : > { %v4567_v10 = vcombine.low %v2910_v46, %v2909_v57  ;;  %v4566_v11 = vcombine.low %v2907_v9, %v2909_v57  ;;  %v5380_v58 = vld [vmem:[#allocation2 + $0x8] ss:$0 sps:$4 sm:$0x33]   ;;  %v2894_v57 = vadd.f32 %v6369_v61, %v6294_v54  ;;  %v4610_v54 = vld [vmem:[%s6709_s2 + $0x6] sm:$0x3] }
0x1b8a   : > { %v4606_v61 = vld [vmem:[%s6718_s11 + $0x2] ss:$0 sm:$0xff] }
0x1b8b   : > { %2932 = vrot.lane.b32.xlu1 %v4567_v10, %s5584_s13  ;;  %v2923_v13 = vrot.slane %v4566_v11, 6  ;;  %v2895_v10 = vadd.f32 %v6374_v3, %v6301_v40  ;;  %v3251_v40 = vsel %vm465_vm0, %v4610_v54, 0 }
0x1b8d   : > { %2924 = vrot.lane.b32.xlu0 %v2923_v13, %s5585_s14 }
0x1b91   : > { %2934 = vrot.lane.b32.xlu0 %v5374_v14, %s5584_s13 }
0x1bfd   : > { %v2933_v49 = vpop.permute.xlu1 %2932 }
0x1bff   : > { %v2925_v23 = vpop.permute.xlu0 %2924 }
0x1c00   : > { %v2938_v25 = vsel %vm556_vm5, %v4564_v18, %v2925_v23  ;;  %v2940_v27 = vsel %vm556_vm5, %v5380_v58, %v2925_v23 }
0x1c01   : > { %v2942_v26 = vsel %vm562_vm6, %v2938_v25, %v2933_v49 }
0x1c02   : > { %v2968_v31 = vrot.slane %v2942_v26, 2 }
0x1c03   : > { %v2935_v28 = vpop.permute.xlu0 %2934 }
0x1c04   : > { %v2944_v30 = vsel %vm562_vm6, %v2940_v27, %v2935_v28 }
0x1c05   : > { %v2969_v33 = vrot.slane %v2944_v30, 2  ;;  %v3232_v30 = vmul.f32 %v5947_v6, %v5703_v12  ;;  %v5389_v6 = vld [vmem:[%s6711_s4 + $0x1d8] sm:$0xff]  }
0x1c07   : > { %v2970_v34 = vsel %vm1113_vm10, %v2968_v31, %v2969_v33  ;;  %v3233_v33 = vmul.f32 %v5949_v7, %v5710_v20  ;;  %v5390_v7 = vld [vmem:[%s6711_s4 + $0x1d0] sm:$0xff]  }
0x1c08   : > { %5147 = vmatmul.mubr.msk.bf16.vlgmr.msra.gmra.mxu1 %vm638_vm8, %v2970_v34 }
0x1c09   : > { %5184 = vmatprep.mubr.msk.bf16.mxu1 %vm5582_vm1, %v5581_v1  ;;  %5173 = vmatpush3.bf16.msra.mxu1 %v5389_v6 }
0x1c0a   : > { %5174 = vmatprep.subr.bf16.mxu1 %v5581_v1 }
0x1c0d   : > { %5175 = vmatpush3.bf16.msra.mxu1 %v5390_v7 }
0x1c0e   : > { %5176 = vmatprep.subr.bf16.mxu1 %v5581_v1 }
0x1cc8   : > { %v3044_v39 = vpop.f32.mrf.mxu1 }
0x1cc9   : > { %v3045_v16 = vadd.f32 %v4582_v38, %v3044_v39 }
0x1cca   : > { %v5148_v22 = vpop.f32.mrf.mxu1 }
0x1ccb   : > { %v4590_v43 = vmul.f32 -1.442695, %v3045_v16 }
0x1ccc   : > { %v3047_v45 = vpop.f32.mrf.mxu1 }
0x1ccd   : > { %5523 = vpow2.f32 %v4590_v43  ;;  %v3048_v48 = vadd.f32 %v4582_v38, %v3047_v45 }
0x1cce   : > { %v5149_v50 = vpop.f32.mrf.mxu1 }
0x1ccf   : > { %v4591_v36 = vmul.f32 -1.442695, %v3048_v48 }
0x1cd1   : > { %5525 = vpow2.f32 %v4591_v36 }
0x1cda   : > { %v5524_v17 = vpop.eup %5523 }
0x1cdb   : > { %v3059_v51 = vadd.f32 1.0, %v5524_v17 }
0x1cdd   : > { %5527 = vrcp.f32 %v3059_v51 }
0x1cde   : > { %v5526_v24 = vpop.eup %5525 }
0x1cdf   : > { %v3060_v55 = vadd.f32 1.0, %v5526_v24 }
0x1ce1   : > { %5529 = vrcp.f32 %v3060_v55  ;;  %v5391_v55 = vld [vmem:[%s6711_s4 + $0x1c8] sm:$0xff]  }
0x1ce2   : > { %5531 = vtanh.f32 %v3045_v16  ;;  %v4612_v16 = vld [vmem:[%s6710_s3 + $0x3] ss:$0 sm:$0xff]  ;;  %5177 = vmatpush3.bf16.msra.mxu1 %v5391_v55 }
0x1ce3   : > { %5533 = vtanh.f32 %v3048_v48  ;;  %5178 = vmatprep.subr.bf16.mxu1 %v5581_v1 }
0x1ce6   : > { %5179 = vmatpush3.bf16.msra.mxu1 %v5394_v56 }
0x1ce7   : > { %5180 = vmatprep.subr.bf16.mxu1 %v5581_v1 }
0x1cea   : > { %v5528_v32 = vpop.eup %5527 }
0x1ceb   : > { %3067 = vrot.lane.b32.xlu1 %v5528_v32, %s5586_s22 }
0x1cee   : > { %v5530_v44 = vpop.eup %5529 }
0x1cef   : > { %3069 = vrot.lane.b32.xlu0 %v5530_v44, %s5586_s22  ;;  %v5532_v60 = vpop.eup %5531 }
0x1cf0   : > { %v5534_v29 = vpop.eup %5533 }
0x1d5d   : > { %v3068_v59 = vpop.permute.xlu1 %3067 }
0x1d5e   : > { %v3073_v35 = vmul.f32 %v5532_v60, %v3068_v59  ;;  %v5395_v59 = vld [vmem:[%s6711_s4 + $0x1b8] sm:$0xff]  }
0x1d5f   : > { %5181 = vmatpush3.bf16.msra.mxu1 %v5395_v59 }
0x1d60   : > { %5182 = vmatprep.subr.bf16.mxu1 %v5581_v1 }
0x1d61   : > { %v3070_v41 = vpop.permute.xlu0 %3069 }
0x1d62   : > { %v3074_v62 = vmul.f32 %v5534_v29, %v3070_v41 }
0x1d64   : > { %v3075_v63 = vpack.c.bf16 %v3074_v62, %v3073_v35  ;;  %v5388_v62 = vld [vmem:[#allocation2 + $0xc] ss:$0 sps:$4 sm:$0x11]  }
0x1d66   : > { %5155 = vmatmul.mubr.msk.bf16.vlgmr.msra.gmra.mxu0 %vm556_vm5, %v3075_v63  ;;  %v5396_v63 = vld [vmem:[%s6711_s4 + $0x1b0] sm:$0xff]  }
0x1d67   : > { %5162 = vmatprep.mubr.msk.bf16.mxu0 %vm5582_vm1, %v5581_v1  ;;  %5159 = vmatpush3.bf16.msra.mxu0 %v5385_v4 }
0x1d68   : > { %5160 = vmatprep.subr.bf16.mxu0 %v5581_v1  ;;  %5183 = vmatpush3.bf16.msra.mxu1 %v5396_v63  ;;  %v4648_v63 = vld [vmem:[%s6714_s7 + $0x6] ss:$0 sm:$0xff] }
0x1d69   : > { %5212 = vmatprep.subr.bf16.mxu1 %v5581_v1 }
0x1d6b   : > { %5161 = vmatpush3.bf16.msra.mxu0 %v5386_v42  ;;  %v3306_v42 = vld [vmem:[#allocation2] sm:$0x8] }
0x1d6c   : > { %5166 = vmatprep.subr.bf16.mxu0 %v5581_v1 }
0x1e26   : > { %v3138_v2 = vpop.f32.mrf.mxu0 }
0x1e27   : > { %v3139_v5 = vadd.f32 %v4597_v0, %v3138_v2 }
0x1e28   : > { %v5156_v8 = vpop.f32.mrf.mxu0 }
0x1e29   : > { %3147 = vrot.lane.b32.xlu1 %v3139_v5, %s5585_s14  ;;  %v3333_v5 = vrot.slane %v5388_v62, 5  ;;  %v5405_v62 = vld [vmem:[%s6711_s4 + $0x1f0] sm:$0xff]  }
0x1e2a   : > { %v3141_v47 = vpop.f32.mrf.mxu0 }
0x1e2b   : > { %v3142_v52 = vadd.f32 %v4597_v0, %v3141_v47 }
0x1e2c   : > { %v5157_v37 = vpop.f32.mrf.mxu0 }
0x1e2d   : > { %3149 = vrot.lane.b32.xlu0 %v3142_v52, %s5585_s14 }
0x1e9b   : > { %v3148_v46 = vpop.permute.xlu1 %3147 }
0x1e9c   : > { %v3153_v9 = vadd.f32 %v3148_v46, %v2894_v57 }
0x1e9e   : > { %v3155_v14 = vmul.f32 %v3153_v9, %v5703_v12 }
0x1e9f   : > { %v3150_v11 = vpop.permute.xlu0 %3149 }
0x1ea0   : > { %v3154_v13 = vadd.f32 %v3150_v11, %v2895_v10 }
0x1ea2   : > { %v3156_v15 = vmul.f32 %v3154_v13, %v5710_v20 }
0x1ea4   : > { %v3157_v18 = vpack.c.bf16 %v3156_v15, %v3155_v14 }
0x1ea6   : > { %3172 = vrot.lane.b32.xlu1 %v3157_v18, %s5586_s22 }
0x1f18   : > { %v3173_v23 = vpop.permute.xlu1 %3172 }
0x1f19   : > { %5163 = vmatmul.mubr.msk.bf16.vlgmr.msra.gmra.mxu0 %vm556_vm5, %v3173_v23 }
0x1f1a   : > { %5168 = vmatprep.mubr.msk.bf16.mxu0 %vm5582_vm1, %v5581_v1  ;;  %5167 = vmatpush3.bf16.msra.mxu0 %v3251_v40 }
0x1f1b   : > { %5188 = vmatprep.subr.bf16.mxu0 %v5581_v1 }
0x1fd9   : > { %v3223_v3 = vpop.f32.mrf.mxu0 }
0x1fda   : > { %v3224_v25 = vadd.f32 %v4606_v61, %v3223_v3 }
0x1fdb   : > { %v5164_v49 = vpop.f32.mrf.mxu0 }
0x1fdc   : > { %v3230_v26 = vmul.f32 %v3224_v25, %v5703_v12 }
0x1fdd   : > { %v3226_v58 = vpop.f32.mrf.mxu0 }
0x1fde   : > { %v3227_v27 = vadd.f32 %v4606_v61, %v3226_v58  ;;  %v6453_v34 = vadd.f32 %v3232_v30, %v3230_v26  ;;  %v4633_v26 = vld [vmem:[%s6712_s5 + $0x9] ss:$0 sm:$0xff] }
0x1fdf   : > { %v5165_v28 = vpop.f32.mrf.mxu0 }
0x1fe0   : > { %v3231_v31 = vmul.f32 %v3227_v27, %v5710_v20 }
0x1fe2   : > { %v6455_v38 = vadd.f32 %v3233_v33, %v3231_v31 }
0x1fe4   : > { %v3236_v39 = vpack.c.bf16 %v6455_v38, %v6453_v34 }
0x1fe6   : > { %5169 = vmatmul.mubr.msk.bf16.vlgmr.msra.gmra.mxu0 %vm461_vm3, %v3236_v39 }
0x1fe7   : > { %5192 = vmatprep.mubr.msk.bf16.mxu0 %vm5582_vm1, %v5581_v1 }
0x20a6   : > { %v3287_v22 = vpop.f32.mrf.mxu0 }
0x20a7   : > { %v3288_v43 = vadd.f32 %v4612_v16, %v3287_v22 }
0x20a8   : > { %v5170_v45 = vpop.f32.mrf.mxu0 }
0x20a9   : > { %v6474_v48 = vmul.f32 %v3288_v43, %v5703_v12  ;;  %v5397_v45 = vld [vmem:[%s6713_s6 + $0x68] sm:$0xff]  }
0x20aa   : > { %v3290_v50 = vpop.f32.mrf.mxu0  ;;  %5189 = vmatpush3.bf16.msra.mxu0 %v5397_v45 }
0x20ab   : > { %v4762_v36 = vpack.c.bf16 %v6474_v48, %v6474_v48  ;;  %v3291_v17 = vadd.f32 %v4612_v16, %v3290_v50  ;;  %5190 = vmatprep.subr.bf16.mxu0 %v5581_v1 }
0x20ac   : > { %v5171_v51 = vpop.f32.mrf.mxu0 }
0x20ad   : > { %3304 = vst.msk [vmem:[#allocation2 + $0x4] sm:$0xf] %vm449_vm2, %v4762_v36  ;;  %v6480_v24 = vmul.f32 %v3291_v17, %v5710_v20  ;;  %v5398_v36 = vld [vmem:[%s6713_s6 + $0x60] sm:$0xff]  }
0x20ae   : > { %5191 = vmatpush3.bf16.msra.mxu0 %v5398_v36 }
0x20af   : > { %v4763_v53 = vpack.c.bf16 %v6480_v24, %v6480_v24  ;;  %5196 = vmatprep.subr.bf16.mxu0 %v5581_v1 }
0x20b1   : > { %3305 = vst.msk [vmem:[#allocation2 + $0x8] sm:$0xf] %vm449_vm2, %v4763_v53 }
0x20b4   : > { %v3307_v32 = vld [vmem:[#allocation2 + $0x4] sm:$0xf] }
0x20b5   : > { %v4616_v47 = vcombine.low %v3306_v42, %v3307_v32 }
0x20b8   : > { %v3308_v44 = vld [vmem:[#allocation2 + $0x8] sm:$0xf] }
0x20b9   : > { %v4618_v60 = vcombine.low %v3307_v32, %v3308_v44  ;;  %v4617_v57 = vcombine.low %v3308_v44, %v3308_v44 }
0x20bb   : > { %v3332_v29 = vrot.slane %v4618_v60, 5  ;;  %v3320_v41 = vshrl.u32 %v4618_v60, 16  ;;  %v3323_v35 = vshll.u32 %v4618_v60, 16 }
0x20bd   : > { %3335 = vrot.lane.b32.xlu1 %v3332_v29, %s5584_s13  ;;  %v3322_v0 = vrot.slane %v3320_v41, 4  ;;  %v3325_v2 = vrot.slane %v3323_v35, 5  ;;  %v3334_v8 = vsel %vm548_vm4, %v3332_v29, %v3333_v5  ;;  %v5402_v29 = vld [vmem:[%s6711_s4 + $0x208] sm:$0xff]   ;;  %v5403_v41 = vld [vmem:[%s6711_s4 + $0x200] sm:$0xff]   ;;  %v5404_v35 = vld [vmem:[%s6711_s4 + $0x1f8] sm:$0xff]  }
0x20bf   : > { %v3326_v4 = vor.u32 %v3325_v2, %v3322_v0 }
0x20c1   : > { %3327 = vrot.lane.b32.xlu0 %v3326_v4, %s5585_s14 }
0x20c5   : > { %3337 = vrot.lane.b32.xlu0 %v3334_v8, %s5584_s13 }
0x212f   : > { %v3336_v37 = vpop.permute.xlu1 %3335 }
0x2133   : > { %v3328_v52 = vpop.permute.xlu0 %3327 }
0x2134   : > { %v3341_v46 = vsel %vm556_vm5, %v4616_v47, %v3328_v52  ;;  %v3343_v13 = vsel %vm556_vm5, %v4617_v57, %v3328_v52 }
0x2135   : > { %v3345_v9 = vsel %vm562_vm6, %v3341_v46, %v3336_v37 }
0x2136   : > { %v3369_v10 = vshrl.u32 %v3345_v9, 16  ;;  %v3372_v11 = vshll.u32 %v3345_v9, 16  ;;  %v5408_v9 = vld [vmem:[%s6711_s4 + $0x1e8] sm:$0xff]  }
0x2137   : > { %v3338_v14 = vpop.permute.xlu0 %3337 }
0x2138   : > { %v3347_v15 = vsel %vm562_vm6, %v3343_v13, %v3338_v14  ;;  %v3371_v18 = vrot.slane %v3369_v10, 3  ;;  %v3374_v23 = vrot.slane %v3372_v11, 4  ;;  %v5401_v11 = vld [vmem:[#allocation2 + $0xc] ss:$0 sps:$4 sm:$0x11]  }
0x2139   : > { %v3376_v54 = vshrl.u32 %v3347_v15, 16  ;;  %v3379_v40 = vshll.u32 %v3347_v15, 16 }
0x213a   : > { %v3375_v25 = vor.u32 %v3374_v23, %v3371_v18 }
0x213b   : > { %v3378_v61 = vrot.slane %v3376_v54, 3  ;;  %v3381_v3 = vrot.slane %v3379_v40, 4  ;;  %v3601_v40 = vrot.slane %v5401_v11, 6 }
0x213d   : > { %v3382_v49 = vor.u32 %v3381_v3, %v3378_v61  ;;  %v3574_v3 = vld [vmem:[#allocation2] sm:$0x8] }
0x213f   : > { %v3383_v58 = vsel %vm586_vm7, %v3375_v25, %v3382_v49 }
0x2140   : > { %5185 = vmatmul.mubr.msk.bf16.vlgmr.msra.gmra.mxu1 %vm638_vm8, %v3383_v58 }
0x2141   : > { %5216 = vmatprep.mubr.msk.bf16.mxu1 %vm5582_vm1, %v5581_v1 }
0x2200   : > { %v3457_v27 = vpop.f32.mrf.mxu1 }
0x2201   : > { %v3458_v28 = vadd.f32 %v4633_v26, %v3457_v27 }
0x2202   : > { %v5186_v30 = vpop.f32.mrf.mxu1 }
0x2203   : > { %v4641_v31 = vmul.f32 -1.442695, %v3458_v28 }
0x2204   : > { %v3460_v33 = vpop.f32.mrf.mxu1 }
0x2205   : > { %5535 = vpow2.f32 %v4641_v31  ;;  %v3461_v39 = vadd.f32 %v4633_v26, %v3460_v33 }
0x2206   : > { %v5187_v6 = vpop.f32.mrf.mxu1 }
0x2207   : > { %v4642_v7 = vmul.f32 -1.442695, %v3461_v39 }
0x2209   : > { %5537 = vpow2.f32 %v4642_v7 }
0x2212   : > { %v5536_v16 = vpop.eup %5535 }
0x2213   : > { %v3472_v22 = vadd.f32 1.0, %v5536_v16  ;;  %v4672_v16 = vld [vmem:[%s6712_s5 + $0xa] ss:$0 sm:$0xff] }
0x2215   : > { %5539 = vrcp.f32 %v3472_v22 }
0x2216   : > { %v5538_v43 = vpop.eup %5537 }
0x2217   : > { %v3473_v50 = vadd.f32 1.0, %v5538_v43 }
0x2219   : > { %5541 = vrcp.f32 %v3473_v50 }
0x221a   : > { %5543 = vtanh.f32 %v3458_v28 }
0x221b   : > { %5545 = vtanh.f32 %v3461_v39 }
0x2222   : > { %v5540_v17 = vpop.eup %5539 }
0x2223   : > { %3480 = vrot.lane.b32.xlu1 %v5540_v17, %s5586_s22 }
0x2226   : > { %v5542_v51 = vpop.eup %5541 }
0x2227   : > { %3482 = vrot.lane.b32.xlu0 %v5542_v51, %s5586_s22  ;;  %v5544_v55 = vpop.eup %5543 }
0x2228   : > { %v5546_v56 = vpop.eup %5545 }
0x2295   : > { %v3481_v53 = vpop.permute.xlu1 %3480 }
0x2296   : > { %v3486_v44 = vmul.f32 %v5544_v55, %v3481_v53 }
0x2299   : > { %v3483_v32 = vpop.permute.xlu0 %3482 }
0x229a   : > { %v3487_v59 = vmul.f32 %v5546_v56, %v3483_v32 }
0x229c   : > { %v3488_v60 = vpack.c.bf16 %v3487_v59, %v3486_v44  ;;  %v5410_v44 = vld [vmem:[%s6713_s6 + $0x78] sm:$0xff]  }
0x229d   : > { %5213 = vmatpush3.bf16.msra.mxu1 %v5410_v44 }
0x229e   : > { %5193 = vmatmul.mubr.msk.bf16.vlgmr.msra.gmra.mxu0 %vm556_vm5, %v3488_v60  ;;  %5214 = vmatprep.subr.bf16.mxu1 %v5581_v1  ;;  %v5411_v60 = vld [vmem:[%s6713_s6 + $0x70] sm:$0xff]  }
0x229f   : > { %5208 = vmatprep.mubr.msk.bf16.mxu0 %vm5582_vm1, %v5581_v1  ;;  %5197 = vmatpush3.bf16.msra.mxu0 %v5402_v29 }
0x22a0   : > { %5198 = vmatprep.subr.bf16.mxu0 %v5581_v1 }
0x22a1   : > { %5215 = vmatpush3.bf16.msra.mxu1 %v5411_v60 }
0x22a2   : > { %5220 = vmatprep.subr.bf16.mxu1 %v5581_v1 }
0x22a3   : > { %5199 = vmatpush3.bf16.msra.mxu0 %v5403_v41 }
0x22a4   : > { %5200 = vmatprep.subr.bf16.mxu0 %v5581_v1 }
0x22a7   : > { %5201 = vmatpush3.bf16.msra.mxu0 %v5404_v35 }
0x22a8   : > { %5202 = vmatprep.subr.bf16.mxu0 %v5581_v1 }
0x22ab   : > { %5203 = vmatpush3.bf16.msra.mxu0 %v5405_v62 }
0x22ac   : > { %5204 = vmatprep.subr.bf16.mxu0 %v5581_v1 }
0x22af   : > { %5205 = vmatpush3.bf16.msra.mxu0 %v5408_v9  ;;  %v4687_v9 = vld [vmem:[%s6714_s7 + $0x7] ss:$0 sm:$0xff] }
0x22b0   : > { %5206 = vmatprep.subr.bf16.mxu0 %v5581_v1 }
0x235e   : > { %v3551_v0 = vpop.f32.mrf.mxu0 }
0x235f   : > { %v6548_v2 = vadd.f32 %v4648_v63, %v3551_v0 }
0x2360   : > { %v5194_v4 = vpop.f32.mrf.mxu0 }
0x2361   : > { %v3558_v5 = vadd.f32 %v6548_v2, %v6474_v48 }
0x2362   : > { %v3554_v8 = vpop.f32.mrf.mxu0 }
0x2363   : > { %v6553_v42 = vmul.f32 %v3558_v5, %v5703_v12  ;;  %v6555_v47 = vadd.f32 %v4648_v63, %v3554_v8 }
0x2364   : > { %v5195_v52 = vpop.f32.mrf.mxu0 }
0x2365   : > { %v4764_v37 = vpack.c.bf16 %v6553_v42, %v6553_v42  ;;  %v3559_v46 = vadd.f32 %v6555_v47, %v6480_v24  ;;  %v5409_v24 = vld [vmem:[%s6711_s4 + $0x1e0] sm:$0xff]   ;;  %v5415_v52 = vld [vmem:[%s6711_s4 + $0x238] sm:$0xff]  }
0x2366   : > { %5207 = vmatpush3.bf16.msra.mxu0 %v5409_v24 }
0x2367   : > { %3572 = vst.msk [vmem:[#allocation2 + $0x4] sm:$0xf] %vm449_vm2, %v4764_v37  ;;  %v6563_v57 = vmul.f32 %v3559_v46, %v5710_v20  ;;  %5236 = vmatprep.subr.bf16.mxu0 %v5581_v1  ;;  %v5416_v37 = vld [vmem:[%s6711_s4 + $0x230] sm:$0xff]   ;;  %v5417_v46 = vld [vmem:[%s6711_s4 + $0x228] sm:$0xff]  }
0x2369   : > { %v4765_v48 = vpack.c.bf16 %v6563_v57, %v6563_v57 }
0x236b   : > { %3573 = vst.msk [vmem:[#allocation2 + $0x8] sm:$0xf] %vm449_vm2, %v4765_v48  ;;  %v5418_v48 = vld [vmem:[%s6711_s4 + $0x220] sm:$0xff]  }
0x236e   : > { %v3578_v10 = vld [vmem:[#allocation2 + $0x4] sm:$0xe] }
0x236f   : > { %v3575_v14 = vld [vmem:[#allocation2 + $0x4] sm:$0xf] }
0x2370   : > { %v4654_v25 = vcombine.low %v3574_v3, %v3575_v14 }
0x2372   : > { %v3577_v13 = vld [vmem:[#allocation2 + $0x8] sm:$0xf] }
0x2373   : > { %v4657_v15 = vcombine.low %v3578_v10, %v3577_v13  ;;  %v4656_v18 = vcombine.low %v3575_v14, %v3577_v13  ;;  %v5407_v27 = vld [vmem:[#allocation2 + $0x8] ss:$0 sps:$4 sm:$0x77]  }
0x2375   : > { %v3600_v23 = vrot.slane %v4657_v15, 6  ;;  %v3591_v54 = vrot.slane %v4656_v18, 5 }
0x2377   : > { %3603 = vrot.lane.b32.xlu0 %v3600_v23, %s5584_s13  ;;  %3592 = vrot.lane.b32.xlu1 %v3591_v54, %s5585_s14  ;;  %v3602_v61 = vsel %vm465_vm0, %v3600_v23, %v3601_v40 }
0x237b   : > { %3605 = vrot.lane.b32.xlu1 %v3602_v61, %s5584_s13 }
0x23e9   : > { %v3604_v49 = vpop.permute.xlu0 %3603  ;;  %v3593_v58 = vpop.permute.xlu1 %3592 }
0x23ea   : > { %v3609_v26 = vsel %vm556_vm5, %v4654_v25, %v3593_v58  ;;  %v3611_v30 = vsel %vm556_vm5, %v5407_v27, %v3593_v58  ;;  %v5421_v25 = vld [vmem:[%s6711_s4 + $0x218] sm:$0xff]  }
0x23eb   : > { %v3613_v28 = vsel %vm562_vm6, %v3609_v26, %v3604_v49 }
0x23ec   : > { %v3639_v39 = vrot.slane %v3613_v28, 3 }
0x23ed   : > { %v3606_v31 = vpop.permute.xlu1 %3605 }
0x23ee   : > { %v3615_v33 = vsel %vm562_vm6, %v3611_v30, %v3606_v31  ;;  %v5414_v30 = vld [vmem:[#allocation2 + $0xc] ss:$0 sps:$4 sm:$0x33]   ;;  %v3832_v31 = vld [vmem:[#allocation2] sm:$0xc] }
0x23ef   : > { %v3640_v6 = vrot.slane %v3615_v33, 3 }
0x23f1   : > { %v3641_v7 = vsel %vm857_vm9, %v3639_v39, %v3640_v6 }
0x23f2   : > { %5209 = vmatmul.mubr.msk.bf16.vlgmr.msra.gmra.mxu0 %vm638_vm8, %v3641_v7 }
0x23f3   : > { %5240 = vmatprep.mubr.msk.bf16.mxu0 %vm5582_vm1, %v5581_v1 }
0x24b2   : > { %v3715_v22 = vpop.f32.mrf.mxu0 }
0x24b3   : > { %v3716_v43 = vadd.f32 %v4672_v16, %v3715_v22 }
0x24b4   : > { %v5210_v45 = vpop.f32.mrf.mxu0 }
0x24b5   : > { %v4680_v50 = vmul.f32 -1.442695, %v3716_v43 }
0x24b6   : > { %v3718_v36 = vpop.f32.mrf.mxu0 }
0x24b7   : > { %5547 = vpow2.f32 %v4680_v50  ;;  %v3719_v17 = vadd.f32 %v4672_v16, %v3718_v36 }
0x24b8   : > { %v5211_v51 = vpop.f32.mrf.mxu0 }
0x24b9   : > { %v4681_v53 = vmul.f32 -1.442695, %v3719_v17 }
0x24bb   : > { %5549 = vpow2.f32 %v4681_v53  ;;  %v4711_v53 = vld [vmem:[%s6712_s5 + $0xb] ss:$0 sm:$0xff] }
0x24c4   : > { %v5548_v55 = vpop.eup %5547 }
0x24c5   : > { %v3730_v56 = vadd.f32 1.0, %v5548_v55 }
0x24c7   : > { %5551 = vrcp.f32 %v3730_v56 }
0x24c8   : > { %v5550_v32 = vpop.eup %5549 }
0x24c9   : > { %v3731_v59 = vadd.f32 1.0, %v5550_v32 }
0x24cb   : > { %5553 = vrcp.f32 %v3731_v59 }
0x24cc   : > { %5555 = vtanh.f32 %v3716_v43 }
0x24cd   : > { %5557 = vtanh.f32 %v3719_v17 }
0x24d4   : > { %v5552_v29 = vpop.eup %5551 }
0x24d5   : > { %3738 = vrot.lane.b32.xlu0 %v5552_v29, %s5586_s22 }
0x24d8   : > { %v5554_v41 = vpop.eup %5553 }
0x24d9   : > { %3740 = vrot.lane.b32.xlu1 %v5554_v41, %s5586_s22  ;;  %v5556_v62 = vpop.eup %5555 }
0x24da   : > { %v5558_v63 = vpop.eup %5557 }
0x2547   : > { %v3739_v35 = vpop.permute.xlu0 %3738 }
0x2548   : > { %v3744_v4 = vmul.f32 %v5556_v62, %v3739_v35 }
0x254b   : > { %v3741_v0 = vpop.permute.xlu1 %3740 }
0x254c   : > { %v3745_v5 = vmul.f32 %v5558_v63, %v3741_v0  ;;  %v5423_v0 = vld [vmem:[%s6715_s8 + $0x38] sm:$0xff]  }
0x254d   : > { %5237 = vmatpush3.bf16.msra.mxu0 %v5423_v0 }
0x254e   : > { %v3746_v8 = vpack.c.bf16 %v3745_v5, %v3744_v4  ;;  %5238 = vmatprep.subr.bf16.mxu0 %v5581_v1  ;;  %v5424_v5 = vld [vmem:[%s6715_s8 + $0x30] sm:$0xff]  }
0x2550   : > { %5217 = vmatmul.mubr.msk.bf16.vlgmr.msra.gmra.mxu1 %vm556_vm5, %v3746_v8 }
0x2551   : > { %5232 = vmatprep.mubr.msk.bf16.mxu1 %vm5582_vm1, %v5581_v1  ;;  %5221 = vmatpush3.bf16.msra.mxu1 %v5415_v52 }
0x2552   : > { %5222 = vmatprep.subr.bf16.mxu1 %v5581_v1  ;;  %5239 = vmatpush3.bf16.msra.mxu0 %v5424_v5 }
0x2553   : > { %5244 = vmatprep.subr.bf16.mxu0 %v5581_v1 }
0x2555   : > { %5223 = vmatpush3.bf16.msra.mxu1 %v5416_v37 }
0x2556   : > { %5224 = vmatprep.subr.bf16.mxu1 %v5581_v1 }
0x2559   : > { %5225 = vmatpush3.bf16.msra.mxu1 %v5417_v46 }
0x255a   : > { %5226 = vmatprep.subr.bf16.mxu1 %v5581_v1 }
0x255d   : > { %5227 = vmatpush3.bf16.msra.mxu1 %v5418_v48 }
0x255e   : > { %5228 = vmatprep.subr.bf16.mxu1 %v5581_v1 }
0x2561   : > { %5229 = vmatpush3.bf16.msra.mxu1 %v5421_v25 }
0x2562   : > { %5230 = vmatprep.subr.bf16.mxu1 %v5581_v1 }
0x2610   : > { %v3809_v24 = vpop.f32.mrf.mxu1 }
0x2611   : > { %v6623_v10 = vadd.f32 %v4687_v9, %v3809_v24 }
0x2612   : > { %v5218_v11 = vpop.f32.mrf.mxu1 }
0x2613   : > { %v3816_v13 = vadd.f32 %v6623_v10, %v6553_v42  ;;  %v5422_v42 = vld [vmem:[%s6711_s4 + $0x210] sm:$0xff]  }
0x2614   : > { %v3812_v14 = vpop.f32.mrf.mxu1  ;;  %5231 = vmatpush3.bf16.msra.mxu1 %v5422_v42  ;;  %v5426_v42 = vld [vmem:[%s6717_s10 + $0x30] sm:$0xff]  }
0x2615   : > { %v3818_v15 = vmul.f32 %v3816_v13, %v5703_v12  ;;  %v6628_v18 = vadd.f32 %v4687_v9, %v3812_v14  ;;  %v4726_v14 = vld [vmem:[%s6716_s9 + $0x3] ss:$0 sm:$0xff] }
0x2616   : > { %v5219_v23 = vpop.f32.mrf.mxu1 }
0x2617   : > { %v4766_v54 = vpack.c.bf16 %v3818_v15, %v3818_v15  ;;  %v3817_v40 = vadd.f32 %v6628_v18, %v6563_v57 }
0x2619   : > { %3830 = vst.msk [vmem:[#allocation2 + $0x4] sm:$0xf] %vm449_vm2, %v4766_v54  ;;  %v3819_v61 = vmul.f32 %v3817_v40, %v5710_v20 }
0x261b   : > { %v4767_v3 = vpack.c.bf16 %v3819_v61, %v3819_v61  ;;  %v5425_v61 = vld [vmem:[%s6717_s10 + $0x38] sm:$0xff]  }
0x261d   : > { %3831 = vst.msk [vmem:[#allocation2 + $0x8] sm:$0xf] %vm449_vm2, %v4767_v3 }
0x2620   : > { %v3836_v57 = vld [vmem:[#allocation2 + $0x4] sm:$0xc] }
0x2621   : > { %v3833_v58 = vld [vmem:[#allocation2 + $0x4] sm:$0xf] }
0x2622   : > { %v4693_v33 = vcombine.low %v3832_v31, %v3833_v58 }
0x2624   : > { %v3835_v49 = vld [vmem:[#allocation2 + $0x8] sm:$0xf] }
0x2625   : > { %v4696_v26 = vcombine.low %v3836_v57, %v3835_v49  ;;  %v4695_v27 = vcombine.low %v3833_v58, %v3835_v49  ;;  %v5420_v16 = vld [vmem:[#allocation2 + $0x8] ss:$0 sps:$4 sm:$0x33]   ;;  %v3820_v49 = vadd.f32 %v6623_v10, %v6548_v2  ;;  %v4735_v2 = vld [vmem:[%s6718_s11 + $0x3] ss:$0 sm:$0xff] }
0x2627   : > { %3858 = vrot.lane.b32.xlu1 %v4696_v26, %s5584_s13  ;;  %v3849_v28 = vrot.slane %v4695_v27, 6  ;;  %v3821_v26 = vadd.f32 %v6628_v18, %v6555_v47 }
0x2629   : > { %3850 = vrot.lane.b32.xlu0 %v3849_v28, %s5585_s14 }
0x262d   : > { %3860 = vrot.lane.b32.xlu0 %v5414_v30, %s5584_s13 }
0x2699   : > { %v3859_v7 = vpop.permute.xlu1 %3858 }
0x269b   : > { %v3851_v39 = vpop.permute.xlu0 %3850 }
0x269c   : > { %v3864_v6 = vsel %vm556_vm5, %v4693_v33, %v3851_v39  ;;  %v3866_v43 = vsel %vm556_vm5, %v5420_v16, %v3851_v39  ;;  %v4158_v39 = vmul.f32 %v6198_v19, %v5703_v12 }
0x269d   : > { %v3868_v22 = vsel %vm562_vm6, %v3864_v6, %v3859_v7 }
0x269e   : > { %v3894_v36 = vrot.slane %v3868_v22, 2 }
0x269f   : > { %v3861_v45 = vpop.permute.xlu0 %3860 }
0x26a0   : > { %v3870_v50 = vsel %vm562_vm6, %v3866_v43, %v3861_v45 }
0x26a1   : > { %v3895_v17 = vrot.slane %v3870_v50, 2  ;;  %v4159_v50 = vmul.f32 %v6201_v21, %v5710_v20 }
0x26a3   : > { %v3896_v51 = vsel %vm1113_vm10, %v3894_v36, %v3895_v17 }
0x26a4   : > { %5233 = vmatmul.mubr.msk.bf16.vlgmr.msra.gmra.mxu1 %vm638_vm8, %v3896_v51 }
0x2764   : > { %v3970_v55 = vpop.f32.mrf.mxu1 }
0x2765   : > { %v3971_v56 = vadd.f32 %v4711_v53, %v3970_v55 }
0x2766   : > { %v5234_v32 = vpop.f32.mrf.mxu1 }
0x2767   : > { %v4719_v44 = vmul.f32 -1.442695, %v3971_v56 }
0x2768   : > { %v3973_v59 = vpop.f32.mrf.mxu1 }
0x2769   : > { %5559 = vpow2.f32 %v4719_v44  ;;  %v3974_v60 = vadd.f32 %v4711_v53, %v3973_v59 }
0x276a   : > { %v5235_v29 = vpop.f32.mrf.mxu1 }
0x276b   : > { %v4720_v41 = vmul.f32 -1.442695, %v3974_v60 }
0x276d   : > { %5561 = vpow2.f32 %v4720_v41 }
0x2776   : > { %v5560_v35 = vpop.eup %5559 }
0x2777   : > { %v3985_v62 = vadd.f32 1.0, %v5560_v35 }
0x2779   : > { %5563 = vrcp.f32 %v3985_v62 }
0x277a   : > { %v5562_v63 = vpop.eup %5561 }
0x277b   : > { %v3986_v4 = vadd.f32 1.0, %v5562_v63 }
0x277d   : > { %5565 = vrcp.f32 %v3986_v4 }
0x277e   : > { %5567 = vtanh.f32 %v3971_v56 }
0x277f   : > { %5569 = vtanh.f32 %v3974_v60 }
0x2786   : > { %v5564_v8 = vpop.eup %5563 }
0x2787   : > { %3993 = vrot.lane.b32.xlu1 %v5564_v8, %s5586_s22 }
0x278a   : > { %v5566_v52 = vpop.eup %5565 }
0x278b   : > { %3995 = vrot.lane.b32.xlu0 %v5566_v52, %s5586_s22  ;;  %v5568_v46 = vpop.eup %5567 }
0x278c   : > { %v5570_v48 = vpop.eup %5569 }
0x27f9   : > { %v3994_v37 = vpop.permute.xlu1 %3993 }
0x27fa   : > { %v3999_v24 = vmul.f32 %v5568_v46, %v3994_v37 }
0x27fd   : > { %v3996_v9 = vpop.permute.xlu0 %3995 }
0x27fe   : > { %v4000_v11 = vmul.f32 %v5570_v48, %v3996_v9 }
0x2800   : > { %v4001_v13 = vpack.c.bf16 %v4000_v11, %v3999_v24 }
0x2802   : > { %5241 = vmatmul.mubr.msk.bf16.vlgmr.msra.gmra.mxu0 %vm556_vm5, %v4001_v13 }
0x2803   : > { %5248 = vmatprep.mubr.msk.bf16.mxu0 %vm5582_vm1, %v5581_v1  ;;  %5245 = vmatpush3.bf16.msra.mxu0 %v5425_v61 }
0x2804   : > { %5246 = vmatprep.subr.bf16.mxu0 %v5581_v1 }
0x2807   : > { %5247 = vmatpush3.bf16.msra.mxu0 %v5426_v42 }
0x28c2   : > { %v4064_v15 = vpop.f32.mrf.mxu0 }
0x28c3   : > { %v4065_v23 = vadd.f32 %v4726_v14, %v4064_v15 }
0x28c4   : > { %v5242_v54 = vpop.f32.mrf.mxu0 }
0x28c5   : > { %4073 = vrot.lane.b32.xlu1 %v4065_v23, %s5585_s14 }
0x28c6   : > { %v4067_v40 = vpop.f32.mrf.mxu0 }
0x28c7   : > { %v4068_v3 = vadd.f32 %v4726_v14, %v4067_v40 }
0x28c8   : > { %v5243_v25 = vpop.f32.mrf.mxu0 }
0x28c9   : > { %4075 = vrot.lane.b32.xlu0 %v4068_v3, %s5585_s14 }
0x28cd   : > { %4164 = vrot.lane.b32.xlu0 %v6453_v34, %s5588_s23 }
0x2937   : > { %v4074_v57 = vpop.permute.xlu1 %4073 }
0x2938   : > { %v4079_v58 = vadd.f32 %v4074_v57, %v3820_v49 }
0x293a   : > { %v4081_v30 = vmul.f32 %v4079_v58, %v5703_v12 }
0x293b   : > { %v4076_v27 = vpop.permute.xlu0 %4075 }
0x293c   : > { %v4080_v28 = vadd.f32 %v4076_v27, %v3821_v26 }
0x293e   : > { %v4082_v31 = vmul.f32 %v4080_v28, %v5710_v20 }
0x293f   : > { %v4165_v16 = vpop.permute.xlu0 %4164 }
0x2940   : > { %v4083_v1 = vpack.c.bf16 %v4082_v31, %v4081_v30 }
0x2942   : > { %4098 = vrot.lane.b32.xlu1 %v4083_v1, %s5586_s22 }
0x2946   : > { %4166 = vrot.lane.b32.xlu1 %v6455_v38, %s5588_s23 }
0x29b4   : > { %v4099_v34 = vpop.permute.xlu1 %4098 }
0x29b5   : > { %5249 = vmatmul.mubr.msk.bf16.vlgmr.msra.gmra.mxu0 %vm556_vm5, %v4099_v34 }
0x2a75   : > { %v4149_v47 = vpop.f32.mrf.mxu0 }
0x2a76   : > { %v4150_v10 = vadd.f32 %v4735_v2, %v4149_v47 }
0x2a77   : > { %v5250_v18 = vpop.f32.mrf.mxu0 }
0x2a78   : > { %v4156_v33 = vmul.f32 %v4150_v10, %v5703_v12  ;;  %v4167_v12 = vpop.permute.xlu1 %4166 }
0x2a79   : > { %v4152_v6 = vpop.f32.mrf.mxu0 }
0x2a7a   : > { %v4160_v38 = vadd.f32 %v4158_v39, %v4156_v33  ;;  %v4153_v7 = vadd.f32 %v4735_v2, %v4152_v6 }
0x2a7b   : > { %v5251_v22 = vpop.f32.mrf.mxu0 }
0x2a7c   : > { %v4170_v43 = vsel %vm461_vm3, %v4160_v38, %v4165_v16  ;;  %v4157_v45 = vmul.f32 %v4153_v7, %v5710_v20 }
0x2a7d   : > { %4173 = vst.msk [vmem:[%s433_s24] sm:$0xff] %vm4172_vm11, %v4170_v43 }
0x2a7e   : > { %v4161_v36 = vadd.f32 %v4159_v50, %v4157_v45 }
0x2a80   : > { %v4171_v19 = vsel %vm461_vm3, %v4161_v36, %v4167_v12 }
0x2a81   : > { %4174 = vst.msk [vmem:[%s433_s24 + $0x8] sm:$0xff] %vm4172_vm11, %v4171_v19 }
0x2a82 PF: > { %s22_s21 = sadd.s32 1, %s5579_s21  }
0x2a83   : > { %p19_p4 = scmp.ge.s32.totalorder %s22_s21, 4  }
0x2a85   :  { %21 = sbr.rel (!%p19_p4) target bundleno = 1 (0x1), region = 155 }

// kernel: residual_coupling_block.1
= control target key start
LH: loop header
LB: loop body
LE: loop exit
PB: predicated region body
PF: predicated region fallthrough
CT: control target
= control target key end

     0   :  { %s5654_s21 = smov 0   ;;  %s6707_s0 = inlined_call_operand.vmem [shape: f32[2,16,8], index: 0, kind: input, shape index: {}]   ;;  %s6708_s1 = inlined_call_operand.vmem [shape: f32[2,16,1], index: 1, kind: input, shape index: {}]   ;;  %s6709_s2 = inlined_call_operand.vmem [shape: bf16[4,4,32], index: 2, kind: input, shape index: {}]   ;;  %s6710_s3 = inlined_call_operand.vmem [shape: f32[4,1,32], index: 3, kind: input, shape index: {}]   ;;  %s6711_s4 = inlined_call_operand.vmem [shape: bf16[4,3,96,64], index: 4, kind: input, shape index: {}]   ;;  %s6712_s5 = inlined_call_operand.vmem [shape: f32[4,3,1,64], index: 5, kind: input, shape index: {}]   ;;  %s6713_s6 = inlined_call_operand.vmem [shape: bf16[4,2,32,64], index: 6, kind: input, shape index: {}]   ;;  %s6714_s7 = inlined_call_operand.vmem [shape: f32[4,2,1,64], index: 7, kind: input, shape index: {}]   ;;  %s6715_s8 = inlined_call_operand.vmem [shape: bf16[4,32,32], index: 8, kind: input, shape index: {}]   ;;  %s6716_s9 = inlined_call_operand.vmem [shape: f32[4,1,32], index: 9, kind: input, shape index: {}]   ;;  %s6717_s10 = inlined_call_operand.vmem [shape: bf16[4,32,4], index: 10, kind: input, shape index: {}]   ;;  %s6718_s11 = inlined_call_operand.vmem [shape: f32[4,1,4], index: 11, kind: input, shape index: {}]   ;;  %s6719_s12 = inlined_call_operand.vmem [shape: f32[2,16,8], index: 12, kind: output, shape index: {}]  }
   0x1 LB: > { %s4242_s22 = sadd.s32 4294967295, %s5579_s21   ;;  %p4246_p0 = scmp.ge.s32.totalorder %s5579_s21, 1  ;;  %s5579_s21 = sphi %s5654_s21, %s22_s21  }
   0x2   : > { %p372_p1 = scmp.lt.s32.totalorder %s5579_s21, 3 }
   0x4   : > { %p373_p2 = pnand %p4246_p0, %p372_p1 }
   0x5   : > { %p419_p3 = scmp.lt.s32.totalorder (!%p373_p2), %s4242_s22, 1  ;;  %s5585_s14 = smov (!%p373_p2), 32  }
   0x6   : > { %376 = sbr.rel (%p373_p2) target bundleno = 10882 (0x2a82), region = 68  ;;  %s5587_s19 = smov (!%p373_p2), 124  }
   0x7   : > { %s5588_s23 = smov (!%p373_p2), 4  }
   0xb   : > { %v453_v0 = vld [vmem:[%s6709_s2] sm:$0x3]  ;;  %vm465_vm0 = vcmask 1041408   ;;  %v5581_v1 = vmov 0.0   ;;  %vm5582_vm1 = vmmov 0   ;;  %vm449_vm2 = vcmask 257024  }
   0xc   : > { %4908 = vmatprep.subr.bf16.mxu0 %v5581_v1  ;;  %v467_v2 = vsel %vm465_vm0, %v453_v0, 0  ;;  %4910 = vmatprep.mubr.msk.bf16.mxu0 %vm5582_vm1, %v5581_v1  ;;  %s6721_s22 = smov (!%p419_p3, %s4242_s22), 1  ;;  %v5583_v3 = vmov 0   ;;  %vm461_vm3 = vcmask 31744   ;;  %v5270_v9 = vld [vmem:[%s6711_s4 + $0x28] sm:$0xff]   ;;  %v5271_v10 = vld [vmem:[%s6711_s4 + $0x20] sm:$0xff]  }
   0xd   : > { %4909 = vmatpush3.bf16.msra.mxu0 %v467_v2  ;;  %5268 = vset.pattern.permute.xlu0 %v5583_v3  ;;  %450 = vst.msk [vmem:[#allocation2] sm:$0xf] %vm449_vm2, %v5583_v3  ;;  %451 = vst.msk [vmem:[#allocation2 + $0xc] sm:$0xf] %vm449_vm2, %v5583_v3  ;;  %s5674_s25 = sshll.u32 %s6721_s22, 4  ;;  %v5272_v24 = vld [vmem:[%s6711_s4 + $0x18] sm:$0xff]  }
   0xe   : > { %4914 = vmatprep.subr.bf16.mxu1 %v5581_v1  ;;  %4926 = vmatprep.mubr.msk.bf16.mxu1 %vm5582_vm1, %v5581_v1  ;;  %s5681_s28 = scalar_lea.vmem %s6707_s0, %s5674_s25  ;;  %s428_s13 = scalar_lea.vmem %s6708_s1, %s5674_s25  ;;  %v4253_v11 = vld [vmem:[%s6710_s3] ss:$0 sm:$0xff]  ;;  %v5274_v25 = vld [vmem:[%s6711_s4 + $0x10] sm:$0xff]   ;;  %v5275_v27 = vld [vmem:[%s6711_s4 + $0x8] sm:$0xff]   ;;  %vm548_vm4 = vcmask 1042432   ;;  %vm556_vm5 = vcmask 261120  }
   0xf   : > { %4930 = vmatprep.subr.bf16.mxu0 %v5581_v1  ;;  %v435_v4 = vld [vmem:[%s5681_s28] sm:$0xff]  ;;  %v436_v5 = vld [vmem:[%s5681_s28 + $0x8] sm:$0xff]  ;;  %4915 = vmatpush3.bf16.msra.mxu1 %v5270_v9  ;;  %vm562_vm6 = vcmask 523264   ;;  %vm586_vm7 = vsmask.f32 4352  ;;  %vm638_vm8 = vcmask 785408   ;;  %s433_s24 = scalar_lea.vmem %s6719_s12, %s5674_s25 }
  0x10   : > { %v437_v6 = vld [vmem:[%s428_s13] sm:$0xff]  ;;  %v452_v7 = vpack.c.bf16 %v436_v5, %v435_v4  ;;  %v438_v8 = vld [vmem:[%s428_s13 + $0x8] sm:$0xff]  ;;  %4916 = vmatprep.subr.bf16.mxu1 %v5581_v1  ;;  %s5584_s13 = smov 64   ;;  %s5586_s22 = smov 96   ;;  %vm857_vm9 = vcmask 1044480   ;;  %vm1113_vm10 = vcmask 1045504  }
  0x11   : > { %441 = vperm.xlu0 %5268, %v437_v6   ;;  %v5276_v35 = vld [vmem:[%s6711_s4] sm:$0xff]   ;;  %v5277_v9 = vld [vmem:[%s6713_s6 + $0x8] sm:$0xff]   ;;  %vm4172_vm11 = vcmask 64512  }
  0x12   : > { %4911 = vmatmul.mubr.msk.bf16.vlgmr.msra.gmra.mxu0 %vm461_vm3, %v452_v7  ;;  %v4261_v61 = vld [vmem:[%s6712_s5] ss:$0 sm:$0xff] }
  0x13   : > { %4934 = vmatprep.mubr.msk.bf16.mxu0 %vm5582_vm1, %v5581_v1  ;;  %4917 = vmatpush3.bf16.msra.mxu1 %v5271_v10 }
  0x14   : > { %4918 = vmatprep.subr.bf16.mxu1 %v5581_v1  ;;  %v5269_v26 = vld [vmem:[#allocation2 + $0xc] ss:$0 sps:$4 sm:$0x11]   ;;  %v522_v40 = vld [vmem:[#allocation2] sm:$0x8]  ;;  %4931 = vmatpush3.bf16.msra.mxu0 %v5277_v9 }
  0x15   : > { %446 = vperm.xlu0 %5268, %v438_v8   ;;  %v550_v31 = vrot.slane %v5269_v26, 5  ;;  %4932 = vmatprep.subr.bf16.mxu0 %v5581_v1  ;;  %v5282_v26 = vld [vmem:[%s6711_s4 + $0x58] sm:$0xff]  }
  0x17   : > { %4919 = vmatpush3.bf16.msra.mxu1 %v5272_v24 }
  0x18   : > { %4920 = vmatprep.subr.bf16.mxu1 %v5581_v1 }
  0x1b   : > { %4921 = vmatpush3.bf16.msra.mxu1 %v5274_v25 }
  0x1c   : > { %4922 = vmatprep.subr.bf16.mxu1 %v5581_v1 }
  0x1f   : > { %4923 = vmatpush3.bf16.msra.mxu1 %v5275_v27  ;;  %v5283_v27 = vld [vmem:[%s6711_s4 + $0x50] sm:$0xff]  }
  0x20   : > { %4924 = vmatprep.subr.bf16.mxu1 %v5581_v1 }
  0x23   : > { %4925 = vmatpush3.bf16.msra.mxu1 %v5276_v35 }
  0x24   : > { %4954 = vmatprep.subr.bf16.mxu1 %v5581_v1 }
  0x8c   : > { %v5703_v12 = vpop.permute.xlu0 %441 }
  0x90   : > { %v5710_v20 = vpop.permute.xlu0 %446 }
  0xd2   : > { %v503_v13 = vpop.f32.mrf.mxu0 }
  0xd3   : > { %v504_v14 = vadd.f32 %v4253_v11, %v503_v13  ;;  %v5278_v13 = vld [vmem:[%s6713_s6] sm:$0xff]  }
  0xd4   : > { %v4912_v15 = vpop.f32.mrf.mxu0  ;;  %4933 = vmatpush3.bf16.msra.mxu0 %v5278_v13 }
  0xd5   : > { %v5706_v16 = vmul.f32 %v504_v14, %v5703_v12  ;;  %4938 = vmatprep.subr.bf16.mxu0 %v5581_v1 }
  0xd6   : > { %v506_v17 = vpop.f32.mrf.mxu0 }
  0xd7   : > { %v4744_v18 = vpack.c.bf16 %v5706_v16, %v5706_v16  ;;  %v507_v19 = vadd.f32 %v4253_v11, %v506_v17 }
  0xd8   : > { %v4913_v21 = vpop.f32.mrf.mxu0 }
  0xd9   : > { %520 = vst.msk [vmem:[#allocation2 + $0x4] sm:$0xf] %vm449_vm2, %v4744_v18  ;;  %v5714_v22 = vmul.f32 %v507_v19, %v5710_v20 }
  0xdb   : > { %v4745_v23 = vpack.c.bf16 %v5714_v22, %v5714_v22 }
  0xdd   : > { %521 = vst.msk [vmem:[#allocation2 + $0x8] sm:$0xf] %vm449_vm2, %v4745_v23 }
  0xe0   : > { %v523_v28 = vld [vmem:[#allocation2 + $0x4] sm:$0xf] }
  0xe1   : > { %v4257_v45 = vcombine.low %v522_v40, %v523_v28 }
  0xe4   : > { %v524_v29 = vld [vmem:[#allocation2 + $0x8] sm:$0xf] }
  0xe5   : > { %v4259_v30 = vcombine.low %v523_v28, %v524_v29  ;;  %v4258_v41 = vcombine.low %v524_v29, %v524_v29  ;;  %v5284_v28 = vld [vmem:[%s6711_s4 + $0x48] sm:$0xff]   ;;  %v5285_v29 = vld [vmem:[%s6711_s4 + $0x40] sm:$0xff]  }
  0xe7   : > { %v549_v32 = vrot.slane %v4259_v30, 5  ;;  %v536_v33 = vshrl.u32 %v4259_v30, 16  ;;  %v539_v34 = vshll.u32 %v4259_v30, 16  ;;  %v4271_v30 = vld [vmem:[%s6714_s7] ss:$0 sm:$0xff] }
  0xe9   : > { %v551_v36 = vsel %vm548_vm4, %v549_v32, %v550_v31  ;;  %v538_v37 = vrot.slane %v536_v33, 4  ;;  %v541_v38 = vrot.slane %v539_v34, 5 }
  0xea   : > { %554 = vrot.lane.b32.xlu0 %v551_v36, %s5584_s13 }
  0xeb   : > { %v542_v39 = vor.u32 %v541_v38, %v538_v37 }
  0xed   : > { %543 = vrot.lane.b32.xlu1 %v542_v39, %s5585_s14 }
  0xf1   : > { %552 = vrot.lane.b32.xlu1 %v549_v32, %s5584_s13 }
 0x15c   : > { %v555_v43 = vpop.permute.xlu0 %554 }
 0x15f   : > { %v544_v42 = vpop.permute.xlu1 %543 }
 0x160   : > { %v561_v44 = vsel %vm556_vm5, %v4258_v41, %v544_v42  ;;  %v559_v49 = vsel %vm556_vm5, %v4257_v45, %v544_v42  ;;  %v5288_v42 = vld [vmem:[%s6711_s4 + $0x38] sm:$0xff]  }
 0x161   : > { %v566_v46 = vsel %vm562_vm6, %v561_v44, %v555_v43  ;;  %v5281_v44 = vld [vmem:[#allocation2 + $0xc] ss:$0 sps:$4 sm:$0x11]  }
 0x162   : > { %v594_v47 = vshrl.u32 %v566_v46, 16  ;;  %v597_v48 = vshll.u32 %v566_v46, 16 }
 0x163   : > { %v553_v50 = vpop.permute.xlu1 %552 }
 0x164   : > { %v564_v51 = vsel %vm562_vm6, %v559_v49, %v553_v50  ;;  %v596_v52 = vrot.slane %v594_v47, 3  ;;  %v599_v53 = vrot.slane %v597_v48, 4 }
 0x165   : > { %v587_v54 = vshrl.u32 %v564_v51, 16  ;;  %v590_v55 = vshll.u32 %v564_v51, 16  ;;  %v819_v51 = vrot.slane %v5281_v44, 6 }
 0x166   : > { %v600_v58 = vor.u32 %v599_v53, %v596_v52  ;;  %v791_v53 = vld [vmem:[#allocation2] sm:$0x8] }
 0x167   : > { %v589_v56 = vrot.slane %v587_v54, 3  ;;  %v592_v57 = vrot.slane %v590_v55, 4 }
 0x169   : > { %v593_v59 = vor.u32 %v592_v57, %v589_v56 }
 0x16b   : > { %v601_v60 = vsel %vm586_vm7, %v593_v59, %v600_v58 }
 0x16c   : > { %4927 = vmatmul.mubr.msk.bf16.vlgmr.msra.gmra.mxu1 %vm638_vm8, %v601_v60 }
 0x16d   : > { %4958 = vmatprep.mubr.msk.bf16.mxu1 %vm5582_vm1, %v5581_v1 }
 0x22c   : > { %v676_v62 = vpop.f32.mrf.mxu1 }
 0x22d   : > { %v677_v63 = vadd.f32 %v4261_v61, %v676_v62 }
 0x22e   : > { %v4928_v0 = vpop.f32.mrf.mxu1 }
 0x22f   : > { %v4269_v2 = vmul.f32 -1.442695, %v677_v63 }
 0x230   : > { %v679_v3 = vpop.f32.mrf.mxu1 }
 0x231   : > { %5427 = vpow2.f32 %v4269_v2  ;;  %v680_v4 = vadd.f32 %v4261_v61, %v679_v3  ;;  %v4295_v3 = vld [vmem:[%s6712_s5 + $0x1] ss:$0 sm:$0xff] }
 0x232   : > { %v4929_v5 = vpop.f32.mrf.mxu1 }
 0x233   : > { %v4270_v6 = vmul.f32 -1.442695, %v680_v4 }
 0x235   : > { %5429 = vpow2.f32 %v4270_v6 }
 0x23e   : > { %v5428_v7 = vpop.eup %5427 }
 0x23f   : > { %v691_v8 = vadd.f32 1.0, %v5428_v7 }
 0x241   : > { %5431 = vrcp.f32 %v691_v8 }
 0x242   : > { %v5430_v10 = vpop.eup %5429 }
 0x243   : > { %v692_v11 = vadd.f32 1.0, %v5430_v10 }
 0x245   : > { %5433 = vrcp.f32 %v692_v11 }
 0x246   : > { %5435 = vtanh.f32 %v677_v63 }
 0x247   : > { %5437 = vtanh.f32 %v680_v4 }
 0x24e   : > { %v5432_v14 = vpop.eup %5431 }
 0x24f   : > { %699 = vrot.lane.b32.xlu1 %v5432_v14, %s5586_s22 }
 0x252   : > { %v5434_v15 = vpop.eup %5433 }
 0x253   : > { %701 = vrot.lane.b32.xlu0 %v5434_v15, %s5586_s22  ;;  %v5436_v18 = vpop.eup %5435 }
 0x254   : > { %v5438_v19 = vpop.eup %5437 }
 0x2c1   : > { %v700_v17 = vpop.permute.xlu1 %699 }
 0x2c2   : > { %v705_v23 = vmul.f32 %v5436_v18, %v700_v17  ;;  %v5290_v17 = vld [vmem:[%s6713_s6 + $0x18] sm:$0xff]  }
 0x2c3   : > { %4955 = vmatpush3.bf16.msra.mxu1 %v5290_v17 }
 0x2c4   : > { %4956 = vmatprep.subr.bf16.mxu1 %v5581_v1 }
 0x2c5   : > { %v702_v21 = vpop.permute.xlu0 %701 }
 0x2c6   : > { %v706_v24 = vmul.f32 %v5438_v19, %v702_v21  ;;  %v5291_v19 = vld [vmem:[%s6713_s6 + $0x10] sm:$0xff]  }
 0x2c7   : > { %4957 = vmatpush3.bf16.msra.mxu1 %v5291_v19 }
 0x2c8   : > { %v707_v25 = vpack.c.bf16 %v706_v24, %v705_v23  ;;  %4962 = vmatprep.subr.bf16.mxu1 %v5581_v1 }
 0x2ca   : > { %4935 = vmatmul.mubr.msk.bf16.vlgmr.msra.gmra.mxu0 %vm556_vm5, %v707_v25 }
 0x2cb   : > { %4950 = vmatprep.mubr.msk.bf16.mxu0 %vm5582_vm1, %v5581_v1  ;;  %4939 = vmatpush3.bf16.msra.mxu0 %v5282_v26 }
 0x2cc   : > { %4940 = vmatprep.subr.bf16.mxu0 %v5581_v1 }
 0x2cf   : > { %4941 = vmatpush3.bf16.msra.mxu0 %v5283_v27 }
 0x2d0   : > { %4942 = vmatprep.subr.bf16.mxu0 %v5581_v1 }
 0x2d3   : > { %4943 = vmatpush3.bf16.msra.mxu0 %v5284_v28 }
 0x2d4   : > { %4944 = vmatprep.subr.bf16.mxu0 %v5581_v1 }
 0x2d7   : > { %4945 = vmatpush3.bf16.msra.mxu0 %v5285_v29 }
 0x2d8   : > { %4946 = vmatprep.subr.bf16.mxu0 %v5581_v1 }
 0x2db   : > { %4947 = vmatpush3.bf16.msra.mxu0 %v5288_v42 }
 0x2dc   : > { %4948 = vmatprep.subr.bf16.mxu0 %v5581_v1 }
 0x38a   : > { %v768_v31 = vpop.f32.mrf.mxu0 }
 0x38b   : > { %v5782_v32 = vadd.f32 %v4271_v30, %v768_v31  ;;  %v5295_v31 = vld [vmem:[%s6711_s4 + $0x88] sm:$0xff]  }
 0x38c   : > { %v4936_v33 = vpop.f32.mrf.mxu0 }
 0x38d   : > { %v775_v34 = vadd.f32 %v5782_v32, %v5706_v16  ;;  %v5296_v33 = vld [vmem:[%s6711_s4 + $0x80] sm:$0xff]  }
 0x38e   : > { %v771_v35 = vpop.f32.mrf.mxu0 }
 0x38f   : > { %v5787_v36 = vmul.f32 %v775_v34, %v5703_v12  ;;  %v5789_v37 = vadd.f32 %v4271_v30, %v771_v35  ;;  %v5297_v34 = vld [vmem:[%s6711_s4 + $0x78] sm:$0xff]   ;;  %v5298_v35 = vld [vmem:[%s6711_s4 + $0x70] sm:$0xff]  }
 0x390   : > { %v4937_v38 = vpop.f32.mrf.mxu0 }
 0x391   : > { %v4746_v39 = vpack.c.bf16 %v5787_v36, %v5787_v36  ;;  %v776_v40 = vadd.f32 %v5789_v37, %v5714_v22  ;;  %v5289_v22 = vld [vmem:[%s6711_s4 + $0x30] sm:$0xff]   ;;  %v4310_v38 = vld [vmem:[%s6714_s7 + $0x1] ss:$0 sm:$0xff] }
 0x392   : > { %4949 = vmatpush3.bf16.msra.mxu0 %v5289_v22 }
 0x393   : > { %789 = vst.msk [vmem:[#allocation2 + $0x4] sm:$0xf] %vm449_vm2, %v4746_v39  ;;  %v5797_v41 = vmul.f32 %v776_v40, %v5710_v20  ;;  %4978 = vmatprep.subr.bf16.mxu0 %v5581_v1 }
 0x395   : > { %v4747_v16 = vpack.c.bf16 %v5797_v41, %v5797_v41 }
 0x397   : > { %790 = vst.msk [vmem:[#allocation2 + $0x8] sm:$0xf] %vm449_vm2, %v4747_v16 }
 0x39a   : > { %v795_v43 = vld [vmem:[#allocation2 + $0x4] sm:$0xe] }
 0x39b   : > { %v792_v46 = vld [vmem:[#allocation2 + $0x4] sm:$0xf] }
 0x39c   : > { %v4277_v54 = vcombine.low %v791_v53, %v792_v46 }
 0x39e   : > { %v794_v45 = vld [vmem:[#allocation2 + $0x8] sm:$0xf] }
 0x39f   : > { %v4280_v47 = vcombine.low %v795_v43, %v794_v45  ;;  %v4279_v48 = vcombine.low %v792_v46, %v794_v45  ;;  %v5287_v58 = vld [vmem:[#allocation2 + $0x8] ss:$0 sps:$4 sm:$0x77]  }
 0x3a1   : > { %v818_v49 = vrot.slane %v4280_v47, 6  ;;  %v808_v50 = vrot.slane %v4279_v48, 5 }
 0x3a3   : > { %821 = vrot.lane.b32.xlu0 %v818_v49, %s5584_s13  ;;  %809 = vrot.lane.b32.xlu1 %v808_v50, %s5585_s14  ;;  %v820_v52 = vsel %vm465_vm0, %v818_v49, %v819_v51  ;;  %v5301_v50 = vld [vmem:[%s6711_s4 + $0x68] sm:$0xff]  }
 0x3a7   : > { %823 = vrot.lane.b32.xlu1 %v820_v52, %s5584_s13 }
 0x415   : > { %v822_v55 = vpop.permute.xlu0 %821  ;;  %v810_v56 = vpop.permute.xlu1 %809 }
 0x416   : > { %v827_v57 = vsel %vm556_vm5, %v4277_v54, %v810_v56  ;;  %v829_v60 = vsel %vm556_vm5, %v5287_v58, %v810_v56  ;;  %v5294_v56 = vld [vmem:[#allocation2 + $0xc] ss:$0 sps:$4 sm:$0x33]  }
 0x417   : > { %v831_v59 = vsel %vm562_vm6, %v827_v57, %v822_v55  ;;  %v1051_v57 = vld [vmem:[#allocation2] sm:$0xc] }
 0x418   : > { %v858_v63 = vrot.slane %v831_v59, 3 }
 0x419   : > { %v824_v61 = vpop.permute.xlu1 %823 }
 0x41a   : > { %v833_v62 = vsel %vm562_vm6, %v829_v60, %v824_v61 }
 0x41b   : > { %v859_v0 = vrot.slane %v833_v62, 3 }
 0x41d   : > { %v860_v2 = vsel %vm857_vm9, %v858_v63, %v859_v0 }
 0x41e   : > { %4951 = vmatmul.mubr.msk.bf16.vlgmr.msra.gmra.mxu0 %vm638_vm8, %v860_v2 }
 0x41f   : > { %4982 = vmatprep.mubr.msk.bf16.mxu0 %vm5582_vm1, %v5581_v1 }
 0x4de   : > { %v934_v4 = vpop.f32.mrf.mxu0 }
 0x4df   : > { %v935_v5 = vadd.f32 %v4295_v3, %v934_v4 }
 0x4e0   : > { %v4952_v6 = vpop.f32.mrf.mxu0 }
 0x4e1   : > { %v4303_v7 = vmul.f32 -1.442695, %v935_v5 }
 0x4e2   : > { %v937_v8 = vpop.f32.mrf.mxu0 }
 0x4e3   : > { %5439 = vpow2.f32 %v4303_v7  ;;  %v938_v9 = vadd.f32 %v4295_v3, %v937_v8  ;;  %v4334_v7 = vld [vmem:[%s6712_s5 + $0x2] ss:$0 sm:$0xff] }
 0x4e4   : > { %v4953_v10 = vpop.f32.mrf.mxu0 }
 0x4e5   : > { %v4304_v11 = vmul.f32 -1.442695, %v938_v9 }
 0x4e7   : > { %5441 = vpow2.f32 %v4304_v11 }
 0x4f0   : > { %v5440_v13 = vpop.eup %5439 }
 0x4f1   : > { %v949_v14 = vadd.f32 1.0, %v5440_v13 }
 0x4f3   : > { %5443 = vrcp.f32 %v949_v14 }
 0x4f4   : > { %v5442_v15 = vpop.eup %5441 }
 0x4f5   : > { %v950_v18 = vadd.f32 1.0, %v5442_v15 }
 0x4f7   : > { %5445 = vrcp.f32 %v950_v18 }
 0x4f8   : > { %5447 = vtanh.f32 %v935_v5 }
 0x4f9   : > { %5449 = vtanh.f32 %v938_v9 }
 0x500   : > { %v5444_v21 = vpop.eup %5443 }
 0x501   : > { %957 = vrot.lane.b32.xlu0 %v5444_v21, %s5586_s22 }
 0x504   : > { %v5446_v23 = vpop.eup %5445 }
 0x505   : > { %959 = vrot.lane.b32.xlu1 %v5446_v23, %s5586_s22  ;;  %v5448_v25 = vpop.eup %5447  ;;  %v5303_v23 = vld [vmem:[%s6715_s8 + $0x8] sm:$0xff]  }
 0x506   : > { %v5450_v26 = vpop.eup %5449  ;;  %4979 = vmatpush3.bf16.msra.mxu0 %v5303_v23 }
 0x507   : > { %4980 = vmatprep.subr.bf16.mxu0 %v5581_v1 }
 0x573   : > { %v958_v24 = vpop.permute.xlu0 %957 }
 0x574   : > { %v963_v28 = vmul.f32 %v5448_v25, %v958_v24  ;;  %v5304_v25 = vld [vmem:[%s6715_s8] sm:$0xff]  }
 0x575   : > { %4981 = vmatpush3.bf16.msra.mxu0 %v5304_v25 }
 0x576   : > { %4986 = vmatprep.subr.bf16.mxu0 %v5581_v1 }
 0x577   : > { %v960_v27 = vpop.permute.xlu1 %959 }
 0x578   : > { %v964_v29 = vmul.f32 %v5450_v26, %v960_v27 }
 0x57a   : > { %v965_v30 = vpack.c.bf16 %v964_v29, %v963_v28 }
 0x57c   : > { %4959 = vmatmul.mubr.msk.bf16.vlgmr.msra.gmra.mxu1 %vm556_vm5, %v965_v30 }
 0x57d   : > { %4974 = vmatprep.mubr.msk.bf16.mxu1 %vm5582_vm1, %v5581_v1  ;;  %4963 = vmatpush3.bf16.msra.mxu1 %v5295_v31 }
 0x57e   : > { %4964 = vmatprep.subr.bf16.mxu1 %v5581_v1 }
 0x581   : > { %4965 = vmatpush3.bf16.msra.mxu1 %v5296_v33 }
 0x582   : > { %4966 = vmatprep.subr.bf16.mxu1 %v5581_v1 }
 0x585   : > { %4967 = vmatpush3.bf16.msra.mxu1 %v5297_v34 }
 0x586   : > { %4968 = vmatprep.subr.bf16.mxu1 %v5581_v1 }
 0x589   : > { %4969 = vmatpush3.bf16.msra.mxu1 %v5298_v35 }
 0x58a   : > { %4970 = vmatprep.subr.bf16.mxu1 %v5581_v1 }
 0x58d   : > { %4971 = vmatpush3.bf16.msra.mxu1 %v5301_v50 }
 0x58e   : > { %4972 = vmatprep.subr.bf16.mxu1 %v5581_v1 }
 0x63c   : > { %v1028_v39 = vpop.f32.mrf.mxu1 }
 0x63d   : > { %v5857_v40 = vadd.f32 %v4310_v38, %v1028_v39 }
 0x63e   : > { %v4960_v16 = vpop.f32.mrf.mxu1 }
 0x63f   : > { %v1035_v42 = vadd.f32 %v5857_v40, %v5787_v36  ;;  %v5302_v36 = vld [vmem:[%s6711_s4 + $0x60] sm:$0xff]  }
 0x640   : > { %v1031_v22 = vpop.f32.mrf.mxu1  ;;  %4973 = vmatpush3.bf16.msra.mxu1 %v5302_v36  ;;  %v1039_v36 = vadd.f32 %v5857_v40, %v5782_v32 }
 0x641   : > { %v1037_v43 = vmul.f32 %v1035_v42, %v5703_v12  ;;  %v5862_v44 = vadd.f32 %v4310_v38, %v1031_v22  ;;  %5000 = vmatprep.subr.bf16.mxu1 %v5581_v1  ;;  %v4344_v38 = vld [vmem:[%s6716_s9] ss:$0 sm:$0xff] }
 0x642   : > { %v4961_v45 = vpop.f32.mrf.mxu1 }
 0x643   : > { %v4748_v46 = vpack.c.bf16 %v1037_v43, %v1037_v43  ;;  %v1036_v47 = vadd.f32 %v5862_v44, %v5797_v41  ;;  %v5305_v43 = vld [vmem:[%s6717_s10 + $0x8] sm:$0xff]  }
 0x645   : > { %1049 = vst.msk [vmem:[#allocation2 + $0x4] sm:$0xf] %vm449_vm2, %v4748_v46  ;;  %v1038_v48 = vmul.f32 %v1036_v47, %v5710_v20  ;;  %v5306_v47 = vld [vmem:[%s6717_s10] sm:$0xff]  }
 0x647   : > { %v4749_v49 = vpack.c.bf16 %v1038_v48, %v1038_v48  ;;  %v5571_v48 = vld [vmem:[%s5681_s28] sm:$0xff] }
 0x649   : > { %1050 = vst.msk [vmem:[#allocation2 + $0x8] sm:$0xf] %vm449_vm2, %v4749_v49  ;;  %v5918_v49 = vmul.f32 %v5571_v48, %v5703_v12 }
 0x64c   : > { %v1055_v41 = vld [vmem:[#allocation2 + $0x4] sm:$0xc] }
 0x64d   : > { %v1052_v52 = vld [vmem:[#allocation2 + $0x4] sm:$0xf] }
 0x64e   : > { %v4316_v58 = vcombine.low %v1051_v57, %v1052_v52  ;;  %v5572_v57 = vld [vmem:[%s5681_s28 + $0x8] sm:$0xff] }
 0x650   : > { %v1054_v51 = vld [vmem:[#allocation2 + $0x8] sm:$0xf] }
 0x651   : > { %v4319_v53 = vcombine.low %v1055_v41, %v1054_v51  ;;  %v4318_v54 = vcombine.low %v1052_v52, %v1054_v51  ;;  %v5300_v62 = vld [vmem:[#allocation2 + $0x8] ss:$0 sps:$4 sm:$0x33]   ;;  %v1040_v51 = vadd.f32 %v5862_v44, %v5789_v37  ;;  %v4352_v37 = vld [vmem:[%s6709_s2 + $0x2] sm:$0x3] }
 0x652   : > { %v1401_v40 = vsel %vm465_vm0, %v4352_v37, 0  ;;  %v4348_v44 = vld [vmem:[%s6718_s11] ss:$0 sm:$0xff] }
 0x653   : > { %1077 = vrot.lane.b32.xlu1 %v4319_v53, %s5584_s13  ;;  %v1068_v55 = vrot.slane %v4318_v54, 6 }
 0x655   : > { %1069 = vrot.lane.b32.xlu0 %v1068_v55, %s5585_s14 }
 0x659   : > { %1079 = vrot.lane.b32.xlu0 %v5294_v56, %s5584_s13 }
 0x6c5   : > { %v1078_v61 = vpop.permute.xlu1 %1077 }
 0x6c7   : > { %v1070_v59 = vpop.permute.xlu0 %1069 }
 0x6c8   : > { %v1083_v60 = vsel %vm556_vm5, %v4316_v58, %v1070_v59  ;;  %v1085_v0 = vsel %vm556_vm5, %v5300_v62, %v1070_v59  ;;  %v5931_v58 = vmul.f32 %v5572_v57, %v5710_v20 }
 0x6c9   : > { %v1087_v63 = vsel %vm562_vm6, %v1083_v60, %v1078_v61 }
 0x6ca   : > { %v1114_v4 = vrot.slane %v1087_v63, 2 }
 0x6cb   : > { %v1080_v2 = vpop.permute.xlu0 %1079 }
 0x6cc   : > { %v1089_v3 = vsel %vm562_vm6, %v1085_v0, %v1080_v2 }
 0x6cd   : > { %v1115_v5 = vrot.slane %v1089_v3, 2 }
 0x6cf   : > { %v1116_v6 = vsel %vm1113_vm10, %v1114_v4, %v1115_v5 }
 0x6d0   : > { %4975 = vmatmul.mubr.msk.bf16.vlgmr.msra.gmra.mxu1 %vm638_vm8, %v1116_v6 }
 0x6d1   : > { %5012 = vmatprep.mubr.msk.bf16.mxu1 %vm5582_vm1, %v5581_v1 }
 0x790   : > { %v1190_v8 = vpop.f32.mrf.mxu1 }
 0x791   : > { %v1191_v9 = vadd.f32 %v4334_v7, %v1190_v8 }
 0x792   : > { %v4976_v10 = vpop.f32.mrf.mxu1 }
 0x793   : > { %v4342_v11 = vmul.f32 -1.442695, %v1191_v9  ;;  %v5310_v10 = vld [vmem:[%s6711_s4 + $0xb0] sm:$0xff]  }
 0x794   : > { %v1193_v13 = vpop.f32.mrf.mxu1 }
 0x795   : > { %5451 = vpow2.f32 %v4342_v11  ;;  %v1194_v14 = vadd.f32 %v4334_v7, %v1193_v13  ;;  %v4354_v11 = vld [vmem:[%s6710_s3 + $0x1] ss:$0 sm:$0xff] }
 0x796   : > { %v4977_v15 = vpop.f32.mrf.mxu1 }
 0x797   : > { %v4343_v17 = vmul.f32 -1.442695, %v1194_v14 }
 0x799   : > { %5453 = vpow2.f32 %v4343_v17 }
 0x7a2   : > { %v5452_v18 = vpop.eup %5451 }
 0x7a3   : > { %v1205_v19 = vadd.f32 1.0, %v5452_v18 }
 0x7a5   : > { %5455 = vrcp.f32 %v1205_v19 }
 0x7a6   : > { %v5454_v21 = vpop.eup %5453 }
 0x7a7   : > { %v1206_v24 = vadd.f32 1.0, %v5454_v21 }
 0x7a9   : > { %5457 = vrcp.f32 %v1206_v24 }
 0x7aa   : > { %5459 = vtanh.f32 %v1191_v9  ;;  %v5309_v9 = vld [vmem:[%s6711_s4 + $0xb8] sm:$0xff]  }
 0x7ab   : > { %5461 = vtanh.f32 %v1194_v14  ;;  %5001 = vmatpush3.bf16.msra.mxu1 %v5309_v9 }
 0x7ac   : > { %5002 = vmatprep.subr.bf16.mxu1 %v5581_v1 }
 0x7af   : > { %5003 = vmatpush3.bf16.msra.mxu1 %v5310_v10 }
 0x7b0   : > { %5004 = vmatprep.subr.bf16.mxu1 %v5581_v1 }
 0x7b2   : > { %v5456_v26 = vpop.eup %5455 }
 0x7b3   : > { %1213 = vrot.lane.b32.xlu1 %v5456_v26, %s5586_s22  ;;  %v5311_v26 = vld [vmem:[%s6711_s4 + $0xa8] sm:$0xff]  }
 0x7b4   : > { %5005 = vmatpush3.bf16.msra.mxu1 %v5311_v26 }
 0x7b5   : > { %5006 = vmatprep.subr.bf16.mxu1 %v5581_v1 }
 0x7b6   : > { %v5458_v27 = vpop.eup %5457 }
 0x7b7   : > { %1215 = vrot.lane.b32.xlu0 %v5458_v27, %s5586_s22  ;;  %v5460_v29 = vpop.eup %5459  ;;  %v5314_v27 = vld [vmem:[%s6711_s4 + $0xa0] sm:$0xff]  }
 0x7b8   : > { %v5462_v30 = vpop.eup %5461  ;;  %5007 = vmatpush3.bf16.msra.mxu1 %v5314_v27 }
 0x7b9   : > { %5008 = vmatprep.subr.bf16.mxu1 %v5581_v1 }
 0x825   : > { %v1214_v28 = vpop.permute.xlu1 %1213 }
 0x826   : > { %v1219_v33 = vmul.f32 %v5460_v29, %v1214_v28 }
 0x829   : > { %v1216_v31 = vpop.permute.xlu0 %1215 }
 0x82a   : > { %v1220_v34 = vmul.f32 %v5462_v30, %v1216_v31  ;;  %v5315_v30 = vld [vmem:[%s6711_s4 + $0x98] sm:$0xff]  }
 0x82b   : > { %5009 = vmatpush3.bf16.msra.mxu1 %v5315_v30 }
 0x82c   : > { %v1221_v35 = vpack.c.bf16 %v1220_v34, %v1219_v33  ;;  %5010 = vmatprep.subr.bf16.mxu1 %v5581_v1 }
 0x82e   : > { %4983 = vmatmul.mubr.msk.bf16.vlgmr.msra.gmra.mxu0 %vm556_vm5, %v1221_v35 }
 0x82f   : > { %4990 = vmatprep.mubr.msk.bf16.mxu0 %vm5582_vm1, %v5581_v1  ;;  %4987 = vmatpush3.bf16.msra.mxu0 %v5305_v43 }
 0x830   : > { %4988 = vmatprep.subr.bf16.mxu0 %v5581_v1 }
 0x833   : > { %4989 = vmatpush3.bf16.msra.mxu0 %v5306_v47 }
 0x834   : > { %4994 = vmatprep.subr.bf16.mxu0 %v5581_v1 }
 0x8ee   : > { %v1282_v39 = vpop.f32.mrf.mxu0 }
 0x8ef   : > { %v1283_v16 = vadd.f32 %v4344_v38, %v1282_v39  ;;  %v5316_v39 = vld [vmem:[%s6711_s4 + $0x90] sm:$0xff]  }
 0x8f0   : > { %v4984_v42 = vpop.f32.mrf.mxu0  ;;  %5011 = vmatpush3.bf16.msra.mxu1 %v5316_v39  ;;  %v4390_v39 = vld [vmem:[%s6714_s7 + $0x2] ss:$0 sm:$0xff] }
 0x8f1   : > { %1291 = vrot.lane.b32.xlu1 %v1283_v16, %s5585_s14  ;;  %5040 = vmatprep.subr.bf16.mxu1 %v5581_v1 }
 0x8f2   : > { %v1285_v22 = vpop.f32.mrf.mxu0 }
 0x8f3   : > { %v1286_v45 = vadd.f32 %v4344_v38, %v1285_v22  ;;  %v5308_v38 = vld [vmem:[#allocation2 + $0xc] ss:$0 sps:$4 sm:$0x11]  }
 0x8f4   : > { %v4985_v46 = vpop.f32.mrf.mxu0  ;;  %v1483_v43 = vrot.slane %v5308_v38, 5  ;;  %v5325_v38 = vld [vmem:[%s6711_s4 + $0xd0] sm:$0xff]  }
 0x8f5   : > { %1293 = vrot.lane.b32.xlu0 %v1286_v45, %s5585_s14  ;;  %v1456_v46 = vld [vmem:[#allocation2] sm:$0x8] }
 0x8f9   : > { %1378 = vrot.lane.b32.xlu0 %v5918_v49, %s5587_s19 }
 0x963   : > { %v1292_v50 = vpop.permute.xlu1 %1291 }
 0x964   : > { %v1297_v41 = vadd.f32 %v1292_v50, %v1039_v36 }
 0x966   : > { %v1299_v54 = vmul.f32 %v1297_v41, %v5703_v12 }
 0x967   : > { %v1294_v52 = vpop.permute.xlu0 %1293 }
 0x968   : > { %v1298_v53 = vadd.f32 %v1294_v52, %v1040_v51 }
 0x96a   : > { %v1300_v55 = vmul.f32 %v1298_v53, %v5710_v20 }
 0x96b   : > { %v1379_v4 = vpop.permute.xlu0 %1378 }
 0x96c   : > { %v1301_v56 = vpack.c.bf16 %v1300_v55, %v1299_v54 }
 0x96e   : > { %1314 = vrot.lane.b32.xlu1 %v1301_v56, %s5586_s22 }
 0x972   : > { %1380 = vrot.lane.b32.xlu1 %v5931_v58, %s5587_s19 }
 0x9e0   : > { %v1315_v32 = vpop.permute.xlu1 %1314 }
 0x9e1   : > { %4991 = vmatmul.mubr.msk.bf16.vlgmr.msra.gmra.mxu0 %vm556_vm5, %v1315_v32 }
 0x9e2   : > { %4996 = vmatprep.mubr.msk.bf16.mxu0 %vm5582_vm1, %v5581_v1  ;;  %4995 = vmatpush3.bf16.msra.mxu0 %v1401_v40 }
 0x9e3   : > { %5016 = vmatprep.subr.bf16.mxu0 %v5581_v1 }
 0x9e4   : > { %v1381_v5 = vpop.permute.xlu1 %1380 }
 0xaa1   : > { %v1365_v59 = vpop.f32.mrf.mxu0 }
 0xaa2   : > { %v1366_v60 = vadd.f32 %v4348_v44, %v1365_v59 }
 0xaa3   : > { %v4992_v61 = vpop.f32.mrf.mxu0 }
 0xaa4   : > { %v1372_v63 = vmul.f32 %v1366_v60, %v5703_v12 }
 0xaa5   : > { %v1368_v62 = vpop.f32.mrf.mxu0 }
 0xaa6   : > { %v1369_v0 = vadd.f32 %v4348_v44, %v1368_v62  ;;  %v5947_v6 = vadd.f32 %v1379_v4, %v1372_v63  ;;  %v4375_v63 = vld [vmem:[%s6712_s5 + $0x3] ss:$0 sm:$0xff] }
 0xaa7   : > { %v4993_v2 = vpop.f32.mrf.mxu0 }
 0xaa8   : > { %v1373_v3 = vmul.f32 %v1369_v0, %v5710_v20 }
 0xaaa   : > { %v5949_v7 = vadd.f32 %v1381_v5, %v1373_v3 }
 0xaac   : > { %v1386_v8 = vpack.c.bf16 %v5949_v7, %v5947_v6 }
 0xaae   : > { %4997 = vmatmul.mubr.msk.bf16.vlgmr.msra.gmra.mxu0 %vm461_vm3, %v1386_v8 }
 0xaaf   : > { %5020 = vmatprep.mubr.msk.bf16.mxu0 %vm5582_vm1, %v5581_v1 }
 0xb6e   : > { %v1437_v13 = vpop.f32.mrf.mxu0 }
 0xb6f   : > { %v1438_v14 = vadd.f32 %v4354_v11, %v1437_v13 }
 0xb70   : > { %v4998_v15 = vpop.f32.mrf.mxu0 }
 0xb71   : > { %v5968_v17 = vmul.f32 %v1438_v14, %v5703_v12  ;;  %v5317_v15 = vld [vmem:[%s6713_s6 + $0x28] sm:$0xff]  }
 0xb72   : > { %v1440_v18 = vpop.f32.mrf.mxu0  ;;  %5017 = vmatpush3.bf16.msra.mxu0 %v5317_v15 }
 0xb73   : > { %v4750_v19 = vpack.c.bf16 %v5968_v17, %v5968_v17  ;;  %v1441_v21 = vadd.f32 %v4354_v11, %v1440_v18  ;;  %5018 = vmatprep.subr.bf16.mxu0 %v5581_v1 }
 0xb74   : > { %v4999_v23 = vpop.f32.mrf.mxu0 }
 0xb75   : > { %1454 = vst.msk [vmem:[#allocation2 + $0x4] sm:$0xf] %vm449_vm2, %v4750_v19  ;;  %v5974_v24 = vmul.f32 %v1441_v21, %v5710_v20  ;;  %v5318_v19 = vld [vmem:[%s6713_s6 + $0x20] sm:$0xff]  }
 0xb76   : > { %5019 = vmatpush3.bf16.msra.mxu0 %v5318_v19 }
 0xb77   : > { %v4751_v25 = vpack.c.bf16 %v5974_v24, %v5974_v24  ;;  %5024 = vmatprep.subr.bf16.mxu0 %v5581_v1 }
 0xb79   : > { %1455 = vst.msk [vmem:[#allocation2 + $0x8] sm:$0xf] %vm449_vm2, %v4751_v25 }
 0xb7c   : > { %v1457_v28 = vld [vmem:[#allocation2 + $0x4] sm:$0xf] }
 0xb7d   : > { %v4358_v47 = vcombine.low %v1456_v46, %v1457_v28 }
 0xb80   : > { %v1458_v29 = vld [vmem:[#allocation2 + $0x8] sm:$0xf] }
 0xb81   : > { %v4360_v31 = vcombine.low %v1457_v28, %v1458_v29  ;;  %v4359_v41 = vcombine.low %v1458_v29, %v1458_v29 }
 0xb83   : > { %v1482_v33 = vrot.slane %v4360_v31, 5  ;;  %v1470_v34 = vshrl.u32 %v4360_v31, 16  ;;  %v1473_v35 = vshll.u32 %v4360_v31, 16 }
 0xb85   : > { %1485 = vrot.lane.b32.xlu1 %v1482_v33, %s5584_s13  ;;  %v1472_v16 = vrot.slane %v1470_v34, 4  ;;  %v1475_v42 = vrot.slane %v1473_v35, 5  ;;  %v1484_v45 = vsel %vm548_vm4, %v1482_v33, %v1483_v43  ;;  %v5322_v33 = vld [vmem:[%s6711_s4 + $0xe8] sm:$0xff]   ;;  %v5323_v34 = vld [vmem:[%s6711_s4 + $0xe0] sm:$0xff]   ;;  %v5324_v35 = vld [vmem:[%s6711_s4 + $0xd8] sm:$0xff]  }
 0xb87   : > { %v1476_v22 = vor.u32 %v1475_v42, %v1472_v16 }
 0xb89   : > { %1477 = vrot.lane.b32.xlu0 %v1476_v22, %s5585_s14 }
 0xb8d   : > { %1487 = vrot.lane.b32.xlu0 %v1484_v45, %s5584_s13 }
 0xbf7   : > { %v1486_v50 = vpop.permute.xlu1 %1485 }
 0xbfb   : > { %v1478_v48 = vpop.permute.xlu0 %1477 }
 0xbfc   : > { %v1491_v36 = vsel %vm556_vm5, %v4358_v47, %v1478_v48  ;;  %v1493_v54 = vsel %vm556_vm5, %v4359_v41, %v1478_v48 }
 0xbfd   : > { %v1495_v51 = vsel %vm562_vm6, %v1491_v36, %v1486_v50 }
 0xbfe   : > { %v1519_v52 = vshrl.u32 %v1495_v51, 16  ;;  %v1522_v53 = vshll.u32 %v1495_v51, 16  ;;  %v5328_v51 = vld [vmem:[%s6711_s4 + $0xc8] sm:$0xff]  }
 0xbff   : > { %v1488_v55 = vpop.permute.xlu0 %1487 }
 0xc00   : > { %v1497_v56 = vsel %vm562_vm6, %v1493_v54, %v1488_v55  ;;  %v1521_v57 = vrot.slane %v1519_v52, 3  ;;  %v1524_v32 = vrot.slane %v1522_v53, 4  ;;  %v5321_v53 = vld [vmem:[#allocation2 + $0xc] ss:$0 sps:$4 sm:$0x11]  }
 0xc01   : > { %v1526_v37 = vshrl.u32 %v1497_v56, 16  ;;  %v1529_v40 = vshll.u32 %v1497_v56, 16 }
 0xc02   : > { %v1525_v60 = vor.u32 %v1524_v32, %v1521_v57 }
 0xc03   : > { %v1528_v44 = vrot.slane %v1526_v37, 3  ;;  %v1531_v59 = vrot.slane %v1529_v40, 4  ;;  %v1751_v40 = vrot.slane %v5321_v53, 6 }
 0xc05   : > { %v1532_v61 = vor.u32 %v1531_v59, %v1528_v44  ;;  %v1724_v59 = vld [vmem:[#allocation2] sm:$0x8] }
 0xc07   : > { %v1533_v62 = vsel %vm586_vm7, %v1525_v60, %v1532_v61 }
 0xc08   : > { %5013 = vmatmul.mubr.msk.bf16.vlgmr.msra.gmra.mxu1 %vm638_vm8, %v1533_v62 }
 0xc09   : > { %5044 = vmatprep.mubr.msk.bf16.mxu1 %vm5582_vm1, %v5581_v1 }
 0xcc8   : > { %v1607_v0 = vpop.f32.mrf.mxu1 }
 0xcc9   : > { %v1608_v2 = vadd.f32 %v4375_v63, %v1607_v0 }
 0xcca   : > { %v5014_v3 = vpop.f32.mrf.mxu1 }
 0xccb   : > { %v4383_v4 = vmul.f32 -1.442695, %v1608_v2 }
 0xccc   : > { %v1610_v5 = vpop.f32.mrf.mxu1 }
 0xccd   : > { %5463 = vpow2.f32 %v4383_v4  ;;  %v1611_v8 = vadd.f32 %v4375_v63, %v1610_v5 }
 0xcce   : > { %v5015_v9 = vpop.f32.mrf.mxu1 }
 0xccf   : > { %v4384_v10 = vmul.f32 -1.442695, %v1611_v8 }
 0xcd1   : > { %5465 = vpow2.f32 %v4384_v10 }
 0xcda   : > { %v5464_v11 = vpop.eup %5463 }
 0xcdb   : > { %v1622_v13 = vadd.f32 1.0, %v5464_v11  ;;  %v4414_v11 = vld [vmem:[%s6712_s5 + $0x4] ss:$0 sm:$0xff] }
 0xcdd   : > { %5467 = vrcp.f32 %v1622_v13 }
 0xcde   : > { %v5466_v14 = vpop.eup %5465 }
 0xcdf   : > { %v1623_v18 = vadd.f32 1.0, %v5466_v14 }
 0xce1   : > { %5469 = vrcp.f32 %v1623_v18 }
 0xce2   : > { %5471 = vtanh.f32 %v1608_v2 }
 0xce3   : > { %5473 = vtanh.f32 %v1611_v8 }
 0xcea   : > { %v5468_v21 = vpop.eup %5467 }
 0xceb   : > { %1630 = vrot.lane.b32.xlu1 %v5468_v21, %s5586_s22 }
 0xcee   : > { %v5470_v23 = vpop.eup %5469 }
 0xcef   : > { %1632 = vrot.lane.b32.xlu0 %v5470_v23, %s5586_s22  ;;  %v5472_v26 = vpop.eup %5471 }
 0xcf0   : > { %v5474_v27 = vpop.eup %5473 }
 0xd5d   : > { %v1631_v25 = vpop.permute.xlu1 %1630 }
 0xd5e   : > { %v1636_v29 = vmul.f32 %v5472_v26, %v1631_v25 }
 0xd61   : > { %v1633_v28 = vpop.permute.xlu0 %1632 }
 0xd62   : > { %v1637_v30 = vmul.f32 %v5474_v27, %v1633_v28 }
 0xd64   : > { %v1638_v31 = vpack.c.bf16 %v1637_v30, %v1636_v29  ;;  %v5330_v29 = vld [vmem:[%s6713_s6 + $0x38] sm:$0xff]  }
 0xd65   : > { %5041 = vmatpush3.bf16.msra.mxu1 %v5330_v29 }
 0xd66   : > { %5021 = vmatmul.mubr.msk.bf16.vlgmr.msra.gmra.mxu0 %vm556_vm5, %v1638_v31  ;;  %5042 = vmatprep.subr.bf16.mxu1 %v5581_v1  ;;  %v5331_v31 = vld [vmem:[%s6713_s6 + $0x30] sm:$0xff]  }
 0xd67   : > { %5036 = vmatprep.mubr.msk.bf16.mxu0 %vm5582_vm1, %v5581_v1  ;;  %5025 = vmatpush3.bf16.msra.mxu0 %v5322_v33 }
 0xd68   : > { %5026 = vmatprep.subr.bf16.mxu0 %v5581_v1 }
 0xd69   : > { %5043 = vmatpush3.bf16.msra.mxu1 %v5331_v31 }
 0xd6a   : > { %5048 = vmatprep.subr.bf16.mxu1 %v5581_v1 }
 0xd6b   : > { %5027 = vmatpush3.bf16.msra.mxu0 %v5323_v34 }
 0xd6c   : > { %5028 = vmatprep.subr.bf16.mxu0 %v5581_v1 }
 0xd6f   : > { %5029 = vmatpush3.bf16.msra.mxu0 %v5324_v35 }
 0xd70   : > { %5030 = vmatprep.subr.bf16.mxu0 %v5581_v1 }
 0xd73   : > { %5031 = vmatpush3.bf16.msra.mxu0 %v5325_v38 }
 0xd74   : > { %5032 = vmatprep.subr.bf16.mxu0 %v5581_v1 }
 0xd77   : > { %5033 = vmatpush3.bf16.msra.mxu0 %v5328_v51  ;;  %v4429_v51 = vld [vmem:[%s6714_s7 + $0x3] ss:$0 sm:$0xff] }
 0xd78   : > { %5034 = vmatprep.subr.bf16.mxu0 %v5581_v1 }
 0xe26   : > { %v1701_v16 = vpop.f32.mrf.mxu0 }
 0xe27   : > { %v6042_v42 = vadd.f32 %v4390_v39, %v1701_v16 }
 0xe28   : > { %v5022_v22 = vpop.f32.mrf.mxu0 }
 0xe29   : > { %v1708_v43 = vadd.f32 %v6042_v42, %v5968_v17 }
 0xe2a   : > { %v1704_v45 = vpop.f32.mrf.mxu0 }
 0xe2b   : > { %v6047_v46 = vmul.f32 %v1708_v43, %v5703_v12  ;;  %v6049_v47 = vadd.f32 %v4390_v39, %v1704_v45 }
 0xe2c   : > { %v5023_v48 = vpop.f32.mrf.mxu0 }
 0xe2d   : > { %v4752_v50 = vpack.c.bf16 %v6047_v46, %v6047_v46  ;;  %v1709_v36 = vadd.f32 %v6049_v47, %v5974_v24  ;;  %v5329_v24 = vld [vmem:[%s6711_s4 + $0xc0] sm:$0xff]   ;;  %v5335_v48 = vld [vmem:[%s6711_s4 + $0x118] sm:$0xff]  }
 0xe2e   : > { %5035 = vmatpush3.bf16.msra.mxu0 %v5329_v24 }
 0xe2f   : > { %1722 = vst.msk [vmem:[#allocation2 + $0x4] sm:$0xf] %vm449_vm2, %v4752_v50  ;;  %v6057_v41 = vmul.f32 %v1709_v36, %v5710_v20  ;;  %5064 = vmatprep.subr.bf16.mxu0 %v5581_v1  ;;  %v5336_v50 = vld [vmem:[%s6711_s4 + $0x110] sm:$0xff]   ;;  %v5337_v36 = vld [vmem:[%s6711_s4 + $0x108] sm:$0xff]  }
 0xe31   : > { %v4753_v17 = vpack.c.bf16 %v6057_v41, %v6057_v41 }
 0xe33   : > { %1723 = vst.msk [vmem:[#allocation2 + $0x8] sm:$0xf] %vm449_vm2, %v4753_v17  ;;  %v5338_v17 = vld [vmem:[%s6711_s4 + $0x100] sm:$0xff]  }
 0xe36   : > { %v1728_v52 = vld [vmem:[#allocation2 + $0x4] sm:$0xe] }
 0xe37   : > { %v1725_v55 = vld [vmem:[#allocation2 + $0x4] sm:$0xf] }
 0xe38   : > { %v4396_v60 = vcombine.low %v1724_v59, %v1725_v55 }
 0xe3a   : > { %v1727_v54 = vld [vmem:[#allocation2 + $0x8] sm:$0xf] }
 0xe3b   : > { %v4399_v56 = vcombine.low %v1728_v52, %v1727_v54  ;;  %v4398_v57 = vcombine.low %v1725_v55, %v1727_v54  ;;  %v5327_v0 = vld [vmem:[#allocation2 + $0x8] ss:$0 sps:$4 sm:$0x77]  }
 0xe3d   : > { %v1750_v32 = vrot.slane %v4399_v56, 6  ;;  %v1741_v37 = vrot.slane %v4398_v57, 5 }
 0xe3f   : > { %1753 = vrot.lane.b32.xlu0 %v1750_v32, %s5584_s13  ;;  %1742 = vrot.lane.b32.xlu1 %v1741_v37, %s5585_s14  ;;  %v1752_v44 = vsel %vm465_vm0, %v1750_v32, %v1751_v40 }
 0xe43   : > { %1755 = vrot.lane.b32.xlu1 %v1752_v44, %s5584_s13 }
 0xeb1   : > { %v1754_v61 = vpop.permute.xlu0 %1753  ;;  %v1743_v62 = vpop.permute.xlu1 %1742 }
 0xeb2   : > { %v1759_v63 = vsel %vm556_vm5, %v4396_v60, %v1743_v62  ;;  %v1761_v3 = vsel %vm556_vm5, %v5327_v0, %v1743_v62  ;;  %v5341_v60 = vld [vmem:[%s6711_s4 + $0xf8] sm:$0xff]  }
 0xeb3   : > { %v1763_v2 = vsel %vm562_vm6, %v1759_v63, %v1754_v61 }
 0xeb4   : > { %v1789_v8 = vrot.slane %v1763_v2, 3 }
 0xeb5   : > { %v1756_v4 = vpop.permute.xlu1 %1755 }
 0xeb6   : > { %v1765_v5 = vsel %vm562_vm6, %v1761_v3, %v1756_v4  ;;  %v5334_v3 = vld [vmem:[#allocation2 + $0xc] ss:$0 sps:$4 sm:$0x33]   ;;  %v1982_v4 = vld [vmem:[#allocation2] sm:$0xc] }
 0xeb7   : > { %v1790_v9 = vrot.slane %v1765_v5, 3 }
 0xeb9   : > { %v1791_v10 = vsel %vm857_vm9, %v1789_v8, %v1790_v9 }
 0xeba   : > { %5037 = vmatmul.mubr.msk.bf16.vlgmr.msra.gmra.mxu0 %vm638_vm8, %v1791_v10 }
 0xebb   : > { %5068 = vmatprep.mubr.msk.bf16.mxu0 %vm5582_vm1, %v5581_v1 }
 0xf7a   : > { %v1865_v13 = vpop.f32.mrf.mxu0 }
 0xf7b   : > { %v1866_v14 = vadd.f32 %v4414_v11, %v1865_v13 }
 0xf7c   : > { %v5038_v15 = vpop.f32.mrf.mxu0 }
 0xf7d   : > { %v4422_v18 = vmul.f32 -1.442695, %v1866_v14 }
 0xf7e   : > { %v1868_v19 = vpop.f32.mrf.mxu0 }
 0xf7f   : > { %5475 = vpow2.f32 %v4422_v18  ;;  %v1869_v21 = vadd.f32 %v4414_v11, %v1868_v19 }
 0xf80   : > { %v5039_v23 = vpop.f32.mrf.mxu0 }
 0xf81   : > { %v4423_v25 = vmul.f32 -1.442695, %v1869_v21 }
 0xf83   : > { %5477 = vpow2.f32 %v4423_v25  ;;  %v4453_v25 = vld [vmem:[%s6712_s5 + $0x5] ss:$0 sm:$0xff] }
 0xf8c   : > { %v5476_v26 = vpop.eup %5475 }
 0xf8d   : > { %v1880_v27 = vadd.f32 1.0, %v5476_v26 }
 0xf8f   : > { %5479 = vrcp.f32 %v1880_v27 }
 0xf90   : > { %v5478_v28 = vpop.eup %5477 }
 0xf91   : > { %v1881_v30 = vadd.f32 1.0, %v5478_v28 }
 0xf93   : > { %5481 = vrcp.f32 %v1881_v30 }
 0xf94   : > { %5483 = vtanh.f32 %v1866_v14 }
 0xf95   : > { %5485 = vtanh.f32 %v1869_v21 }
 0xf9c   : > { %v5480_v33 = vpop.eup %5479 }
 0xf9d   : > { %1888 = vrot.lane.b32.xlu0 %v5480_v33, %s5586_s22 }
 0xfa0   : > { %v5482_v34 = vpop.eup %5481 }
 0xfa1   : > { %1890 = vrot.lane.b32.xlu1 %v5482_v34, %s5586_s22  ;;  %v5484_v38 = vpop.eup %5483 }
 0xfa2   : > { %v5486_v39 = vpop.eup %5485 }
0x100f   : > { %v1889_v35 = vpop.permute.xlu0 %1888 }
0x1010   : > { %v1894_v22 = vmul.f32 %v5484_v38, %v1889_v35 }
0x1013   : > { %v1891_v16 = vpop.permute.xlu1 %1890 }
0x1014   : > { %v1895_v43 = vmul.f32 %v5486_v39, %v1891_v16  ;;  %v5343_v16 = vld [vmem:[%s6715_s8 + $0x18] sm:$0xff]  }
0x1015   : > { %5065 = vmatpush3.bf16.msra.mxu0 %v5343_v16  ;;  %v5354_v16 = vld [vmem:[%s6711_s4 + $0x130] sm:$0xff]  }
0x1016   : > { %v1896_v45 = vpack.c.bf16 %v1895_v43, %v1894_v22  ;;  %5066 = vmatprep.subr.bf16.mxu0 %v5581_v1  ;;  %v5344_v43 = vld [vmem:[%s6715_s8 + $0x10] sm:$0xff]  }
0x1018   : > { %5045 = vmatmul.mubr.msk.bf16.vlgmr.msra.gmra.mxu1 %vm556_vm5, %v1896_v45 }
0x1019   : > { %5060 = vmatprep.mubr.msk.bf16.mxu1 %vm5582_vm1, %v5581_v1  ;;  %5049 = vmatpush3.bf16.msra.mxu1 %v5335_v48 }
0x101a   : > { %5050 = vmatprep.subr.bf16.mxu1 %v5581_v1  ;;  %5067 = vmatpush3.bf16.msra.mxu0 %v5344_v43 }
0x101b   : > { %5072 = vmatprep.subr.bf16.mxu0 %v5581_v1 }
0x101d   : > { %5051 = vmatpush3.bf16.msra.mxu1 %v5336_v50 }
0x101e   : > { %5052 = vmatprep.subr.bf16.mxu1 %v5581_v1 }
0x1021   : > { %5053 = vmatpush3.bf16.msra.mxu1 %v5337_v36 }
0x1022   : > { %5054 = vmatprep.subr.bf16.mxu1 %v5581_v1 }
0x1025   : > { %5055 = vmatpush3.bf16.msra.mxu1 %v5338_v17 }
0x1026   : > { %5056 = vmatprep.subr.bf16.mxu1 %v5581_v1 }
0x1029   : > { %5057 = vmatpush3.bf16.msra.mxu1 %v5341_v60 }
0x102a   : > { %5058 = vmatprep.subr.bf16.mxu1 %v5581_v1 }
0x10d8   : > { %v1959_v24 = vpop.f32.mrf.mxu1 }
0x10d9   : > { %v6117_v52 = vadd.f32 %v4429_v51, %v1959_v24 }
0x10da   : > { %v5046_v53 = vpop.f32.mrf.mxu1 }
0x10db   : > { %v1966_v54 = vadd.f32 %v6117_v52, %v6047_v46  ;;  %v5342_v46 = vld [vmem:[%s6711_s4 + $0xf0] sm:$0xff]  }
0x10dc   : > { %v1962_v55 = vpop.f32.mrf.mxu1  ;;  %5059 = vmatpush3.bf16.msra.mxu1 %v5342_v46 }
0x10dd   : > { %v1968_v56 = vmul.f32 %v1966_v54, %v5703_v12  ;;  %v6122_v57 = vadd.f32 %v4429_v51, %v1962_v55  ;;  %5086 = vmatprep.subr.bf16.mxu1 %v5581_v1  ;;  %v4468_v55 = vld [vmem:[%s6716_s9 + $0x1] ss:$0 sm:$0xff] }
0x10de   : > { %v5047_v32 = vpop.f32.mrf.mxu1 }
0x10df   : > { %v4754_v37 = vpack.c.bf16 %v1968_v56, %v1968_v56  ;;  %v1967_v40 = vadd.f32 %v6122_v57, %v6057_v41  ;;  %v5345_v32 = vld [vmem:[%s6717_s10 + $0x18] sm:$0xff]  }
0x10e1   : > { %1980 = vst.msk [vmem:[#allocation2 + $0x4] sm:$0xf] %vm449_vm2, %v4754_v37  ;;  %v1969_v44 = vmul.f32 %v1967_v40, %v5710_v20 }
0x10e3   : > { %v4755_v59 = vpack.c.bf16 %v1969_v44, %v1969_v44  ;;  %v5346_v44 = vld [vmem:[%s6717_s10 + $0x10] sm:$0xff]  }
0x10e5   : > { %1981 = vst.msk [vmem:[#allocation2 + $0x8] sm:$0xf] %vm449_vm2, %v4755_v59 }
0x10e8   : > { %v1986_v41 = vld [vmem:[#allocation2 + $0x4] sm:$0xc] }
0x10e9   : > { %v1983_v62 = vld [vmem:[#allocation2 + $0x4] sm:$0xf] }
0x10ea   : > { %v4435_v5 = vcombine.low %v1982_v4, %v1983_v62 }
0x10ec   : > { %v1985_v61 = vld [vmem:[#allocation2 + $0x8] sm:$0xf] }
0x10ed   : > { %v4438_v63 = vcombine.low %v1986_v41, %v1985_v61  ;;  %v4437_v0 = vcombine.low %v1983_v62, %v1985_v61  ;;  %v5340_v11 = vld [vmem:[#allocation2 + $0x8] ss:$0 sps:$4 sm:$0x33]   ;;  %v1970_v61 = vadd.f32 %v6117_v52, %v6042_v42  ;;  %v4481_v42 = vld [vmem:[%s6709_s2 + $0x4] sm:$0x3] }
0x10ee   : > { %v4477_v52 = vld [vmem:[%s6718_s11 + $0x1] ss:$0 sm:$0xff] }
0x10ef   : > { %2008 = vrot.lane.b32.xlu1 %v4438_v63, %s5584_s13  ;;  %v1999_v2 = vrot.slane %v4437_v0, 6  ;;  %v1971_v63 = vadd.f32 %v6122_v57, %v6049_v47  ;;  %v2325_v47 = vsel %vm465_vm0, %v4481_v42, 0 }
0x10f1   : > { %2000 = vrot.lane.b32.xlu0 %v1999_v2, %s5585_s14 }
0x10f5   : > { %2010 = vrot.lane.b32.xlu0 %v5334_v3, %s5584_s13 }
0x1161   : > { %v2009_v10 = vpop.permute.xlu1 %2008 }
0x1163   : > { %v2001_v8 = vpop.permute.xlu0 %2000 }
0x1164   : > { %v2014_v9 = vsel %vm556_vm5, %v4435_v5, %v2001_v8  ;;  %v2016_v14 = vsel %vm556_vm5, %v5340_v11, %v2001_v8 }
0x1165   : > { %v2018_v13 = vsel %vm562_vm6, %v2014_v9, %v2009_v10 }
0x1166   : > { %v2044_v19 = vrot.slane %v2018_v13, 2 }
0x1167   : > { %v2011_v15 = vpop.permute.xlu0 %2010 }
0x1168   : > { %v2020_v18 = vsel %vm562_vm6, %v2016_v14, %v2011_v15 }
0x1169   : > { %v2045_v21 = vrot.slane %v2020_v18, 2 }
0x116b   : > { %v2046_v23 = vsel %vm1113_vm10, %v2044_v19, %v2045_v21 }
0x116c   : > { %5061 = vmatmul.mubr.msk.bf16.vlgmr.msra.gmra.mxu1 %vm638_vm8, %v2046_v23 }
0x116d   : > { %5098 = vmatprep.mubr.msk.bf16.mxu1 %vm5582_vm1, %v5581_v1 }
0x122c   : > { %v2120_v26 = vpop.f32.mrf.mxu1 }
0x122d   : > { %v2121_v27 = vadd.f32 %v4453_v25, %v2120_v26 }
0x122e   : > { %v5062_v28 = vpop.f32.mrf.mxu1 }
0x122f   : > { %v4461_v29 = vmul.f32 -1.442695, %v2121_v27 }
0x1230   : > { %v2123_v30 = vpop.f32.mrf.mxu1 }
0x1231   : > { %5487 = vpow2.f32 %v4461_v29  ;;  %v2124_v31 = vadd.f32 %v4453_v25, %v2123_v30  ;;  %v5349_v25 = vld [vmem:[%s6711_s4 + $0x148] sm:$0xff]  }
0x1232   : > { %v5063_v33 = vpop.f32.mrf.mxu1  ;;  %5087 = vmatpush3.bf16.msra.mxu1 %v5349_v25 }
0x1233   : > { %v4462_v34 = vmul.f32 -1.442695, %v2124_v31  ;;  %5088 = vmatprep.subr.bf16.mxu1 %v5581_v1 }
0x1235   : > { %5489 = vpow2.f32 %v4462_v34 }
0x123e   : > { %v5488_v35 = vpop.eup %5487 }
0x123f   : > { %v2135_v38 = vadd.f32 1.0, %v5488_v35 }
0x1241   : > { %5491 = vrcp.f32 %v2135_v38 }
0x1242   : > { %v5490_v39 = vpop.eup %5489 }
0x1243   : > { %v2136_v22 = vadd.f32 1.0, %v5490_v39  ;;  %v5351_v39 = vld [vmem:[%s6711_s4 + $0x138] sm:$0xff]  }
0x1245   : > { %5493 = vrcp.f32 %v2136_v22 }
0x1246   : > { %5495 = vtanh.f32 %v2121_v27 }
0x1247   : > { %5497 = vtanh.f32 %v2124_v31 }
0x124e   : > { %v5492_v45 = vpop.eup %5491 }
0x124f   : > { %2143 = vrot.lane.b32.xlu1 %v5492_v45, %s5586_s22  ;;  %v5355_v45 = vld [vmem:[%s6711_s4 + $0x128] sm:$0xff]  }
0x1252   : > { %v5494_v48 = vpop.eup %5493 }
0x1253   : > { %2145 = vrot.lane.b32.xlu0 %v5494_v48, %s5586_s22  ;;  %v5496_v36 = vpop.eup %5495 }
0x1254   : > { %v5498_v17 = vpop.eup %5497 }
0x12c1   : > { %v2144_v50 = vpop.permute.xlu1 %2143 }
0x12c2   : > { %v2149_v24 = vmul.f32 %v5496_v36, %v2144_v50 }
0x12c5   : > { %v2146_v51 = vpop.permute.xlu0 %2145 }
0x12c6   : > { %v2150_v53 = vmul.f32 %v5498_v17, %v2146_v51  ;;  %v5348_v51 = vld [vmem:[#allocation2 + $0xc] ss:$0 sps:$4 sm:$0x11]  }
0x12c8   : > { %v2151_v54 = vpack.c.bf16 %v2150_v53, %v2149_v24  ;;  %v5356_v24 = vld [vmem:[%s6711_s4 + $0x120] sm:$0xff]  }
0x12ca   : > { %5069 = vmatmul.mubr.msk.bf16.vlgmr.msra.gmra.mxu0 %vm556_vm5, %v2151_v54 }
0x12cb   : > { %5076 = vmatprep.mubr.msk.bf16.mxu0 %vm5582_vm1, %v5581_v1  ;;  %5073 = vmatpush3.bf16.msra.mxu0 %v5345_v32 }
0x12cc   : > { %5074 = vmatprep.subr.bf16.mxu0 %v5581_v1 }
0x12cf   : > { %5075 = vmatpush3.bf16.msra.mxu0 %v5346_v44 }
0x12d0   : > { %5080 = vmatprep.subr.bf16.mxu0 %v5581_v1 }
0x138a   : > { %v2214_v56 = vpop.f32.mrf.mxu0 }
0x138b   : > { %v2215_v37 = vadd.f32 %v4468_v55, %v2214_v56  ;;  %v2407_v56 = vrot.slane %v5348_v51, 5  ;;  %v5365_v51 = vld [vmem:[%s6711_s4 + $0x160] sm:$0xff]  }
0x138c   : > { %v5070_v40 = vpop.f32.mrf.mxu0 }
0x138d   : > { %2223 = vrot.lane.b32.xlu1 %v2215_v37, %s5585_s14  ;;  %v2380_v37 = vld [vmem:[#allocation2] sm:$0x8] }
0x138e   : > { %v2217_v59 = vpop.f32.mrf.mxu0 }
0x138f   : > { %v2218_v60 = vadd.f32 %v4468_v55, %v2217_v59 }
0x1390   : > { %v5071_v46 = vpop.f32.mrf.mxu0 }
0x1391   : > { %2225 = vrot.lane.b32.xlu0 %v2218_v60, %s5585_s14 }
0x13ff   : > { %v2224_v41 = vpop.permute.xlu1 %2223 }
0x1400   : > { %v2229_v62 = vadd.f32 %v2224_v41, %v1970_v61 }
0x1402   : > { %v2231_v3 = vmul.f32 %v2229_v62, %v5703_v12 }
0x1403   : > { %v2226_v0 = vpop.permute.xlu0 %2225 }
0x1404   : > { %v2230_v2 = vadd.f32 %v2226_v0, %v1971_v63 }
0x1406   : > { %v2232_v4 = vmul.f32 %v2230_v2, %v5710_v20 }
0x1408   : > { %v2233_v5 = vpack.c.bf16 %v2232_v4, %v2231_v3 }
0x140a   : > { %2248 = vrot.lane.b32.xlu1 %v2233_v5, %s5586_s22 }
0x147c   : > { %v2249_v8 = vpop.permute.xlu1 %2248 }
0x147d   : > { %5077 = vmatmul.mubr.msk.bf16.vlgmr.msra.gmra.mxu0 %vm556_vm5, %v2249_v8 }
0x147e   : > { %5082 = vmatprep.mubr.msk.bf16.mxu0 %vm5582_vm1, %v5581_v1  ;;  %5081 = vmatpush3.bf16.msra.mxu0 %v2325_v47 }
0x147f   : > { %5102 = vmatprep.subr.bf16.mxu0 %v5581_v1 }
0x153d   : > { %v2299_v57 = vpop.f32.mrf.mxu0 }
0x153e   : > { %v2300_v9 = vadd.f32 %v4477_v52, %v2299_v57 }
0x153f   : > { %v5078_v10 = vpop.f32.mrf.mxu0 }
0x1540   : > { %v2306_v13 = vmul.f32 %v2300_v9, %v5703_v12  ;;  %v4504_v10 = vld [vmem:[%s6712_s5 + $0x6] ss:$0 sm:$0xff] }
0x1541   : > { %v2302_v11 = vpop.f32.mrf.mxu0 }
0x1542   : > { %v2303_v14 = vadd.f32 %v4477_v52, %v2302_v11  ;;  %v6198_v19 = vadd.f32 %v2306_v13, %v5918_v49  ;;  %v5350_v49 = vld [vmem:[%s6711_s4 + $0x140] sm:$0xff]  }
0x1543   : > { %v5079_v15 = vpop.f32.mrf.mxu0  ;;  %5089 = vmatpush3.bf16.msra.mxu1 %v5350_v49 }
0x1544   : > { %v2307_v18 = vmul.f32 %v2303_v14, %v5710_v20  ;;  %5090 = vmatprep.subr.bf16.mxu1 %v5581_v1 }
0x1546   : > { %v6201_v21 = vadd.f32 %v2307_v18, %v5931_v58  ;;  %v4483_v58 = vld [vmem:[%s6710_s3 + $0x2] ss:$0 sm:$0xff] }
0x1547   : > { %5091 = vmatpush3.bf16.msra.mxu1 %v5351_v39 }
0x1548   : > { %v2310_v23 = vpack.c.bf16 %v6201_v21, %v6198_v19  ;;  %5092 = vmatprep.subr.bf16.mxu1 %v5581_v1 }
0x154a   : > { %5083 = vmatmul.mubr.msk.bf16.vlgmr.msra.gmra.mxu0 %vm461_vm3, %v2310_v23 }
0x154b   : > { %5106 = vmatprep.mubr.msk.bf16.mxu0 %vm5582_vm1, %v5581_v1  ;;  %5093 = vmatpush3.bf16.msra.mxu1 %v5354_v16 }
0x154c   : > { %5094 = vmatprep.subr.bf16.mxu1 %v5581_v1 }
0x154f   : > { %5095 = vmatpush3.bf16.msra.mxu1 %v5355_v45 }
0x1550   : > { %5096 = vmatprep.subr.bf16.mxu1 %v5581_v1 }
0x1553   : > { %5097 = vmatpush3.bf16.msra.mxu1 %v5356_v24  ;;  %v4519_v24 = vld [vmem:[%s6714_s7 + $0x4] ss:$0 sm:$0xff] }
0x1554   : > { %5126 = vmatprep.subr.bf16.mxu1 %v5581_v1 }
0x160a   : > { %v2361_v26 = vpop.f32.mrf.mxu0 }
0x160b   : > { %v2362_v27 = vadd.f32 %v4483_v58, %v2361_v26 }
0x160c   : > { %v5084_v28 = vpop.f32.mrf.mxu0 }
0x160d   : > { %v6220_v29 = vmul.f32 %v2362_v27, %v5703_v12  ;;  %v5357_v28 = vld [vmem:[%s6713_s6 + $0x48] sm:$0xff]  }
0x160e   : > { %v2364_v30 = vpop.f32.mrf.mxu0  ;;  %5103 = vmatpush3.bf16.msra.mxu0 %v5357_v28 }
0x160f   : > { %v4756_v31 = vpack.c.bf16 %v6220_v29, %v6220_v29  ;;  %v2365_v33 = vadd.f32 %v4483_v58, %v2364_v30  ;;  %5104 = vmatprep.subr.bf16.mxu0 %v5581_v1 }
0x1610   : > { %v5085_v34 = vpop.f32.mrf.mxu0 }
0x1611   : > { %2378 = vst.msk [vmem:[#allocation2 + $0x4] sm:$0xf] %vm449_vm2, %v4756_v31  ;;  %v6226_v35 = vmul.f32 %v2365_v33, %v5710_v20  ;;  %v5358_v31 = vld [vmem:[%s6713_s6 + $0x40] sm:$0xff]  }
0x1612   : > { %5105 = vmatpush3.bf16.msra.mxu0 %v5358_v31 }
0x1613   : > { %v4757_v38 = vpack.c.bf16 %v6226_v35, %v6226_v35  ;;  %5110 = vmatprep.subr.bf16.mxu0 %v5581_v1 }
0x1615   : > { %2379 = vst.msk [vmem:[#allocation2 + $0x8] sm:$0xf] %vm449_vm2, %v4757_v38 }
0x1618   : > { %v2381_v22 = vld [vmem:[#allocation2 + $0x4] sm:$0xf] }
0x1619   : > { %v4487_v40 = vcombine.low %v2380_v37, %v2381_v22 }
0x161c   : > { %v2382_v43 = vld [vmem:[#allocation2 + $0x8] sm:$0xf] }
0x161d   : > { %v4489_v48 = vcombine.low %v2381_v22, %v2382_v43  ;;  %v4488_v46 = vcombine.low %v2382_v43, %v2382_v43 }
0x161f   : > { %v2406_v50 = vrot.slane %v4489_v48, 5  ;;  %v2394_v36 = vshrl.u32 %v4489_v48, 16  ;;  %v2397_v17 = vshll.u32 %v4489_v48, 16 }
0x1621   : > { %2409 = vrot.lane.b32.xlu1 %v2406_v50, %s5584_s13  ;;  %v2396_v53 = vrot.slane %v2394_v36, 4  ;;  %v2399_v54 = vrot.slane %v2397_v17, 5  ;;  %v2408_v32 = vsel %vm548_vm4, %v2406_v50, %v2407_v56  ;;  %v5362_v50 = vld [vmem:[%s6711_s4 + $0x178] sm:$0xff]   ;;  %v5363_v36 = vld [vmem:[%s6711_s4 + $0x170] sm:$0xff]   ;;  %v5364_v17 = vld [vmem:[%s6711_s4 + $0x168] sm:$0xff]  }
0x1623   : > { %v2400_v55 = vor.u32 %v2399_v54, %v2396_v53 }
0x1625   : > { %2401 = vrot.lane.b32.xlu0 %v2400_v55, %s5585_s14 }
0x1629   : > { %2411 = vrot.lane.b32.xlu0 %v2408_v32, %s5584_s13 }
0x1693   : > { %v2410_v59 = vpop.permute.xlu1 %2409 }
0x1697   : > { %v2402_v44 = vpop.permute.xlu0 %2401 }
0x1698   : > { %v2415_v60 = vsel %vm556_vm5, %v4487_v40, %v2402_v44  ;;  %v2417_v63 = vsel %vm556_vm5, %v4488_v46, %v2402_v44 }
0x1699   : > { %v2419_v41 = vsel %vm562_vm6, %v2415_v60, %v2410_v59 }
0x169a   : > { %v2443_v61 = vshrl.u32 %v2419_v41, 16  ;;  %v2446_v62 = vshll.u32 %v2419_v41, 16  ;;  %v5368_v41 = vld [vmem:[%s6711_s4 + $0x158] sm:$0xff]  }
0x169b   : > { %v2412_v0 = vpop.permute.xlu0 %2411 }
0x169c   : > { %v2421_v2 = vsel %vm562_vm6, %v2417_v63, %v2412_v0  ;;  %v2445_v3 = vrot.slane %v2443_v61, 3  ;;  %v2448_v4 = vrot.slane %v2446_v62, 4  ;;  %v5361_v62 = vld [vmem:[#allocation2 + $0xc] ss:$0 sps:$4 sm:$0x11]  }
0x169d   : > { %v2450_v5 = vshrl.u32 %v2421_v2, 16  ;;  %v2453_v8 = vshll.u32 %v2421_v2, 16 }
0x169e   : > { %v2449_v52 = vor.u32 %v2448_v4, %v2445_v3 }
0x169f   : > { %v2452_v42 = vrot.slane %v2450_v5, 3  ;;  %v2455_v47 = vrot.slane %v2453_v8, 4  ;;  %v2675_v8 = vrot.slane %v5361_v62, 6 }
0x16a1   : > { %v2456_v57 = vor.u32 %v2455_v47, %v2452_v42  ;;  %v2648_v47 = vld [vmem:[#allocation2] sm:$0x8] }
0x16a3   : > { %v2457_v9 = vsel %vm586_vm7, %v2449_v52, %v2456_v57 }
0x16a4   : > { %5099 = vmatmul.mubr.msk.bf16.vlgmr.msra.gmra.mxu1 %vm638_vm8, %v2457_v9 }
0x16a5   : > { %5130 = vmatprep.mubr.msk.bf16.mxu1 %vm5582_vm1, %v5581_v1 }
0x1764   : > { %v2531_v11 = vpop.f32.mrf.mxu1 }
0x1765   : > { %v2532_v13 = vadd.f32 %v4504_v10, %v2531_v11 }
0x1766   : > { %v5100_v14 = vpop.f32.mrf.mxu1 }
0x1767   : > { %v4512_v15 = vmul.f32 -1.442695, %v2532_v13 }
0x1768   : > { %v2534_v18 = vpop.f32.mrf.mxu1 }
0x1769   : > { %5499 = vpow2.f32 %v4512_v15  ;;  %v2535_v23 = vadd.f32 %v4504_v10, %v2534_v18 }
0x176a   : > { %v5101_v25 = vpop.f32.mrf.mxu1 }
0x176b   : > { %v4513_v49 = vmul.f32 -1.442695, %v2535_v23 }
0x176d   : > { %5501 = vpow2.f32 %v4513_v49 }
0x1776   : > { %v5500_v58 = vpop.eup %5499 }
0x1777   : > { %v2546_v26 = vadd.f32 1.0, %v5500_v58  ;;  %v4543_v58 = vld [vmem:[%s6712_s5 + $0x7] ss:$0 sm:$0xff] }
0x1779   : > { %5503 = vrcp.f32 %v2546_v26 }
0x177a   : > { %v5502_v27 = vpop.eup %5501 }
0x177b   : > { %v2547_v30 = vadd.f32 1.0, %v5502_v27 }
0x177d   : > { %5505 = vrcp.f32 %v2547_v30 }
0x177e   : > { %5507 = vtanh.f32 %v2532_v13 }
0x177f   : > { %5509 = vtanh.f32 %v2535_v23 }
0x1786   : > { %v5504_v33 = vpop.eup %5503 }
0x1787   : > { %2554 = vrot.lane.b32.xlu1 %v5504_v33, %s5586_s22 }
0x178a   : > { %v5506_v34 = vpop.eup %5505 }
0x178b   : > { %2556 = vrot.lane.b32.xlu0 %v5506_v34, %s5586_s22  ;;  %v5508_v39 = vpop.eup %5507 }
0x178c   : > { %v5510_v16 = vpop.eup %5509 }
0x17f9   : > { %v2555_v38 = vpop.permute.xlu1 %2554 }
0x17fa   : > { %v2560_v43 = vmul.f32 %v5508_v39, %v2555_v38 }
0x17fd   : > { %v2557_v22 = vpop.permute.xlu0 %2556 }
0x17fe   : > { %v2561_v45 = vmul.f32 %v5510_v16, %v2557_v22 }
0x1800   : > { %v2562_v48 = vpack.c.bf16 %v2561_v45, %v2560_v43  ;;  %v5370_v43 = vld [vmem:[%s6713_s6 + $0x58] sm:$0xff]  }
0x1801   : > { %5127 = vmatpush3.bf16.msra.mxu1 %v5370_v43 }
0x1802   : > { %5107 = vmatmul.mubr.msk.bf16.vlgmr.msra.gmra.mxu0 %vm556_vm5, %v2562_v48  ;;  %5128 = vmatprep.subr.bf16.mxu1 %v5581_v1  ;;  %v5371_v48 = vld [vmem:[%s6713_s6 + $0x50] sm:$0xff]  }
0x1803   : > { %5122 = vmatprep.mubr.msk.bf16.mxu0 %vm5582_vm1, %v5581_v1  ;;  %5111 = vmatpush3.bf16.msra.mxu0 %v5362_v50 }
0x1804   : > { %5112 = vmatprep.subr.bf16.mxu0 %v5581_v1 }
0x1805   : > { %5129 = vmatpush3.bf16.msra.mxu1 %v5371_v48 }
0x1806   : > { %5134 = vmatprep.subr.bf16.mxu1 %v5581_v1 }
0x1807   : > { %5113 = vmatpush3.bf16.msra.mxu0 %v5363_v36 }
0x1808   : > { %5114 = vmatprep.subr.bf16.mxu0 %v5581_v1 }
0x180b   : > { %5115 = vmatpush3.bf16.msra.mxu0 %v5364_v17 }
0x180c   : > { %5116 = vmatprep.subr.bf16.mxu0 %v5581_v1 }
0x180f   : > { %5117 = vmatpush3.bf16.msra.mxu0 %v5365_v51 }
0x1810   : > { %5118 = vmatprep.subr.bf16.mxu0 %v5581_v1 }
0x1813   : > { %5119 = vmatpush3.bf16.msra.mxu0 %v5368_v41  ;;  %v4558_v41 = vld [vmem:[%s6714_s7 + $0x5] ss:$0 sm:$0xff] }
0x1814   : > { %5120 = vmatprep.subr.bf16.mxu0 %v5581_v1 }
0x18c2   : > { %v2625_v53 = vpop.f32.mrf.mxu0 }
0x18c3   : > { %v6294_v54 = vadd.f32 %v4519_v24, %v2625_v53 }
0x18c4   : > { %v5108_v55 = vpop.f32.mrf.mxu0 }
0x18c5   : > { %v2632_v56 = vadd.f32 %v6294_v54, %v6220_v29 }
0x18c6   : > { %v2628_v32 = vpop.f32.mrf.mxu0 }
0x18c7   : > { %v6299_v37 = vmul.f32 %v2632_v56, %v5703_v12  ;;  %v6301_v40 = vadd.f32 %v4519_v24, %v2628_v32 }
0x18c8   : > { %v5109_v44 = vpop.f32.mrf.mxu0 }
0x18c9   : > { %v4758_v59 = vpack.c.bf16 %v6299_v37, %v6299_v37  ;;  %v2633_v60 = vadd.f32 %v6301_v40, %v6226_v35  ;;  %v5369_v35 = vld [vmem:[%s6711_s4 + $0x150] sm:$0xff]   ;;  %v5375_v44 = vld [vmem:[%s6711_s4 + $0x1a8] sm:$0xff]  }
0x18ca   : > { %5121 = vmatpush3.bf16.msra.mxu0 %v5369_v35 }
0x18cb   : > { %2646 = vst.msk [vmem:[#allocation2 + $0x4] sm:$0xf] %vm449_vm2, %v4758_v59  ;;  %v6309_v46 = vmul.f32 %v2633_v60, %v5710_v20  ;;  %5150 = vmatprep.subr.bf16.mxu0 %v5581_v1  ;;  %v5376_v59 = vld [vmem:[%s6711_s4 + $0x1a0] sm:$0xff]   ;;  %v5377_v60 = vld [vmem:[%s6711_s4 + $0x198] sm:$0xff]  }
0x18cd   : > { %v4759_v29 = vpack.c.bf16 %v6309_v46, %v6309_v46 }
0x18cf   : > { %2647 = vst.msk [vmem:[#allocation2 + $0x8] sm:$0xf] %vm449_vm2, %v4759_v29  ;;  %v5378_v29 = vld [vmem:[%s6711_s4 + $0x190] sm:$0xff]  }
0x18d2   : > { %v2652_v61 = vld [vmem:[#allocation2 + $0x4] sm:$0xe] }
0x18d3   : > { %v2649_v0 = vld [vmem:[#allocation2 + $0x4] sm:$0xf] }
0x18d4   : > { %v4525_v52 = vcombine.low %v2648_v47, %v2649_v0 }
0x18d6   : > { %v2651_v63 = vld [vmem:[#allocation2 + $0x8] sm:$0xf] }
0x18d7   : > { %v4528_v2 = vcombine.low %v2652_v61, %v2651_v63  ;;  %v4527_v3 = vcombine.low %v2649_v0, %v2651_v63  ;;  %v5367_v11 = vld [vmem:[#allocation2 + $0x8] ss:$0 sps:$4 sm:$0x77]  }
0x18d9   : > { %v2674_v4 = vrot.slane %v4528_v2, 6  ;;  %v2665_v5 = vrot.slane %v4527_v3, 5 }
0x18db   : > { %2677 = vrot.lane.b32.xlu0 %v2674_v4, %s5584_s13  ;;  %2666 = vrot.lane.b32.xlu1 %v2665_v5, %s5585_s14  ;;  %v2676_v42 = vsel %vm465_vm0, %v2674_v4, %v2675_v8 }
0x18df   : > { %2679 = vrot.lane.b32.xlu1 %v2676_v42, %s5584_s13 }
0x194d   : > { %v2678_v57 = vpop.permute.xlu0 %2677  ;;  %v2667_v9 = vpop.permute.xlu1 %2666 }
0x194e   : > { %v2683_v10 = vsel %vm556_vm5, %v4525_v52, %v2667_v9  ;;  %v2685_v14 = vsel %vm556_vm5, %v5367_v11, %v2667_v9  ;;  %v5381_v52 = vld [vmem:[%s6711_s4 + $0x188] sm:$0xff]  }
0x194f   : > { %v2687_v13 = vsel %vm562_vm6, %v2683_v10, %v2678_v57 }
0x1950   : > { %v2713_v23 = vrot.slane %v2687_v13, 3 }
0x1951   : > { %v2680_v15 = vpop.permute.xlu1 %2679 }
0x1952   : > { %v2689_v18 = vsel %vm562_vm6, %v2685_v14, %v2680_v15  ;;  %v5374_v14 = vld [vmem:[#allocation2 + $0xc] ss:$0 sps:$4 sm:$0x33]   ;;  %v2906_v15 = vld [vmem:[#allocation2] sm:$0xc] }
0x1953   : > { %v2714_v25 = vrot.slane %v2689_v18, 3 }
0x1955   : > { %v2715_v49 = vsel %vm857_vm9, %v2713_v23, %v2714_v25 }
0x1956   : > { %5123 = vmatmul.mubr.msk.bf16.vlgmr.msra.gmra.mxu0 %vm638_vm8, %v2715_v49 }
0x1957   : > { %5154 = vmatprep.mubr.msk.bf16.mxu0 %vm5582_vm1, %v5581_v1 }
0x1a16   : > { %v2789_v26 = vpop.f32.mrf.mxu0 }
0x1a17   : > { %v2790_v27 = vadd.f32 %v4543_v58, %v2789_v26 }
0x1a18   : > { %v5124_v28 = vpop.f32.mrf.mxu0 }
0x1a19   : > { %v4551_v30 = vmul.f32 -1.442695, %v2790_v27 }
0x1a1a   : > { %v2792_v31 = vpop.f32.mrf.mxu0 }
0x1a1b   : > { %5511 = vpow2.f32 %v4551_v30  ;;  %v2793_v33 = vadd.f32 %v4543_v58, %v2792_v31 }
0x1a1c   : > { %v5125_v34 = vpop.f32.mrf.mxu0 }
0x1a1d   : > { %v4552_v38 = vmul.f32 -1.442695, %v2793_v33 }
0x1a1f   : > { %5513 = vpow2.f32 %v4552_v38  ;;  %v4582_v38 = vld [vmem:[%s6712_s5 + $0x8] ss:$0 sm:$0xff] }
0x1a28   : > { %v5512_v39 = vpop.eup %5511 }
0x1a29   : > { %v2804_v16 = vadd.f32 1.0, %v5512_v39 }
0x1a2b   : > { %5515 = vrcp.f32 %v2804_v16 }
0x1a2c   : > { %v5514_v22 = vpop.eup %5513 }
0x1a2d   : > { %v2805_v45 = vadd.f32 1.0, %v5514_v22 }
0x1a2f   : > { %5517 = vrcp.f32 %v2805_v45 }
0x1a30   : > { %5519 = vtanh.f32 %v2790_v27 }
0x1a31   : > { %5521 = vtanh.f32 %v2793_v33 }
0x1a38   : > { %v5516_v50 = vpop.eup %5515 }
0x1a39   : > { %2812 = vrot.lane.b32.xlu0 %v5516_v50, %s5586_s22 }
0x1a3c   : > { %v5518_v36 = vpop.eup %5517 }
0x1a3d   : > { %2814 = vrot.lane.b32.xlu1 %v5518_v36, %s5586_s22  ;;  %v5520_v51 = vpop.eup %5519 }
0x1a3e   : > { %v5522_v24 = vpop.eup %5521 }
0x1aab   : > { %v2813_v17 = vpop.permute.xlu0 %2812 }
0x1aac   : > { %v2818_v55 = vmul.f32 %v5520_v51, %v2813_v17 }
0x1aaf   : > { %v2815_v53 = vpop.permute.xlu1 %2814 }
0x1ab0   : > { %v2819_v56 = vmul.f32 %v5522_v24, %v2815_v53  ;;  %v5383_v53 = vld [vmem:[%s6715_s8 + $0x28] sm:$0xff]  }
0x1ab1   : > { %5151 = vmatpush3.bf16.msra.mxu0 %v5383_v53 }
0x1ab2   : > { %v2820_v32 = vpack.c.bf16 %v2819_v56, %v2818_v55  ;;  %5152 = vmatprep.subr.bf16.mxu0 %v5581_v1  ;;  %v5384_v56 = vld [vmem:[%s6715_s8 + $0x20] sm:$0xff]  }
0x1ab4   : > { %5131 = vmatmul.mubr.msk.bf16.vlgmr.msra.gmra.mxu1 %vm556_vm5, %v2820_v32 }
0x1ab5   : > { %5146 = vmatprep.mubr.msk.bf16.mxu1 %vm5582_vm1, %v5581_v1  ;;  %5135 = vmatpush3.bf16.msra.mxu1 %v5375_v44 }
0x1ab6   : > { %5136 = vmatprep.subr.bf16.mxu1 %v5581_v1  ;;  %5153 = vmatpush3.bf16.msra.mxu0 %v5384_v56  ;;  %v5394_v56 = vld [vmem:[%s6711_s4 + $0x1c0] sm:$0xff]  }
0x1ab7   : > { %5158 = vmatprep.subr.bf16.mxu0 %v5581_v1 }
0x1ab9   : > { %5137 = vmatpush3.bf16.msra.mxu1 %v5376_v59 }
0x1aba   : > { %5138 = vmatprep.subr.bf16.mxu1 %v5581_v1 }
0x1abd   : > { %5139 = vmatpush3.bf16.msra.mxu1 %v5377_v60 }
0x1abe   : > { %5140 = vmatprep.subr.bf16.mxu1 %v5581_v1 }
0x1ac1   : > { %5141 = vmatpush3.bf16.msra.mxu1 %v5378_v29 }
0x1ac2   : > { %5142 = vmatprep.subr.bf16.mxu1 %v5581_v1 }
0x1ac5   : > { %5143 = vmatpush3.bf16.msra.mxu1 %v5381_v52 }
0x1ac6   : > { %5144 = vmatprep.subr.bf16.mxu1 %v5581_v1 }
0x1b74   : > { %v2883_v35 = vpop.f32.mrf.mxu1 }
0x1b75   : > { %v6369_v61 = vadd.f32 %v4558_v41, %v2883_v35 }
0x1b76   : > { %v5132_v62 = vpop.f32.mrf.mxu1 }
0x1b77   : > { %v2890_v63 = vadd.f32 %v6369_v61, %v6299_v37  ;;  %v5382_v37 = vld [vmem:[%s6711_s4 + $0x180] sm:$0xff]  }
0x1b78   : > { %v2886_v0 = vpop.f32.mrf.mxu1  ;;  %5145 = vmatpush3.bf16.msra.mxu1 %v5382_v37 }
0x1b79   : > { %v2892_v2 = vmul.f32 %v2890_v63, %v5703_v12  ;;  %v6374_v3 = vadd.f32 %v4558_v41, %v2886_v0  ;;  %5172 = vmatprep.subr.bf16.mxu1 %v5581_v1  ;;  %v4597_v0 = vld [vmem:[%s6716_s9 + $0x2] ss:$0 sm:$0xff] }
0x1b7a   : > { %v5133_v4 = vpop.f32.mrf.mxu1 }
0x1b7b   : > { %v4760_v5 = vpack.c.bf16 %v2892_v2, %v2892_v2  ;;  %v2891_v8 = vadd.f32 %v6374_v3, %v6309_v46  ;;  %v5385_v4 = vld [vmem:[%s6717_s10 + $0x28] sm:$0xff]  }
0x1b7d   : > { %2904 = vst.msk [vmem:[#allocation2 + $0x4] sm:$0xf] %vm449_vm2, %v4760_v5  ;;  %v2893_v42 = vmul.f32 %v2891_v8, %v5710_v20 }
0x1b7f   : > { %v4761_v47 = vpack.c.bf16 %v2893_v42, %v2893_v42  ;;  %v5386_v42 = vld [vmem:[%s6717_s10 + $0x20] sm:$0xff]  }
0x1b81   : > { %2905 = vst.msk [vmem:[#allocation2 + $0x8] sm:$0xf] %vm449_vm2, %v4761_v47 }
0x1b84   : > { %v2910_v46 = vld [vmem:[#allocation2 + $0x4] sm:$0xc] }
0x1b85   : > { %v2907_v9 = vld [vmem:[#allocation2 + $0x4] sm:$0xf] }
0x1b86   : > { %v4564_v18 = vcombine.low %v2906_v15, %v2907_v9 }
0x1b88   : > { %v2909_v57 = vld [vmem:[#allocation2 + $0x8] sm:$0xf] }
0x1b89   : > { %v4567_v10 = vcombine.low %v2910_v46, %v2909_v57  ;;  %v4566_v11 = vcombine.low %v2907_v9, %v2909_v57  ;;  %v5380_v58 = vld [vmem:[#allocation2 + $0x8] ss:$0 sps:$4 sm:$0x33]   ;;  %v2894_v57 = vadd.f32 %v6369_v61, %v6294_v54  ;;  %v4610_v54 = vld [vmem:[%s6709_s2 + $0x6] sm:$0x3] }
0x1b8a   : > { %v4606_v61 = vld [vmem:[%s6718_s11 + $0x2] ss:$0 sm:$0xff] }
0x1b8b   : > { %2932 = vrot.lane.b32.xlu1 %v4567_v10, %s5584_s13  ;;  %v2923_v13 = vrot.slane %v4566_v11, 6  ;;  %v2895_v10 = vadd.f32 %v6374_v3, %v6301_v40  ;;  %v3251_v40 = vsel %vm465_vm0, %v4610_v54, 0 }
0x1b8d   : > { %2924 = vrot.lane.b32.xlu0 %v2923_v13, %s5585_s14 }
0x1b91   : > { %2934 = vrot.lane.b32.xlu0 %v5374_v14, %s5584_s13 }
0x1bfd   : > { %v2933_v49 = vpop.permute.xlu1 %2932 }
0x1bff   : > { %v2925_v23 = vpop.permute.xlu0 %2924 }
0x1c00   : > { %v2938_v25 = vsel %vm556_vm5, %v4564_v18, %v2925_v23  ;;  %v2940_v27 = vsel %vm556_vm5, %v5380_v58, %v2925_v23 }
0x1c01   : > { %v2942_v26 = vsel %vm562_vm6, %v2938_v25, %v2933_v49 }
0x1c02   : > { %v2968_v31 = vrot.slane %v2942_v26, 2 }
0x1c03   : > { %v2935_v28 = vpop.permute.xlu0 %2934 }
0x1c04   : > { %v2944_v30 = vsel %vm562_vm6, %v2940_v27, %v2935_v28 }
0x1c05   : > { %v2969_v33 = vrot.slane %v2944_v30, 2  ;;  %v3232_v30 = vmul.f32 %v5947_v6, %v5703_v12  ;;  %v5389_v6 = vld [vmem:[%s6711_s4 + $0x1d8] sm:$0xff]  }
0x1c07   : > { %v2970_v34 = vsel %vm1113_vm10, %v2968_v31, %v2969_v33  ;;  %v3233_v33 = vmul.f32 %v5949_v7, %v5710_v20  ;;  %v5390_v7 = vld [vmem:[%s6711_s4 + $0x1d0] sm:$0xff]  }
0x1c08   : > { %5147 = vmatmul.mubr.msk.bf16.vlgmr.msra.gmra.mxu1 %vm638_vm8, %v2970_v34 }
0x1c09   : > { %5184 = vmatprep.mubr.msk.bf16.mxu1 %vm5582_vm1, %v5581_v1  ;;  %5173 = vmatpush3.bf16.msra.mxu1 %v5389_v6 }
0x1c0a   : > { %5174 = vmatprep.subr.bf16.mxu1 %v5581_v1 }
0x1c0d   : > { %5175 = vmatpush3.bf16.msra.mxu1 %v5390_v7 }
0x1c0e   : > { %5176 = vmatprep.subr.bf16.mxu1 %v5581_v1 }
0x1cc8   : > { %v3044_v39 = vpop.f32.mrf.mxu1 }
0x1cc9   : > { %v3045_v16 = vadd.f32 %v4582_v38, %v3044_v39 }
0x1cca   : > { %v5148_v22 = vpop.f32.mrf.mxu1 }
0x1ccb   : > { %v4590_v43 = vmul.f32 -1.442695, %v3045_v16 }
0x1ccc   : > { %v3047_v45 = vpop.f32.mrf.mxu1 }
0x1ccd   : > { %5523 = vpow2.f32 %v4590_v43  ;;  %v3048_v48 = vadd.f32 %v4582_v38, %v3047_v45 }
0x1cce   : > { %v5149_v50 = vpop.f32.mrf.mxu1 }
0x1ccf   : > { %v4591_v36 = vmul.f32 -1.442695, %v3048_v48 }
0x1cd1   : > { %5525 = vpow2.f32 %v4591_v36 }
0x1cda   : > { %v5524_v17 = vpop.eup %5523 }
0x1cdb   : > { %v3059_v51 = vadd.f32 1.0, %v5524_v17 }
0x1cdd   : > { %5527 = vrcp.f32 %v3059_v51 }
0x1cde   : > { %v5526_v24 = vpop.eup %5525 }
0x1cdf   : > { %v3060_v55 = vadd.f32 1.0, %v5526_v24 }
0x1ce1   : > { %5529 = vrcp.f32 %v3060_v55  ;;  %v5391_v55 = vld [vmem:[%s6711_s4 + $0x1c8] sm:$0xff]  }
0x1ce2   : > { %5531 = vtanh.f32 %v3045_v16  ;;  %v4612_v16 = vld [vmem:[%s6710_s3 + $0x3] ss:$0 sm:$0xff]  ;;  %5177 = vmatpush3.bf16.msra.mxu1 %v5391_v55 }
0x1ce3   : > { %5533 = vtanh.f32 %v3048_v48  ;;  %5178 = vmatprep.subr.bf16.mxu1 %v5581_v1 }
0x1ce6   : > { %5179 = vmatpush3.bf16.msra.mxu1 %v5394_v56 }
0x1ce7   : > { %5180 = vmatprep.subr.bf16.mxu1 %v5581_v1 }
0x1cea   : > { %v5528_v32 = vpop.eup %5527 }
0x1ceb   : > { %3067 = vrot.lane.b32.xlu1 %v5528_v32, %s5586_s22 }
0x1cee   : > { %v5530_v44 = vpop.eup %5529 }
0x1cef   : > { %3069 = vrot.lane.b32.xlu0 %v5530_v44, %s5586_s22  ;;  %v5532_v60 = vpop.eup %5531 }
0x1cf0   : > { %v5534_v29 = vpop.eup %5533 }
0x1d5d   : > { %v3068_v59 = vpop.permute.xlu1 %3067 }
0x1d5e   : > { %v3073_v35 = vmul.f32 %v5532_v60, %v3068_v59  ;;  %v5395_v59 = vld [vmem:[%s6711_s4 + $0x1b8] sm:$0xff]  }
0x1d5f   : > { %5181 = vmatpush3.bf16.msra.mxu1 %v5395_v59 }
0x1d60   : > { %5182 = vmatprep.subr.bf16.mxu1 %v5581_v1 }
0x1d61   : > { %v3070_v41 = vpop.permute.xlu0 %3069 }
0x1d62   : > { %v3074_v62 = vmul.f32 %v5534_v29, %v3070_v41 }
0x1d64   : > { %v3075_v63 = vpack.c.bf16 %v3074_v62, %v3073_v35  ;;  %v5388_v62 = vld [vmem:[#allocation2 + $0xc] ss:$0 sps:$4 sm:$0x11]  }
0x1d66   : > { %5155 = vmatmul.mubr.msk.bf16.vlgmr.msra.gmra.mxu0 %vm556_vm5, %v3075_v63  ;;  %v5396_v63 = vld [vmem:[%s6711_s4 + $0x1b0] sm:$0xff]  }
0x1d67   : > { %5162 = vmatprep.mubr.msk.bf16.mxu0 %vm5582_vm1, %v5581_v1  ;;  %5159 = vmatpush3.bf16.msra.mxu0 %v5385_v4 }
0x1d68   : > { %5160 = vmatprep.subr.bf16.mxu0 %v5581_v1  ;;  %5183 = vmatpush3.bf16.msra.mxu1 %v5396_v63  ;;  %v4648_v63 = vld [vmem:[%s6714_s7 + $0x6] ss:$0 sm:$0xff] }
0x1d69   : > { %5212 = vmatprep.subr.bf16.mxu1 %v5581_v1 }
0x1d6b   : > { %5161 = vmatpush3.bf16.msra.mxu0 %v5386_v42  ;;  %v3306_v42 = vld [vmem:[#allocation2] sm:$0x8] }
0x1d6c   : > { %5166 = vmatprep.subr.bf16.mxu0 %v5581_v1 }
0x1e26   : > { %v3138_v2 = vpop.f32.mrf.mxu0 }
0x1e27   : > { %v3139_v5 = vadd.f32 %v4597_v0, %v3138_v2 }
0x1e28   : > { %v5156_v8 = vpop.f32.mrf.mxu0 }
0x1e29   : > { %3147 = vrot.lane.b32.xlu1 %v3139_v5, %s5585_s14  ;;  %v3333_v5 = vrot.slane %v5388_v62, 5  ;;  %v5405_v62 = vld [vmem:[%s6711_s4 + $0x1f0] sm:$0xff]  }
0x1e2a   : > { %v3141_v47 = vpop.f32.mrf.mxu0 }
0x1e2b   : > { %v3142_v52 = vadd.f32 %v4597_v0, %v3141_v47 }
0x1e2c   : > { %v5157_v37 = vpop.f32.mrf.mxu0 }
0x1e2d   : > { %3149 = vrot.lane.b32.xlu0 %v3142_v52, %s5585_s14 }
0x1e9b   : > { %v3148_v46 = vpop.permute.xlu1 %3147 }
0x1e9c   : > { %v3153_v9 = vadd.f32 %v3148_v46, %v2894_v57 }
0x1e9e   : > { %v3155_v14 = vmul.f32 %v3153_v9, %v5703_v12 }
0x1e9f   : > { %v3150_v11 = vpop.permute.xlu0 %3149 }
0x1ea0   : > { %v3154_v13 = vadd.f32 %v3150_v11, %v2895_v10 }
0x1ea2   : > { %v3156_v15 = vmul.f32 %v3154_v13, %v5710_v20 }
0x1ea4   : > { %v3157_v18 = vpack.c.bf16 %v3156_v15, %v3155_v14 }
0x1ea6   : > { %3172 = vrot.lane.b32.xlu1 %v3157_v18, %s5586_s22 }
0x1f18   : > { %v3173_v23 = vpop.permute.xlu1 %3172 }
0x1f19   : > { %5163 = vmatmul.mubr.msk.bf16.vlgmr.msra.gmra.mxu0 %vm556_vm5, %v3173_v23 }
0x1f1a   : > { %5168 = vmatprep.mubr.msk.bf16.mxu0 %vm5582_vm1, %v5581_v1  ;;  %5167 = vmatpush3.bf16.msra.mxu0 %v3251_v40 }
0x1f1b   : > { %5188 = vmatprep.subr.bf16.mxu0 %v5581_v1 }
0x1fd9   : > { %v3223_v3 = vpop.f32.mrf.mxu0 }
0x1fda   : > { %v3224_v25 = vadd.f32 %v4606_v61, %v3223_v3 }
0x1fdb   : > { %v5164_v49 = vpop.f32.mrf.mxu0 }
0x1fdc   : > { %v3230_v26 = vmul.f32 %v3224_v25, %v5703_v12 }
0x1fdd   : > { %v3226_v58 = vpop.f32.mrf.mxu0 }
0x1fde   : > { %v3227_v27 = vadd.f32 %v4606_v61, %v3226_v58  ;;  %v6453_v34 = vadd.f32 %v3232_v30, %v3230_v26  ;;  %v4633_v26 = vld [vmem:[%s6712_s5 + $0x9] ss:$0 sm:$0xff] }
0x1fdf   : > { %v5165_v28 = vpop.f32.mrf.mxu0 }
0x1fe0   : > { %v3231_v31 = vmul.f32 %v3227_v27, %v5710_v20 }
0x1fe2   : > { %v6455_v38 = vadd.f32 %v3233_v33, %v3231_v31 }
0x1fe4   : > { %v3236_v39 = vpack.c.bf16 %v6455_v38, %v6453_v34 }
0x1fe6   : > { %5169 = vmatmul.mubr.msk.bf16.vlgmr.msra.gmra.mxu0 %vm461_vm3, %v3236_v39 }
0x1fe7   : > { %5192 = vmatprep.mubr.msk.bf16.mxu0 %vm5582_vm1, %v5581_v1 }
0x20a6   : > { %v3287_v22 = vpop.f32.mrf.mxu0 }
0x20a7   : > { %v3288_v43 = vadd.f32 %v4612_v16, %v3287_v22 }
0x20a8   : > { %v5170_v45 = vpop.f32.mrf.mxu0 }
0x20a9   : > { %v6474_v48 = vmul.f32 %v3288_v43, %v5703_v12  ;;  %v5397_v45 = vld [vmem:[%s6713_s6 + $0x68] sm:$0xff]  }
0x20aa   : > { %v3290_v50 = vpop.f32.mrf.mxu0  ;;  %5189 = vmatpush3.bf16.msra.mxu0 %v5397_v45 }
0x20ab   : > { %v4762_v36 = vpack.c.bf16 %v6474_v48, %v6474_v48  ;;  %v3291_v17 = vadd.f32 %v4612_v16, %v3290_v50  ;;  %5190 = vmatprep.subr.bf16.mxu0 %v5581_v1 }
0x20ac   : > { %v5171_v51 = vpop.f32.mrf.mxu0 }
0x20ad   : > { %3304 = vst.msk [vmem:[#allocation2 + $0x4] sm:$0xf] %vm449_vm2, %v4762_v36  ;;  %v6480_v24 = vmul.f32 %v3291_v17, %v5710_v20  ;;  %v5398_v36 = vld [vmem:[%s6713_s6 + $0x60] sm:$0xff]  }
0x20ae   : > { %5191 = vmatpush3.bf16.msra.mxu0 %v5398_v36 }
0x20af   : > { %v4763_v53 = vpack.c.bf16 %v6480_v24, %v6480_v24  ;;  %5196 = vmatprep.subr.bf16.mxu0 %v5581_v1 }
0x20b1   : > { %3305 = vst.msk [vmem:[#allocation2 + $0x8] sm:$0xf] %vm449_vm2, %v4763_v53 }
0x20b4   : > { %v3307_v32 = vld [vmem:[#allocation2 + $0x4] sm:$0xf] }
0x20b5   : > { %v4616_v47 = vcombine.low %v3306_v42, %v3307_v32 }
0x20b8   : > { %v3308_v44 = vld [vmem:[#allocation2 + $0x8] sm:$0xf] }
0x20b9   : > { %v4618_v60 = vcombine.low %v3307_v32, %v3308_v44  ;;  %v4617_v57 = vcombine.low %v3308_v44, %v3308_v44 }
0x20bb   : > { %v3332_v29 = vrot.slane %v4618_v60, 5  ;;  %v3320_v41 = vshrl.u32 %v4618_v60, 16  ;;  %v3323_v35 = vshll.u32 %v4618_v60, 16 }
0x20bd   : > { %3335 = vrot.lane.b32.xlu1 %v3332_v29, %s5584_s13  ;;  %v3322_v0 = vrot.slane %v3320_v41, 4  ;;  %v3325_v2 = vrot.slane %v3323_v35, 5  ;;  %v3334_v8 = vsel %vm548_vm4, %v3332_v29, %v3333_v5  ;;  %v5402_v29 = vld [vmem:[%s6711_s4 + $0x208] sm:$0xff]   ;;  %v5403_v41 = vld [vmem:[%s6711_s4 + $0x200] sm:$0xff]   ;;  %v5404_v35 = vld [vmem:[%s6711_s4 + $0x1f8] sm:$0xff]  }
0x20bf   : > { %v3326_v4 = vor.u32 %v3325_v2, %v3322_v0 }
0x20c1   : > { %3327 = vrot.lane.b32.xlu0 %v3326_v4, %s5585_s14 }
0x20c5   : > { %3337 = vrot.lane.b32.xlu0 %v3334_v8, %s5584_s13 }
0x212f   : > { %v3336_v37 = vpop.permute.xlu1 %3335 }
0x2133   : > { %v3328_v52 = vpop.permute.xlu0 %3327 }
0x2134   : > { %v3341_v46 = vsel %vm556_vm5, %v4616_v47, %v3328_v52  ;;  %v3343_v13 = vsel %vm556_vm5, %v4617_v57, %v3328_v52 }
0x2135   : > { %v3345_v9 = vsel %vm562_vm6, %v3341_v46, %v3336_v37 }
0x2136   : > { %v3369_v10 = vshrl.u32 %v3345_v9, 16  ;;  %v3372_v11 = vshll.u32 %v3345_v9, 16  ;;  %v5408_v9 = vld [vmem:[%s6711_s4 + $0x1e8] sm:$0xff]  }
0x2137   : > { %v3338_v14 = vpop.permute.xlu0 %3337 }
0x2138   : > { %v3347_v15 = vsel %vm562_vm6, %v3343_v13, %v3338_v14  ;;  %v3371_v18 = vrot.slane %v3369_v10, 3  ;;  %v3374_v23 = vrot.slane %v3372_v11, 4  ;;  %v5401_v11 = vld [vmem:[#allocation2 + $0xc] ss:$0 sps:$4 sm:$0x11]  }
0x2139   : > { %v3376_v54 = vshrl.u32 %v3347_v15, 16  ;;  %v3379_v40 = vshll.u32 %v3347_v15, 16 }
0x213a   : > { %v3375_v25 = vor.u32 %v3374_v23, %v3371_v18 }
0x213b   : > { %v3378_v61 = vrot.slane %v3376_v54, 3  ;;  %v3381_v3 = vrot.slane %v3379_v40, 4  ;;  %v3601_v40 = vrot.slane %v5401_v11, 6 }
0x213d   : > { %v3382_v49 = vor.u32 %v3381_v3, %v3378_v61  ;;  %v3574_v3 = vld [vmem:[#allocation2] sm:$0x8] }
0x213f   : > { %v3383_v58 = vsel %vm586_vm7, %v3375_v25, %v3382_v49 }
0x2140   : > { %5185 = vmatmul.mubr.msk.bf16.vlgmr.msra.gmra.mxu1 %vm638_vm8, %v3383_v58 }
0x2141   : > { %5216 = vmatprep.mubr.msk.bf16.mxu1 %vm5582_vm1, %v5581_v1 }
0x2200   : > { %v3457_v27 = vpop.f32.mrf.mxu1 }
0x2201   : > { %v3458_v28 = vadd.f32 %v4633_v26, %v3457_v27 }
0x2202   : > { %v5186_v30 = vpop.f32.mrf.mxu1 }
0x2203   : > { %v4641_v31 = vmul.f32 -1.442695, %v3458_v28 }
0x2204   : > { %v3460_v33 = vpop.f32.mrf.mxu1 }
0x2205   : > { %5535 = vpow2.f32 %v4641_v31  ;;  %v3461_v39 = vadd.f32 %v4633_v26, %v3460_v33 }
0x2206   : > { %v5187_v6 = vpop.f32.mrf.mxu1 }
0x2207   : > { %v4642_v7 = vmul.f32 -1.442695, %v3461_v39 }
0x2209   : > { %5537 = vpow2.f32 %v4642_v7 }
0x2212   : > { %v5536_v16 = vpop.eup %5535 }
0x2213   : > { %v3472_v22 = vadd.f32 1.0, %v5536_v16  ;;  %v4672_v16 = vld [vmem:[%s6712_s5 + $0xa] ss:$0 sm:$0xff] }
0x2215   : > { %5539 = vrcp.f32 %v3472_v22 }
0x2216   : > { %v5538_v43 = vpop.eup %5537 }
0x2217   : > { %v3473_v50 = vadd.f32 1.0, %v5538_v43 }
0x2219   : > { %5541 = vrcp.f32 %v3473_v50 }
0x221a   : > { %5543 = vtanh.f32 %v3458_v28 }
0x221b   : > { %5545 = vtanh.f32 %v3461_v39 }
0x2222   : > { %v5540_v17 = vpop.eup %5539 }
0x2223   : > { %3480 = vrot.lane.b32.xlu1 %v5540_v17, %s5586_s22 }
0x2226   : > { %v5542_v51 = vpop.eup %5541 }
0x2227   : > { %3482 = vrot.lane.b32.xlu0 %v5542_v51, %s5586_s22  ;;  %v5544_v55 = vpop.eup %5543 }
0x2228   : > { %v5546_v56 = vpop.eup %5545 }
0x2295   : > { %v3481_v53 = vpop.permute.xlu1 %3480 }
0x2296   : > { %v3486_v44 = vmul.f32 %v5544_v55, %v3481_v53 }
0x2299   : > { %v3483_v32 = vpop.permute.xlu0 %3482 }
0x229a   : > { %v3487_v59 = vmul.f32 %v5546_v56, %v3483_v32 }
0x229c   : > { %v3488_v60 = vpack.c.bf16 %v3487_v59, %v3486_v44  ;;  %v5410_v44 = vld [vmem:[%s6713_s6 + $0x78] sm:$0xff]  }
0x229d   : > { %5213 = vmatpush3.bf16.msra.mxu1 %v5410_v44 }
0x229e   : > { %5193 = vmatmul.mubr.msk.bf16.vlgmr.msra.gmra.mxu0 %vm556_vm5, %v3488_v60  ;;  %5214 = vmatprep.subr.bf16.mxu1 %v5581_v1  ;;  %v5411_v60 = vld [vmem:[%s6713_s6 + $0x70] sm:$0xff]  }
0x229f   : > { %5208 = vmatprep.mubr.msk.bf16.mxu0 %vm5582_vm1, %v5581_v1  ;;  %5197 = vmatpush3.bf16.msra.mxu0 %v5402_v29 }
0x22a0   : > { %5198 = vmatprep.subr.bf16.mxu0 %v5581_v1 }
0x22a1   : > { %5215 = vmatpush3.bf16.msra.mxu1 %v5411_v60 }
0x22a2   : > { %5220 = vmatprep.subr.bf16.mxu1 %v5581_v1 }
0x22a3   : > { %5199 = vmatpush3.bf16.msra.mxu0 %v5403_v41 }
0x22a4   : > { %5200 = vmatprep.subr.bf16.mxu0 %v5581_v1 }
0x22a7   : > { %5201 = vmatpush3.bf16.msra.mxu0 %v5404_v35 }
0x22a8   : > { %5202 = vmatprep.subr.bf16.mxu0 %v5581_v1 }
0x22ab   : > { %5203 = vmatpush3.bf16.msra.mxu0 %v5405_v62 }
0x22ac   : > { %5204 = vmatprep.subr.bf16.mxu0 %v5581_v1 }
0x22af   : > { %5205 = vmatpush3.bf16.msra.mxu0 %v5408_v9  ;;  %v4687_v9 = vld [vmem:[%s6714_s7 + $0x7] ss:$0 sm:$0xff] }
0x22b0   : > { %5206 = vmatprep.subr.bf16.mxu0 %v5581_v1 }
0x235e   : > { %v3551_v0 = vpop.f32.mrf.mxu0 }
0x235f   : > { %v6548_v2 = vadd.f32 %v4648_v63, %v3551_v0 }
0x2360   : > { %v5194_v4 = vpop.f32.mrf.mxu0 }
0x2361   : > { %v3558_v5 = vadd.f32 %v6548_v2, %v6474_v48 }
0x2362   : > { %v3554_v8 = vpop.f32.mrf.mxu0 }
0x2363   : > { %v6553_v42 = vmul.f32 %v3558_v5, %v5703_v12  ;;  %v6555_v47 = vadd.f32 %v4648_v63, %v3554_v8 }
0x2364   : > { %v5195_v52 = vpop.f32.mrf.mxu0 }
0x2365   : > { %v4764_v37 = vpack.c.bf16 %v6553_v42, %v6553_v42  ;;  %v3559_v46 = vadd.f32 %v6555_v47, %v6480_v24  ;;  %v5409_v24 = vld [vmem:[%s6711_s4 + $0x1e0] sm:$0xff]   ;;  %v5415_v52 = vld [vmem:[%s6711_s4 + $0x238] sm:$0xff]  }
0x2366   : > { %5207 = vmatpush3.bf16.msra.mxu0 %v5409_v24 }
0x2367   : > { %3572 = vst.msk [vmem:[#allocation2 + $0x4] sm:$0xf] %vm449_vm2, %v4764_v37  ;;  %v6563_v57 = vmul.f32 %v3559_v46, %v5710_v20  ;;  %5236 = vmatprep.subr.bf16.mxu0 %v5581_v1  ;;  %v5416_v37 = vld [vmem:[%s6711_s4 + $0x230] sm:$0xff]   ;;  %v5417_v46 = vld [vmem:[%s6711_s4 + $0x228] sm:$0xff]  }
0x2369   : > { %v4765_v48 = vpack.c.bf16 %v6563_v57, %v6563_v57 }
0x236b   : > { %3573 = vst.msk [vmem:[#allocation2 + $0x8] sm:$0xf] %vm449_vm2, %v4765_v48  ;;  %v5418_v48 = vld [vmem:[%s6711_s4 + $0x220] sm:$0xff]  }
0x236e   : > { %v3578_v10 = vld [vmem:[#allocation2 + $0x4] sm:$0xe] }
0x236f   : > { %v3575_v14 = vld [vmem:[#allocation2 + $0x4] sm:$0xf] }
0x2370   : > { %v4654_v25 = vcombine.low %v3574_v3, %v3575_v14 }
0x2372   : > { %v3577_v13 = vld [vmem:[#allocation2 + $0x8] sm:$0xf] }
0x2373   : > { %v4657_v15 = vcombine.low %v3578_v10, %v3577_v13  ;;  %v4656_v18 = vcombine.low %v3575_v14, %v3577_v13  ;;  %v5407_v27 = vld [vmem:[#allocation2 + $0x8] ss:$0 sps:$4 sm:$0x77]  }
0x2375   : > { %v3600_v23 = vrot.slane %v4657_v15, 6  ;;  %v3591_v54 = vrot.slane %v4656_v18, 5 }
0x2377   : > { %3603 = vrot.lane.b32.xlu0 %v3600_v23, %s5584_s13  ;;  %3592 = vrot.lane.b32.xlu1 %v3591_v54, %s5585_s14  ;;  %v3602_v61 = vsel %vm465_vm0, %v3600_v23, %v3601_v40 }
0x237b   : > { %3605 = vrot.lane.b32.xlu1 %v3602_v61, %s5584_s13 }
0x23e9   : > { %v3604_v49 = vpop.permute.xlu0 %3603  ;;  %v3593_v58 = vpop.permute.xlu1 %3592 }
0x23ea   : > { %v3609_v26 = vsel %vm556_vm5, %v4654_v25, %v3593_v58  ;;  %v3611_v30 = vsel %vm556_vm5, %v5407_v27, %v3593_v58  ;;  %v5421_v25 = vld [vmem:[%s6711_s4 + $0x218] sm:$0xff]  }
0x23eb   : > { %v3613_v28 = vsel %vm562_vm6, %v3609_v26, %v3604_v49 }
0x23ec   : > { %v3639_v39 = vrot.slane %v3613_v28, 3 }
0x23ed   : > { %v3606_v31 = vpop.permute.xlu1 %3605 }
0x23ee   : > { %v3615_v33 = vsel %vm562_vm6, %v3611_v30, %v3606_v31  ;;  %v5414_v30 = vld [vmem:[#allocation2 + $0xc] ss:$0 sps:$4 sm:$0x33]   ;;  %v3832_v31 = vld [vmem:[#allocation2] sm:$0xc] }
0x23ef   : > { %v3640_v6 = vrot.slane %v3615_v33, 3 }
0x23f1   : > { %v3641_v7 = vsel %vm857_vm9, %v3639_v39, %v3640_v6 }
0x23f2   : > { %5209 = vmatmul.mubr.msk.bf16.vlgmr.msra.gmra.mxu0 %vm638_vm8, %v3641_v7 }
0x23f3   : > { %5240 = vmatprep.mubr.msk.bf16.mxu0 %vm5582_vm1, %v5581_v1 }
0x24b2   : > { %v3715_v22 = vpop.f32.mrf.mxu0 }
0x24b3   : > { %v3716_v43 = vadd.f32 %v4672_v16, %v3715_v22 }
0x24b4   : > { %v5210_v45 = vpop.f32.mrf.mxu0 }
0x24b5   : > { %v4680_v50 = vmul.f32 -1.442695, %v3716_v43 }
0x24b6   : > { %v3718_v36 = vpop.f32.mrf.mxu0 }
0x24b7   : > { %5547 = vpow2.f32 %v4680_v50  ;;  %v3719_v17 = vadd.f32 %v4672_v16, %v3718_v36 }
0x24b8   : > { %v5211_v51 = vpop.f32.mrf.mxu0 }
0x24b9   : > { %v4681_v53 = vmul.f32 -1.442695, %v3719_v17 }
0x24bb   : > { %5549 = vpow2.f32 %v4681_v53  ;;  %v4711_v53 = vld [vmem:[%s6712_s5 + $0xb] ss:$0 sm:$0xff] }
0x24c4   : > { %v5548_v55 = vpop.eup %5547 }
0x24c5   : > { %v3730_v56 = vadd.f32 1.0, %v5548_v55 }
0x24c7   : > { %5551 = vrcp.f32 %v3730_v56 }
0x24c8   : > { %v5550_v32 = vpop.eup %5549 }
0x24c9   : > { %v3731_v59 = vadd.f32 1.0, %v5550_v32 }
0x24cb   : > { %5553 = vrcp.f32 %v3731_v59 }
0x24cc   : > { %5555 = vtanh.f32 %v3716_v43 }
0x24cd   : > { %5557 = vtanh.f32 %v3719_v17 }
0x24d4   : > { %v5552_v29 = vpop.eup %5551 }
0x24d5   : > { %3738 = vrot.lane.b32.xlu0 %v5552_v29, %s5586_s22 }
0x24d8   : > { %v5554_v41 = vpop.eup %5553 }
0x24d9   : > { %3740 = vrot.lane.b32.xlu1 %v5554_v41, %s5586_s22  ;;  %v5556_v62 = vpop.eup %5555 }
0x24da   : > { %v5558_v63 = vpop.eup %5557 }
0x2547   : > { %v3739_v35 = vpop.permute.xlu0 %3738 }
0x2548   : > { %v3744_v4 = vmul.f32 %v5556_v62, %v3739_v35 }
0x254b   : > { %v3741_v0 = vpop.permute.xlu1 %3740 }
0x254c   : > { %v3745_v5 = vmul.f32 %v5558_v63, %v3741_v0  ;;  %v5423_v0 = vld [vmem:[%s6715_s8 + $0x38] sm:$0xff]  }
0x254d   : > { %5237 = vmatpush3.bf16.msra.mxu0 %v5423_v0 }
0x254e   : > { %v3746_v8 = vpack.c.bf16 %v3745_v5, %v3744_v4  ;;  %5238 = vmatprep.subr.bf16.mxu0 %v5581_v1  ;;  %v5424_v5 = vld [vmem:[%s6715_s8 + $0x30] sm:$0xff]  }
0x2550   : > { %5217 = vmatmul.mubr.msk.bf16.vlgmr.msra.gmra.mxu1 %vm556_vm5, %v3746_v8 }
0x2551   : > { %5232 = vmatprep.mubr.msk.bf16.mxu1 %vm5582_vm1, %v5581_v1  ;;  %5221 = vmatpush3.bf16.msra.mxu1 %v5415_v52 }
0x2552   : > { %5222 = vmatprep.subr.bf16.mxu1 %v5581_v1  ;;  %5239 = vmatpush3.bf16.msra.mxu0 %v5424_v5 }
0x2553   : > { %5244 = vmatprep.subr.bf16.mxu0 %v5581_v1 }
0x2555   : > { %5223 = vmatpush3.bf16.msra.mxu1 %v5416_v37 }
0x2556   : > { %5224 = vmatprep.subr.bf16.mxu1 %v5581_v1 }
0x2559   : > { %5225 = vmatpush3.bf16.msra.mxu1 %v5417_v46 }
0x255a   : > { %5226 = vmatprep.subr.bf16.mxu1 %v5581_v1 }
0x255d   : > { %5227 = vmatpush3.bf16.msra.mxu1 %v5418_v48 }
0x255e   : > { %5228 = vmatprep.subr.bf16.mxu1 %v5581_v1 }
0x2561   : > { %5229 = vmatpush3.bf16.msra.mxu1 %v5421_v25 }
0x2562   : > { %5230 = vmatprep.subr.bf16.mxu1 %v5581_v1 }
0x2610   : > { %v3809_v24 = vpop.f32.mrf.mxu1 }
0x2611   : > { %v6623_v10 = vadd.f32 %v4687_v9, %v3809_v24 }
0x2612   : > { %v5218_v11 = vpop.f32.mrf.mxu1 }
0x2613   : > { %v3816_v13 = vadd.f32 %v6623_v10, %v6553_v42  ;;  %v5422_v42 = vld [vmem:[%s6711_s4 + $0x210] sm:$0xff]  }
0x2614   : > { %v3812_v14 = vpop.f32.mrf.mxu1  ;;  %5231 = vmatpush3.bf16.msra.mxu1 %v5422_v42  ;;  %v5426_v42 = vld [vmem:[%s6717_s10 + $0x30] sm:$0xff]  }
0x2615   : > { %v3818_v15 = vmul.f32 %v3816_v13, %v5703_v12  ;;  %v6628_v18 = vadd.f32 %v4687_v9, %v3812_v14  ;;  %v4726_v14 = vld [vmem:[%s6716_s9 + $0x3] ss:$0 sm:$0xff] }
0x2616   : > { %v5219_v23 = vpop.f32.mrf.mxu1 }
0x2617   : > { %v4766_v54 = vpack.c.bf16 %v3818_v15, %v3818_v15  ;;  %v3817_v40 = vadd.f32 %v6628_v18, %v6563_v57 }
0x2619   : > { %3830 = vst.msk [vmem:[#allocation2 + $0x4] sm:$0xf] %vm449_vm2, %v4766_v54  ;;  %v3819_v61 = vmul.f32 %v3817_v40, %v5710_v20 }
0x261b   : > { %v4767_v3 = vpack.c.bf16 %v3819_v61, %v3819_v61  ;;  %v5425_v61 = vld [vmem:[%s6717_s10 + $0x38] sm:$0xff]  }
0x261d   : > { %3831 = vst.msk [vmem:[#allocation2 + $0x8] sm:$0xf] %vm449_vm2, %v4767_v3 }
0x2620   : > { %v3836_v57 = vld [vmem:[#allocation2 + $0x4] sm:$0xc] }
0x2621   : > { %v3833_v58 = vld [vmem:[#allocation2 + $0x4] sm:$0xf] }
0x2622   : > { %v4693_v33 = vcombine.low %v3832_v31, %v3833_v58 }
0x2624   : > { %v3835_v49 = vld [vmem:[#allocation2 + $0x8] sm:$0xf] }
0x2625   : > { %v4696_v26 = vcombine.low %v3836_v57, %v3835_v49  ;;  %v4695_v27 = vcombine.low %v3833_v58, %v3835_v49  ;;  %v5420_v16 = vld [vmem:[#allocation2 + $0x8] ss:$0 sps:$4 sm:$0x33]   ;;  %v3820_v49 = vadd.f32 %v6623_v10, %v6548_v2  ;;  %v4735_v2 = vld [vmem:[%s6718_s11 + $0x3] ss:$0 sm:$0xff] }
0x2627   : > { %3858 = vrot.lane.b32.xlu1 %v4696_v26, %s5584_s13  ;;  %v3849_v28 = vrot.slane %v4695_v27, 6  ;;  %v3821_v26 = vadd.f32 %v6628_v18, %v6555_v47 }
0x2629   : > { %3850 = vrot.lane.b32.xlu0 %v3849_v28, %s5585_s14 }
0x262d   : > { %3860 = vrot.lane.b32.xlu0 %v5414_v30, %s5584_s13 }
0x2699   : > { %v3859_v7 = vpop.permute.xlu1 %3858 }
0x269b   : > { %v3851_v39 = vpop.permute.xlu0 %3850 }
0x269c   : > { %v3864_v6 = vsel %vm556_vm5, %v4693_v33, %v3851_v39  ;;  %v3866_v43 = vsel %vm556_vm5, %v5420_v16, %v3851_v39  ;;  %v4158_v39 = vmul.f32 %v6198_v19, %v5703_v12 }
0x269d   : > { %v3868_v22 = vsel %vm562_vm6, %v3864_v6, %v3859_v7 }
0x269e   : > { %v3894_v36 = vrot.slane %v3868_v22, 2 }
0x269f   : > { %v3861_v45 = vpop.permute.xlu0 %3860 }
0x26a0   : > { %v3870_v50 = vsel %vm562_vm6, %v3866_v43, %v3861_v45 }
0x26a1   : > { %v3895_v17 = vrot.slane %v3870_v50, 2  ;;  %v4159_v50 = vmul.f32 %v6201_v21, %v5710_v20 }
0x26a3   : > { %v3896_v51 = vsel %vm1113_vm10, %v3894_v36, %v3895_v17 }
0x26a4   : > { %5233 = vmatmul.mubr.msk.bf16.vlgmr.msra.gmra.mxu1 %vm638_vm8, %v3896_v51 }
0x2764   : > { %v3970_v55 = vpop.f32.mrf.mxu1 }
0x2765   : > { %v3971_v56 = vadd.f32 %v4711_v53, %v3970_v55 }
0x2766   : > { %v5234_v32 = vpop.f32.mrf.mxu1 }
0x2767   : > { %v4719_v44 = vmul.f32 -1.442695, %v3971_v56 }
0x2768   : > { %v3973_v59 = vpop.f32.mrf.mxu1 }
0x2769   : > { %5559 = vpow2.f32 %v4719_v44  ;;  %v3974_v60 = vadd.f32 %v4711_v53, %v3973_v59 }
0x276a   : > { %v5235_v29 = vpop.f32.mrf.mxu1 }
0x276b   : > { %v4720_v41 = vmul.f32 -1.442695, %v3974_v60 }
0x276d   : > { %5561 = vpow2.f32 %v4720_v41 }
0x2776   : > { %v5560_v35 = vpop.eup %5559 }
0x2777   : > { %v3985_v62 = vadd.f32 1.0, %v5560_v35 }
0x2779   : > { %5563 = vrcp.f32 %v3985_v62 }
0x277a   : > { %v5562_v63 = vpop.eup %5561 }
0x277b   : > { %v3986_v4 = vadd.f32 1.0, %v5562_v63 }
0x277d   : > { %5565 = vrcp.f32 %v3986_v4 }
0x277e   : > { %5567 = vtanh.f32 %v3971_v56 }
0x277f   : > { %5569 = vtanh.f32 %v3974_v60 }
0x2786   : > { %v5564_v8 = vpop.eup %5563 }
0x2787   : > { %3993 = vrot.lane.b32.xlu1 %v5564_v8, %s5586_s22 }
0x278a   : > { %v5566_v52 = vpop.eup %5565 }
0x278b   : > { %3995 = vrot.lane.b32.xlu0 %v5566_v52, %s5586_s22  ;;  %v5568_v46 = vpop.eup %5567 }
0x278c   : > { %v5570_v48 = vpop.eup %5569 }
0x27f9   : > { %v3994_v37 = vpop.permute.xlu1 %3993 }
0x27fa   : > { %v3999_v24 = vmul.f32 %v5568_v46, %v3994_v37 }
0x27fd   : > { %v3996_v9 = vpop.permute.xlu0 %3995 }
0x27fe   : > { %v4000_v11 = vmul.f32 %v5570_v48, %v3996_v9 }
0x2800   : > { %v4001_v13 = vpack.c.bf16 %v4000_v11, %v3999_v24 }
0x2802   : > { %5241 = vmatmul.mubr.msk.bf16.vlgmr.msra.gmra.mxu0 %vm556_vm5, %v4001_v13 }
0x2803   : > { %5248 = vmatprep.mubr.msk.bf16.mxu0 %vm5582_vm1, %v5581_v1  ;;  %5245 = vmatpush3.bf16.msra.mxu0 %v5425_v61 }
0x2804   : > { %5246 = vmatprep.subr.bf16.mxu0 %v5581_v1 }
0x2807   : > { %5247 = vmatpush3.bf16.msra.mxu0 %v5426_v42 }
0x28c2   : > { %v4064_v15 = vpop.f32.mrf.mxu0 }
0x28c3   : > { %v4065_v23 = vadd.f32 %v4726_v14, %v4064_v15 }
0x28c4   : > { %v5242_v54 = vpop.f32.mrf.mxu0 }
0x28c5   : > { %4073 = vrot.lane.b32.xlu1 %v4065_v23, %s5585_s14 }
0x28c6   : > { %v4067_v40 = vpop.f32.mrf.mxu0 }
0x28c7   : > { %v4068_v3 = vadd.f32 %v4726_v14, %v4067_v40 }
0x28c8   : > { %v5243_v25 = vpop.f32.mrf.mxu0 }
0x28c9   : > { %4075 = vrot.lane.b32.xlu0 %v4068_v3, %s5585_s14 }
0x28cd   : > { %4164 = vrot.lane.b32.xlu0 %v6453_v34, %s5588_s23 }
0x2937   : > { %v4074_v57 = vpop.permute.xlu1 %4073 }
0x2938   : > { %v4079_v58 = vadd.f32 %v4074_v57, %v3820_v49 }
0x293a   : > { %v4081_v30 = vmul.f32 %v4079_v58, %v5703_v12 }
0x293b   : > { %v4076_v27 = vpop.permute.xlu0 %4075 }
0x293c   : > { %v4080_v28 = vadd.f32 %v4076_v27, %v3821_v26 }
0x293e   : > { %v4082_v31 = vmul.f32 %v4080_v28, %v5710_v20 }
0x293f   : > { %v4165_v16 = vpop.permute.xlu0 %4164 }
0x2940   : > { %v4083_v1 = vpack.c.bf16 %v4082_v31, %v4081_v30 }
0x2942   : > { %4098 = vrot.lane.b32.xlu1 %v4083_v1, %s5586_s22 }
0x2946   : > { %4166 = vrot.lane.b32.xlu1 %v6455_v38, %s5588_s23 }
0x29b4   : > { %v4099_v34 = vpop.permute.xlu1 %4098 }
0x29b5   : > { %5249 = vmatmul.mubr.msk.bf16.vlgmr.msra.gmra.mxu0 %vm556_vm5, %v4099_v34 }
0x2a75   : > { %v4149_v47 = vpop.f32.mrf.mxu0 }
0x2a76   : > { %v4150_v10 = vadd.f32 %v4735_v2, %v4149_v47 }
0x2a77   : > { %v5250_v18 = vpop.f32.mrf.mxu0 }
0x2a78   : > { %v4156_v33 = vmul.f32 %v4150_v10, %v5703_v12  ;;  %v4167_v12 = vpop.permute.xlu1 %4166 }
0x2a79   : > { %v4152_v6 = vpop.f32.mrf.mxu0 }
0x2a7a   : > { %v4160_v38 = vadd.f32 %v4158_v39, %v4156_v33  ;;  %v4153_v7 = vadd.f32 %v4735_v2, %v4152_v6 }
0x2a7b   : > { %v5251_v22 = vpop.f32.mrf.mxu0 }
0x2a7c   : > { %v4170_v43 = vsel %vm461_vm3, %v4160_v38, %v4165_v16  ;;  %v4157_v45 = vmul.f32 %v4153_v7, %v5710_v20 }
0x2a7d   : > { %4173 = vst.msk [vmem:[%s433_s24] sm:$0xff] %vm4172_vm11, %v4170_v43 }
0x2a7e   : > { %v4161_v36 = vadd.f32 %v4159_v50, %v4157_v45 }
0x2a80   : > { %v4171_v19 = vsel %vm461_vm3, %v4161_v36, %v4167_v12 }
0x2a81   : > { %4174 = vst.msk [vmem:[%s433_s24 + $0x8] sm:$0xff] %vm4172_vm11, %v4171_v19 }
0x2a82 PF: > { %s22_s21 = sadd.s32 1, %s5579_s21  }
0x2a83   : > { %p19_p4 = scmp.ge.s32.totalorder %s22_s21, 4  }
0x2a85   :  { %21 = sbr.rel (!%p19_p4) target bundleno = 1 (0x1), region = 155 }

</bundles_post_ra>
